<compile_context>
chip_gen: v5e
topology: v5e:2x2
jax: 0.10.0
libtpu: 0.0.40
codegen_flags: <defaults>
</compile_context>

<pallas_src>
import numpy as np
import jax
import jax.numpy as jnp
from jax import lax
from jax.experimental import pallas as pl
from jax.experimental.pallas import tpu as pltpu

LEAKY_SLOPE = 0.01   # nn.LeakyReLU() default
BN_EPS = 1e-5        # nn.BatchNorm2d default


# ----------------------------- small helpers --------------------------------

def _round_up(x, m):
    return (x + m - 1) // m * m


def _interp_matrix(out_size, in_size):
    """Row-interpolation matrix for bilinear resize with align_corners=True."""
    if in_size == 1:
        return jnp.ones((out_size, 1), jnp.float32)
    src = jnp.arange(out_size, dtype=jnp.float32) * (in_size - 1) / (out_size - 1)
    lo = jnp.clip(jnp.floor(src).astype(jnp.int32), 0, in_size - 2)
    frac = src - lo.astype(jnp.float32)
    return (jax.nn.one_hot(lo, in_size, dtype=jnp.float32) * (1.0 - frac)[:, None]
            + jax.nn.one_hot(lo + 1, in_size, dtype=jnp.float32) * frac[:, None])


def _fold_bn(w_hwio, b, gamma, beta, mean, var):
    """Fold eval-mode BatchNorm2d into conv weights/bias: y = conv(x)*scale + shift."""
    scale = gamma / jnp.sqrt(var + BN_EPS)
    return w_hwio * scale, (b - mean) * scale + beta


def _pack_conv3x3_weights(w_hwio):
    """(3, 3, Cin, Cout) -> (3, Cin, 3*Cout): the 3 column taps packed along N."""
    kh, kw, cin, cout = w_hwio.shape
    return jnp.transpose(w_hwio, (0, 2, 1, 3)).reshape(kh, cin, kw * cout)


# --------------------------- in-kernel conv helpers ---------------------------

def _zero_halo(pad, H, W):
    """Zero only the halo cells the 3x3 conv actually reads.

    The interior [1:H+1, 1:W+1, :] is fully rewritten every grid step, and the tail
    columns [W+2, Wp) only feed matmul results that the realignment slices discard,
    so zeroing rows {0, H+1} and columns {0, W+1} is sufficient.  Done every step
    (cheap) so it stays correct when the "parallel" grid axis is split across cores.
    """
    Wp, C = pad.shape[1], pad.shape[2]
    dt = pad.dtype
    zrow = jnp.zeros((1, Wp, C), dt)
    pad[0:1, :, :] = zrow
    pad[H + 1:H + 2, :, :] = zrow
    zcol = jnp.zeros((pad.shape[0], 1, C), dt)
    pad[:, 0:1, :] = zcol
    pad[:, W + 1:W + 2, :] = zcol


def _conv3x3_bn_lrelu(pad_ref, w_ref, bias, H, W, Cout):
    """3x3 conv (padding already in `pad_ref`) + folded-BN bias + LeakyReLU -> f32.

    pad_ref: (H+2, Wp, Cin) VMEM scratch, data at [1:H+1, 1:W+1, :], zero halo.
    w_ref:   (3, Cin, 3*Cout) weights; the 3 column taps are packed along N so each
             row tap is ONE contiguous (H*Wp, Cin) x (Cin, 3*Cout) MXU matmul.
    bias:    (1, Cout) f32 folded-BN bias.
    """
    Wp, Cin = pad_ref.shape[1], pad_ref.shape[2]
    wdt = w_ref.dtype
    acc = jnp.zeros((H, W, Cout), jnp.float32)
    for dy in range(3):
        slab = pad_ref[dy:dy + H, :, :].reshape(H * Wp, Cin).astype(wdt)
        t = jnp.dot(slab, w_ref[dy], preferred_element_type=jnp.float32)
        t = t.reshape(H, Wp, 3 * Cout)
        for dx in range(3):
            # out[h, w] needs t[h, w + dx, dx-th Cout chunk]
            acc = acc + t[:, dx:dx + W, dx * Cout:(dx + 1) * Cout]
    acc = acc + bias
    return jnp.where(acc >= 0, acc, LEAKY_SLOPE * acc)


# ------------------------------- Pallas kernel --------------------------------

def _up_block_kernel(x1_ref, x2_ref, w1_ref, b1_ref, ah_ref, aw_ref,
                     wc1_ref, bc1_ref, wc2_ref, bc2_ref, o_ref, pad1, pad2):
    """conv1x1 + bilinear x2 upsample + fused concat + (conv3x3+BN+LReLU) x 2."""
    H1, W1, C1 = x1_ref.shape[1], x1_ref.shape[2], x1_ref.shape[3]
    H2, W2, C2 = x2_ref.shape[1], x2_ref.shape[2], x2_ref.shape[3]
    Cout = o_ref.shape[3]
    bf = w1_ref.dtype                       # MXU operand dtype (bf16)

    # ---- 1x1 conv on the low-res input (single MXU matmul, f32 accumulate) ----
    y = jnp.dot(x1_ref[0].reshape(H1 * W1, C1), w1_ref[...],
                preferred_element_type=jnp.float32) + b1_ref[...]
    y = y.reshape(H1, W1, C2).astype(bf)

    # ---- bilinear x2 upsample (align_corners=True) as two interp matmuls ----
    # Width interp is batched over H1 (the only single-matmul form that keeps the
    # result channel-minor without a full-res transpose); bf16 operands keep the
    # small broadcast half-size and the MXU passes single-pass (f32 accumulate).
    awb = jnp.broadcast_to(aw_ref[...], (H1, W2, W1))
    yw = lax.dot_general(awb, y, (((2,), (1,)), ((0,), (0,))),
                         preferred_element_type=jnp.float32)          # (H1, W2, C2)
    up = jnp.dot(ah_ref[...], yw.reshape(H1, W2 * C2).astype(bf),
                 preferred_element_type=jnp.float32).reshape(H2, W2, C2)

    # ---- refresh only the conv halo of the persistent scratches ----
    _zero_halo(pad1, H2, W2)
    _zero_halo(pad2, H2, W2)

    # ---- fused channel concat [x2 | upsampled x1] written into ONE padded slab ----
    pad1[1:H2 + 1, 1:W2 + 1, 0:C2] = x2_ref[0].astype(pad1.dtype)
    pad1[1:H2 + 1, 1:W2 + 1, C2:2 * C2] = up

    # ---- ConvBlock layer 1: 3x3 conv (one K = 2*C2 pass) + folded BN + LeakyReLU ----
    z = _conv3x3_bn_lrelu(pad1, wc1_ref, bc1_ref[...], H2, W2, Cout)

    # ---- ConvBlock layer 2 (Dropout p=0 is identity): 3x3 conv + BN + LeakyReLU ----
    pad2[1:H2 + 1, 1:W2 + 1, :] = z
    out = _conv3x3_bn_lrelu(pad2, wc2_ref, bc2_ref[...], H2, W2, Cout)

    o_ref[...] = out.reshape(1, H2, W2, Cout).astype(o_ref.dtype)


# ------------------------------ host wrappers --------------------------------

def prepare_params(p, h1, w1, compute_dtype=jnp.bfloat16):
    """One-time prep outside the hot path: fold eval-mode BN into the convs, pack the
    3x3 weights (column taps along N), build the bilinear interp matrices, and cast
    weights to the compute dtype (bf16 operands / f32 accumulate)."""
    c2 = p["w1x1"].shape[1]
    cout = p["wc1"].shape[-1]
    w1f, b1f = _fold_bn(p["wc1"], p["bc1"], p["g1"], p["be1"], p["m1"], p["v1"])
    w2f, b2f = _fold_bn(p["wc2"], p["bc2"], p["g2"], p["be2"], p["m2"], p["v2"])
    return {
        "w1x1": p["w1x1"].astype(compute_dtype),
        "b1x1": p["b1x1"].reshape(1, c2).astype(jnp.float32),
        "ah": _interp_matrix(2 * h1, h1).astype(compute_dtype),
        "aw": _interp_matrix(2 * w1, w1).astype(compute_dtype),
        # concat order is [x2, upsampled-x1]; input channels [0:C2] of wc1 hit x2.
        "wc1": _pack_conv3x3_weights(w1f).astype(compute_dtype),   # (3, 2*C2, 3*Cout)
        "bc1": b1f.reshape(1, cout).astype(jnp.float32),
        "wc2": _pack_conv3x3_weights(w2f).astype(compute_dtype),   # (3, Cout, 3*Cout)
        "bc2": b2f.reshape(1, cout).astype(jnp.float32),
    }


def up_block_forward(prep, x1_nchw, x2_nchw):
    """UpBlock.forward (mode_upsampling=1): NCHW in / NCHW (f32) out."""
    cd = prep["w1x1"].dtype
    x1 = jnp.transpose(x1_nchw, (0, 2, 3, 1)).astype(cd)   # -> NHWC bf16
    x2 = jnp.transpose(x2_nchw, (0, 2, 3, 1)).astype(cd)
    N, H1, W1, C1 = x1.shape
    _, H2, W2, C2 = x2.shape
    Cout = prep["bc1"].shape[-1]
    Wp = _round_up(W2 + 2, 8)   # padded width rounded to 8 sublanes -> free slab reshapes

    cparams = pltpu.CompilerParams(
        dimension_semantics=("parallel",),
        vmem_limit_bytes=32 * 1024 * 1024,
    )

    out = pl.pallas_call(
        _up_block_kernel,
        out_shape=jax.ShapeDtypeStruct((N, H2, W2, Cout), cd),     # bf16 out: half HBM
        grid=(N,),
        in_specs=[
            pl.BlockSpec((1, H1, W1, C1), lambda n: (n, 0, 0, 0)),
            pl.BlockSpec((1, H2, W2, C2), lambda n: (n, 0, 0, 0)),
            pl.BlockSpec((C1, C2), lambda n: (0, 0)),
            pl.BlockSpec((1, C2), lambda n: (0, 0)),
            pl.BlockSpec((H2, H1), lambda n: (0, 0)),
            pl.BlockSpec((W2, W1), lambda n: (0, 0)),
            pl.BlockSpec((3, 2 * C2, 3 * Cout), lambda n: (0, 0, 0)),
            pl.BlockSpec((1, Cout), lambda n: (0, 0)),
            pl.BlockSpec((3, Cout, 3 * Cout), lambda n: (0, 0, 0)),
            pl.BlockSpec((1, Cout), lambda n: (0, 0)),
        ],
        out_specs=pl.BlockSpec((1, H2, W2, Cout), lambda n: (n, 0, 0, 0)),
        scratch_shapes=[
            pltpu.VMEM((H2 + 2, Wp, 2 * C2), jnp.float32),   # concat slab (x2 | up)
            pltpu.VMEM((H2 + 2, Wp, Cout), jnp.float32),     # intermediate slab
        ],
        compiler_params=cparams,
    )(x1, x2, prep["w1x1"], prep["b1x1"], prep["ah"], prep["aw"],
      prep["wc1"], prep["bc1"], prep["wc2"], prep["bc2"])

    # Transpose in bf16 (half the HBM traffic of that pass), then upcast to match the
    # PyTorch float output.
    return jnp.transpose(out, (0, 3, 1, 2)).astype(jnp.float32)


# -------------------------- pure-JAX f32 reference ---------------------------

def _ref_block(x, w, b, g, be, m, v):
    wf, bf = _fold_bn(w, b, g, be, m, v)
    z = lax.conv_general_dilated(x, wf, (1, 1), ((1, 1), (1, 1)),
                                 dimension_numbers=("NHWC", "HWIO", "NHWC")) + bf
    return jnp.where(z >= 0, z, LEAKY_SLOPE * z)


def reference_forward(p, x1_nchw, x2_nchw):
    x1 = jnp.transpose(x1_nchw, (0, 2, 3, 1))
    x2 = jnp.transpose(x2_nchw, (0, 2, 3, 1))
    y = jnp.einsum("nhwc,cd->nhwd", x1, p["w1x1"]) + p["b1x1"]
    N, H, W, C = y.shape
    Ah = _interp_matrix(2 * H, H)
    Aw = _interp_matrix(2 * W, W)
    up = jnp.einsum("jw,niwc->nijc", Aw, jnp.einsum("ih,nhwc->niwc", Ah, y))
    x = jnp.concatenate([x2, up], axis=-1)
    z = _ref_block(x, p["wc1"], p["bc1"], p["g1"], p["be1"], p["m1"], p["v1"])
    z = _ref_block(z, p["wc2"], p["bc2"], p["g2"], p["be2"], p["m2"], p["v2"])
    return jnp.transpose(z, (0, 3, 1, 2))


# ------------------------------------ params ---------------------------------

def make_params(key, in_channels1, in_channels2, out_channels):
    ks = jax.random.split(key, 14)
    ccat = 2 * in_channels2
    p = {}
    # conv1x1: (Cin1 -> Cin2), stored as (Cin1, Cin2) for x @ w
    p["w1x1"] = 0.05 * jax.random.normal(ks[0], (in_channels1, in_channels2), jnp.float32)
    p["b1x1"] = 0.1 * jax.random.normal(ks[1], (in_channels2,), jnp.float32)
    # ConvBlock conv1: (2*Cin2 -> Cout), HWIO, + BatchNorm params
    p["wc1"] = 0.03 * jax.random.normal(ks[2], (3, 3, ccat, out_channels), jnp.float32)
    p["bc1"] = 0.1 * jax.random.normal(ks[3], (out_channels,), jnp.float32)
    p["g1"] = 1.0 + 0.1 * jax.random.normal(ks[4], (out_channels,), jnp.float32)
    p["be1"] = 0.1 * jax.random.normal(ks[5], (out_channels,), jnp.float32)
    p["m1"] = 0.1 * jax.random.normal(ks[6], (out_channels,), jnp.float32)
    p["v1"] = jax.random.uniform(ks[7], (out_channels,), jnp.float32, 0.5, 1.5)
    # ConvBlock conv2: (Cout -> Cout) + BatchNorm params
    p["wc2"] = 0.03 * jax.random.normal(ks[8], (3, 3, out_channels, out_channels), jnp.float32)
    p["bc2"] = 0.1 * jax.random.normal(ks[9], (out_channels,), jnp.float32)
    p["g2"] = 1.0 + 0.1 * jax.random.normal(ks[10], (out_channels,), jnp.float32)
    p["be2"] = 0.1 * jax.random.normal(ks[11], (out_channels,), jnp.float32)
    p["m2"] = 0.1 * jax.random.normal(ks[12], (out_channels,), jnp.float32)
    p["v2"] = jax.random.uniform(ks[13], (out_channels,), jnp.float32, 0.5, 1.5)
    return p


# -------------------------------------- main ---------------------------------

if __name__ == "__main__":
    # Channel sizes of UpBlock `up1` in My_Arch (feature_chns=[16, 32, 64, 128, 256]):
    # x1 is the deepest feature (256 ch) at low res, x2 the 128-ch skip at 2x resolution.
    # Lane-dense (multiples of 128) channels keep MXU / vector stores fully utilized.
    in_channels1, in_channels2, out_channels = 256, 128, 128
    N, H1, W1 = 2, 8, 8

    key = jax.random.PRNGKey(0)
    k_p, k_x1, k_x2 = jax.random.split(key, 3)
    params = make_params(k_p, in_channels1, in_channels2, out_channels)

    x1 = jax.random.normal(k_x1, (N, in_channels1, H1, W1), jnp.float32)          # NCHW
    x2 = jax.random.normal(k_x2, (N, in_channels2, 2 * H1, 2 * W1), jnp.float32)  # NCHW

    prep = prepare_params(params, H1, W1)      # BN folding / weight packing done once
    fwd = jax.jit(up_block_forward)
    out = jax.block_until_ready(fwd(prep, x1, x2))

    ref = jax.block_until_ready(reference_forward(params, x1, x2))
    assert out.shape == (N, out_channels, 2 * H1, 2 * W1), out.shape
    # bf16 activations/weights/output with f32 accumulation vs a pure-f32 reference:
    # typical error is well under 1% of the O(1) activation scale; real bugs (wrong tap,
    # wrong BN fold, wrong interp) produce O(1) errors, so 0.1 abs/rel still discriminates.
    np.testing.assert_allclose(np.asarray(out), np.asarray(ref), rtol=1e-1, atol=1e-1)

    print("KERNEL_OK")
</pallas_src>

<mosaic_0001>
module attributes {stable_mosaic.version = 11 : i64} {
  func.func @_up_block_kernel(%arg0: i32, %arg1: memref<1x8x8x256xbf16, #tpu.memory_space<vmem>>, %arg2: memref<1x16x16x128xbf16, #tpu.memory_space<vmem>>, %arg3: memref<256x128xbf16, #tpu.memory_space<vmem>>, %arg4: memref<1x128xf32, #tpu.memory_space<vmem>>, %arg5: memref<16x8xbf16, #tpu.memory_space<vmem>>, %arg6: memref<16x8xbf16, #tpu.memory_space<vmem>>, %arg7: memref<3x256x384xbf16, #tpu.memory_space<vmem>>, %arg8: memref<1x128xf32, #tpu.memory_space<vmem>>, %arg9: memref<3x128x384xbf16, #tpu.memory_space<vmem>>, %arg10: memref<1x128xf32, #tpu.memory_space<vmem>>, %arg11: memref<1x16x16x128xbf16, #tpu.memory_space<vmem>>, %arg12: memref<18x24x256xf32, #tpu.memory_space<vmem>>, %arg13: memref<18x24x128xf32, #tpu.memory_space<vmem>>) attributes {dimension_semantics = [#tpu.dimension_semantics<parallel>], iteration_bounds = array<i64: 2>, scalar_prefetch = 0 : i64, scratch_operands = 2 : i64, tpu.core_type = #tpu.core_type<tc>, window_params = [{transform_indices = @transform_0, window_bounds = array<i64: 1, 8, 8, 256>}, {transform_indices = @transform_1, window_bounds = array<i64: 1, 16, 16, 128>}, {pipeline_mode = #tpu.pipeline_mode<synchronous>, transform_indices = @transform_2, window_bounds = array<i64: 256, 128>}, {pipeline_mode = #tpu.pipeline_mode<synchronous>, transform_indices = @transform_3, window_bounds = array<i64: 1, 128>}, {pipeline_mode = #tpu.pipeline_mode<synchronous>, transform_indices = @transform_4, window_bounds = array<i64: 16, 8>}, {pipeline_mode = #tpu.pipeline_mode<synchronous>, transform_indices = @transform_5, window_bounds = array<i64: 16, 8>}, {pipeline_mode = #tpu.pipeline_mode<synchronous>, transform_indices = @transform_6, window_bounds = array<i64: 3, 256, 384>}, {pipeline_mode = #tpu.pipeline_mode<synchronous>, transform_indices = @transform_7, window_bounds = array<i64: 1, 128>}, {pipeline_mode = #tpu.pipeline_mode<synchronous>, transform_indices = @transform_8, window_bounds = array<i64: 3, 128, 384>}, {pipeline_mode = #tpu.pipeline_mode<synchronous>, transform_indices = @transform_9, window_bounds = array<i64: 1, 128>}, {transform_indices = @transform_10, window_bounds = array<i64: 1, 16, 16, 128>}]} {
    %c0 = arith.constant 0 : index
    %c0_0 = arith.constant 0 : index
    %c0_1 = arith.constant 0 : index
    %c0_2 = arith.constant 0 : index
    %0 = vector.load %arg1[%c0, %c0_0, %c0_1, %c0_2] : memref<1x8x8x256xbf16, #tpu.memory_space<vmem>>, vector<1x8x8x256xbf16>
    %1 = vector.shape_cast %0 : vector<1x8x8x256xbf16> to vector<8x8x256xbf16>
    %2 = vector.shape_cast %1 : vector<8x8x256xbf16> to vector<64x256xbf16>
    %c0_3 = arith.constant 0 : index
    %c0_4 = arith.constant 0 : index
    %3 = vector.load %arg3[%c0_3, %c0_4] : memref<256x128xbf16, #tpu.memory_space<vmem>>, vector<256x128xbf16>
    %cst = arith.constant dense<0.000000e+00> : vector<64x128xf32>
    %4 = tpu.matmul %2, %3, %cst {dimension_numbers = #tpu.dot_dimension_numbers<[1], [0], [0], [1], [0, 0, 1, 1], [], []>} : vector<64x256xbf16>, vector<256x128xbf16>, vector<64x128xf32> -> vector<64x128xf32>
    %c0_5 = arith.constant 0 : index
    %c0_6 = arith.constant 0 : index
    %5 = vector.load %arg4[%c0_5, %c0_6] : memref<1x128xf32, #tpu.memory_space<vmem>>, vector<1x128xf32>
    %6 = vector.broadcast %5 : vector<1x128xf32> to vector<64x128xf32>
    %7 = arith.addf %4, %6 : vector<64x128xf32>
    %8 = vector.shape_cast %7 : vector<64x128xf32> to vector<8x8x128xf32>
    %9 = arith.truncf %8 : vector<8x8x128xf32> to vector<8x8x128xbf16>
    %c0_7 = arith.constant 0 : index
    %c0_8 = arith.constant 0 : index
    %10 = vector.load %arg6[%c0_7, %c0_8] : memref<16x8xbf16, #tpu.memory_space<vmem>>, vector<16x8xbf16>
    %11 = vector.shape_cast %10 : vector<16x8xbf16> to vector<1x16x8xbf16>
    %12 = vector.broadcast %11 : vector<1x16x8xbf16> to vector<8x16x8xbf16>
    %cst_9 = arith.constant dense<0.000000e+00> : vector<8x16x128xf32>
    %13 = tpu.matmul %12, %9, %cst_9 {dimension_numbers = #tpu.dot_dimension_numbers<[2], [1], [1], [2], [0, 0, 0, 1, 1, 2], [0], [0]>} : vector<8x16x8xbf16>, vector<8x8x128xbf16>, vector<8x16x128xf32> -> vector<8x16x128xf32>
    %c0_10 = arith.constant 0 : index
    %c0_11 = arith.constant 0 : index
    %14 = vector.load %arg5[%c0_10, %c0_11] : memref<16x8xbf16, #tpu.memory_space<vmem>>, vector<16x8xbf16>
    %15 = vector.shape_cast %13 : vector<8x16x128xf32> to vector<8x2048xf32>
    %16 = arith.truncf %15 : vector<8x2048xf32> to vector<8x2048xbf16>
    %cst_12 = arith.constant dense<0.000000e+00> : vector<16x2048xf32>
    %17 = tpu.matmul %14, %16, %cst_12 {dimension_numbers = #tpu.dot_dimension_numbers<[1], [0], [0], [1], [0, 0, 1, 1], [], []>} : vector<16x8xbf16>, vector<8x2048xbf16>, vector<16x2048xf32> -> vector<16x2048xf32>
    %18 = vector.shape_cast %17 : vector<16x2048xf32> to vector<16x16x128xf32>
    %cst_13 = arith.constant 0.000000e+00 : f32
    %19 = vector.broadcast %cst_13 : f32 to vector<1x24x256xf32>
    %c0_14 = arith.constant 0 : index
    %c0_15 = arith.constant 0 : index
    %c0_16 = arith.constant 0 : index
    %20 = vector.load %arg12[%c0_14, %c0_15, %c0_16] : memref<18x24x256xf32, #tpu.memory_space<vmem>>, vector<1x24x256xf32>
    tpu.vector_store %arg12[%c0_14, %c0_15, %c0_16], %19 {strides = array<i32>} : memref<18x24x256xf32, #tpu.memory_space<vmem>>, vector<1x24x256xf32>,
    %c17 = arith.constant 17 : index
    %c0_17 = arith.constant 0 : index
    %c0_18 = arith.constant 0 : index
    %21 = vector.load %arg12[%c17, %c0_17, %c0_18] : memref<18x24x256xf32, #tpu.memory_space<vmem>>, vector<1x24x256xf32>
    tpu.vector_store %arg12[%c17, %c0_17, %c0_18], %19 {strides = array<i32>} : memref<18x24x256xf32, #tpu.memory_space<vmem>>, vector<1x24x256xf32>,
    %cst_19 = arith.constant 0.000000e+00 : f32
    %22 = vector.broadcast %cst_19 : f32 to vector<18x1x256xf32>
    %c0_20 = arith.constant 0 : index
    %c0_21 = arith.constant 0 : index
    %c0_22 = arith.constant 0 : index
    %23 = vector.load %arg12[%c0_20, %c0_21, %c0_22] : memref<18x24x256xf32, #tpu.memory_space<vmem>>, vector<18x1x256xf32>
    tpu.vector_store %arg12[%c0_20, %c0_21, %c0_22], %22 {strides = array<i32>} : memref<18x24x256xf32, #tpu.memory_space<vmem>>, vector<18x1x256xf32>,
    %c0_23 = arith.constant 0 : index
    %c17_24 = arith.constant 17 : index
    %c0_25 = arith.constant 0 : index
    %24 = vector.load %arg12[%c0_23, %c17_24, %c0_25] : memref<18x24x256xf32, #tpu.memory_space<vmem>>, vector<18x1x256xf32>
    tpu.vector_store %arg12[%c0_23, %c17_24, %c0_25], %22 {strides = array<i32>} : memref<18x24x256xf32, #tpu.memory_space<vmem>>, vector<18x1x256xf32>,
    %cst_26 = arith.constant 0.000000e+00 : f32
    %25 = vector.broadcast %cst_26 : f32 to vector<1x24x128xf32>
    %c0_27 = arith.constant 0 : index
    %c0_28 = arith.constant 0 : index
    %c0_29 = arith.constant 0 : index
    %26 = vector.load %arg13[%c0_27, %c0_28, %c0_29] : memref<18x24x128xf32, #tpu.memory_space<vmem>>, vector<1x24x128xf32>
    tpu.vector_store %arg13[%c0_27, %c0_28, %c0_29], %25 {strides = array<i32>} : memref<18x24x128xf32, #tpu.memory_space<vmem>>, vector<1x24x128xf32>,
    %c17_30 = arith.constant 17 : index
    %c0_31 = arith.constant 0 : index
    %c0_32 = arith.constant 0 : index
    %27 = vector.load %arg13[%c17_30, %c0_31, %c0_32] : memref<18x24x128xf32, #tpu.memory_space<vmem>>, vector<1x24x128xf32>
    tpu.vector_store %arg13[%c17_30, %c0_31, %c0_32], %25 {strides = array<i32>} : memref<18x24x128xf32, #tpu.memory_space<vmem>>, vector<1x24x128xf32>,
    %cst_33 = arith.constant 0.000000e+00 : f32
    %28 = vector.broadcast %cst_33 : f32 to vector<18x1x128xf32>
    %c0_34 = arith.constant 0 : index
    %c0_35 = arith.constant 0 : index
    %c0_36 = arith.constant 0 : index
    %29 = vector.load %arg13[%c0_34, %c0_35, %c0_36] : memref<18x24x128xf32, #tpu.memory_space<vmem>>, vector<18x1x128xf32>
    tpu.vector_store %arg13[%c0_34, %c0_35, %c0_36], %28 {strides = array<i32>} : memref<18x24x128xf32, #tpu.memory_space<vmem>>, vector<18x1x128xf32>,
    %c0_37 = arith.constant 0 : index
    %c17_38 = arith.constant 17 : index
    %c0_39 = arith.constant 0 : index
    %30 = vector.load %arg13[%c0_37, %c17_38, %c0_39] : memref<18x24x128xf32, #tpu.memory_space<vmem>>, vector<18x1x128xf32>
    tpu.vector_store %arg13[%c0_37, %c17_38, %c0_39], %28 {strides = array<i32>} : memref<18x24x128xf32, #tpu.memory_space<vmem>>, vector<18x1x128xf32>,
    %c0_40 = arith.constant 0 : index
    %c0_41 = arith.constant 0 : index
    %c0_42 = arith.constant 0 : index
    %c0_43 = arith.constant 0 : index
    %31 = vector.load %arg2[%c0_40, %c0_41, %c0_42, %c0_43] : memref<1x16x16x128xbf16, #tpu.memory_space<vmem>>, vector<1x16x16x128xbf16>
    %32 = vector.shape_cast %31 : vector<1x16x16x128xbf16> to vector<16x16x128xbf16>
    %33 = arith.extf %32 : vector<16x16x128xbf16> to vector<16x16x128xf32>
    %c1 = arith.constant 1 : index
    %c1_44 = arith.constant 1 : index
    %c0_45 = arith.constant 0 : index
    %34 = vector.load %arg12[%c1, %c1_44, %c0_45] : memref<18x24x256xf32, #tpu.memory_space<vmem>>, vector<16x16x128xf32>
    tpu.vector_store %arg12[%c1, %c1_44, %c0_45], %33 {strides = array<i32>} : memref<18x24x256xf32, #tpu.memory_space<vmem>>, vector<16x16x128xf32>,
    %c1_46 = arith.constant 1 : index
    %c1_47 = arith.constant 1 : index
    %c128 = arith.constant 128 : index
    %35 = vector.load %arg12[%c1_46, %c1_47, %c128] : memref<18x24x256xf32, #tpu.memory_space<vmem>>, vector<16x16x128xf32>
    tpu.vector_store %arg12[%c1_46, %c1_47, %c128], %18 {strides = array<i32>} : memref<18x24x256xf32, #tpu.memory_space<vmem>>, vector<16x16x128xf32>,
    %c0_48 = arith.constant 0 : index
    %c0_49 = arith.constant 0 : index
    %36 = vector.load %arg8[%c0_48, %c0_49] : memref<1x128xf32, #tpu.memory_space<vmem>>, vector<1x128xf32>
    %cst_50 = arith.constant 0.000000e+00 : f32
    %37 = vector.broadcast %cst_50 : f32 to vector<16x16x128xf32>
    %c0_51 = arith.constant 0 : index
    %c0_52 = arith.constant 0 : index
    %c0_53 = arith.constant 0 : index
    %38 = vector.load %arg12[%c0_51, %c0_52, %c0_53] : memref<18x24x256xf32, #tpu.memory_space<vmem>>, vector<16x24x256xf32>
    %39 = vector.shape_cast %38 : vector<16x24x256xf32> to vector<384x256xf32>
    %40 = arith.truncf %39 : vector<384x256xf32> to vector<384x256xbf16>
    %c0_54 = arith.constant 0 : index
    %c0_55 = arith.constant 0 : index
    %c0_56 = arith.constant 0 : index
    %41 = vector.load %arg7[%c0_54, %c0_55, %c0_56] : memref<3x256x384xbf16, #tpu.memory_space<vmem>>, vector<1x256x384xbf16>
    %42 = vector.shape_cast %41 : vector<1x256x384xbf16> to vector<256x384xbf16>
    %cst_57 = arith.constant dense<0.000000e+00> : vector<384x384xf32>
    %43 = tpu.matmul %40, %42, %cst_57 {dimension_numbers = #tpu.dot_dimension_numbers<[1], [0], [0], [1], [0, 0, 1, 1], [], []>} : vector<384x256xbf16>, vector<256x384xbf16>, vector<384x384xf32> -> vector<384x384xf32>
    %44 = vector.shape_cast %43 : vector<384x384xf32> to vector<16x24x384xf32>
    %45 = vector.extract_strided_slice %44 {offsets = [0, 0, 0], sizes = [16, 16, 128], strides = [1, 1, 1]} : vector<16x24x384xf32> to vector<16x16x128xf32>
    %46 = arith.addf %37, %45 : vector<16x16x128xf32>
    %47 = vector.extract_strided_slice %44 {offsets = [0, 1, 128], sizes = [16, 16, 128], strides = [1, 1, 1]} : vector<16x24x384xf32> to vector<16x16x128xf32>
    %48 = arith.addf %46, %47 : vector<16x16x128xf32>
    %49 = vector.extract_strided_slice %44 {offsets = [0, 2, 256], sizes = [16, 16, 128], strides = [1, 1, 1]} : vector<16x24x384xf32> to vector<16x16x128xf32>
    %50 = arith.addf %48, %49 : vector<16x16x128xf32>
    %c1_58 = arith.constant 1 : index
    %c0_59 = arith.constant 0 : index
    %c0_60 = arith.constant 0 : index
    %51 = vector.load %arg12[%c1_58, %c0_59, %c0_60] : memref<18x24x256xf32, #tpu.memory_space<vmem>>, vector<16x24x256xf32>
    %52 = vector.shape_cast %51 : vector<16x24x256xf32> to vector<384x256xf32>
    %53 = arith.truncf %52 : vector<384x256xf32> to vector<384x256xbf16>
    %c1_61 = arith.constant 1 : index
    %c0_62 = arith.constant 0 : index
    %c0_63 = arith.constant 0 : index
    %54 = vector.load %arg7[%c1_61, %c0_62, %c0_63] : memref<3x256x384xbf16, #tpu.memory_space<vmem>>, vector<1x256x384xbf16>
    %55 = vector.shape_cast %54 : vector<1x256x384xbf16> to vector<256x384xbf16>
    %cst_64 = arith.constant dense<0.000000e+00> : vector<384x384xf32>
    %56 = tpu.matmul %53, %55, %cst_64 {dimension_numbers = #tpu.dot_dimension_numbers<[1], [0], [0], [1], [0, 0, 1, 1], [], []>} : vector<384x256xbf16>, vector<256x384xbf16>, vector<384x384xf32> -> vector<384x384xf32>
    %57 = vector.shape_cast %56 : vector<384x384xf32> to vector<16x24x384xf32>
    %58 = vector.extract_strided_slice %57 {offsets = [0, 0, 0], sizes = [16, 16, 128], strides = [1, 1, 1]} : vector<16x24x384xf32> to vector<16x16x128xf32>
    %59 = arith.addf %50, %58 : vector<16x16x128xf32>
    %60 = vector.extract_strided_slice %57 {offsets = [0, 1, 128], sizes = [16, 16, 128], strides = [1, 1, 1]} : vector<16x24x384xf32> to vector<16x16x128xf32>
    %61 = arith.addf %59, %60 : vector<16x16x128xf32>
    %62 = vector.extract_strided_slice %57 {offsets = [0, 2, 256], sizes = [16, 16, 128], strides = [1, 1, 1]} : vector<16x24x384xf32> to vector<16x16x128xf32>
    %63 = arith.addf %61, %62 : vector<16x16x128xf32>
    %c2 = arith.constant 2 : index
    %c0_65 = arith.constant 0 : index
    %c0_66 = arith.constant 0 : index
    %64 = vector.load %arg12[%c2, %c0_65, %c0_66] : memref<18x24x256xf32, #tpu.memory_space<vmem>>, vector<16x24x256xf32>
    %65 = vector.shape_cast %64 : vector<16x24x256xf32> to vector<384x256xf32>
    %66 = arith.truncf %65 : vector<384x256xf32> to vector<384x256xbf16>
    %c2_67 = arith.constant 2 : index
    %c0_68 = arith.constant 0 : index
    %c0_69 = arith.constant 0 : index
    %67 = vector.load %arg7[%c2_67, %c0_68, %c0_69] : memref<3x256x384xbf16, #tpu.memory_space<vmem>>, vector<1x256x384xbf16>
    %68 = vector.shape_cast %67 : vector<1x256x384xbf16> to vector<256x384xbf16>
    %cst_70 = arith.constant dense<0.000000e+00> : vector<384x384xf32>
    %69 = tpu.matmul %66, %68, %cst_70 {dimension_numbers = #tpu.dot_dimension_numbers<[1], [0], [0], [1], [0, 0, 1, 1], [], []>} : vector<384x256xbf16>, vector<256x384xbf16>, vector<384x384xf32> -> vector<384x384xf32>
    %70 = vector.shape_cast %69 : vector<384x384xf32> to vector<16x24x384xf32>
    %71 = vector.extract_strided_slice %70 {offsets = [0, 0, 0], sizes = [16, 16, 128], strides = [1, 1, 1]} : vector<16x24x384xf32> to vector<16x16x128xf32>
    %72 = arith.addf %63, %71 : vector<16x16x128xf32>
    %73 = vector.extract_strided_slice %70 {offsets = [0, 1, 128], sizes = [16, 16, 128], strides = [1, 1, 1]} : vector<16x24x384xf32> to vector<16x16x128xf32>
    %74 = arith.addf %72, %73 : vector<16x16x128xf32>
    %75 = vector.extract_strided_slice %70 {offsets = [0, 2, 256], sizes = [16, 16, 128], strides = [1, 1, 1]} : vector<16x24x384xf32> to vector<16x16x128xf32>
    %76 = arith.addf %74, %75 : vector<16x16x128xf32>
    %77 = vector.shape_cast %36 : vector<1x128xf32> to vector<1x1x128xf32>
    %78 = vector.broadcast %77 : vector<1x1x128xf32> to vector<16x16x128xf32>
    %79 = arith.addf %76, %78 : vector<16x16x128xf32>
    %cst_71 = arith.constant 0.000000e+00 : f32
    %80 = vector.broadcast %cst_71 : f32 to vector<16x16x128xf32>
    %81 = arith.cmpf oge, %79, %80 : vector<16x16x128xf32>
    %cst_72 = arith.constant 0.00999999977 : f32
    %82 = vector.broadcast %cst_72 : f32 to vector<16x16x128xf32>
    %83 = arith.mulf %82, %79 : vector<16x16x128xf32>
    %84 = arith.select %81, %79, %83 : vector<16x16x128xi1>, vector<16x16x128xf32>
    %c1_73 = arith.constant 1 : index
    %c1_74 = arith.constant 1 : index
    %c0_75 = arith.constant 0 : index
    %85 = vector.load %arg13[%c1_73, %c1_74, %c0_75] : memref<18x24x128xf32, #tpu.memory_space<vmem>>, vector<16x16x128xf32>
    tpu.vector_store %arg13[%c1_73, %c1_74, %c0_75], %84 {strides = array<i32>} : memref<18x24x128xf32, #tpu.memory_space<vmem>>, vector<16x16x128xf32>,
    %c0_76 = arith.constant 0 : index
    %c0_77 = arith.constant 0 : index
    %86 = vector.load %arg10[%c0_76, %c0_77] : memref<1x128xf32, #tpu.memory_space<vmem>>, vector<1x128xf32>
    %cst_78 = arith.constant 0.000000e+00 : f32
    %87 = vector.broadcast %cst_78 : f32 to vector<16x16x128xf32>
    %c0_79 = arith.constant 0 : index
    %c0_80 = arith.constant 0 : index
    %c0_81 = arith.constant 0 : index
    %88 = vector.load %arg13[%c0_79, %c0_80, %c0_81] : memref<18x24x128xf32, #tpu.memory_space<vmem>>, vector<16x24x128xf32>
    %89 = vector.shape_cast %88 : vector<16x24x128xf32> to vector<384x128xf32>
    %90 = arith.truncf %89 : vector<384x128xf32> to vector<384x128xbf16>
    %c0_82 = arith.constant 0 : index
    %c0_83 = arith.constant 0 : index
    %c0_84 = arith.constant 0 : index
    %91 = vector.load %arg9[%c0_82, %c0_83, %c0_84] : memref<3x128x384xbf16, #tpu.memory_space<vmem>>, vector<1x128x384xbf16>
    %92 = vector.shape_cast %91 : vector<1x128x384xbf16> to vector<128x384xbf16>
    %cst_85 = arith.constant dense<0.000000e+00> : vector<384x384xf32>
    %93 = tpu.matmul %90, %92, %cst_85 {dimension_numbers = #tpu.dot_dimension_numbers<[1], [0], [0], [1], [0, 0, 1, 1], [], []>} : vector<384x128xbf16>, vector<128x384xbf16>, vector<384x384xf32> -> vector<384x384xf32>
    %94 = vector.shape_cast %93 : vector<384x384xf32> to vector<16x24x384xf32>
    %95 = vector.extract_strided_slice %94 {offsets = [0, 0, 0], sizes = [16, 16, 128], strides = [1, 1, 1]} : vector<16x24x384xf32> to vector<16x16x128xf32>
    %96 = arith.addf %87, %95 : vector<16x16x128xf32>
    %97 = vector.extract_strided_slice %94 {offsets = [0, 1, 128], sizes = [16, 16, 128], strides = [1, 1, 1]} : vector<16x24x384xf32> to vector<16x16x128xf32>
    %98 = arith.addf %96, %97 : vector<16x16x128xf32>
    %99 = vector.extract_strided_slice %94 {offsets = [0, 2, 256], sizes = [16, 16, 128], strides = [1, 1, 1]} : vector<16x24x384xf32> to vector<16x16x128xf32>
    %100 = arith.addf %98, %99 : vector<16x16x128xf32>
    %c1_86 = arith.constant 1 : index
    %c0_87 = arith.constant 0 : index
    %c0_88 = arith.constant 0 : index
    %101 = vector.load %arg13[%c1_86, %c0_87, %c0_88] : memref<18x24x128xf32, #tpu.memory_space<vmem>>, vector<16x24x128xf32>
    %102 = vector.shape_cast %101 : vector<16x24x128xf32> to vector<384x128xf32>
    %103 = arith.truncf %102 : vector<384x128xf32> to vector<384x128xbf16>
    %c1_89 = arith.constant 1 : index
    %c0_90 = arith.constant 0 : index
    %c0_91 = arith.constant 0 : index
    %104 = vector.load %arg9[%c1_89, %c0_90, %c0_91] : memref<3x128x384xbf16, #tpu.memory_space<vmem>>, vector<1x128x384xbf16>
    %105 = vector.shape_cast %104 : vector<1x128x384xbf16> to vector<128x384xbf16>
    %cst_92 = arith.constant dense<0.000000e+00> : vector<384x384xf32>
    %106 = tpu.matmul %103, %105, %cst_92 {dimension_numbers = #tpu.dot_dimension_numbers<[1], [0], [0], [1], [0, 0, 1, 1], [], []>} : vector<384x128xbf16>, vector<128x384xbf16>, vector<384x384xf32> -> vector<384x384xf32>
    %107 = vector.shape_cast %106 : vector<384x384xf32> to vector<16x24x384xf32>
    %108 = vector.extract_strided_slice %107 {offsets = [0, 0, 0], sizes = [16, 16, 128], strides = [1, 1, 1]} : vector<16x24x384xf32> to vector<16x16x128xf32>
    %109 = arith.addf %100, %108 : vector<16x16x128xf32>
    %110 = vector.extract_strided_slice %107 {offsets = [0, 1, 128], sizes = [16, 16, 128], strides = [1, 1, 1]} : vector<16x24x384xf32> to vector<16x16x128xf32>
    %111 = arith.addf %109, %110 : vector<16x16x128xf32>
    %112 = vector.extract_strided_slice %107 {offsets = [0, 2, 256], sizes = [16, 16, 128], strides = [1, 1, 1]} : vector<16x24x384xf32> to vector<16x16x128xf32>
    %113 = arith.addf %111, %112 : vector<16x16x128xf32>
    %c2_93 = arith.constant 2 : index
    %c0_94 = arith.constant 0 : index
    %c0_95 = arith.constant 0 : index
    %114 = vector.load %arg13[%c2_93, %c0_94, %c0_95] : memref<18x24x128xf32, #tpu.memory_space<vmem>>, vector<16x24x128xf32>
    %115 = vector.shape_cast %114 : vector<16x24x128xf32> to vector<384x128xf32>
    %116 = arith.truncf %115 : vector<384x128xf32> to vector<384x128xbf16>
    %c2_96 = arith.constant 2 : index
    %c0_97 = arith.constant 0 : index
    %c0_98 = arith.constant 0 : index
    %117 = vector.load %arg9[%c2_96, %c0_97, %c0_98] : memref<3x128x384xbf16, #tpu.memory_space<vmem>>, vector<1x128x384xbf16>
    %118 = vector.shape_cast %117 : vector<1x128x384xbf16> to vector<128x384xbf16>
    %cst_99 = arith.constant dense<0.000000e+00> : vector<384x384xf32>
    %119 = tpu.matmul %116, %118, %cst_99 {dimension_numbers = #tpu.dot_dimension_numbers<[1], [0], [0], [1], [0, 0, 1, 1], [], []>} : vector<384x128xbf16>, vector<128x384xbf16>, vector<384x384xf32> -> vector<384x384xf32>
    %120 = vector.shape_cast %119 : vector<384x384xf32> to vector<16x24x384xf32>
    %121 = vector.extract_strided_slice %120 {offsets = [0, 0, 0], sizes = [16, 16, 128], strides = [1, 1, 1]} : vector<16x24x384xf32> to vector<16x16x128xf32>
    %122 = arith.addf %113, %121 : vector<16x16x128xf32>
    %123 = vector.extract_strided_slice %120 {offsets = [0, 1, 128], sizes = [16, 16, 128], strides = [1, 1, 1]} : vector<16x24x384xf32> to vector<16x16x128xf32>
    %124 = arith.addf %122, %123 : vector<16x16x128xf32>
    %125 = vector.extract_strided_slice %120 {offsets = [0, 2, 256], sizes = [16, 16, 128], strides = [1, 1, 1]} : vector<16x24x384xf32> to vector<16x16x128xf32>
    %126 = arith.addf %124, %125 : vector<16x16x128xf32>
    %127 = vector.shape_cast %86 : vector<1x128xf32> to vector<1x1x128xf32>
    %128 = vector.broadcast %127 : vector<1x1x128xf32> to vector<16x16x128xf32>
    %129 = arith.addf %126, %128 : vector<16x16x128xf32>
    %cst_100 = arith.constant 0.000000e+00 : f32
    %130 = vector.broadcast %cst_100 : f32 to vector<16x16x128xf32>
    %131 = arith.cmpf oge, %129, %130 : vector<16x16x128xf32>
    %cst_101 = arith.constant 0.00999999977 : f32
    %132 = vector.broadcast %cst_101 : f32 to vector<16x16x128xf32>
    %133 = arith.mulf %132, %129 : vector<16x16x128xf32>
    %134 = arith.select %131, %129, %133 : vector<16x16x128xi1>, vector<16x16x128xf32>
    %135 = vector.shape_cast %134 : vector<16x16x128xf32> to vector<1x16x16x128xf32>
    %136 = arith.truncf %135 : vector<1x16x16x128xf32> to vector<1x16x16x128xbf16>
    %c0_102 = arith.constant 0 : index
    %c0_103 = arith.constant 0 : index
    %c0_104 = arith.constant 0 : index
    %c0_105 = arith.constant 0 : index
    %137 = vector.load %arg11[%c0_102, %c0_103, %c0_104, %c0_105] : memref<1x16x16x128xbf16, #tpu.memory_space<vmem>>, vector<1x16x16x128xbf16>
    tpu.vector_store %arg11[%c0_102, %c0_103, %c0_104, %c0_105], %136 {strides = array<i32>} : memref<1x16x16x128xbf16, #tpu.memory_space<vmem>>, vector<1x16x16x128xbf16>,
    return
  }
  func.func @transform_0(%arg0: i32) -> (i32, i32, i32, i32) {
    %c0_i32 = arith.constant 0 : i32
    %c0_i32_0 = arith.constant 0 : i32
    %c0_i32_1 = arith.constant 0 : i32
    %c0_i32_2 = arith.constant 0 : i32
    return %arg0, %c0_i32, %c0_i32_0, %c0_i32_1 : i32, i32, i32, i32
  }
  func.func @transform_1(%arg0: i32) -> (i32, i32, i32, i32) {
    %c0_i32 = arith.constant 0 : i32
    %c0_i32_0 = arith.constant 0 : i32
    %c0_i32_1 = arith.constant 0 : i32
    %c0_i32_2 = arith.constant 0 : i32
    return %arg0, %c0_i32, %c0_i32_0, %c0_i32_1 : i32, i32, i32, i32
  }
  func.func @transform_2(%arg0: i32) -> (i32, i32) {
    %c0_i32 = arith.constant 0 : i32
    %c0_i32_0 = arith.constant 0 : i32
    %c0_i32_1 = arith.constant 0 : i32
    return %c0_i32, %c0_i32_0 : i32, i32
  }
  func.func @transform_3(%arg0: i32) -> (i32, i32) {
    %c0_i32 = arith.constant 0 : i32
    %c0_i32_0 = arith.constant 0 : i32
    %c0_i32_1 = arith.constant 0 : i32
    return %c0_i32, %c0_i32_0 : i32, i32
  }
  func.func @transform_4(%arg0: i32) -> (i32, i32) {
    %c0_i32 = arith.constant 0 : i32
    %c0_i32_0 = arith.constant 0 : i32
    %c0_i32_1 = arith.constant 0 : i32
    return %c0_i32, %c0_i32_0 : i32, i32
  }
  func.func @transform_5(%arg0: i32) -> (i32, i32) {
    %c0_i32 = arith.constant 0 : i32
    %c0_i32_0 = arith.constant 0 : i32
    %c0_i32_1 = arith.constant 0 : i32
    return %c0_i32, %c0_i32_0 : i32, i32
  }
  func.func @transform_6(%arg0: i32) -> (i32, i32, i32) {
    %c0_i32 = arith.constant 0 : i32
    %c0_i32_0 = arith.constant 0 : i32
    %c0_i32_1 = arith.constant 0 : i32
    %c0_i32_2 = arith.constant 0 : i32
    return %c0_i32, %c0_i32_0, %c0_i32_1 : i32, i32, i32
  }
  func.func @transform_7(%arg0: i32) -> (i32, i32) {
    %c0_i32 = arith.constant 0 : i32
    %c0_i32_0 = arith.constant 0 : i32
    %c0_i32_1 = arith.constant 0 : i32
    return %c0_i32, %c0_i32_0 : i32, i32
  }
  func.func @transform_8(%arg0: i32) -> (i32, i32, i32) {
    %c0_i32 = arith.constant 0 : i32
    %c0_i32_0 = arith.constant 0 : i32
    %c0_i32_1 = arith.constant 0 : i32
    %c0_i32_2 = arith.constant 0 : i32
    return %c0_i32, %c0_i32_0, %c0_i32_1 : i32, i32, i32
  }
  func.func @transform_9(%arg0: i32) -> (i32, i32) {
    %c0_i32 = arith.constant 0 : i32
    %c0_i32_0 = arith.constant 0 : i32
    %c0_i32_1 = arith.constant 0 : i32
    return %c0_i32, %c0_i32_0 : i32, i32
  }
  func.func @transform_10(%arg0: i32) -> (i32, i32, i32, i32) {
    %c0_i32 = arith.constant 0 : i32
    %c0_i32_0 = arith.constant 0 : i32
    %c0_i32_1 = arith.constant 0 : i32
    %c0_i32_2 = arith.constant 0 : i32
    return %arg0, %c0_i32, %c0_i32_0, %c0_i32_1 : i32, i32, i32, i32
  }
}

</mosaic_0001>

<bundles_post_ra>
// kernel: up_block_forward.1
= control target key start
LH: loop header
LB: loop body
LE: loop exit
PB: predicated region body
PF: predicated region fallthrough
CT: control target
= control target key end

     0   :  { %15 = vsyncpa [#allocation5], 0  ;;  %s17699_s0 = inlined_call_operand.vmem [shape: bf16[2,8,8,256], index: 0, kind: input, shape index: {}]   ;;  %s17700_s1 = inlined_call_operand.vmem [shape: bf16[2,16,16,128], index: 1, kind: input, shape index: {}]   ;;  %s17701_s2 = inlined_call_operand.hbm [shape: bf16[256,128], index: 2, kind: input, shape index: {}]   ;;  %s17702_s3 = inlined_call_operand.vmem [shape: f32[1,128], index: 3, kind: input, shape index: {}]   ;;  %s17703_s4 = inlined_call_operand.vmem [shape: bf16[16,8], index: 4, kind: input, shape index: {}]   ;;  %s17704_s5 = inlined_call_operand.vmem [shape: bf16[16,8], index: 5, kind: input, shape index: {}]   ;;  %s17705_s6 = inlined_call_operand.vmem [shape: bf16[3,256,384], index: 6, kind: input, shape index: {}]   ;;  %s17706_s7 = inlined_call_operand.vmem [shape: f32[1,128], index: 7, kind: input, shape index: {}]   ;;  %s17707_s8 = inlined_call_operand.hbm [shape: bf16[3,128,384], index: 8, kind: input, shape index: {}]   ;;  %s17708_s9 = inlined_call_operand.vmem [shape: f32[1,128], index: 9, kind: input, shape index: {}]   ;;  %s17709_s10 = inlined_call_operand.vmem [shape: bf16[2,16,16,128], index: 10, kind: output, shape index: {}]  }
   0x1   :  { %16 = vsyncpa [#allocation7], 0  ;;  %s12511_s13 = smov 0  }
   0x2 LB: > { %s284_s16 = sshll.u32 %s17701_s2, 4  ;;  %s12520_s17 = sadd.s32 4294967295, %s12445_s13   ;;  %s12445_s13 = sphi %s12511_s13, %s22_s13   ;;  %s285_s16 = int_to_ptr.hbm [resolvable:$true] %s284_s16 }
   0x3   : > { %p10748_p0 = scmp.ge.s32.totalorder %s12445_s13, 1  ;;  %p273_p1 = scmp.lt.s32.totalorder %s12445_s13, 3 }
   0x4   : > { %p12325_p2 = scmp.eq.s32.totalorder %s12520_s17, 0  ;;  %s12447_s19 = smov [#allocation4]  }
   0x5   : > { %p12525_p3 = pnand %p10748_p0, %p273_p1  ;;  %s286_s20 = sshll.u32 %s12447_s19, 4  ;;  %s287_s20 = int_to_ptr.vmem [resolvable:$true] %s286_s20 }
   0x6   : > { %s313_s23 = sshll.u32 %s17707_s8, 4  ;;  %s12448_s24 = smov [#allocation6]   ;;  %s314_s23 = int_to_ptr.hbm [resolvable:$true] %s313_s23 }
   0x7   : > { %p12318_p4 = pneg %p12525_p3  ;;  %s315_s25 = sshll.u32 %s12448_s24, 4  ;;  %s316_s25 = int_to_ptr.vmem [resolvable:$true] %s315_s25 }
   0x8   : > { %s12449_s26 = smov 64   ;;  %s12450_s27 = smov 4  }
   0x9   : > { %p12319_p5 = pnand %p12325_p2, %p12318_p4  ;;  %s12451_s28 = smov 192  }
   0xa   : > { %s12452_s29 = smov 12   ;;  %350 = sbr.rel (%p12525_p3) target bundleno = 3661 (0xe4d), region = 60 }
   0xb   : > { %12321 = dma.hbm_to_vmem [thread:$0]  (!%p12319_p5), %s285_s16, 2048, %s287_s20, [#allocation5], %s12449_s26, %s12449_s26, %s12450_s27  }
   0xc   : > { %12324 = dma.hbm_to_vmem [thread:$0]  (!%p12319_p5), %s314_s23, 9216, %s316_s25, [#allocation7], %s12451_s28, %s12451_s28, %s12452_s29  }
   0xf   : > { %12436 = dma.done.wait (%p12325_p2), [#allocation5], 2048  }
  0x10   : > { %12438 = vsyncadd (%p12325_p2), [#allocation5], 4294965248 }
  0x11   : > { %12440 = dma.done.wait (%p12325_p2), [#allocation7], 9216  }
  0x12   : > { %12442 = vsyncadd (%p12325_p2), [#allocation7], 4294958080  ;;  %v11901_v0 = vld [vmem:[#allocation4 + $0x38] sm:$0xff]  ;;  %v11900_v1 = vld [vmem:[#allocation4 + $0x30] sm:$0xff]  ;;  %p399_p6 = scmp.lt.s32.totalorder %s12520_s17, 1  ;;  %vm672_vm0 = vcmask 1043456  }
  0x13   : > { %595 = vmatpush.bf16.msra.mxu3 %v11901_v0  ;;  %v11899_v2 = vld [vmem:[#allocation4 + $0x28] sm:$0xff]  ;;  %v11898_v3 = vld [vmem:[#allocation4 + $0x20] sm:$0xff]  ;;  %v11897_v4 = vld [vmem:[#allocation4 + $0x18] sm:$0xff]  ;;  %vm668_vm1 = vcmask 64512   ;;  %vm812_vm2 = vcmask 1047556   ;;  %vm2043_vm4 = vcmask 1040384  }
  0x14   : > { %s18306_s17 = smov (!%p399_p6, %s12520_s17), 1  ;;  %v11896_v5 = vld [vmem:[#allocation4 + $0x10] sm:$0xff]  ;;  %v11895_v6 = vld [vmem:[#allocation4 + $0x8] sm:$0xff]  ;;  %v11894_v7 = vld [vmem:[#allocation4] sm:$0xff]  ;;  %vm3652_vm5 = vcmask 1046528   ;;  %vm3845_vm6 = vcmask 1045504  }
  0x15   : > { %s11883_s30 = sshll.u32 %s18306_s17, 6  ;;  %v11909_v11 = vld [vmem:[#allocation4 + $0x78] sm:$0xff]  ;;  %v11908_v12 = vld [vmem:[#allocation4 + $0x70] sm:$0xff]  ;;  %v11907_v13 = vld [vmem:[#allocation4 + $0x68] sm:$0xff]  ;;  %s11884_s18 = sshll.u32 %s18306_s17, 7 }
  0x16   : > { %s12554_s14 = scalar_lea.vmem %s17699_s0, %s11883_s30  ;;  %v11906_v16 = vld [vmem:[#allocation4 + $0x60] sm:$0xff]  ;;  %v11905_v18 = vld [vmem:[#allocation4 + $0x58] sm:$0xff]  ;;  %v11904_v19 = vld [vmem:[#allocation4 + $0x50] sm:$0xff]  ;;  %s12994_s21 = scalar_lea.vmem %s17700_s1, %s11884_s18 }
  0x17   : > { %596 = vmatpush.bf16.msra.mxu3 %v11900_v1  ;;  %v10763_v8 = vld [vmem:[%s12554_s14] sm:$0xf]  ;;  %v11887_v9 = vld [vmem:[%s12554_s14 + $0x4] sm:$0xf0]  ;;  %v10771_v14 = vld [vmem:[%s12554_s14 + $0x10] sm:$0xf]  ;;  %s17514_s30 = scalar_lea.vmem %s17709_s10, %s11884_s18 }
  0x18   : > { %v10764_v10 = vor.u32 %v11887_v9, %v10763_v8  ;;  %v11889_v15 = vld [vmem:[%s12554_s14 + $0x14] sm:$0xf0]  ;;  %v10779_v21 = vld [vmem:[%s12554_s14 + $0x20] sm:$0xf]  ;;  %v11891_v22 = vld [vmem:[%s12554_s14 + $0x24] sm:$0xf0] }
  0x19   : > { %v10772_v17 = vor.u32 %v11889_v15, %v10771_v14  ;;  %v11903_v20 = vld [vmem:[#allocation4 + $0x48] sm:$0xff]  ;;  %v11902_v23 = vld [vmem:[#allocation4 + $0x40] sm:$0xff]  ;;  %v10780_v24 = vor.u32 %v11891_v22, %v10779_v21  ;;  %v11886_v28 = vld [vmem:[%s12554_s14 + $0x4] sm:$0xf] }
  0x1a   : > { %v10787_v25 = vld [vmem:[%s12554_s14 + $0x30] sm:$0xf]  ;;  %v11893_v26 = vld [vmem:[%s12554_s14 + $0x34] sm:$0xf0]  ;;  %v10765_v29 = vld [vmem:[%s12554_s14 + $0x8] sm:$0xf0] }
  0x1b   : > { %597 = vmatpush.bf16.msra.mxu3 %v11899_v2  ;;  %v10788_v27 = vor.u32 %v11893_v26, %v10787_v25  ;;  %v10768_v30 = vor.u32 %v11886_v28, %v10765_v29  ;;  %v11888_v31 = vld [vmem:[%s12554_s14 + $0x14] sm:$0xf]  ;;  %v10773_v32 = vld [vmem:[%s12554_s14 + $0x18] sm:$0xf0]  ;;  %v11890_v34 = vld [vmem:[%s12554_s14 + $0x24] sm:$0xf] }
  0x1c   : > { %v10776_v33 = vor.u32 %v11888_v31, %v10773_v32  ;;  %v10781_v35 = vld [vmem:[%s12554_s14 + $0x28] sm:$0xf0]  ;;  %v11892_v37 = vld [vmem:[%s12554_s14 + $0x34] sm:$0xf]  ;;  %v10789_v38 = vld [vmem:[%s12554_s14 + $0x38] sm:$0xf0] }
  0x1d   : > { %v10784_v36 = vor.u32 %v11890_v34, %v10781_v35  ;;  %v10792_v39 = vor.u32 %v11892_v37, %v10789_v38  ;;  %v12346_v48 = vld [vmem:[%s17702_s3] ss:$0 sm:$0xff]  ;;  %v12453_v37 = vmov 1983009808  }
  0x1e   : > { %v11910_v54 = vld [vmem:[%s17704_s5] sm:$0xff]  ;;  %v817_v38 = vunpack.c.l.s4 %v12453_v37 }
  0x1f   : > { %598 = vmatpush.bf16.msra.mxu3 %v11898_v3 }
  0x23   : > { %599 = vmatpush.bf16.msra.mxu3 %v11897_v4 }
  0x27   : > { %600 = vmatpush.bf16.msra.mxu3 %v11896_v5 }
  0x2b   : > { %601 = vmatpush.bf16.msra.mxu3 %v11895_v6 }
  0x2f   : > { %602 = vmatpush.bf16.msra.mxu3 %v11894_v7 }
  0x32   : > { %603 = vmatmul.bf16.vlgmr.msra.gmra.mxu3 %v10764_v10 }
  0x33   : > { %624 = vmatpush.bf16.msrb.mxu3 %v11909_v11 }
  0x37   : > { %625 = vmatpush.bf16.msrb.mxu3 %v11908_v12 }
  0x3b   : > { %626 = vmatpush.bf16.msrb.mxu3 %v11907_v13 }
  0x3f   : > { %627 = vmatpush.bf16.msrb.mxu3 %v11906_v16 }
  0x42   : > { %608 = vmatmul.bf16.gmra.mxu3 %v10772_v17 }
  0x43   : > { %628 = vmatpush.bf16.msrb.mxu3 %v11905_v18 }
  0x47   : > { %629 = vmatpush.bf16.msrb.mxu3 %v11904_v19 }
  0x4b   : > { %630 = vmatpush.bf16.msrb.mxu3 %v11903_v20 }
  0x4f   : > { %631 = vmatpush.bf16.msrb.mxu3 %v11902_v23 }
  0x52   : > { %613 = vmatmul.bf16.gmra.mxu3 %v10780_v24 }
  0x62   : > { %618 = vmatmul.bf16.gmra.mxu3 %v10788_v27 }
  0x72   : > { %632 = vmatmul.bf16.vlgmr.msrb.gmra.mxu3 %v10768_v30 }
  0x82   : > { %637 = vmatmul.bf16.gmra.mxu3 %v10776_v33 }
  0x92   : > { %642 = vmatmul.bf16.gmra.mxu3 %v10784_v36 }
  0xa2   : > { %647 = vmatmul.bf16.gmra.mxu3 %v10792_v39 }
  0xb5   : > { %v604_v40 = vpop.f32.mrf.mxu3 }
  0xb6   : > { %v605_v49 = vadd.f32 %v12346_v48, %v604_v40 }
  0xbd   : > { %v606_v41 = vpop.f32.mrf.mxu3 }
  0xbe   : > { %v607_v55 = vadd.f32 %v12346_v48, %v606_v41 }
  0xc5   : > { %v609_v42 = vpop.f32.mrf.mxu3 }
  0xc6   : > { %v610_v60 = vadd.f32 %v12346_v48, %v609_v42 }
  0xcd   : > { %v611_v43 = vpop.f32.mrf.mxu3 }
  0xce   : > { %v612_v1 = vadd.f32 %v12346_v48, %v611_v43 }
  0xd5   : > { %v614_v44 = vpop.f32.mrf.mxu3 }
  0xd6   : > { %v615_v6 = vadd.f32 %v12346_v48, %v614_v44 }
  0xdd   : > { %v616_v45 = vpop.f32.mrf.mxu3 }
  0xde   : > { %v617_v11 = vadd.f32 %v12346_v48, %v616_v45  ;;  %v12598_v45 = vunpack.c.0.s8 %v817_v38 }
  0xe5   : > { %v619_v46 = vpop.f32.mrf.mxu3 }
  0xe6   : > { %v620_v16 = vadd.f32 %v12346_v48, %v619_v46 }
  0xed   : > { %v621_v47 = vpop.f32.mrf.mxu3 }
  0xee   : > { %v622_v21 = vadd.f32 %v12346_v48, %v621_v47 }
  0xf5   : > { %v633_v50 = vpop.f32.mrf.mxu3 }
  0xf6   : > { %v634_v51 = vadd.f32 %v633_v50, %v605_v49 }
  0xf8   : > { %v653_v52 = vpack.c.bf16 %v634_v51, %v634_v51 }
  0xfa   : > { %v674_v53 = vsel %vm672_vm0, %v653_v52, 0 }
  0xfb   : > { %683 = vmatpush.bf16.msra.mxu2 %v674_v53 }
  0xfd   : > { %v635_v56 = vpop.f32.mrf.mxu3 }
  0xfe   : > { %v636_v57 = vadd.f32 %v635_v56, %v607_v55  ;;  %10861 = vmatmul.msk.bf16.vlgmr.msra.gmra.mxu2 %vm668_vm1, %v11910_v54  ;;  %v12454_v55 = vmov 1934713408  }
  0xff   : > { %v865_v56 = vunpack.c.l.s4 %v12454_v55 }
 0x100   : > { %v654_v58 = vpack.c.bf16 %v636_v57, %v636_v57 }
 0x102   : > { %v691_v59 = vsel %vm672_vm0, %v654_v58, 0 }
 0x103   : > { %700 = vmatpush.bf16.msra.mxu3 %v691_v59 }
 0x105   : > { %v638_v61 = vpop.f32.mrf.mxu3 }
 0x106   : > { %v639_v62 = vadd.f32 %v638_v61, %v610_v60  ;;  %10862 = vmatmul.msk.bf16.vlgmr.msra.gmra.mxu3 %vm668_vm1, %v11910_v54 }
 0x108   : > { %v655_v63 = vpack.c.bf16 %v639_v62, %v639_v62 }
 0x10a   : > { %v708_v0 = vsel %vm672_vm0, %v655_v63, 0 }
 0x10b   : > { %717 = vmatpush.bf16.msrb.mxu2 %v708_v0 }
 0x10d   : > { %v640_v2 = vpop.f32.mrf.mxu3 }
 0x10e   : > { %v641_v3 = vadd.f32 %v640_v2, %v612_v1  ;;  %10863 = vmatmul.msk.bf16.vlgmr.msrb.gmra.mxu2 %vm668_vm1, %v11910_v54 }
 0x110   : > { %v656_v4 = vpack.c.bf16 %v641_v3, %v641_v3 }
 0x112   : > { %v725_v5 = vsel %vm672_vm0, %v656_v4, 0 }
 0x113   : > { %734 = vmatpush.bf16.msrb.mxu3 %v725_v5 }
 0x115   : > { %v643_v7 = vpop.f32.mrf.mxu3 }
 0x116   : > { %v644_v8 = vadd.f32 %v643_v7, %v615_v6  ;;  %10864 = vmatmul.msk.bf16.vlgmr.msrb.gmra.mxu3 %vm668_vm1, %v11910_v54  ;;  %v12615_v6 = vunpack.c.0.s8 %v865_v56 }
 0x118   : > { %v657_v9 = vpack.c.bf16 %v644_v8, %v644_v8 }
 0x11a   : > { %v742_v10 = vsel %vm672_vm0, %v657_v9, 0 }
 0x11b   : > { %751 = vmatpush.bf16.msra.mxu2 %v742_v10 }
 0x11d   : > { %v645_v12 = vpop.f32.mrf.mxu3 }
 0x11e   : > { %v646_v13 = vadd.f32 %v645_v12, %v617_v11  ;;  %10865 = vmatmul.msk.bf16.vlgmr.msra.gmra.mxu2 %vm668_vm1, %v11910_v54 }
 0x120   : > { %v658_v14 = vpack.c.bf16 %v646_v13, %v646_v13 }
 0x122   : > { %v759_v15 = vsel %vm672_vm0, %v658_v14, 0 }
 0x123   : > { %768 = vmatpush.bf16.msra.mxu3 %v759_v15 }
 0x125   : > { %v648_v17 = vpop.f32.mrf.mxu3 }
 0x126   : > { %v649_v18 = vadd.f32 %v648_v17, %v620_v16  ;;  %10866 = vmatmul.msk.bf16.vlgmr.msra.gmra.mxu3 %vm668_vm1, %v11910_v54 }
 0x128   : > { %v659_v19 = vpack.c.bf16 %v649_v18, %v649_v18 }
 0x12a   : > { %v776_v20 = vsel %vm672_vm0, %v659_v19, 0 }
 0x12b   : > { %785 = vmatpush.bf16.msrb.mxu2 %v776_v20 }
 0x12d   : > { %v650_v22 = vpop.f32.mrf.mxu3 }
 0x12e   : > { %v651_v23 = vadd.f32 %v650_v22, %v622_v21  ;;  %10867 = vmatmul.msk.bf16.vlgmr.msrb.gmra.mxu2 %vm668_vm1, %v11910_v54 }
 0x130   : > { %v660_v24 = vpack.c.bf16 %v651_v23, %v651_v23 }
 0x132   : > { %v793_v25 = vsel %vm672_vm0, %v660_v24, 0 }
 0x133   : > { %802 = vmatpush.bf16.msrb.mxu3 %v793_v25 }
 0x136   : > { %10868 = vmatmul.msk.bf16.vlgmr.msrb.gmra.mxu3 %vm668_vm1, %v11910_v54 }
 0x181   : > { %v685_v26 = vpop.f32.mrf.mxu2 }
 0x182   : > { %v814_v41 = vrot.slane %v685_v26, 4 }
 0x189   : > { %v702_v27 = vpop.f32.mrf.mxu3  ;;  %v687_v28 = vpop.f32.mrf.mxu2 }
 0x18a   : > { %v826_v42 = vrot.slane %v702_v27, 4  ;;  %v926_v2 = vrot.slane %v687_v28, 4 }
 0x191   : > { %v704_v29 = vpop.f32.mrf.mxu3  ;;  %v719_v30 = vpop.f32.mrf.mxu2 }
 0x192   : > { %v811_v35 = vrot.slane %v719_v30, 4  ;;  %v938_v46 = vrot.slane %v704_v29, 4  ;;  %v815_v47 = vsel %vm812_vm2, %v719_v30, %v814_v41 }
 0x193   : > { %v823_v53 = vperm.slane %v815_v47, %v12598_v45 }
 0x194   : > { %v813_v43 = vsel %vm812_vm2, %v811_v35, %v685_v26 }
 0x195   : > { %v819_v49 = vperm.slane %v813_v43, %v12598_v45  ;;  %v874_v4 = vrot.slane %v823_v53, 4 }
 0x197   : > { %v862_v62 = vrot.slane %v819_v49, 4 }
 0x199   : > { %v736_v31 = vpop.f32.mrf.mxu3  ;;  %v721_v32 = vpop.f32.mrf.mxu2 }
 0x19a   : > { %v824_v36 = vrot.slane %v736_v31, 4  ;;  %v827_v48 = vsel %vm812_vm2, %v736_v31, %v826_v42  ;;  %v924_v59 = vrot.slane %v721_v32, 4  ;;  %v927_v9 = vsel %vm812_vm2, %v721_v32, %v926_v2 }
 0x19b   : > { %v835_v54 = vperm.slane %v827_v48, %v12598_v45  ;;  %v12633_v20 = vperm.slane %v927_v9, %v12598_v45 }
 0x19c   : > { %v825_v44 = vsel %vm812_vm2, %v824_v36, %v702_v27  ;;  %v925_v8 = vsel %vm812_vm2, %v924_v59, %v687_v28 }
 0x19d   : > { %v831_v50 = vperm.slane %v825_v44, %v12598_v45  ;;  %v872_v7 = vrot.slane %v835_v54, 4  ;;  %v875_v15 = vsel %vm812_vm2, %v835_v54, %v874_v4  ;;  %v12630_v19 = vperm.slane %v925_v8, %v12598_v45 }
 0x19e   : > { %v12640_v28 = vperm.slane %v875_v15, %v12615_v6 }
 0x19f   : > { %v860_v63 = vrot.slane %v831_v50, 4  ;;  %v863_v5 = vsel %vm812_vm2, %v831_v50, %v862_v62  ;;  %v873_v18 = vsel %vm812_vm2, %v872_v7, %v823_v53 }
 0x1a0   : > { %v871_v17 = vperm.slane %v863_v5, %v12615_v6  ;;  %v12647_v35 = vperm.slane %v873_v18, %v12615_v6 }
 0x1a1   : > { %v738_v33 = vpop.f32.mrf.mxu3  ;;  %v753_v34 = vpop.f32.mrf.mxu2  ;;  %v861_v14 = vsel %vm812_vm2, %v860_v63, %v819_v49 }
 0x1a2   : > { %v936_v51 = vrot.slane %v738_v33, 4  ;;  %v939_v52 = vsel %vm812_vm2, %v738_v33, %v938_v46  ;;  %v838_v60 = vrot.slane %v753_v34, 4  ;;  %v867_v27 = vperm.slane %v861_v14, %v12615_v6 }
 0x1a3   : > { %v12611_v1 = vperm.slane %v939_v52, %v12598_v45 }
 0x1a4   : > { %v937_v0 = vsel %vm812_vm2, %v936_v51, %v704_v29  ;;  %v910_v43 = vrot.slane %v867_v27, 4 }
 0x1a5   : > { %v12620_v10 = vperm.slane %v937_v0, %v12598_v45  ;;  %v984_v12 = vrot.slane %v12611_v1, 4 }
 0x1a7   : > { %v972_v24 = vrot.slane %v12620_v10, 4  ;;  %v985_v31 = vsel %vm812_vm2, %v984_v12, %v12633_v20 }
 0x1a9   : > { %v770_v39 = vpop.f32.mrf.mxu3  ;;  %v12594_v40 = vpop.f32.mrf.mxu2  ;;  %v973_v44 = vsel %vm812_vm2, %v972_v24, %v12630_v19 }
 0x1aa   : > { %v850_v16 = vrot.slane %v770_v39, 4  ;;  %v950_v46 = vrot.slane %v12594_v40, 4  ;;  %v979_v59 = vperm.slane %v973_v44, %v12615_v6 }
 0x1b1   : > { %v12607_v57 = vpop.f32.mrf.mxu3  ;;  %v787_v58 = vpop.f32.mrf.mxu2 }
 0x1b2   : > { %v836_v61 = vrot.slane %v787_v58, 4  ;;  %v839_v3 = vsel %vm812_vm2, %v787_v58, %v838_v60  ;;  %v962_v50 = vrot.slane %v12607_v57, 4 }
 0x1b3   : > { %v847_v13 = vperm.slane %v839_v3, %v12598_v45 }
 0x1b4   : > { %v837_v11 = vsel %vm812_vm2, %v836_v61, %v753_v34  ;;  %v914_v34 = vrot.slane %v871_v17, 4 }
 0x1b5   : > { %v843_v21 = vperm.slane %v837_v11, %v12598_v45  ;;  %v898_v29 = vrot.slane %v847_v13, 4 }
 0x1b7   : > { %v886_v36 = vrot.slane %v843_v21, 4 }
 0x1b9   : > { %v804_v22 = vpop.f32.mrf.mxu3  ;;  %v789_v23 = vpop.f32.mrf.mxu2 }
 0x1ba   : > { %v848_v25 = vrot.slane %v804_v22, 4  ;;  %v851_v26 = vsel %vm812_vm2, %v804_v22, %v850_v16  ;;  %v948_v33 = vrot.slane %v789_v23, 4  ;;  %v951_v54 = vsel %vm812_vm2, %v789_v23, %v950_v46  ;;  %v12698_v23 = vld [vmem:[%s17703_s4] sm:$0xff] }
 0x1bb   : > { %v859_v30 = vperm.slane %v851_v26, %v12598_v45  ;;  %v12688_v14 = vperm.slane %v951_v54, %v12598_v45  ;;  %v10975_v54 = vld [vmem:[%s17705_s6 + $0xa8] sm:$0xf] }
 0x1bc   : > { %v849_v32 = vsel %vm812_vm2, %v848_v25, %v770_v39  ;;  %v12657_v39 = vperm.slane %v985_v31, %v12615_v6  ;;  %v949_v52 = vsel %vm812_vm2, %v948_v33, %v12594_v40 }
 0x1bd   : > { %v855_v37 = vperm.slane %v849_v32, %v12598_v45  ;;  %v896_v38 = vrot.slane %v859_v30, 4  ;;  %v899_v41 = vsel %vm812_vm2, %v859_v30, %v898_v29  ;;  %v955_v40 = vperm.slane %v949_v52, %v12598_v45 }
 0x1be   : > { %v12652_v42 = vperm.slane %v899_v41, %v12615_v6 }
 0x1bf   : > { %v884_v47 = vrot.slane %v855_v37, 4  ;;  %v897_v48 = vsel %vm812_vm2, %v896_v38, %v847_v13  ;;  %v887_v49 = vsel %vm812_vm2, %v855_v37, %v886_v36  ;;  %v1030_v13 = vrot.slane %v12657_v39, 4 }
 0x1c0   : > { %v12664_v51 = vperm.slane %v897_v48, %v12615_v6  ;;  %v895_v53 = vperm.slane %v887_v49, %v12615_v6  ;;  %v920_v58 = vrot.slane %v12652_v42, 4  ;;  %v998_v25 = vrot.slane %v955_v40, 4 }
 0x1c1   : > { %v806_v55 = vpop.f32.mrf.mxu3  ;;  %v885_v56 = vsel %vm812_vm2, %v884_v47, %v843_v21  ;;  %v1022_v36 = vrot.slane %v979_v59, 4 }
 0x1c2   : > { %v960_v60 = vrot.slane %v806_v55, 4  ;;  %v963_v61 = vsel %vm812_vm2, %v806_v55, %v962_v50  ;;  %v891_v62 = vperm.slane %v885_v56, %v12615_v6  ;;  %v915_v63 = vsel %vm812_vm2, %v895_v53, %v914_v34  ;;  %v11934_v55 = vld [vmem:[%s17705_s6 + $0xb0] sm:$0xf0] }
 0x1c3   : > { %v12678_v0 = vperm.slane %v963_v61, %v12598_v45  ;;  %v1039_v2 = vpack.c.bf16 %v915_v63, %v915_v63  ;;  %v912_v3 = vrot.slane %v895_v53, 4  ;;  %v916_v8 = vrot.slane %v12664_v51, 4 }
 0x1c4   : > { %v961_v4 = vsel %vm812_vm2, %v960_v60, %v12607_v57  ;;  %v911_v5 = vsel %vm812_vm2, %v891_v62, %v910_v43  ;;  %v908_v7 = vrot.slane %v891_v62, 4  ;;  %v921_v57 = vsel %vm812_vm2, %v920_v58, %v12640_v28 }
 0x1c5   : > { %v967_v9 = vperm.slane %v961_v4, %v12598_v45  ;;  %v1008_v11 = vrot.slane %v12678_v0, 4  ;;  %v1037_v12 = vpack.c.bf16 %v911_v5, %v911_v5  ;;  %v913_v16 = vsel %vm812_vm2, %v912_v3, %v871_v17  ;;  %v10963_v5 = vld [vmem:[%s17705_s6 + $0x90] sm:$0xf] }
 0x1c6   : > { %v909_v15 = vsel %vm812_vm2, %v908_v7, %v867_v27  ;;  %v1038_v24 = vpack.c.bf16 %v913_v16, %v913_v16  ;;  %v1070_v26 = vsel %vm672_vm0, %v1039_v2, 0  ;;  %v917_v17 = vsel %vm812_vm2, %v916_v8, %v12647_v35  ;;  %v11931_v7 = vld [vmem:[%s17705_s6 + $0x98] sm:$0xf0] }
 0x1c7   : > { %v996_v18 = vrot.slane %v967_v9, 4  ;;  %v1064_v21 = vsel %vm672_vm0, %v1037_v12, 0  ;;  %v1036_v22 = vpack.c.bf16 %v909_v15, %v909_v15  ;;  %v1009_v27 = vsel %vm812_vm2, %v1008_v11, %v12688_v14  ;;  %v11928_v15 = vld [vmem:[%s17705_s6 + $0x80] sm:$0xf0] }
 0x1c8   : > { %1129 = vmatpush.bf16.msra.mxu3 %v1064_v21  ;;  %v1040_v30 = vpack.c.bf16 %v917_v17, %v917_v17  ;;  %v1042_v31 = vpack.c.bf16 %v921_v57, %v921_v57  ;;  %v1067_v33 = vsel %vm672_vm0, %v1038_v24, 0  ;;  %v1015_v37 = vperm.slane %v1009_v27, %v12615_v6  ;;  %v10939_v24 = vld [vmem:[%s17705_s6 + $0x60] sm:$0xf]  ;;  %v10927_v27 = vld [vmem:[%s17705_s6 + $0x48] sm:$0xf] }
 0x1c9   : > { %v1061_v29 = vsel %vm672_vm0, %v1036_v22, 0  ;;  %v997_v32 = vsel %vm812_vm2, %v996_v18, %v955_v40  ;;  %v999_v41 = vsel %vm812_vm2, %v967_v9, %v998_v25  ;;  %v974_v58 = vrot.slane %v12630_v19, 4 }
 0x1ca   : > { %1115 = vmatpush.bf16.msra.mxu2 %v1061_v29  ;;  %v1003_v34 = vperm.slane %v997_v32, %v12615_v6  ;;  %v1073_v38 = vsel %vm672_vm0, %v1040_v30, 0  ;;  %v1031_v44 = vsel %vm812_vm2, %v1015_v37, %v1030_v13  ;;  %v1028_v47 = vrot.slane %v1015_v37, 4  ;;  %v10951_v13 = vld [vmem:[%s17705_s6 + $0x78] sm:$0xf]  ;;  %v11922_v29 = vld [vmem:[%s17705_s6 + $0x50] sm:$0xf0] }
 0x1cb   : > { %10874 = vmatmul.msk.bf16.vlgmr.msra.gmra.mxu3 %vm668_vm1, %v12698_v23  ;;  %v1079_v48 = vsel %vm672_vm0, %v1042_v31, 0  ;;  %v1049_v50 = vpack.c.bf16 %v1031_v44, %v1031_v44  ;;  %v12729_v56 = vperm.slane %v999_v41, %v12615_v6  ;;  %v10976_v63 = vor.u32 %v11934_v55, %v10975_v54  ;;  %v10915_v32 = vld [vmem:[%s17705_s6 + $0x30] sm:$0xf]  ;;  %v11916_v41 = vld [vmem:[%s17705_s6 + $0x20] sm:$0xf0] }
 0x1cc   : > { %1157 = vmatpush.bf16.msrb.mxu3 %v1070_v26  ;;  %v1023_v43 = vsel %vm812_vm2, %v1003_v34, %v1022_v36  ;;  %v1020_v46 = vrot.slane %v1003_v34, 4  ;;  %v1029_v53 = vsel %vm812_vm2, %v1028_v47, %v12657_v39  ;;  %v918_v40 = vrot.slane %v12647_v35, 4 }
 0x1cd   : > { %10873 = vmatmul.msk.bf16.vlgmr.msra.gmra.mxu2 %vm668_vm1, %v12698_v23  ;;  %v1045_v49 = vpack.c.bf16 %v1023_v43, %v1023_v43  ;;  %v1100_v39 = vsel %vm672_vm0, %v1049_v50, 0  ;;  %v975_v2 = vsel %vm812_vm2, %v12620_v10, %v974_v58  ;;  %v1024_v19 = vrot.slane %v12729_v56, 4 }
 0x1ce   : > { %1143 = vmatpush.bf16.msrb.mxu2 %v1067_v33  ;;  %v1021_v52 = vsel %vm812_vm2, %v1020_v46, %v979_v59  ;;  %v1048_v59 = vpack.c.bf16 %v1029_v53, %v1029_v53  ;;  %v1793_v4 = vlaneseq  ;;  %v12455_v8 = vmov 0.0   ;;  %v10891_v46 = vld [vmem:[%s17705_s6] sm:$0xf] }
 0x1cf   : > { %v1088_v60 = vsel %vm672_vm0, %v1045_v49, 0  ;;  %v1044_v61 = vpack.c.bf16 %v1021_v52, %v1021_v52  ;;  %1780 = vst [vmem:[#allocation2] sm:$0xff] %v12455_v8  ;;  %v919_v10 = vsel %vm812_vm2, %v12664_v51, %v918_v40  ;;  %v12752_v35 = vperm.slane %v975_v2, %v12615_v6  ;;  %v11933_v2 = vld [vmem:[%s17705_s6 + $0xac] sm:$0xf] }
 0x1d0   : > { %1171 = vmatpush.bf16.msra.mxu3 %v1073_v38  ;;  %1241 = vmatpush.bf16.msra.mxu1 %v1088_v60  ;;  %v1097_v3 = vsel %vm672_vm0, %v1048_v59, 0  ;;  %1781 = vst [vmem:[#allocation2 + $0x8] sm:$0xff] %v12455_v8  ;;  %vm12755_vm3 = vcmp.lt.s32.totalorder %v1793_v4, 256  ;;  %v10964_v11 = vor.u32 %v11931_v7, %v10963_v5  ;;  %v1041_v51 = vpack.c.bf16 %v919_v10, %v919_v10  ;;  %v10977_v4 = vld [vmem:[%s17705_s6 + $0xb4] sm:$0xf0] }
 0x1d1   : > { %v1085_v62 = vsel %vm672_vm0, %v1044_v61, 0  ;;  %1782 = vst [vmem:[#allocation2 + $0x10] sm:$0xff] %v12455_v8  ;;  %v1025_v12 = vsel %vm812_vm2, %v1024_v19, %v12752_v35  ;;  %v1010_v16 = vrot.slane %v12688_v14, 4  ;;  %v10952_v18 = vor.u32 %v11928_v15, %v10951_v13  ;;  %v11925_v14 = vld [vmem:[%s17705_s6 + $0x68] sm:$0xf0] }
 0x1d2   : > { %1199 = vmatpush.bf16.msra.mxu2 %v1079_v48  ;;  %1227 = vmatpush.bf16.msra.mxu0 %v1085_v62  ;;  %1797 = vst.msk [vmem:[#allocation2] ss:$8 sm:$0x3] %vm12755_vm3, %v12455_v8  ;;  %v1046_v57 = vpack.c.bf16 %v1025_v12, %v1025_v12  ;;  %v1076_v22 = vsel %vm672_vm0, %v1041_v51, 0  ;;  %v10940_v26 = vor.u32 %v11925_v14, %v10939_v24  ;;  %v986_v17 = vrot.slane %v12633_v20, 4  ;;  %v12129_v62 = vld [vmem:[%s12994_s21] sm:$0xff]  }
 0x1d3   : > { %10882 = vmatmul.msk.bf16.vlgmr.msra.gmra.mxu1 %vm668_vm1, %v12698_v23  ;;  %1784 = vst [vmem:[#allocation2 + $0x20] sm:$0xff] %v12455_v8  ;;  %v1011_v21 = vsel %vm812_vm2, %v12678_v0, %v1010_v16  ;;  %v922_v31 = vrot.slane %v12640_v28, 4  ;;  %v10928_v20 = vor.u32 %v11922_v29, %v10927_v27  ;;  %v11913_v48 = vld [vmem:[%s17705_s6 + $0x8] sm:$0xf0]  ;;  %v1026_v54 = vrot.slane %v12752_v35, 4  ;;  %v12273_v27 = vld [vmem:[%s12994_s21 + $0x10] sm:$0xff]  }
 0x1d4   : > { %1297 = vmatpush.bf16.msrb.mxu1 %v1100_v39  ;;  %1785 = vst [vmem:[#allocation2 + $0x28] sm:$0xff] %v12455_v8  ;;  %v1091_v0 = vsel %vm672_vm0, %v1046_v57, 0  ;;  %v12793_v25 = vperm.slane %v1011_v21, %v12615_v6  ;;  %v987_v30 = vsel %vm812_vm2, %v12611_v1, %v986_v17  ;;  %v11919_v1 = vld [vmem:[%s17705_s6 + $0x38] sm:$0xf0]  ;;  %v10892_v50 = vor.u32 %v11913_v48, %v10891_v46  ;;  %v11930_v35 = vld [vmem:[%s17705_s6 + $0x94] sm:$0xf] }
 0x1d5   : > { %10881 = vmatmul.msk.bf16.vlgmr.msra.gmra.mxu0 %vm668_vm1, %v12698_v23  ;;  %1787 = vst [vmem:[#allocation2 + $0x330] sm:$0xff] %v12455_v8  ;;  %v12829_v28 = vperm.slane %v987_v30, %v12615_v6  ;;  %v923_v34 = vsel %vm812_vm2, %v12652_v42, %v922_v31  ;;  %v10916_v36 = vor.u32 %v11919_v1, %v10915_v32  ;;  %v10903_v42 = vld [vmem:[%s17705_s6 + $0x18] sm:$0xf]  ;;  %v12131_v40 = vunpack.c.h.bf16 %v12129_v62  ;;  %v11927_v51 = vld [vmem:[%s17705_s6 + $0x7c] sm:$0xf] }
 0x1d6   : > { %1283 = vmatpush.bf16.msrb.mxu0 %v1097_v3  ;;  %1788 = vst [vmem:[#allocation2 + $0x338] sm:$0xff] %v12455_v8  ;;  %v1032_v33 = vrot.slane %v12793_v25, 4  ;;  %v1043_v38 = vpack.c.bf16 %v923_v34, %v923_v34  ;;  %v10904_v44 = vor.u32 %v11916_v41, %v10903_v42  ;;  %v1027_v55 = vsel %vm812_vm2, %v12729_v56, %v1026_v54  ;;  %v12272_v3 = vld [vmem:[%s12994_s21 + $0x8] sm:$0xff]   ;;  %v11924_v24 = vld [vmem:[%s17705_s6 + $0x64] sm:$0xf] }
 0x1d7   : > { %1791 = vst [vmem:[#allocation2 + $0x350] sm:$0xff] %v12455_v8  ;;  %v1047_v58 = vpack.c.bf16 %v1027_v55, %v1027_v55  ;;  %v1034_v60 = vrot.slane %v12829_v28, 4  ;;  %v12134_v5 = vunpack.c.l.bf16 %v12272_v3  ;;  %v12135_v7 = vunpack.c.h.bf16 %v12272_v3  ;;  %v10953_v13 = vld [vmem:[%s17705_s6 + $0x84] sm:$0xf0]  ;;  %v10941_v14 = vld [vmem:[%s17705_s6 + $0x6c] sm:$0xf0] }
 0x1d8   : > { %1792 = vst [vmem:[#allocation2 + $0x358] sm:$0xff] %v12455_v8  ;;  %v1033_v37 = vsel %vm812_vm2, %v1032_v33, %v12829_v28  ;;  %v1082_v47 = vsel %vm672_vm0, %v1043_v38, 0  ;;  %v10980_v10 = vor.u32 %v11933_v2, %v10977_v4  ;;  %v2045_v9 = vrot.slane %v12131_v40, 7  ;;  %v11918_v29 = vld [vmem:[%s17705_s6 + $0x34] sm:$0xf]  ;;  %v12282_v33 = vld [vmem:[%s12994_s21 + $0x58] sm:$0xff]  }
 0x1d9   : > { %1800 = vst.msk [vmem:[#allocation2 + $0x30] ss:$8 sm:$0x3] %vm12755_vm3, %v12455_v8  ;;  %v1050_v43 = vpack.c.bf16 %v1033_v37, %v1033_v37  ;;  %v2366_v52 = vld [vmem:[#allocation2] sm:$0xff]  ;;  %v1094_v56 = vsel %vm672_vm0, %v1047_v58, 0  ;;  %v1035_v61 = vsel %vm812_vm2, %v12793_v25, %v1034_v60  ;;  %v2047_v15 = vrot.slane %v12134_v5, 7 }
 0x1da   : > { %2830 = vmatpush.bf16.msra.mxu0 %v10976_v63  ;;  %1803 = vst.msk [vmem:[#allocation2 + $0x60] ss:$8 sm:$0x3] %vm12755_vm3, %v12455_v8  ;;  %v12894_v53 = vpack.c.bf16 0.0, %v2366_v52  ;;  %v1051_v59 = vpack.c.bf16 %v1035_v61, %v1035_v61  ;;  %v12130_v63 = vunpack.c.l.bf16 %v12129_v62  ;;  %v2048_v16 = vrot.slane %v12135_v7, 7  ;;  %v12283_v58 = vld [vmem:[%s12994_s21 + $0x60] sm:$0xff]  }
 0x1db   : > { %10876 = vmatmul.msk.bf16.vlgmr.msrb.gmra.mxu3 %vm668_vm1, %v12698_v23  ;;  %1806 = vst.msk [vmem:[#allocation2 + $0x90] ss:$8 sm:$0x3] %vm12755_vm3, %v12455_v8  ;;  %v1103_v49 = vsel %vm672_vm0, %v1050_v43, 0  ;;  %v11921_v25 = vld [vmem:[%s17705_s6 + $0x4c] sm:$0xf]  ;;  %v12138_v31 = vunpack.c.l.bf16 %v12273_v27  ;;  %v12174_v34 = vunpack.c.l.bf16 %v12282_v33  ;;  %v12175_v41 = vunpack.c.h.bf16 %v12282_v33 }
 0x1dc   : > { %1185 = vmatpush.bf16.msrb.mxu3 %v1076_v22  ;;  %1809 = vst.msk [vmem:[#allocation2 + $0xc0] ss:$8 sm:$0x3] %vm12755_vm3, %v12455_v8  ;;  %v1106_v39 = vsel %vm672_vm0, %v1051_v59, 0  ;;  %v2044_v19 = vrot.slane %v12130_v63, 7  ;;  %v13041_v21 = vsel %vm2043_vm4, %v2047_v15, %v2048_v16  ;;  %v12139_v46 = vunpack.c.h.bf16 %v12273_v27 }
 0x1dd   : > { %10875 = vmatmul.msk.bf16.vlgmr.msrb.gmra.mxu2 %vm668_vm1, %v12698_v23  ;;  %1812 = vst.msk [vmem:[#allocation2 + $0xf0] ss:$8 sm:$0x3] %vm12755_vm3, %v12455_v8  ;;  %v10917_v30 = vld [vmem:[%s17705_s6 + $0x3c] sm:$0xf0]  ;;  %v2077_v37 = vrot.slane %v12174_v34, 7 }
 0x1de   : > { %2831 = vmatpush.bf16.msra.mxu0 %v10964_v11  ;;  %1255 = vmatpush.bf16.msrb.mxu2 %v1091_v0  ;;  %1815 = vst.msk [vmem:[#allocation2 + $0x120] ss:$8 sm:$0x3] %vm12755_vm3, %v12455_v8  ;;  %v10965_v11 = vld [vmem:[%s17705_s6 + $0x9c] sm:$0xf0]  ;;  %v2046_v57 = vsel %vm2043_vm4, %v2044_v19, %v2045_v9  ;;  %v10944_v0 = vor.u32 %v11924_v24, %v10941_v14  ;;  %v2078_v48 = vrot.slane %v12175_v41, 7 }
 0x1df   : > { %1818 = vst.msk [vmem:[#allocation2 + $0x150] ss:$8 sm:$0x3] %vm12755_vm3, %v12455_v8  ;;  %v10968_v12 = vor.u32 %v11930_v35, %v10965_v11  ;;  %v10920_v32 = vor.u32 %v11918_v29, %v10917_v30  ;;  %v11915_v1 = vld [vmem:[%s17705_s6 + $0x1c] sm:$0xf] }
 0x1e0   : > { %1821 = vst.msk [vmem:[#allocation2 + $0x180] ss:$8 sm:$0x3] %vm12755_vm3, %v12455_v8  ;;  %v10905_v28 = vld [vmem:[%s17705_s6 + $0x24] sm:$0xf0] }
 0x1e1   : > { %1824 = vst.msk [vmem:[#allocation2 + $0x1b0] ss:$8 sm:$0x3] %vm12755_vm3, %v12455_v8  ;;  %v10908_v42 = vor.u32 %v11915_v1, %v10905_v28  ;;  %v11912_v43 = vld [vmem:[%s17705_s6 + $0x4] sm:$0xf] }
 0x1e2   : > { %2832 = vmatpush.bf16.msra.mxu0 %v10952_v18  ;;  %1827 = vst.msk [vmem:[#allocation2 + $0x1e0] ss:$8 sm:$0x3] %vm12755_vm3, %v12455_v8  ;;  %v10956_v18 = vor.u32 %v11927_v51, %v10953_v13 }
 0x1e3   : > { %10886 = vmatmul.msk.bf16.vlgmr.msrb.gmra.mxu1 %vm668_vm1, %v12698_v23  ;;  %1830 = vst.msk [vmem:[#allocation2 + $0x210] ss:$8 sm:$0x3] %vm12755_vm3, %v12455_v8 }
 0x1e4   : > { %1833 = vst.msk [vmem:[#allocation2 + $0x240] ss:$8 sm:$0x3] %vm12755_vm3, %v12455_v8 }
 0x1e5   : > { %10885 = vmatmul.msk.bf16.vlgmr.msrb.gmra.mxu0 %vm668_vm1, %v12698_v23  ;;  %1836 = vst.msk [vmem:[#allocation2 + $0x270] ss:$8 sm:$0x3] %vm12755_vm3, %v12455_v8 }
 0x1e6   : > { %2833 = vmatpush.bf16.msra.mxu0 %v10940_v26  ;;  %1839 = vst.msk [vmem:[#allocation2 + $0x2a0] ss:$8 sm:$0x3] %vm12755_vm3, %v12455_v8  ;;  %v10929_v26 = vld [vmem:[%s17705_s6 + $0x54] sm:$0xf0] }
 0x1e7   : > { %1842 = vst.msk [vmem:[#allocation2 + $0x2d0] ss:$8 sm:$0x3] %vm12755_vm3, %v12455_v8  ;;  %v10932_v17 = vor.u32 %v11921_v25, %v10929_v26 }
 0x1e8   : > { %1845 = vst.msk [vmem:[#allocation2 + $0x300] ss:$8 sm:$0x3] %vm12755_vm3, %v12455_v8 }
 0x1e9   : > { %1854 = vst.msk [vmem:[#allocation2 + $0x51] ss:$8 sm:$0x3] %vm12755_vm3, %v12455_v8 }
 0x1ea   : > { %2834 = vmatpush.bf16.msra.mxu0 %v10928_v20  ;;  %17860 = vst [vmem:[#allocation10_spill] sm:$0xff] %v12894_v53  ;;  %v2050_v20 = vrot.slane %v12138_v31, 7 }
 0x1eb   : > { %10877 = vmatmul.msk.bf16.vlgmr.msra.gmra.mxu3 %vm668_vm1, %v12698_v23  ;;  %1857 = vst.msk [vmem:[#allocation2 + $0x81] ss:$8 sm:$0x3] %vm12755_vm3, %v12455_v8 }
 0x1ec   : > { %1213 = vmatpush.bf16.msra.mxu3 %v1082_v47  ;;  %1860 = vst.msk [vmem:[#allocation2 + $0xb1] ss:$8 sm:$0x3] %vm12755_vm3, %v12455_v8 }
 0x1ed   : > { %10879 = vmatmul.msk.bf16.vlgmr.msra.gmra.mxu2 %vm668_vm1, %v12698_v23  ;;  %1863 = vst.msk [vmem:[#allocation2 + $0xe1] ss:$8 sm:$0x3] %vm12755_vm3, %v12455_v8 }
 0x1ee   : > { %2835 = vmatpush.bf16.msra.mxu0 %v10916_v36  ;;  %1311 = vmatpush.bf16.msra.mxu2 %v1103_v49  ;;  %1866 = vst.msk [vmem:[#allocation2 + $0x111] ss:$8 sm:$0x3] %vm12755_vm3, %v12455_v8  ;;  %v2051_v49 = vrot.slane %v12139_v46, 7 }
 0x1ef   : > { %1869 = vst.msk [vmem:[#allocation2 + $0x141] ss:$8 sm:$0x3] %vm12755_vm3, %v12455_v8 }
 0x1f0   : > { %1872 = vst.msk [vmem:[#allocation2 + $0x171] ss:$8 sm:$0x3] %vm12755_vm3, %v12455_v8  ;;  %v2052_v55 = vsel %vm2043_vm4, %v2050_v20, %v2051_v49 }
 0x1f1   : > { %1875 = vst.msk [vmem:[#allocation2 + $0x1a1] ss:$8 sm:$0x3] %vm12755_vm3, %v12455_v8 }
 0x1f2   : > { %2836 = vmatpush.bf16.msra.mxu0 %v10904_v44  ;;  %1878 = vst.msk [vmem:[#allocation2 + $0x1d1] ss:$8 sm:$0x3] %vm12755_vm3, %v12455_v8  ;;  %v10893_v44 = vld [vmem:[%s17705_s6 + $0xc] sm:$0xf0] }
 0x1f3   : > { %1881 = vst.msk [vmem:[#allocation2 + $0x201] ss:$8 sm:$0x3] %vm12755_vm3, %v12455_v8  ;;  %v10896_v47 = vor.u32 %v11912_v43, %v10893_v44 }
 0x1f4   : > { %1884 = vst.msk [vmem:[#allocation2 + $0x231] ss:$8 sm:$0x3] %vm12755_vm3, %v12455_v8 }
 0x1f5   : > { %1887 = vst.msk [vmem:[#allocation2 + $0x261] ss:$8 sm:$0x3] %vm12755_vm3, %v12455_v8 }
 0x1f6   : > { %2837 = vmatpush.bf16.msra.mxu0 %v10892_v50  ;;  %1890 = vst.msk [vmem:[#allocation2 + $0x291] ss:$8 sm:$0x3] %vm12755_vm3, %v12455_v8  ;;  %v2079_v50 = vsel %vm2043_vm4, %v2077_v37, %v2078_v48 }
 0x1f7   : > { %1893 = vst.msk [vmem:[#allocation2 + $0x2c1] ss:$8 sm:$0x3] %vm12755_vm3, %v12455_v8 }
 0x1f8   : > { %1896 = vst.msk [vmem:[#allocation2 + $0x2f1] ss:$8 sm:$0x3] %vm12755_vm3, %v12455_v8 }
 0x1f9   : > { %2838 = vmatmul.bf16.vlgmr.msra.gmra.mxu0 %v12894_v53  ;;  %1899 = vst.msk [vmem:[#allocation2 + $0x321] ss:$8 sm:$0x3] %vm12755_vm3, %v12455_v8 }
 0x1fa   : > { %1904 = vst [vmem:[#allocation3] sm:$0xff] %v12455_v8 }
 0x1fb   : > { %10878 = vmatmul.msk.bf16.vlgmr.msrb.gmra.mxu3 %vm668_vm1, %v12698_v23  ;;  %1906 = vst [vmem:[#allocation3 + $0x10] sm:$0xff] %v12455_v8 }
 0x1fc   : > { %1269 = vmatpush.bf16.msrb.mxu3 %v1094_v56  ;;  %1908 = vst [vmem:[#allocation3 + $0x198] sm:$0xff] %v12455_v8  ;;  %v12178_v56 = vunpack.c.l.bf16 %v12283_v58 }
 0x1fd   : > { %10883 = vmatmul.msk.bf16.vlgmr.msrb.gmra.mxu2 %vm668_vm1, %v12698_v23  ;;  %1910 = vst [vmem:[#allocation3 + $0x1a8] sm:$0xff] %v12455_v8 }
 0x1fe   : > { %1912 = vst [vmem:[#allocation3 + $0x18] sm:$0x1] %v12455_v8  ;;  %3056 = vmatpush.bf16.msrb.mxu2 %v10980_v10  ;;  %v2080_v61 = vrot.slane %v12178_v56, 7 }
 0x1ff   : > { %1913 = vst [vmem:[#allocation3 + $0x30] sm:$0x1] %v12455_v8 }
 0x200   : > { %1914 = vst [vmem:[#allocation3 + $0x48] sm:$0x1] %v12455_v8 }
 0x201   : > { %1915 = vst [vmem:[#allocation3 + $0x60] sm:$0x1] %v12455_v8 }
 0x202   : > { %1916 = vst [vmem:[#allocation3 + $0x78] sm:$0x1] %v12455_v8  ;;  %3057 = vmatpush.bf16.msrb.mxu2 %v10968_v12 }
 0x203   : > { %1917 = vst [vmem:[#allocation3 + $0x90] sm:$0x1] %v12455_v8 }
 0x204   : > { %1918 = vst [vmem:[#allocation3 + $0xa8] sm:$0x1] %v12455_v8 }
 0x205   : > { %1919 = vst [vmem:[#allocation3 + $0xc0] sm:$0x1] %v12455_v8 }
 0x206   : > { %1920 = vst [vmem:[#allocation3 + $0xd8] sm:$0x1] %v12455_v8  ;;  %3058 = vmatpush.bf16.msrb.mxu2 %v10956_v18 }
 0x207   : > { %1921 = vst [vmem:[#allocation3 + $0xf0] sm:$0x1] %v12455_v8 }
 0x208   : > { %1922 = vst [vmem:[#allocation3 + $0x108] sm:$0x1] %v12455_v8 }
 0x209   : > { %1923 = vst [vmem:[#allocation3 + $0x120] sm:$0x1] %v12455_v8 }
 0x20a   : > { %1924 = vst [vmem:[#allocation3 + $0x138] sm:$0x1] %v12455_v8  ;;  %3059 = vmatpush.bf16.msrb.mxu2 %v10944_v0 }
 0x20b   : > { %10880 = vmatmul.msk.bf16.vlgmr.msra.gmra.mxu3 %vm668_vm1, %v12698_v23  ;;  %1925 = vst [vmem:[#allocation3 + $0x150] sm:$0x1] %v12455_v8 }
 0x20c   : > { %1325 = vmatpush.bf16.msra.mxu3 %v1106_v39  ;;  %1926 = vst [vmem:[#allocation3 + $0x168] sm:$0x1] %v12455_v8  ;;  %v12274_v39 = vld [vmem:[%s12994_s21 + $0x18] sm:$0xff]  }
 0x20d   : > { %10887 = vmatmul.msk.bf16.vlgmr.msra.gmra.mxu2 %vm668_vm1, %v12698_v23  ;;  %1927 = vst [vmem:[#allocation3 + $0x180] sm:$0x1] %v12455_v8  ;;  %v12142_v63 = vunpack.c.l.bf16 %v12274_v39  ;;  %v12143_v40 = vunpack.c.h.bf16 %v12274_v39  ;;  %v11071_v39 = vld [vmem:[%s17705_s6 + $0x168] sm:$0xf] }
 0x20e   : > { %1930 = vst [vmem:[#allocation3 + $0x29] sm:$0x1] %v12455_v8  ;;  %3060 = vmatpush.bf16.msrb.mxu2 %v10932_v17 }
 0x20f   : > { %1931 = vst [vmem:[#allocation3 + $0x41] sm:$0x1] %v12455_v8  ;;  %v2053_v3 = vrot.slane %v12142_v63, 7 }
 0x210   : > { %1932 = vst [vmem:[#allocation3 + $0x59] sm:$0x1] %v12455_v8 }
 0x211   : > { %1933 = vst [vmem:[#allocation3 + $0x71] sm:$0x1] %v12455_v8 }
 0x212   : > { %1934 = vst [vmem:[#allocation3 + $0x89] sm:$0x1] %v12455_v8  ;;  %3061 = vmatpush.bf16.msrb.mxu2 %v10920_v32 }
 0x213   : > { %1935 = vst [vmem:[#allocation3 + $0xa1] sm:$0x1] %v12455_v8 }
 0x214   : > { %1936 = vst [vmem:[#allocation3 + $0xb9] sm:$0x1] %v12455_v8 }
 0x215   : > { %1937 = vst [vmem:[#allocation3 + $0xd1] sm:$0x1] %v12455_v8 }
 0x216   : > { %1938 = vst [vmem:[#allocation3 + $0xe9] sm:$0x1] %v12455_v8  ;;  %3062 = vmatpush.bf16.msrb.mxu2 %v10908_v42 }
 0x217   : > { %1939 = vst [vmem:[#allocation3 + $0x101] sm:$0x1] %v12455_v8 }
 0x218   : > { %1940 = vst [vmem:[#allocation3 + $0x119] sm:$0x1] %v12455_v8 }
 0x219   : > { %1941 = vst [vmem:[#allocation3 + $0x131] sm:$0x1] %v12455_v8 }
 0x21a   : > { %1942 = vst [vmem:[#allocation3 + $0x149] sm:$0x1] %v12455_v8  ;;  %3063 = vmatpush.bf16.msrb.mxu2 %v10896_v47 }
 0x21b   : > { %10884 = vmatmul.msk.bf16.vlgmr.msrb.gmra.mxu3 %vm668_vm1, %v12698_v23  ;;  %1943 = vst [vmem:[#allocation3 + $0x161] sm:$0x1] %v12455_v8 }
 0x21c   : > { %1944 = vst [vmem:[#allocation3 + $0x179] sm:$0x1] %v12455_v8  ;;  %12302 = vmatpush.bf16.msrb.mxu3 %v10980_v10  ;;  %v12179_v10 = vunpack.c.h.bf16 %v12283_v58 }
 0x21d   : > { %1945 = vst [vmem:[#allocation3 + $0x191] sm:$0x1] %v12455_v8  ;;  %3064 = vmatmul.bf16.vlgmr.msrb.gmra.mxu2 %v12894_v53 }
 0x21e   : > { %1848 = vst.msk [vmem:[#allocation2 + $0x330] ss:$8 sm:$0x3] %vm12755_vm3, %v12455_v8 }
 0x21f   : > { %1851 = vst.msk [vmem:[#allocation2 + $0x21] ss:$8 sm:$0x3] %vm12755_vm3, %v12455_v8 }
 0x220   : > { %1902 = vst.msk [vmem:[#allocation2 + $0x351] ss:$8 sm:$0x3] %vm12755_vm3, %v12455_v8  ;;  %12303 = vmatpush.bf16.msrb.mxu3 %v10968_v12 }
 0x221   : > { %1911 = vst [vmem:[#allocation3] sm:$0x1] %v12455_v8 }
 0x222   : > { %1928 = vst [vmem:[#allocation3 + $0x198] sm:$0x1] %v12455_v8 }
 0x223   : > { %1929 = vst [vmem:[#allocation3 + $0x11] sm:$0x1] %v12455_v8 }
 0x224   : > { %1946 = vst [vmem:[#allocation3 + $0x1a9] sm:$0x1] %v12455_v8  ;;  %12304 = vmatpush.bf16.msrb.mxu3 %v10956_v18 }
 0x225   : > { %2141 = vst [vmem:[#allocation2 + $0x30] sm:$0xfe] %v2044_v19  ;;  %v2054_v19 = vrot.slane %v12143_v40, 7 }
 0x226   : > { %2142 = vst [vmem:[#allocation2 + $0x40] sm:$0xff] %v2046_v57  ;;  %v2370_v8 = vld [vmem:[#allocation2 + $0x20] sm:$0xff] }
 0x227   : > { %2143 = vst [vmem:[#allocation2 + $0x50] sm:$0x1] %v2045_v9  ;;  %v2055_v5 = vsel %vm2043_vm4, %v2053_v3, %v2054_v19  ;;  %v2081_v9 = vrot.slane %v12179_v10, 7  ;;  %v12276_v10 = vld [vmem:[%s12994_s21 + $0x28] sm:$0xff]  }
 0x228   : > { %2144 = vst [vmem:[#allocation2 + $0x60] sm:$0xfe] %v2047_v15  ;;  %12305 = vmatpush.bf16.msrb.mxu3 %v10944_v0 }
 0x229   : > { %2145 = vst [vmem:[#allocation2 + $0x70] sm:$0xff] %v13041_v21  ;;  %v2082_v15 = vsel %vm2043_vm4, %v2080_v61, %v2081_v9 }
 0x22a   : > { %2146 = vst [vmem:[#allocation2 + $0x80] sm:$0x1] %v2048_v16  ;;  %v12275_v16 = vld [vmem:[%s12994_s21 + $0x20] sm:$0xff]  }
 0x22b   : > { %10888 = vmatmul.msk.bf16.vlgmr.msra.gmra.mxu3 %vm668_vm1, %v12698_v23  ;;  %2147 = vst [vmem:[#allocation2 + $0x90] sm:$0xfe] %v2050_v20  ;;  %v12147_v30 = vunpack.c.h.bf16 %v12275_v16 }
 0x22c   : > { %v2372_v23 = vld [vmem:[#allocation2 + $0x30] sm:$0xff]  ;;  %12306 = vmatpush.bf16.msrb.mxu3 %v10932_v17  ;;  %2174 = vst [vmem:[#allocation2 + $0x240] sm:$0xfe] %v2077_v37 }
 0x22d   : > { %v13044_v22 = vpack.c.bf16 %v2372_v23, %v2370_v8  ;;  %2176 = vst [vmem:[#allocation2 + $0x260] sm:$0x1] %v2078_v48  ;;  %v12284_v23 = vld [vmem:[%s12994_s21 + $0x68] sm:$0xff]   ;;  %v13134_v37 = vld [vmem:[%s12994_s21 + $0x70] sm:$0xff]  }
 0x22e   : > { %v2376_v36 = vld [vmem:[#allocation2 + $0x50] sm:$0xff]  ;;  %2175 = vst [vmem:[#allocation2 + $0x250] sm:$0xff] %v2079_v50  ;;  %v12182_v14 = vunpack.c.l.bf16 %v12284_v23  ;;  %v12183_v27 = vunpack.c.h.bf16 %v12284_v23  ;;  %v12186_v43 = vunpack.c.l.bf16 %v13134_v37  ;;  %v11061_v23 = vld [vmem:[%s17705_s6 + $0x15c] sm:$0xf0] }
 0x22f   : > { %17861 = vst [vmem:[#allocation11_spill] sm:$0xff] %v13044_v22  ;;  %2843 = vmatmul.bf16.gmra.mxu0 %v13044_v22  ;;  %v13073_v38 = vpack.c.bf16 %v2376_v36, %v2046_v57  ;;  %v2378_v60 = vld [vmem:[#allocation2 + $0x60] sm:$0xff]  ;;  %3069 = vmatmul.bf16.gmra.mxu2 %v13044_v22  ;;  %v12146_v57 = vunpack.c.l.bf16 %v12275_v16 }
 0x230   : > { %12307 = vmatpush.bf16.msrb.mxu3 %v10920_v32  ;;  %2148 = vst [vmem:[#allocation2 + $0xa0] sm:$0xff] %v2052_v55  ;;  %v13090_v59 = vpack.c.bf16 %v13041_v21, %v2378_v60  ;;  %v2083_v26 = vrot.slane %v12182_v14, 7  ;;  %v2084_v20 = vrot.slane %v12183_v27, 7  ;;  %v2057_v32 = vrot.slane %v12147_v30, 7  ;;  %v11952_v27 = vld [vmem:[%s17705_s6 + $0x140] sm:$0xf0] }
 0x231   : > { %17862 = vst [vmem:[#allocation12_spill] sm:$0xff] %v13073_v38  ;;  %v2382_v35 = vld [vmem:[#allocation2 + $0x80] sm:$0xff]  ;;  %v2056_v21 = vrot.slane %v12146_v57, 7  ;;  %v13139_v46 = vrot.slane %v12186_v43, 7 }
 0x232   : > { %2149 = vst [vmem:[#allocation2 + $0xb0] sm:$0x1] %v2051_v49  ;;  %v2384_v11 = vld [vmem:[#allocation2 + $0x90] sm:$0xff]  ;;  %v2085_v1 = vsel %vm2043_vm4, %v2083_v26, %v2084_v20 }
 0x233   : > { %v2438_v52 = vld [vmem:[#allocation2 + $0x240] sm:$0xff]  ;;  %17864 = vst [vmem:[#allocation14_spill] sm:$0xff] %v13090_v59  ;;  %v13101_v12 = vpack.c.bf16 %v2384_v11, %v2382_v35  ;;  %v13128_v36 = vsel %vm2043_vm4, %v2056_v21, %v2057_v32  ;;  %v11059_v11 = vld [vmem:[%s17705_s6 + $0x150] sm:$0xf] }
 0x234   : > { %12308 = vmatpush.bf16.msrb.mxu3 %v10908_v42  ;;  %v13083_v54 = vpack.c.bf16 %v2079_v50, %v2438_v52  ;;  %2177 = vst [vmem:[#allocation2 + $0x270] sm:$0xfe] %v2080_v61  ;;  %v2442_v62 = vld [vmem:[#allocation2 + $0x260] sm:$0xff] }
 0x235   : > { %2150 = vst [vmem:[#allocation2 + $0xc0] sm:$0xfe] %v2053_v3 }
 0x236   : > { %17863 = vst [vmem:[#allocation13_spill] sm:$0xff] %v13083_v54 }
 0x237   : > { %2151 = vst [vmem:[#allocation2 + $0xd0] sm:$0xff] %v2055_v5 }
 0x238   : > { %12309 = vmatpush.bf16.msrb.mxu3 %v10896_v47  ;;  %2152 = vst [vmem:[#allocation2 + $0xe0] sm:$0x1] %v2054_v19 }
 0x239   : > { %17866 = vst [vmem:[#allocation16_spill] sm:$0xff] %v13101_v12  ;;  %v2388_v25 = vld [vmem:[#allocation2 + $0xb0] sm:$0xff] }
 0x23a   : > { %2179 = vst [vmem:[#allocation2 + $0x290] sm:$0x1] %v2081_v9  ;;  %v13117_v17 = vpack.c.bf16 %v2388_v25, %v2052_v55  ;;  %v11955_v9 = vld [vmem:[%s17705_s6 + $0x158] sm:$0xf0] }
 0x23b   : > { %3154 = vmatmul.bf16.vlgmr.msrb.gmra.mxu3 %v13083_v54  ;;  %v2444_v2 = vld [vmem:[#allocation2 + $0x270] sm:$0xff]  ;;  %2178 = vst [vmem:[#allocation2 + $0x280] sm:$0xff] %v2082_v15 }
 0x23c   : > { %v13094_v4 = vpack.c.bf16 %v2444_v2, %v2442_v62  ;;  %2153 = vst [vmem:[#allocation2 + $0xf0] sm:$0xfe] %v2056_v21  ;;  %v2390_v44 = vld [vmem:[#allocation2 + $0xc0] sm:$0xff]  ;;  %v11958_v62 = vld [vmem:[%s17705_s6 + $0x170] sm:$0xf0]  ;;  %v11060_v21 = vor.u32 %v11955_v9, %v11059_v11 }
 0x23d   : > { %17867 = vst [vmem:[#allocation17_spill] sm:$0xff] %v13117_v17  ;;  %v13144_v49 = vpack.c.bf16 %v2055_v5, %v2390_v44  ;;  %v11072_v3 = vor.u32 %v11958_v62, %v11071_v39  ;;  %v11957_v5 = vld [vmem:[%s17705_s6 + $0x16c] sm:$0xf] }
 0x23e   : > { %17865 = vst [vmem:[#allocation15_spill] sm:$0xff] %v13094_v4 }
 0x23f   : > { %2847 = vmatmul.bf16.gmra.mxu0 %v13073_v38  ;;  %3074 = vmatmul.bf16.gmra.mxu2 %v13073_v38  ;;  %2180 = vst [vmem:[#allocation2 + $0x2a0] sm:$0xfe] %v2083_v26  ;;  %v11047_v26 = vld [vmem:[%s17705_s6 + $0x138] sm:$0xf]  ;;  %v2394_v39 = vld [vmem:[#allocation2 + $0xe0] sm:$0xff] }
 0x240   : > { %2182 = vst [vmem:[#allocation2 + $0x2c0] sm:$0x1] %v2084_v20  ;;  %2943 = vmatpush.bf16.msra.mxu1 %v11072_v3  ;;  %v11048_v44 = vor.u32 %v11952_v27, %v11047_v26 }
 0x241   : > { %v2448_v18 = vld [vmem:[#allocation2 + $0x290] sm:$0xff]  ;;  %2181 = vst [vmem:[#allocation2 + $0x2b0] sm:$0xff] %v2085_v1 }
 0x242   : > { %v13110_v8 = vpack.c.bf16 %v2448_v18, %v2082_v15  ;;  %2154 = vst [vmem:[#allocation2 + $0x100] sm:$0xff] %v13128_v36  ;;  %v12150_v15 = vunpack.c.l.bf16 %v12276_v10 }
 0x243   : > { %2155 = vst [vmem:[#allocation2 + $0x110] sm:$0x1] %v2057_v32  ;;  %v2396_v62 = vld [vmem:[#allocation2 + $0xf0] sm:$0xff] }
 0x244   : > { %17869 = vst [vmem:[#allocation19_spill] sm:$0xff] %v13144_v49  ;;  %v2059_v30 = vrot.slane %v12150_v15, 7  ;;  %2944 = vmatpush.bf16.msra.mxu1 %v11060_v21  ;;  %v13232_v11 = vpack.c.bf16 %v2396_v62, %v2394_v39 }
 0x245   : > { %2183 = vst [vmem:[#allocation2 + $0x2d0] sm:$0xfe] %v13139_v46 }
 0x246   : > { %v2450_v28 = vld [vmem:[#allocation2 + $0x2a0] sm:$0xff]  ;;  %2156 = vst [vmem:[#allocation2 + $0x120] sm:$0xfe] %v2059_v30 }
 0x247   : > { %v13125_v34 = vpack.c.bf16 %v2085_v1, %v2450_v28  ;;  %v2454_v63 = vld [vmem:[#allocation2 + $0x2c0] sm:$0xff]  ;;  %17871 = vst [vmem:[#allocation21_spill] sm:$0xff] %v13232_v11 }
 0x248   : > { %2945 = vmatpush.bf16.msra.mxu1 %v11048_v44  ;;  %v11948_v44 = vld [vmem:[%s17705_s6 + $0x124] sm:$0xf] }
 0x249   : > { %17868 = vst [vmem:[#allocation18_spill] sm:$0xff] %v13125_v34 }
 0x24b   : > { %3159 = vmatmul.bf16.gmra.mxu3 %v13094_v4 }
 0x24c   : > { %v2456_v57 = vld [vmem:[#allocation2 + $0x2d0] sm:$0xff] }
 0x24d   : > { %v2402_v21 = vld [vmem:[#allocation2 + $0x120] sm:$0xff] }
 0x24e   : > { %v13098_v7 = vpop.f32.mrf.mxu3 }
 0x24f   : > { %2851 = vmatmul.bf16.gmra.mxu0 %v13090_v59  ;;  %3079 = vmatmul.bf16.gmra.mxu2 %v13090_v59  ;;  %v1346_v48 = vrot.slane %v13098_v7, 4 }
 0x250   : > { %v13103_v51 = vpop.f32.mrf.mxu2 }
 0x251   : > { %v1334_v52 = vrot.slane %v13103_v51, 4 }
 0x252   : > { %v13122_v31 = vpop.f32.mrf.mxu0 }
 0x256   : > { %v13106_v13 = vpop.f32.mrf.mxu3 }
 0x257   : > { %v1570_v20 = vrot.slane %v13106_v13, 4 }
 0x258   : > { %v13115_v0 = vpop.f32.mrf.mxu2 }
 0x259   : > { %v1558_v28 = vrot.slane %v13115_v0, 4 }
 0x25a   : > { %v13141_v47 = vpop.f32.mrf.mxu0 }
 0x25b   : > { %3164 = vmatmul.bf16.gmra.mxu3 %v13110_v8 }
 0x25e   : > { %v1159_v24 = vpop.f32.mrf.mxu3 }
 0x25f   : > { %2856 = vmatmul.bf16.gmra.mxu0 %v13101_v12  ;;  %v1344_v42 = vrot.slane %v1159_v24, 4  ;;  %v1347_v56 = vsel %vm812_vm2, %v1159_v24, %v1346_v48  ;;  %v13190_v24 = vpack.c.bf16 %v2456_v57, %v2454_v63  ;;  %3084 = vmatmul.bf16.gmra.mxu2 %v13101_v12  ;;  %v11035_v57 = vld [vmem:[%s17705_s6 + $0x120] sm:$0xf] }
 0x260   : > { %v1145_v33 = vpop.f32.mrf.mxu2  ;;  %v1355_v2 = vperm.slane %v1347_v56, %v12598_v45  ;;  %v12187_v56 = vunpack.c.h.bf16 %v13134_v37 }
 0x261   : > { %v1345_v50 = vsel %vm812_vm2, %v1344_v42, %v13098_v7  ;;  %v1332_v58 = vrot.slane %v1145_v33, 4  ;;  %v1335_v40 = vsel %vm812_vm2, %v1145_v33, %v1334_v52  ;;  %v11073_v7 = vld [vmem:[%s17705_s6 + $0x174] sm:$0xf0]  ;;  %17870 = vst [vmem:[#allocation20_spill] sm:$0xff] %v13190_v24 }
 0x262   : > { %v13154_v60 = vperm.slane %v1345_v50, %v12598_v45  ;;  %v11076_v35 = vor.u32 %v11957_v5, %v11073_v7  ;;  %v1343_v18 = vperm.slane %v1335_v40, %v12598_v45  ;;  %v1392_v32 = vrot.slane %v1355_v2, 4  ;;  %v13202_v33 = vpop.f32.mrf.mxu0 }
 0x263   : > { %v1333_v19 = vsel %vm812_vm2, %v1332_v58, %v13103_v51  ;;  %v11954_v51 = vld [vmem:[%s17705_s6 + $0x154] sm:$0xf]  ;;  %v12151_v40 = vunpack.c.h.bf16 %v12276_v10  ;;  %v2087_v5 = vrot.slane %v12187_v56, 7 }
 0x264   : > { %v1380_v16 = vrot.slane %v13154_v60, 4  ;;  %v13193_v14 = vperm.slane %v1333_v19, %v12598_v45  ;;  %3185 = vmatpush.bf16.msra.mxu3 %v11076_v35  ;;  %v11064_v25 = vor.u32 %v11954_v51, %v11061_v23  ;;  %v1394_v52 = vrot.slane %v1343_v18, 4  ;;  %v11049_v51 = vld [vmem:[%s17705_s6 + $0x144] sm:$0xf0] }
 0x265   : > { %v1393_v63 = vsel %vm812_vm2, %v1392_v32, %v1343_v18  ;;  %v2060_v10 = vrot.slane %v12151_v40, 7  ;;  %2185 = vst [vmem:[#allocation2 + $0x2f0] sm:$0x1] %v2087_v5  ;;  %v13292_v40 = vld [vmem:[%s12994_s21 + $0x30] sm:$0xff]  }
 0x266   : > { %v13120_v29 = vpop.f32.mrf.mxu3  ;;  %v1381_v50 = vsel %vm812_vm2, %v1380_v16, %v13193_v14  ;;  %v1382_v7 = vrot.slane %v13193_v14, 4  ;;  %v13236_v9 = vperm.slane %v1393_v63, %v12615_v6  ;;  %v11946_v63 = vld [vmem:[%s17705_s6 + $0x110] sm:$0xf0] }
 0x267   : > { %v1568_v1 = vrot.slane %v13120_v29, 4  ;;  %v1571_v43 = vsel %vm812_vm2, %v13120_v29, %v1570_v20  ;;  %v13228_v35 = vperm.slane %v1381_v50, %v12615_v6  ;;  %2158 = vst [vmem:[#allocation2 + $0x140] sm:$0x1] %v2060_v10  ;;  %v11023_v50 = vld [vmem:[%s17705_s6 + $0x108] sm:$0xf] }
 0x268   : > { %v13150_v55 = vpop.f32.mrf.mxu2  ;;  %3186 = vmatpush.bf16.msra.mxu3 %v11064_v25  ;;  %v13222_v3 = vperm.slane %v1571_v43, %v12598_v45  ;;  %v11949_v25 = vld [vmem:[%s17705_s6 + $0x128] sm:$0xf0]  ;;  %v1438_v56 = vrot.slane %v13236_v9, 4 }
 0x269   : > { %v1556_v48 = vrot.slane %v13150_v55, 4  ;;  %v1569_v29 = vsel %vm812_vm2, %v1568_v1, %v13106_v13  ;;  %v1559_v19 = vsel %vm812_vm2, %v13150_v55, %v1558_v28  ;;  %v1395_v13 = vsel %vm812_vm2, %v1355_v2, %v1394_v52  ;;  %v11951_v55 = vld [vmem:[%s17705_s6 + $0x13c] sm:$0xf] }
 0x26a   : > { %v13245_v15 = vperm.slane %v1569_v29, %v12598_v45  ;;  %v11052_v16 = vor.u32 %v11951_v55, %v11049_v51  ;;  %v13249_v2 = vsel %vm2043_vm4, %v2059_v30, %v2060_v10  ;;  %v1616_v23 = vrot.slane %v13222_v3, 4  ;;  %v13264_v26 = vpop.f32.mrf.mxu0 }
 0x26b   : > { %3169 = vmatmul.bf16.gmra.mxu3 %v13125_v34  ;;  %v1557_v37 = vsel %vm812_vm2, %v1556_v48, %v13115_v0  ;;  %v1567_v0 = vperm.slane %v1559_v19, %v12598_v45  ;;  %2157 = vst [vmem:[#allocation2 + $0x130] sm:$0xff] %v13249_v2  ;;  %v1430_v30 = vrot.slane %v13228_v35, 4  ;;  %v11036_v20 = vor.u32 %v11949_v25, %v11035_v57  ;;  %v11037_v48 = vld [vmem:[%s17705_s6 + $0x12c] sm:$0xf0] }
 0x26c   : > { %v13258_v14 = vperm.slane %v1557_v37, %v12598_v45  ;;  %3187 = vmatpush.bf16.msra.mxu3 %v11052_v16  ;;  %v1383_v1 = vsel %vm812_vm2, %v13154_v60, %v1382_v7  ;;  %v13273_v28 = vperm.slane %v1395_v13, %v12615_v6  ;;  %v1604_v60 = vrot.slane %v13245_v15, 4  ;;  %v2460_v55 = vld [vmem:[#allocation2 + $0x2f0] sm:$0xff] }
 0x26d   : > { %v1618_v39 = vrot.slane %v1567_v0, 4  ;;  %2946 = vmatpush.bf16.msra.mxu1 %v11036_v20  ;;  %v11040_v62 = vor.u32 %v11948_v44, %v11037_v48  ;;  %v1617_v19 = vsel %vm812_vm2, %v1616_v23, %v1567_v0  ;;  %v11024_v7 = vor.u32 %v11946_v63, %v11023_v50  ;;  %v11945_v23 = vld [vmem:[%s17705_s6 + $0x10c] sm:$0xf]  ;;  %v11013_v48 = vld [vmem:[%s17705_s6 + $0xfc] sm:$0xf0] }
 0x26e   : > { %v13136_v41 = vpop.f32.mrf.mxu3  ;;  %v1606_v29 = vrot.slane %v13258_v14, 4  ;;  %v12154_v37 = vunpack.c.l.bf16 %v13292_v40  ;;  %v2088_v13 = vsel %vm2043_vm4, %v13139_v46, %v2087_v5  ;;  %v13303_v57 = vperm.slane %v1383_v1, %v12615_v6  ;;  %v11025_v46 = vld [vmem:[%s17705_s6 + $0x114] sm:$0xf0]  ;;  %v11942_v1 = vld [vmem:[%s17705_s6 + $0xf4] sm:$0xf] }
 0x26f   : > { %2860 = vmatmul.bf16.gmra.mxu0 %v13117_v17  ;;  %v1358_v27 = vrot.slane %v13136_v41, 4  ;;  %2184 = vst [vmem:[#allocation2 + $0x2e0] sm:$0xff] %v2088_v13  ;;  %v13305_v25 = vpack.c.bf16 %v2460_v55, %v2088_v13  ;;  %v11028_v20 = vor.u32 %v11945_v23, %v11025_v46  ;;  %v13331_v44 = vperm.slane %v1617_v19, %v12615_v6  ;;  %v10999_v50 = vld [vmem:[%s17705_s6 + $0xd8] sm:$0xf] }
 0x270   : > { %v13207_v42 = vpop.f32.mrf.mxu2  ;;  %3188 = vmatpush.bf16.msra.mxu3 %v11040_v62  ;;  %v13315_v5 = vrot.slane %v12154_v37, 7  ;;  %3089 = vmatmul.bf16.gmra.mxu2 %v13117_v17  ;;  %v11016_v19 = vor.u32 %v11942_v1, %v11013_v48  ;;  %v1434_v37 = vrot.slane %v13303_v57, 4 }
 0x271   : > { %v1356_v32 = vrot.slane %v13207_v42, 4  ;;  %v1359_v51 = vsel %vm812_vm2, %v13207_v42, %v1358_v27  ;;  %17872 = vst [vmem:[#allocation22_spill] sm:$0xff] %v13305_v25  ;;  %v1605_v42 = vsel %vm812_vm2, %v1604_v60, %v13258_v14  ;;  %v1619_v27 = vsel %vm812_vm2, %v13222_v3, %v1618_v39  ;;  %2947 = vmatpush.bf16.msra.mxu1 %v11024_v7  ;;  %v11940_v60 = vld [vmem:[%s17705_s6 + $0xe0] sm:$0xf0]  ;;  %v2400_v7 = vld [vmem:[#allocation2 + $0x110] sm:$0xff] }
 0x272   : > { %v1367_v3 = vperm.slane %v1359_v51, %v12598_v45  ;;  %v1442_v39 = vrot.slane %v13273_v28, 4  ;;  %2159 = vst [vmem:[#allocation2 + $0x150] sm:$0xfe] %v13315_v5  ;;  %v13351_v13 = vperm.slane %v1605_v42, %v12615_v6  ;;  %v13354_v55 = vperm.slane %v1619_v27, %v12615_v6 }
 0x273   : > { %v1357_v0 = vsel %vm812_vm2, %v1356_v32, %v13136_v41  ;;  %v11011_v41 = vld [vmem:[%s17705_s6 + $0xf0] sm:$0xf]  ;;  %v11943_v32 = vld [vmem:[%s17705_s6 + $0xf8] sm:$0xf0]  ;;  %v1607_v42 = vsel %vm812_vm2, %v13245_v15, %v1606_v29 }
 0x274   : > { %v11012_v14 = vor.u32 %v11943_v32, %v11011_v41  ;;  %v1363_v63 = vperm.slane %v1357_v0, %v12598_v45  ;;  %3189 = vmatpush.bf16.msra.mxu3 %v11028_v20  ;;  %v11000_v41 = vor.u32 %v11940_v60, %v10999_v50  ;;  %v1418_v27 = vrot.slane %v1367_v3, 4 }
 0x275   : > { %v13386_v60 = vperm.slane %v1607_v42, %v12615_v6 }
 0x276   : > { %v13157_v61 = vpop.f32.mrf.mxu3  ;;  %v13357_v46 = vpop.f32.mrf.mxu0  ;;  %2948 = vmatpush.bf16.msra.mxu1 %v11012_v14 }
 0x277   : > { %v1582_v10 = vrot.slane %v13157_v61, 4  ;;  %v1658_v18 = vrot.slane %v13386_v60, 4 }
 0x278   : > { %v1203_v52 = vpop.f32.mrf.mxu2  ;;  %3190 = vmatpush.bf16.msra.mxu3 %v11016_v19 }
 0x279   : > { %v1580_v16 = vrot.slane %v1203_v52, 4  ;;  %v1583_v23 = vsel %vm812_vm2, %v1203_v52, %v1582_v10  ;;  %v13367_v52 = vpack.c.bf16 %v2400_v7, %v13128_v36  ;;  %v1406_v10 = vrot.slane %v1363_v63, 4  ;;  %v11939_v36 = vld [vmem:[%s17705_s6 + $0xdc] sm:$0xf]  ;;  %v2408_v17 = vld [vmem:[#allocation2 + $0x150] sm:$0xff] }
 0x27a   : > { %v13372_v50 = vperm.slane %v1583_v23, %v12598_v45  ;;  %2949 = vmatpush.bf16.msra.mxu1 %v11000_v41  ;;  %v11937_v23 = vld [vmem:[%s17705_s6 + $0xc8] sm:$0xf0] }
 0x27b   : > { %3174 = vmatmul.bf16.gmra.mxu3 %v13190_v24  ;;  %v1581_v32 = vsel %vm812_vm2, %v1580_v16, %v13157_v61 }
 0x27c   : > { %v13377_v29 = vperm.slane %v1581_v32, %v12598_v45 }
 0x27e   : > { %v13215_v58 = vpop.f32.mrf.mxu3 }
 0x27f   : > { %2864 = vmatmul.bf16.gmra.mxu0 %v13144_v49  ;;  %v1370_v62 = vrot.slane %v13215_v58, 4 }
 0x280   : > { %3094 = vmatmul.bf16.gmra.mxu2 %v13144_v49 }
 0x286   : > { %v13275_v43 = vpop.f32.mrf.mxu3 }
 0x28b   : > { %3179 = vmatmul.bf16.gmra.mxu3 %v13305_v25 }
 0x28e   : > { %v1215_v51 = vpop.f32.mrf.mxu3 }
 0x28f   : > { %2869 = vmatmul.bf16.gmra.mxu0 %v13232_v11  ;;  %v1368_v0 = vrot.slane %v1215_v51, 4  ;;  %v1371_v20 = vsel %vm812_vm2, %v1215_v51, %v1370_v62  ;;  %v10987_v51 = vld [vmem:[%s17705_s6 + $0xc0] sm:$0xf] }
 0x290   : > { %v1379_v48 = vperm.slane %v1371_v20, %v12598_v45  ;;  %v10988_v42 = vor.u32 %v11937_v23, %v10987_v51  ;;  %3099 = vmatmul.bf16.gmra.mxu2 %v13232_v11 }
 0x291   : > { %v1369_v14 = vsel %vm812_vm2, %v1368_v0, %v13215_v58  ;;  %v11001_v58 = vld [vmem:[%s17705_s6 + $0xe4] sm:$0xf0] }
 0x292   : > { %v1375_v61 = vperm.slane %v1369_v14, %v12598_v45  ;;  %v1416_v16 = vrot.slane %v1379_v48, 4  ;;  %v1419_v15 = vsel %vm812_vm2, %v1379_v48, %v1418_v27  ;;  %v11004_v7 = vor.u32 %v11939_v36, %v11001_v58  ;;  %2950 = vmatpush.bf16.msra.mxu1 %v10988_v42  ;;  %v2367_v42 = vld [vmem:[#allocation2 + $0x8] sm:$0xff] }
 0x293   : > { %v1427_v19 = vperm.slane %v1419_v15, %v12615_v6  ;;  %v1642_v14 = vrot.slane %v13372_v50, 4 }
 0x294   : > { %v1404_v0 = vrot.slane %v1375_v61, 4  ;;  %v1407_v20 = vsel %vm812_vm2, %v1375_v61, %v1406_v10  ;;  %v1417_v32 = vsel %vm812_vm2, %v1416_v16, %v1367_v3  ;;  %3191 = vmatpush.bf16.msra.mxu3 %v11004_v7  ;;  %v1630_v3 = vrot.slane %v13377_v29, 4 }
 0x295   : > { %v1415_v27 = vperm.slane %v1407_v20, %v12615_v6  ;;  %v1423_v48 = vperm.slane %v1417_v32, %v12615_v6  ;;  %v13401_v41 = vsel %vm812_vm2, %v1427_v19, %v1442_v39  ;;  %v1440_v36 = vrot.slane %v1427_v19, 4 }
 0x296   : > { %v1405_v15 = vsel %vm812_vm2, %v1404_v0, %v1363_v63  ;;  %v17710_v10 = vrot.slane %v13401_v41, 7  ;;  %v1217_v61 = vpop.f32.mrf.mxu3  ;;  %v1594_v7 = vrot.slane %v13275_v43, 4  ;;  %v13421_v0 = vpop.f32.mrf.mxu0 }
 0x297   : > { %v1411_v16 = vperm.slane %v1405_v15, %v12615_v6  ;;  %v1432_v58 = vrot.slane %v1415_v27, 4  ;;  %v13410_v51 = vsel %vm812_vm2, %v1415_v27, %v1434_v37  ;;  %v1436_v39 = vrot.slane %v1423_v48, 4  ;;  %17873 = vst [vmem:[#allocation23_spill] sm:$0xff] %v13421_v0  ;;  %v11936_v27 = vld [vmem:[%s17705_s6 + $0xc4] sm:$0xf]  ;;  %v1257_v15 = vpop.f32.mrf.mxu2 }
 0x298   : > { %v13416_v63 = vsel %vm812_vm2, %v1423_v48, %v1438_v56  ;;  %v17711_v19 = vrot.slane %v13410_v51, 7  ;;  %2338 = vst [vmem:[#allocation2 + $0x188] sm:$0xfe] %v17710_v10  ;;  %v1592_v23 = vrot.slane %v1217_v61, 4  ;;  %v10989_v48 = vld [vmem:[%s17705_s6 + $0xcc] sm:$0xf0] }
 0x299   : > { %v1428_v20 = vrot.slane %v1411_v16, 4  ;;  %v13426_v37 = vsel %vm812_vm2, %v1411_v16, %v1430_v30  ;;  %v13430_v32 = vsel %vm812_vm2, %v1432_v58, %v13303_v57  ;;  %v13434_v56 = vsel %vm812_vm2, %v1436_v39, %v13236_v9 }
 0x29a   : > { %v13444_v30 = vsel %vm812_vm2, %v1440_v36, %v13273_v28  ;;  %v17712_v57 = vrot.slane %v13426_v37, 7  ;;  %v17715_v16 = vrot.slane %v13430_v32, 7  ;;  %v17714_v9 = vrot.slane %v13434_v56, 7  ;;  %2326 = vst [vmem:[#allocation2 + $0xc8] sm:$0xfe] %v17711_v19  ;;  %v13459_v36 = vpop.f32.mrf.mxu1 }
 0x29b   : > { %v13453_v58 = vsel %vm812_vm2, %v1428_v20, %v13228_v35  ;;  %v17713_v39 = vrot.slane %v13416_v63, 7  ;;  %v1593_v10 = vsel %vm812_vm2, %v1592_v23, %v13275_v43  ;;  %v1595_v28 = vsel %vm812_vm2, %v1217_v61, %v1594_v7  ;;  %v12349_v20 = vld [vmem:[#allocation2 + $0x10] sm:$0xff] }
 0x29c   : > { %v17719_v1 = vrot.slane %v13453_v58, 7  ;;  %2320 = vst [vmem:[#allocation2 + $0x68] sm:$0xfe] %v17712_v57  ;;  %v1599_v19 = vperm.slane %v1593_v10, %v12598_v45  ;;  %v1603_v35 = vperm.slane %v1595_v28, %v12598_v45  ;;  %v13466_v62 = vpack.c.bf16 %v12349_v20, %v2367_v42 }
 0x29d   : > { %v1666_v43 = vrot.slane %v13354_v55, 4  ;;  %2323 = vst [vmem:[#allocation2 + $0x98] sm:$0xfe] %v17715_v16  ;;  %v10992_v7 = vor.u32 %v11936_v27, %v10989_v48  ;;  %v1444_v23 = vrot.slane %v1257_v15, 4  ;;  %v13480_v61 = vpack.c.bf16 %v13249_v2, %v2402_v21 }
 0x29e   : > { %17874 = vst [vmem:[#allocation24_spill] sm:$0xff] %v13466_v62  ;;  %v1628_v10 = vrot.slane %v1599_v19, 4  ;;  %v1631_v28 = vsel %vm812_vm2, %v1599_v19, %v1630_v3  ;;  %v1640_v57 = vrot.slane %v1603_v35, 4  ;;  %v1643_v42 = vsel %vm812_vm2, %v1603_v35, %v1642_v14  ;;  %2951 = vmatmul.bf16.vlgmr.msra.gmra.mxu1 %v13466_v62  ;;  %v1271_v20 = vpop.f32.mrf.mxu3 }
 0x29f   : > { %2873 = vmatmul.bf16.gmra.mxu0 %v13367_v52  ;;  %2317 = vst [vmem:[#allocation2 + $0x38] sm:$0xfe] %v17719_v1  ;;  %v1639_v27 = vperm.slane %v1631_v28, %v12615_v6  ;;  %v1651_v48 = vperm.slane %v1643_v42, %v12615_v6  ;;  %3192 = vmatpush.bf16.msra.mxu3 %v10992_v7  ;;  %v1458_v2 = vrot.slane %v13459_v36, 4  ;;  %v17875_v21 = vrot.slane %v13122_v31, 4 }
 0x2a0   : > { %2329 = vst [vmem:[#allocation2 + $0xf8] sm:$0xfe] %v17714_v9  ;;  %v1629_v14 = vsel %vm812_vm2, %v1628_v10, %v13377_v29  ;;  %v1641_v3 = vsel %vm812_vm2, %v1640_v57, %v13372_v50  ;;  %v17876_v35 = vrot.slane %v13444_v30, 7  ;;  %v1259_v29 = vpop.f32.mrf.mxu2  ;;  %v1456_v57 = vrot.slane %v1271_v20, 4  ;;  %3104 = vmatmul.bf16.gmra.mxu2 %v13367_v52 }
 0x2a1   : > { %2332 = vst [vmem:[#allocation2 + $0x128] sm:$0xfe] %v17713_v39  ;;  %v1447_v19 = vsel %vm812_vm2, %v1257_v15, %v17875_v21  ;;  %v1635_v7 = vperm.slane %v1629_v14, %v12615_v6  ;;  %v1647_v28 = vperm.slane %v1641_v3, %v12615_v6  ;;  %v1656_v42 = vrot.slane %v1639_v27, 4 }
 0x2a2   : > { %2335 = vst [vmem:[#allocation2 + $0x158] sm:$0xfe] %v17876_v35  ;;  %v13501_v39 = vsel %vm812_vm2, %v1639_v27, %v1658_v18  ;;  %v1664_v10 = vrot.slane %v1651_v48, 4  ;;  %3193 = vmatmul.bf16.vlgmr.msra.gmra.mxu3 %v13466_v62  ;;  %v1445_v15 = vsel %vm812_vm2, %v1444_v23, %v13122_v31  ;;  %v17877_v14 = vrot.slane %v13351_v13, 4 }
 0x2a3   : > { %v17716_v50 = vrot.slane %v13501_v39, 7  ;;  %v1652_v35 = vrot.slane %v1635_v7, 4  ;;  %v13514_v18 = vsel %vm812_vm2, %v1656_v42, %v13386_v60  ;;  %v1660_v27 = vrot.slane %v1647_v28, 4 }
 0x2a4   : > { %v13510_v3 = vsel %vm812_vm2, %v1635_v7, %v17877_v14  ;;  %v17878_v9 = vrot.slane %v13331_v44, 4  ;;  %v13523_v31 = vsel %vm812_vm2, %v1664_v10, %v13354_v55  ;;  %v1451_v55 = vperm.slane %v1445_v15, %v12598_v45 }
 0x2a5   : > { %v17717_v23 = vrot.slane %v13510_v3, 7  ;;  %2350 = vst [vmem:[#allocation2 + $0x248] sm:$0xfe] %v17716_v50  ;;  %v13531_v60 = vsel %vm812_vm2, %v1652_v35, %v13351_v13  ;;  %v13535_v7 = vsel %vm812_vm2, %v1660_v27, %v13331_v44  ;;  %v1455_v44 = vperm.slane %v1447_v19, %v12598_v45 }
 0x2a6   : > { %v13519_v16 = vsel %vm812_vm2, %v1647_v28, %v17878_v9  ;;  %v13538_v9 = vsel %vm812_vm2, %v1651_v48, %v1666_v43  ;;  %v1245_v28 = vpop.f32.mrf.mxu1  ;;  %v17720_v42 = vrot.slane %v13531_v60, 7  ;;  %v17721_v10 = vrot.slane %v13535_v7, 7  ;;  %v1273_v13 = vpop.f32.mrf.mxu3  ;;  %v2373_v49 = vld [vmem:[#allocation2 + $0x38] sm:$0xff] }
 0x2a7   : > { %v17722_v14 = vrot.slane %v13519_v16, 7  ;;  %2344 = vst [vmem:[#allocation2 + $0x1e8] sm:$0xfe] %v17717_v23  ;;  %v17725_v43 = vrot.slane %v13523_v31, 7  ;;  %v1457_v48 = vsel %vm812_vm2, %v1456_v57, %v13459_v36  ;;  %v1459_v15 = vsel %vm812_vm2, %v1271_v20, %v1458_v2 }
 0x2a8   : > { %v1668_v35 = vrot.slane %v1259_v29, 4  ;;  %v17727_v27 = vrot.slane %v13538_v9, 7  ;;  %2341 = vst [vmem:[#allocation2 + $0x1b8] sm:$0xfe] %v17720_v42  ;;  %v1463_v50 = vperm.slane %v1457_v48, %v12598_v45  ;;  %v1467_v19 = vperm.slane %v1459_v15, %v12598_v45  ;;  %v1313_v42 = vpop.f32.mrf.mxu2 }
 0x2a9   : > { %v12155_v23 = vunpack.c.h.bf16 %v13292_v40  ;;  %2353 = vst [vmem:[#allocation2 + $0x278] sm:$0xfe] %v17721_v10  ;;  %v1680_v1 = vrot.slane %v1273_v13, 4  ;;  %v1506_v36 = vrot.slane %v1455_v44, 4  ;;  %v1682_v2 = vrot.slane %v1245_v28, 4 }
 0x2aa   : > { %2356 = vst [vmem:[#allocation2 + $0x2a8] sm:$0xfe] %v17722_v14  ;;  %v1492_v20 = vrot.slane %v1463_v50, 4  ;;  %v1669_v57 = vsel %vm812_vm2, %v1668_v35, %v13141_v47  ;;  %v1504_v40 = vrot.slane %v1467_v19, 4  ;;  %v17880_v15 = vrot.slane %v13141_v47, 4  ;;  %v2371_v35 = vld [vmem:[#allocation2 + $0x28] sm:$0xff] }
 0x2ab   : > { %2359 = vst [vmem:[#allocation2 + $0x2d8] sm:$0xfe] %v17725_v43  ;;  %v2063_v14 = vrot.slane %v12155_v23, 7  ;;  %v1681_v0 = vsel %vm812_vm2, %v1680_v1, %v1245_v28  ;;  %v1683_v62 = vsel %vm812_vm2, %v1273_v13, %v1682_v2  ;;  %v2406_v43 = vld [vmem:[#allocation2 + $0x140] sm:$0xff]  ;;  %v1507_v23 = vsel %vm812_vm2, %v1467_v19, %v1506_v36 }
 0x2ac   : > { %v2844_v21 = vpop.f32.mrf.mxu0  ;;  %v1671_v10 = vsel %vm812_vm2, %v1259_v29, %v17880_v15  ;;  %2362 = vst [vmem:[#allocation2 + $0x308] sm:$0xfe] %v17727_v27  ;;  %v1675_v29 = vperm.slane %v1669_v57, %v12598_v45  ;;  %v1493_v15 = vsel %vm812_vm2, %v1492_v20, %v1451_v55  ;;  %v1505_v13 = vsel %vm812_vm2, %v1504_v40, %v1455_v44 }
 0x2ad   : > { %v17718_v21 = vrot.slane %v13514_v18, 7  ;;  %v1679_v1 = vperm.slane %v1671_v10, %v12598_v45  ;;  %v13586_v28 = vsel %vm2043_vm4, %v13315_v5, %v2063_v14  ;;  %2161 = vst [vmem:[#allocation2 + $0x170] sm:$0x1] %v2063_v14  ;;  %v1687_v2 = vperm.slane %v1681_v0, %v12598_v45 }
 0x2ae   : > { %2160 = vst [vmem:[#allocation2 + $0x160] sm:$0xff] %v13586_v28  ;;  %v1327_v20 = vpop.f32.mrf.mxu3  ;;  %v1694_v19 = vrot.slane %v13264_v26, 4  ;;  %v13595_v10 = vpack.c.bf16 %v2408_v17, %v2406_v43  ;;  %v13601_v44 = vperm.slane %v1507_v23, %v12615_v6  ;;  %v1718_v36 = vrot.slane %v1675_v29, 4 }
 0x2af   : > { %2877 = vmatmul.bf16.gmra.mxu0 %v13480_v61  ;;  %2347 = vst [vmem:[#allocation2 + $0x218] sm:$0xfe] %v17718_v21  ;;  %v1494_v21 = vrot.slane %v1451_v55, 4  ;;  %v1299_v55 = vpop.f32.mrf.mxu1  ;;  %v1468_v0 = vrot.slane %v1313_v42, 4  ;;  %v1511_v57 = vperm.slane %v1505_v13, %v12615_v6  ;;  %v1480_v43 = vrot.slane %v1327_v20, 4 }
 0x2b0   : > { %v1482_v14 = vrot.slane %v1299_v55, 4  ;;  %v1719_v23 = vsel %vm812_vm2, %v1687_v2, %v1718_v36  ;;  %v1315_v13 = vpop.f32.mrf.mxu2  ;;  %3109 = vmatmul.bf16.gmra.mxu2 %v13480_v61 }
 0x2b1   : > { %v1495_v47 = vsel %vm812_vm2, %v1463_v50, %v1494_v21  ;;  %v1691_v50 = vperm.slane %v1683_v62, %v12598_v45  ;;  %v13592_v21 = vpack.c.bf16 %v2373_v49, %v2371_v35  ;;  %v1499_v62 = vperm.slane %v1493_v15, %v12615_v6 }
 0x2b2   : > { %v13598_v5 = vperm.slane %v1495_v47, %v12615_v6  ;;  %v1730_v35 = vrot.slane %v1679_v1, 4  ;;  %v1716_v47 = vrot.slane %v1687_v2, 4  ;;  %v1469_v11 = vsel %vm812_vm2, %v1468_v0, %v13202_v33 }
 0x2b3   : > { %17881 = vst [vmem:[#allocation26_spill] sm:$0xff] %v13592_v21  ;;  %2956 = vmatmul.bf16.gmra.mxu1 %v13592_v21  ;;  %3198 = vmatmul.bf16.gmra.mxu3 %v13592_v21  ;;  %v1728_v27 = vrot.slane %v1691_v50, 4  ;;  %v1483_v15 = vsel %vm812_vm2, %v1327_v20, %v1482_v14  ;;  %v1475_v12 = vperm.slane %v1469_v11, %v12598_v45  ;;  %v1542_v2 = vrot.slane %v1499_v62, 4 }
 0x2b4   : > { %v13566_v48 = vpop.f32.mrf.mxu0  ;;  %v1546_v21 = vrot.slane %v13598_v5, 4  ;;  %v1550_v36 = vrot.slane %v1511_v57, 4  ;;  %v1491_v0 = vperm.slane %v1483_v15, %v12598_v45 }
 0x2b5   : > { %17879 = vst [vmem:[#allocation25_spill] sm:$0xff] %v13566_v48  ;;  %v1470_v48 = vrot.slane %v13202_v33, 4  ;;  %v1731_v33 = vsel %vm812_vm2, %v1691_v50, %v1730_v35  ;;  %v1518_v20 = vrot.slane %v1475_v12, 4  ;;  %v1729_v11 = vsel %vm812_vm2, %v1728_v27, %v1679_v1 }
 0x2b6   : > { %v1528_v38 = vrot.slane %v1491_v0, 4  ;;  %v13630_v22 = vperm.slane %v1731_v33, %v12615_v6  ;;  %v1329_v15 = vpop.f32.mrf.mxu3  ;;  %v1695_v27 = vsel %vm812_vm2, %v1315_v13, %v1694_v19 }
 0x2b7   : > { %v1471_v49 = vsel %vm812_vm2, %v1313_v42, %v1470_v48  ;;  %v1481_v48 = vsel %vm812_vm2, %v1480_v43, %v1299_v55  ;;  %v13624_v55 = vperm.slane %v1719_v23, %v12615_v6  ;;  %v1692_v43 = vrot.slane %v1315_v13, 4 }
 0x2b8   : > { %v1479_v17 = vperm.slane %v1471_v49, %v12598_v45  ;;  %v1487_v59 = vperm.slane %v1481_v48, %v12598_v45  ;;  %v1717_v49 = vsel %vm812_vm2, %v1716_v47, %v1675_v29 }
 0x2b9   : > { %v13640_v47 = vperm.slane %v1717_v49, %v12615_v6  ;;  %v1301_v49 = vpop.f32.mrf.mxu1 }
 0x2ba   : > { %v1530_v42 = vrot.slane %v1479_v17, 4  ;;  %v1516_v14 = vrot.slane %v1487_v59, 4  ;;  %v1519_v35 = vsel %vm812_vm2, %v1487_v59, %v1518_v20  ;;  %v1529_v29 = vsel %vm812_vm2, %v1528_v38, %v1479_v17 }
 0x2bb   : > { %v1527_v25 = vperm.slane %v1519_v35, %v12615_v6  ;;  %v1535_v59 = vperm.slane %v1529_v29, %v12615_v6 }
 0x2bc   : > { %v13609_v40 = vpop.f32.mrf.mxu0  ;;  %v1531_v48 = vsel %vm812_vm2, %v1491_v0, %v1530_v42  ;;  %v1517_v50 = vsel %vm812_vm2, %v1516_v14, %v1475_v12  ;;  %v13643_v42 = vperm.slane %v1729_v11, %v12615_v6  ;;  %v1693_v12 = vsel %vm812_vm2, %v1692_v43, %v13264_v26 }
 0x2bd   : > { %v1539_v23 = vperm.slane %v1531_v48, %v12615_v6  ;;  %v1523_v53 = vperm.slane %v1517_v50, %v12615_v6  ;;  %v1544_v20 = vrot.slane %v1527_v25, 4  ;;  %v1547_v38 = vsel %vm812_vm2, %v1527_v25, %v1546_v21 }
 0x2be   : > { %v1548_v19 = vrot.slane %v1535_v59, 4  ;;  %v1703_v14 = vperm.slane %v1695_v27, %v12598_v45  ;;  %v13656_v43 = vsel %vm812_vm2, %v1535_v59, %v1550_v36  ;;  %v17882_v48 = vrot.slane %v13426_v37, 7 }
 0x2bf   : > { %2882 = vmatmul.bf16.gmra.mxu0 %v13595_v10  ;;  %v1540_v33 = vrot.slane %v1523_v53, 4  ;;  %v1543_v0 = vsel %vm812_vm2, %v1523_v53, %v1542_v2  ;;  %v1552_v17 = vrot.slane %v1539_v23, 4  ;;  %v1545_v26 = vsel %vm812_vm2, %v1544_v20, %v13598_v5  ;;  %v2412_v2 = vld [vmem:[#allocation2 + $0x170] sm:$0xff] }
 0x2c0   : > { %v2225_v13 = vrot.slane %v1543_v0, 7  ;;  %v2231_v53 = vrot.slane %v1547_v38, 7  ;;  %v1549_v25 = vsel %vm812_vm2, %v1548_v19, %v1511_v57  ;;  %v2228_v35 = vrot.slane %v1545_v26, 7  ;;  %v12278_v57 = vld [vmem:[%s12994_s21 + $0x38] sm:$0xff]   ;;  %v13691_v19 = vpop.f32.mrf.mxu3  ;;  %3114 = vmatmul.bf16.gmra.mxu2 %v13595_v10 }
 0x2c1   : > { %v1541_v11 = vsel %vm812_vm2, %v1540_v33, %v1499_v62  ;;  %v17883_v62 = vrot.slane %v13410_v51, 7  ;;  %v2234_v5 = vrot.slane %v1549_v25, 7  ;;  %v1706_v36 = vrot.slane %v1301_v49, 4 }
 0x2c2   : > { %v2222_v21 = vrot.slane %v1541_v11, 7  ;;  %v13662_v50 = vsel %vm2043_vm4, %v17882_v48, %v2225_v13  ;;  %2322 = vst [vmem:[#allocation2 + $0x88] sm:$0x1] %v2225_v13  ;;  %v1699_v27 = vperm.slane %v1693_v12, %v12598_v45  ;;  %v1553_v37 = vsel %vm812_vm2, %v1552_v17, %v13601_v44 }
 0x2c3   : > { %v13667_v29 = vsel %vm2043_vm4, %v17883_v62, %v2231_v53  ;;  %2321 = vst [vmem:[#allocation2 + $0x78] sm:$0xff] %v13662_v50  ;;  %v17885_v51 = vrot.slane %v13430_v32, 7  ;;  %v2237_v0 = vrot.slane %v13656_v43, 7  ;;  %v13686_v20 = vpack.c.bf16 %v2412_v2, %v13586_v28 }
 0x2c4   : > { %v2850_v1 = vpop.f32.mrf.mxu0  ;;  %2319 = vst [vmem:[#allocation2 + $0x58] sm:$0x1] %v2222_v21  ;;  %v1770_v12 = vrot.slane %v13624_v55, 4  ;;  %v1778_v38 = vrot.slane %v13630_v22, 4  ;;  %v17886_v32 = vrot.slane %v13601_v44, 4  ;;  %v1754_v11 = vrot.slane %v1703_v14, 4 }
 0x2c5   : > { %v17884_v1 = vrot.slane %v13453_v58, 7  ;;  %v13682_v33 = vsel %vm2043_vm4, %v17885_v51, %v2228_v35  ;;  %v1704_v58 = vrot.slane %v1329_v15, 4  ;;  %v12158_v28 = vunpack.c.l.bf16 %v12278_v57  ;;  %2325 = vst [vmem:[#allocation2 + $0xb8] sm:$0x1] %v2228_v35 }
 0x2c6   : > { %v1555_v13 = vsel %vm812_vm2, %v1539_v23, %v17886_v32  ;;  %2324 = vst [vmem:[#allocation2 + $0xa8] sm:$0xff] %v13682_v33  ;;  %v1707_v26 = vsel %vm812_vm2, %v1329_v15, %v1706_v36  ;;  %v17887_v43 = vrot.slane %v13434_v56, 7  ;;  %v2240_v25 = vrot.slane %v1553_v37, 7 }
 0x2c7   : > { %v13677_v59 = vsel %vm2043_vm4, %v17884_v1, %v2222_v21  ;;  %v1705_v21 = vsel %vm812_vm2, %v1704_v58, %v1301_v49  ;;  %v1715_v48 = vperm.slane %v1707_v26, %v12598_v45  ;;  %v1766_v44 = vrot.slane %v13640_v47, 4  ;;  %2327 = vst [vmem:[#allocation2 + $0xd8] sm:$0xff] %v13667_v29 }
 0x2c8   : > { %2318 = vst [vmem:[#allocation2 + $0x48] sm:$0xff] %v13677_v59  ;;  %v13703_v2 = vsel %vm2043_vm4, %v17887_v43, %v2234_v5  ;;  %v17888_v23 = vrot.slane %v13416_v63, 7  ;;  %v1742_v15 = vrot.slane %v1699_v27, 4  ;;  %v1711_v56 = vperm.slane %v1705_v21, %v12598_v45 }
 0x2c9   : > { %v2243_v36 = vrot.slane %v1555_v13, 7  ;;  %2328 = vst [vmem:[#allocation2 + $0xe8] sm:$0x1] %v2231_v53  ;;  %v12159_v35 = vunpack.c.h.bf16 %v12278_v57  ;;  %v1752_v49 = vrot.slane %v1715_v48, 4  ;;  %v1755_v37 = vsel %vm812_vm2, %v1715_v48, %v1754_v11 }
 0x2ca   : > { %v13711_v62 = vsel %vm2043_vm4, %v17888_v23, %v2237_v0  ;;  %v1774_v1 = vrot.slane %v13643_v42, 4  ;;  %2330 = vst [vmem:[#allocation2 + $0x108] sm:$0xff] %v13703_v2  ;;  %v1740_v63 = vrot.slane %v1711_v56, 4  ;;  %v1743_v51 = vsel %vm812_vm2, %v1711_v56, %v1742_v15 }
 0x2cb   : > { %v1763_v58 = vperm.slane %v1755_v37, %v12615_v6  ;;  %v17889_v32 = vrot.slane %v13444_v30, 7  ;;  %2331 = vst [vmem:[#allocation2 + $0x118] sm:$0x1] %v2234_v5  ;;  %v2065_v53 = vrot.slane %v12158_v28, 7  ;;  %v1751_v57 = vperm.slane %v1743_v51, %v12615_v6 }
 0x2cc   : > { %v13693_v17 = vpop.f32.mrf.mxu0  ;;  %v1753_v13 = vsel %vm812_vm2, %v1752_v49, %v1703_v14  ;;  %2333 = vst [vmem:[#allocation2 + $0x138] sm:$0xff] %v13711_v62  ;;  %v1741_v11 = vsel %vm812_vm2, %v1740_v63, %v1699_v27  ;;  %v17890_v30 = vrot.slane %v13401_v41, 7  ;;  %v2066_v5 = vrot.slane %v12159_v35, 7  ;;  %v13752_v49 = vpop.f32.mrf.mxu3 }
 0x2cd   : > { %v13724_v45 = vsel %vm2043_vm4, %v17889_v32, %v2240_v25  ;;  %v1759_v26 = vperm.slane %v1753_v13, %v12615_v6  ;;  %v1776_v43 = vrot.slane %v1763_v58, 4  ;;  %v13732_v21 = vsel %vm812_vm2, %v1763_v58, %v1778_v38  ;;  %2334 = vst [vmem:[#allocation2 + $0x148] sm:$0x1] %v2237_v0 }
 0x2ce   : > { %v13737_v48 = vsel %vm2043_vm4, %v17890_v30, %v2243_v36  ;;  %v1747_v28 = vperm.slane %v1741_v11, %v12615_v6  ;;  %v1768_v14 = vrot.slane %v1751_v57, 4  ;;  %2336 = vst [vmem:[#allocation2 + $0x168] sm:$0xff] %v13724_v45  ;;  %v2267_v41 = vrot.slane %v13732_v21, 7 }
 0x2cf   : > { %2886 = vmatmul.bf16.gmra.mxu0 %v13686_v20  ;;  %v1772_v27 = vrot.slane %v1759_v26, 4  ;;  %v1775_v15 = vsel %vm812_vm2, %v1759_v26, %v1774_v1  ;;  %v13746_v38 = vsel %vm812_vm2, %v1776_v43, %v13630_v22  ;;  %2337 = vst [vmem:[#allocation2 + $0x178] sm:$0x1] %v2240_v25  ;;  %v1771_v37 = vsel %vm812_vm2, %v1751_v57, %v1770_v12  ;;  %v2377_v25 = vld [vmem:[#allocation2 + $0x58] sm:$0xff] }
 0x2d0   : > { %v1764_v56 = vrot.slane %v1747_v28, 4  ;;  %v1767_v0 = vsel %vm812_vm2, %v1747_v28, %v1766_v44  ;;  %v1769_v6 = vsel %vm812_vm2, %v1768_v14, %v13624_v55  ;;  %v2261_v35 = vrot.slane %v1775_v15, 7  ;;  %2339 = vst [vmem:[#allocation2 + $0x198] sm:$0xff] %v13737_v48  ;;  %3119 = vmatmul.bf16.gmra.mxu2 %v13686_v20 }
 0x2d1   : > { %v1773_v22 = vsel %vm812_vm2, %v1772_v27, %v13643_v42  ;;  %v2249_v1 = vrot.slane %v1767_v0, 7  ;;  %2340 = vst [vmem:[#allocation2 + $0x1a8] sm:$0x1] %v2243_v36  ;;  %v17891_v55 = vrot.slane %v13519_v16, 7  ;;  %v2264_v58 = vrot.slane %v13746_v38, 7  ;;  %v12280_v0 = vld [vmem:[%s12994_s21 + $0x48] sm:$0xff]  }
 0x2d2   : > { %v1765_v44 = vsel %vm812_vm2, %v1764_v56, %v13640_v47  ;;  %v2258_v63 = vrot.slane %v1773_v22, 7  ;;  %v2067_v32 = vsel %vm2043_vm4, %v2065_v53, %v2066_v5  ;;  %2162 = vst [vmem:[#allocation2 + $0x180] sm:$0xfe] %v2065_v53  ;;  %v2252_v57 = vrot.slane %v1769_v6, 7  ;;  %v2379_v22 = vld [vmem:[#allocation2 + $0x68] sm:$0xff] }
 0x2d3   : > { %v13764_v51 = vsel %vm2043_vm4, %v17891_v55, %v2261_v35  ;;  %v2246_v12 = vrot.slane %v1765_v44, 7  ;;  %v17892_v42 = vrot.slane %v13538_v9, 7  ;;  %2163 = vst [vmem:[#allocation2 + $0x190] sm:$0xff] %v2067_v32  ;;  %v17893_v47 = vrot.slane %v13535_v7, 7 }
 0x2d4   : > { %v13740_v23 = vpop.f32.mrf.mxu0  ;;  %v17894_v13 = vrot.slane %v13523_v31, 7  ;;  %v13782_v53 = vpack.c.bf16 %v2377_v25, %v13677_v59  ;;  %2164 = vst [vmem:[#allocation2 + $0x1a0] sm:$0x1] %v2066_v5  ;;  %v17895_v26 = vrot.slane %v13531_v60, 7  ;;  %v17896_v43 = vrot.slane %v13510_v3, 7  ;;  %v13803_v3 = vpop.f32.mrf.mxu3 }
 0x2d5   : > { %v2268_v36 = vsel %vm2043_vm4, %v17892_v42, %v2267_v41  ;;  %v13776_v16 = vsel %vm2043_vm4, %v17893_v47, %v2258_v63  ;;  %v2255_v30 = vrot.slane %v1771_v37, 7  ;;  %v17897_v59 = vrot.slane %v13514_v18, 7  ;;  %2343 = vst [vmem:[#allocation2 + $0x1d8] sm:$0x1] %v2246_v12  ;;  %v12279_v18 = vld [vmem:[%s12994_s21 + $0x40] sm:$0xff]  }
 0x2d6   : > { %v2265_v11 = vsel %vm2043_vm4, %v17894_v13, %v2264_v58  ;;  %v13787_v9 = vsel %vm2043_vm4, %v17895_v26, %v2246_v12  ;;  %v13792_v7 = vsel %vm2043_vm4, %v17896_v43, %v2249_v1  ;;  %2960 = vmatmul.bf16.gmra.mxu1 %v13782_v53  ;;  %3203 = vmatmul.bf16.gmra.mxu3 %v13782_v53  ;;  %v17898_v5 = vrot.slane %v13501_v39, 7  ;;  %v11935_v47 = vld [vmem:[%s17705_s6 + $0xb8] sm:$0xf0]  ;;  %v2383_v13 = vld [vmem:[#allocation2 + $0x88] sm:$0xff]  ;;  %v11079_v26 = vld [vmem:[%s17705_s6 + $0x170] sm:$0xf] }
 0x2d7   : > { %2342 = vst [vmem:[#allocation2 + $0x1c8] sm:$0xff] %v13787_v9  ;;  %v13800_v60 = vsel %vm2043_vm4, %v17897_v59, %v2252_v57  ;;  %v12162_v39 = vunpack.c.l.bf16 %v12279_v18  ;;  %v12163_v38 = vunpack.c.h.bf16 %v12279_v18  ;;  %v12166_v37 = vunpack.c.l.bf16 %v12280_v0  ;;  %v11959_v43 = vld [vmem:[%s17705_s6 + $0x178] sm:$0xf0] }
 0x2d8   : > { %2345 = vst [vmem:[#allocation2 + $0x1f8] sm:$0xff] %v13792_v7  ;;  %v13808_v28 = vsel %vm2043_vm4, %v17898_v5, %v2255_v30  ;;  %v13825_v25 = vpack.c.bf16 %v13662_v50, %v2379_v22  ;;  %v12167_v55 = vunpack.c.h.bf16 %v12280_v0  ;;  %v2385_v5 = vld [vmem:[#allocation2 + $0x98] sm:$0xff] }
 0x2d9   : > { %2346 = vst [vmem:[#allocation2 + $0x208] sm:$0x1] %v2249_v1  ;;  %v2414_v14 = vld [vmem:[#allocation2 + $0x180] sm:$0xff]  ;;  %v2068_v6 = vrot.slane %v12162_v39, 7  ;;  %v2069_v1 = vrot.slane %v12163_v38, 7  ;;  %v2071_v44 = vrot.slane %v12166_v37, 7 }
 0x2da   : > { %2348 = vst [vmem:[#allocation2 + $0x228] sm:$0xff] %v13800_v60  ;;  %v13811_v27 = vpack.c.bf16 %v2067_v32, %v2414_v14  ;;  %v2072_v50 = vrot.slane %v12167_v55, 7  ;;  %v13856_v14 = vpack.c.bf16 %v2385_v5, %v2383_v13  ;;  %v2391_v13 = vld [vmem:[#allocation2 + $0xc8] sm:$0xff] }
 0x2db   : > { %2349 = vst [vmem:[#allocation2 + $0x238] sm:$0x1] %v2252_v57  ;;  %v2418_v32 = vld [vmem:[#allocation2 + $0x1a0] sm:$0xff] }
 0x2dc   : > { %v2857_v31 = vpop.f32.mrf.mxu0  ;;  %2351 = vst [vmem:[#allocation2 + $0x258] sm:$0xff] %v13808_v28  ;;  %v13820_v56 = vpop.f32.mrf.mxu3  ;;  %v2073_v21 = vsel %vm2043_vm4, %v2071_v44, %v2072_v50 }
 0x2dd   : > { %2352 = vst [vmem:[#allocation2 + $0x268] sm:$0x1] %v2255_v30  ;;  %v12281_v30 = vld [vmem:[%s12994_s21 + $0x50] sm:$0xff]   ;;  %v11080_v31 = vor.u32 %v11959_v43, %v11079_v26 }
 0x2de   : > { %2354 = vst [vmem:[#allocation2 + $0x288] sm:$0xff] %v13776_v16  ;;  %v12170_v59 = vunpack.c.l.bf16 %v12281_v30 }
 0x2df   : > { %2890 = vmatmul.bf16.gmra.mxu0 %v13811_v27  ;;  %2355 = vst [vmem:[#allocation2 + $0x298] sm:$0x1] %v2258_v63  ;;  %v2070_v63 = vsel %vm2043_vm4, %v2068_v6, %v2069_v1  ;;  %3443 = vmatpush.bf16.msrb.mxu1 %v11080_v31 }
 0x2e0   : > { %2357 = vst [vmem:[#allocation2 + $0x2b8] sm:$0xff] %v13764_v51  ;;  %v2074_v18 = vrot.slane %v12170_v59, 7 }
 0x2e1   : > { %2358 = vst [vmem:[#allocation2 + $0x2c8] sm:$0x1] %v2261_v35 }
 0x2e2   : > { %2360 = vst [vmem:[#allocation2 + $0x2e8] sm:$0xff] %v2265_v11 }
 0x2e3   : > { %2361 = vst [vmem:[#allocation2 + $0x2f8] sm:$0x1] %v2264_v58 }
 0x2e4   : > { %v13817_v15 = vpop.f32.mrf.mxu0  ;;  %2363 = vst [vmem:[#allocation2 + $0x318] sm:$0xff] %v2268_v36  ;;  %v13834_v58 = vpop.f32.mrf.mxu3  ;;  %v10983_v36 = vld [vmem:[%s17705_s6 + $0xb0] sm:$0xf] }
 0x2e5   : > { %2364 = vst [vmem:[#allocation2 + $0x328] sm:$0x1] %v2267_v41  ;;  %v10984_v11 = vor.u32 %v11935_v47, %v10983_v36 }
 0x2e6   : > { %2165 = vst [vmem:[#allocation2 + $0x1b0] sm:$0xfe] %v2068_v6  ;;  %2964 = vmatmul.bf16.gmra.mxu1 %v13825_v25  ;;  %3208 = vmatmul.bf16.gmra.mxu3 %v13825_v25 }
 0x2e7   : > { %2166 = vst [vmem:[#allocation2 + $0x1c0] sm:$0xff] %v2070_v63  ;;  %3314 = vmatpush.bf16.msrb.mxu0 %v10984_v11  ;;  %v13887_v11 = vpack.c.bf16 %v13667_v29, %v2391_v13  ;;  %v10971_v29 = vld [vmem:[%s17705_s6 + $0x98] sm:$0xf] }
 0x2e8   : > { %2167 = vst [vmem:[#allocation2 + $0x1d0] sm:$0x1] %v2069_v1  ;;  %v2389_v1 = vld [vmem:[#allocation2 + $0xb8] sm:$0xff] }
 0x2e9   : > { %2168 = vst [vmem:[#allocation2 + $0x1e0] sm:$0xfe] %v2071_v44  ;;  %v12171_v44 = vunpack.c.h.bf16 %v12281_v30  ;;  %v13872_v55 = vpack.c.bf16 %v2389_v1, %v13682_v33  ;;  %v11067_v1 = vld [vmem:[%s17705_s6 + $0x158] sm:$0xf] }
 0x2ea   : > { %2170 = vst [vmem:[#allocation2 + $0x200] sm:$0x1] %v2072_v50  ;;  %v2397_v13 = vld [vmem:[#allocation2 + $0xf8] sm:$0xff] }
 0x2eb   : > { %2169 = vst [vmem:[#allocation2 + $0x1f0] sm:$0xff] %v2073_v21  ;;  %v2075_v50 = vrot.slane %v12171_v44, 7 }
 0x2ec   : > { %v13832_v35 = vpop.f32.mrf.mxu0  ;;  %v13840_v42 = vpop.f32.mrf.mxu3  ;;  %2171 = vst [vmem:[#allocation2 + $0x210] sm:$0xfe] %v2074_v18 }
 0x2ed   : > { %v2420_v41 = vld [vmem:[#allocation2 + $0x1b0] sm:$0xff]  ;;  %2173 = vst [vmem:[#allocation2 + $0x230] sm:$0x1] %v2075_v50 }
 0x2ee   : > { %v13837_v12 = vpack.c.bf16 %v2420_v41, %v2418_v32  ;;  %17901 = vst [vmem:[#allocation29_spill] sm:$0xff] %v13887_v11 }
 0x2ef   : > { %v2424_v0 = vld [vmem:[#allocation2 + $0x1d0] sm:$0xff] }
 0x2f0   : > { %2895 = vmatmul.bf16.gmra.mxu0 %v13837_v12  ;;  %v13864_v6 = vpack.c.bf16 %v2424_v0, %v2070_v63  ;;  %v2076_v63 = vsel %vm2043_vm4, %v2074_v18, %v2075_v50  ;;  %v11932_v0 = vld [vmem:[%s17705_s6 + $0xa0] sm:$0xf0] }
 0x2f1   : > { %2172 = vst [vmem:[#allocation2 + $0x220] sm:$0xff] %v2076_v63  ;;  %v10972_v44 = vor.u32 %v11932_v0, %v10971_v29  ;;  %v11956_v50 = vld [vmem:[%s17705_s6 + $0x160] sm:$0xf0] }
 0x2f3   : > { %v2432_v30 = vld [vmem:[#allocation2 + $0x210] sm:$0xff]  ;;  %3315 = vmatpush.bf16.msrb.mxu0 %v10972_v44 }
 0x2f4   : > { %v2863_v57 = vpop.f32.mrf.mxu0  ;;  %v13862_v38 = vpop.f32.mrf.mxu3  ;;  %v2436_v29 = vld [vmem:[#allocation2 + $0x230] sm:$0xff] }
 0x2f5   : > { %v2426_v57 = vld [vmem:[#allocation2 + $0x1e0] sm:$0xff] }
 0x2f6   : > { %2969 = vmatmul.bf16.gmra.mxu1 %v13856_v14  ;;  %3213 = vmatmul.bf16.gmra.mxu3 %v13856_v14  ;;  %v13879_v36 = vpack.c.bf16 %v2073_v21, %v2426_v57  ;;  %v2430_v21 = vld [vmem:[#allocation2 + $0x200] sm:$0xff]  ;;  %v11068_v57 = vor.u32 %v11956_v50, %v11067_v1 }
 0x2f7   : > { %v13895_v31 = vpack.c.bf16 %v2432_v30, %v2430_v21  ;;  %v3065_v30 = vpop.f32.mrf.mxu2 }
 0x2f8   : > { %3444 = vmatpush.bf16.msrb.mxu1 %v11068_v57 }
 0x2fc   : > { %v13860_v39 = vpop.f32.mrf.mxu0  ;;  %v13869_v22 = vpop.f32.mrf.mxu3 }
 0x2ff   : > { %v3067_v44 = vpop.f32.mrf.mxu2  ;;  %3124 = vmatmul.bf16.gmra.mxu2 %v13811_v27 }
 0x300   : > { %2899 = vmatmul.bf16.gmra.mxu0 %v13864_v6 }
 0x304   : > { %v13866_v37 = vpop.f32.mrf.mxu0  ;;  %v13877_v41 = vpop.f32.mrf.mxu3 }
 0x305   : > { %17899 = vst [vmem:[#allocation27_spill] sm:$0xff] %v13877_v41 }
 0x306   : > { %2973 = vmatmul.bf16.gmra.mxu1 %v13872_v55  ;;  %3218 = vmatmul.bf16.gmra.mxu3 %v13872_v55 }
 0x30c   : > { %v2870_v32 = vpop.f32.mrf.mxu0  ;;  %v13884_v33 = vpop.f32.mrf.mxu3 }
 0x30d   : > { %17900 = vst [vmem:[#allocation28_spill] sm:$0xff] %v13884_v33  ;;  %v2395_v32 = vld [vmem:[#allocation2 + $0xe8] sm:$0xff]  ;;  %v13920_v33 = vpack.c.bf16 %v2436_v29, %v2076_v63 }
 0x30e   : > { %v13912_v21 = vpack.c.bf16 %v2397_v13, %v2395_v32  ;;  %v2401_v32 = vld [vmem:[#allocation2 + $0x118] sm:$0xff] }
 0x310   : > { %2903 = vmatmul.bf16.gmra.mxu0 %v13879_v36  ;;  %17904 = vst [vmem:[#allocation32_spill] sm:$0xff] %v13912_v21 }
 0x314   : > { %v13881_v47 = vpop.f32.mrf.mxu0  ;;  %v13893_v43 = vpop.f32.mrf.mxu3 }
 0x315   : > { %17902 = vst [vmem:[#allocation30_spill] sm:$0xff] %v13893_v43 }
 0x316   : > { %2977 = vmatmul.bf16.gmra.mxu1 %v13887_v11  ;;  %3223 = vmatmul.bf16.gmra.mxu3 %v13887_v11  ;;  %v3070_v11 = vpop.f32.mrf.mxu2 }
 0x31b   : > { %v2952_v5 = vpop.f32.mrf.mxu1 }
 0x31c   : > { %v13891_v26 = vpop.f32.mrf.mxu0  ;;  %v13898_v18 = vpop.f32.mrf.mxu3  ;;  %v2953_v63 = vadd.f32 %v2952_v5, %v13357_v46  ;;  %v2403_v5 = vld [vmem:[#allocation2 + $0x128] sm:$0xff] }
 0x31d   : > { %17903 = vst [vmem:[#allocation31_spill] sm:$0xff] %v13898_v18 }
 0x31e   : > { %v3072_v46 = vpop.f32.mrf.mxu2  ;;  %3129 = vmatmul.bf16.gmra.mxu2 %v13837_v12 }
 0x320   : > { %2908 = vmatmul.bf16.gmra.mxu0 %v13895_v31 }
 0x323   : > { %v13918_v18 = vpop.f32.mrf.mxu1 }
 0x324   : > { %v2876_v59 = vpop.f32.mrf.mxu0  ;;  %17905 = vst [vmem:[#allocation33_spill] sm:$0xff] %v13918_v18  ;;  %v13927_v18 = vpack.c.bf16 %v2401_v32, %v13703_v2 }
 0x325   : > { %v3194_v0 = vpop.f32.mrf.mxu3 }
 0x326   : > { %2982 = vmatmul.bf16.gmra.mxu1 %v13912_v21  ;;  %3228 = vmatmul.bf16.gmra.mxu3 %v13912_v21  ;;  %v3195_v43 = vadd.f32 %v3194_v0, %v3065_v30  ;;  %17906 = vst [vmem:[#allocation34_spill] sm:$0xff] %v13927_v18 }
 0x328   : > { %v3653_v57 = vrot.slane %v3195_v43, 1 }
 0x32c   : > { %v13916_v59 = vpop.f32.mrf.mxu0 }
 0x32d   : > { %v3196_v50 = vpop.f32.mrf.mxu3 }
 0x32e   : > { %v3197_v21 = vadd.f32 %v3196_v50, %v3067_v44  ;;  %v13943_v50 = vpack.c.bf16 %v13711_v62, %v2403_v5  ;;  %v11929_v62 = vld [vmem:[%s17705_s6 + $0x88] sm:$0xf0] }
 0x330   : > { %2912 = vmatmul.bf16.gmra.mxu0 %v13920_v33  ;;  %v2957_v13 = vpop.f32.mrf.mxu1  ;;  %v3654_v41 = vrot.slane %v3197_v21, 1  ;;  %17909 = vst [vmem:[#allocation37_spill] sm:$0xff] %v13943_v50 }
 0x332   : > { %v3655_v30 = vsel %vm3652_vm5, %v3653_v57, %v3654_v41  ;;  %v10959_v57 = vld [vmem:[%s17705_s6 + $0x80] sm:$0xf] }
 0x333   : > { %v13933_v0 = vadd.f32 %v3655_v30, %v2953_v63  ;;  %v11055_v63 = vld [vmem:[%s17705_s6 + $0x140] sm:$0xf] }
 0x334   : > { %v13922_v1 = vpop.f32.mrf.mxu0 }
 0x335   : > { %17907 = vst [vmem:[#allocation35_spill] sm:$0xff] %v13933_v0 }
 0x336   : > { %2986 = vmatmul.bf16.gmra.mxu1 %v13927_v18  ;;  %3233 = vmatmul.bf16.gmra.mxu3 %v13927_v18  ;;  %v3199_v43 = vpop.f32.mrf.mxu3 }
 0x337   : > { %v3200_v13 = vadd.f32 %v3199_v43, %v3070_v11  ;;  %v11953_v43 = vld [vmem:[%s17705_s6 + $0x148] sm:$0xf0] }
 0x338   : > { %v13949_v32 = vpop.f32.mrf.mxu1 }
 0x339   : > { %v3656_v44 = vrot.slane %v3200_v13, 1  ;;  %17910 = vst [vmem:[#allocation38_spill] sm:$0xff] %v13949_v32  ;;  %v2407_v13 = vld [vmem:[#allocation2 + $0x148] sm:$0xff] }
 0x33b   : > { %v13936_v21 = vsel %vm3652_vm5, %v3654_v41, %v3656_v44  ;;  %v11056_v44 = vor.u32 %v11953_v43, %v11055_v63 }
 0x33c   : > { %v2883_v29 = vpop.f32.mrf.mxu0  ;;  %17908 = vst [vmem:[#allocation36_spill] sm:$0xff] %v13936_v21 }
 0x33d   : > { %v10960_v29 = vor.u32 %v11929_v62, %v10959_v57  ;;  %3445 = vmatpush.bf16.msrb.mxu1 %v11056_v44 }
 0x33e   : > { %v3201_v30 = vpop.f32.mrf.mxu3 }
 0x33f   : > { %3316 = vmatpush.bf16.msrb.mxu0 %v10960_v29  ;;  %v3202_v21 = vadd.f32 %v3201_v30, %v3072_v46 }
 0x340   : > { %2916 = vmatmul.bf16.gmra.mxu0 %v13083_v54 }
 0x341   : > { %v3658_v54 = vrot.slane %v3202_v21, 1 }
 0x344   : > { %v13938_v2 = vpop.f32.mrf.mxu0 }
 0x346   : > { %2990 = vmatmul.bf16.gmra.mxu1 %v13943_v50  ;;  %3238 = vmatmul.bf16.gmra.mxu3 %v13943_v50 }
 0x34c   : > { %v13947_v11 = vpop.f32.mrf.mxu0 }
 0x350   : > { %2921 = vmatmul.bf16.gmra.mxu0 %v13094_v4  ;;  %v3075_v4 = vpop.f32.mrf.mxu2 }
 0x353   : > { %v2961_v5 = vpop.f32.mrf.mxu1 }
 0x354   : > { %v2889_v41 = vpop.f32.mrf.mxu0 }
 0x355   : > { %v2409_v41 = vld [vmem:[#allocation2 + $0x158] sm:$0xff] }
 0x356   : > { %v13964_v32 = vpack.c.bf16 %v2409_v41, %v2407_v13  ;;  %v2413_v13 = vld [vmem:[#allocation2 + $0x178] sm:$0xff] }
 0x358   : > { %2995 = vmatmul.bf16.gmra.mxu1 %v13964_v32  ;;  %3243 = vmatmul.bf16.gmra.mxu3 %v13964_v32  ;;  %v3077_v63 = vpop.f32.mrf.mxu2 }
 0x359   : > { %v3204_v50 = vpop.f32.mrf.mxu3  ;;  %3134 = vmatmul.bf16.gmra.mxu2 %v13864_v6 }
 0x35a   : > { %v3205_v62 = vadd.f32 %v3204_v50, %v3075_v4  ;;  %v13978_v4 = vpack.c.bf16 %v2413_v13, %v13724_v45  ;;  %v11926_v45 = vld [vmem:[%s17705_s6 + $0x70] sm:$0xf0] }
 0x35b   : > { %v2963_v0 = vpop.f32.mrf.mxu1 }
 0x35c   : > { %v13968_v57 = vpop.f32.mrf.mxu0  ;;  %v3659_v18 = vrot.slane %v3205_v62, 1  ;;  %17911 = vst [vmem:[#allocation39_spill] sm:$0xff] %v13978_v4  ;;  %v2962_v0 = vadd.f32 %v2961_v5, %v13609_v40 }
 0x35e   : > { %v13972_v29 = vsel %vm3652_vm5, %v3658_v54, %v3659_v18 }
 0x360   : > { %2925 = vmatmul.bf16.gmra.mxu0 %v13110_v8  ;;  %v3080_v21 = vpop.f32.mrf.mxu2 }
 0x361   : > { %v3206_v43 = vpop.f32.mrf.mxu3 }
 0x362   : > { %v3207_v44 = vadd.f32 %v3206_v43, %v3077_v63  ;;  %v10947_v43 = vld [vmem:[%s17705_s6 + $0x68] sm:$0xf] }
 0x363   : > { %v2965_v46 = vpop.f32.mrf.mxu1  ;;  %v10948_v5 = vor.u32 %v11926_v45, %v10947_v43  ;;  %v11920_v43 = vld [vmem:[%s17705_s6 + $0x40] sm:$0xf0] }
 0x364   : > { %v13975_v41 = vpop.f32.mrf.mxu0  ;;  %v3661_v30 = vrot.slane %v3207_v44, 1  ;;  %v10935_v44 = vld [vmem:[%s17705_s6 + $0x50] sm:$0xf] }
 0x365   : > { %3317 = vmatpush.bf16.msrb.mxu0 %v10948_v5  ;;  %v2415_v5 = vld [vmem:[#allocation2 + $0x188] sm:$0xff] }
 0x366   : > { %v3662_v50 = vsel %vm3652_vm5, %v3659_v18, %v3661_v30  ;;  %v11923_v30 = vld [vmem:[%s17705_s6 + $0x58] sm:$0xf0] }
 0x367   : > { %v13984_v54 = vadd.f32 %v3662_v50, %v2962_v0  ;;  %v10936_v0 = vor.u32 %v11923_v30, %v10935_v44  ;;  %v14007_v44 = vpack.c.bf16 %v13737_v48, %v2415_v5 }
 0x368   : > { %2999 = vmatmul.bf16.gmra.mxu1 %v13978_v4  ;;  %3248 = vmatmul.bf16.gmra.mxu3 %v13978_v4  ;;  %v3082_v18 = vpop.f32.mrf.mxu2 }
 0x369   : > { %17912 = vst [vmem:[#allocation40_spill] sm:$0xff] %v13984_v54  ;;  %v3209_v62 = vpop.f32.mrf.mxu3  ;;  %3139 = vmatmul.bf16.gmra.mxu2 %v13879_v36  ;;  %3318 = vmatpush.bf16.msrb.mxu0 %v10936_v0 }
 0x36a   : > { %v3210_v63 = vadd.f32 %v3209_v62, %v3080_v21  ;;  %v10923_v62 = vld [vmem:[%s17705_s6 + $0x38] sm:$0xf]  ;;  %17913 = vst [vmem:[#allocation41_spill] sm:$0xff] %v14007_v44 }
 0x36b   : > { %v2967_v40 = vpop.f32.mrf.mxu1 }
 0x36c   : > { %v3663_v4 = vrot.slane %v3210_v63, 1 }
 0x36d   : > { %v2896_v13 = vpop.f32.mrf.mxu0 }
 0x36e   : > { %v10924_v13 = vor.u32 %v11920_v43, %v10923_v62  ;;  %v10899_v62 = vld [vmem:[%s17705_s6 + $0x8] sm:$0xf]  ;;  %v11914_v43 = vld [vmem:[%s17705_s6 + $0x10] sm:$0xf0] }
 0x370   : > { %2929 = vmatmul.bf16.gmra.mxu0 %v13125_v34  ;;  %v3085_v0 = vpop.f32.mrf.mxu2 }
 0x371   : > { %v3211_v21 = vpop.f32.mrf.mxu3  ;;  %3319 = vmatpush.bf16.msrb.mxu0 %v10924_v13 }
 0x372   : > { %v3212_v50 = vadd.f32 %v3211_v21, %v3082_v18  ;;  %v2966_v18 = vadd.f32 %v2965_v46, %v13693_v17  ;;  %v10911_v21 = vld [vmem:[%s17705_s6 + $0x20] sm:$0xf] }
 0x373   : > { %v2970_v45 = vpop.f32.mrf.mxu1 }
 0x374   : > { %v3664_v54 = vrot.slane %v3212_v50, 1  ;;  %v11917_v45 = vld [vmem:[%s17705_s6 + $0x28] sm:$0xf0] }
 0x375   : > { %v14009_v30 = vpop.f32.mrf.mxu0  ;;  %v10912_v48 = vor.u32 %v11917_v45, %v10911_v21  ;;  %v2968_v21 = vadd.f32 %v2967_v40, %v13740_v23  ;;  %v2419_v40 = vld [vmem:[#allocation2 + $0x1a8] sm:$0xff] }
 0x376   : > { %v3665_v63 = vsel %vm3652_vm5, %v3663_v4, %v3664_v54  ;;  %v10900_v4 = vor.u32 %v11914_v43, %v10899_v62  ;;  %v2421_v43 = vld [vmem:[#allocation2 + $0x1b8] sm:$0xff] }
 0x377   : > { %v14021_v50 = vadd.f32 %v3665_v63, %v2966_v18  ;;  %3320 = vmatpush.bf16.msrb.mxu0 %v10912_v48  ;;  %v11043_v63 = vld [vmem:[%s17705_s6 + $0x128] sm:$0xf]  ;;  %v11950_v48 = vld [vmem:[%s17705_s6 + $0x130] sm:$0xf0] }
 0x378   : > { %3003 = vmatmul.bf16.gmra.mxu1 %v14007_v44  ;;  %3253 = vmatmul.bf16.gmra.mxu3 %v14007_v44  ;;  %v3087_v18 = vpop.f32.mrf.mxu2  ;;  %v11044_v23 = vor.u32 %v11950_v48, %v11043_v63 }
 0x379   : > { %17914 = vst [vmem:[#allocation42_spill] sm:$0xff] %v14021_v50  ;;  %v3214_v17 = vpop.f32.mrf.mxu3  ;;  %3144 = vmatmul.bf16.gmra.mxu2 %v13895_v31 }
 0x37a   : > { %v3215_v46 = vadd.f32 %v3214_v17, %v3085_v0  ;;  %3446 = vmatpush.bf16.msrb.mxu1 %v11044_v23  ;;  %v17918_v23 = vld [vmem:[#allocation22_spill] sm:$0xff] }
 0x37b   : > { %v2971_v5 = vpop.f32.mrf.mxu1  ;;  %3321 = vmatpush.bf16.msrb.mxu0 %v10900_v4 }
 0x37c   : > { %v3666_v13 = vrot.slane %v3215_v46, 1 }
 0x37d   : > { %v14029_v34 = vpop.f32.mrf.mxu0 }
 0x37e   : > { %v3667_v0 = vsel %vm3652_vm5, %v3664_v54, %v3666_v13  ;;  %v14043_v54 = vpack.c.bf16 %v2421_v43, %v2419_v40  ;;  %v2425_v43 = vld [vmem:[#allocation2 + $0x1d8] sm:$0xff] }
 0x37f   : > { %v14034_v45 = vadd.f32 %v3667_v0, %v2968_v21 }
 0x380   : > { %2934 = vmatmul.bf16.gmra.mxu0 %v13190_v24  ;;  %17916 = vst [vmem:[#allocation44_spill] sm:$0xff] %v14043_v54  ;;  %v3090_v13 = vpop.f32.mrf.mxu2 }
 0x381   : > { %17915 = vst [vmem:[#allocation43_spill] sm:$0xff] %v14034_v45  ;;  %v3216_v17 = vpop.f32.mrf.mxu3 }
 0x382   : > { %v3217_v46 = vadd.f32 %v3216_v17, %v3087_v18  ;;  %v2972_v18 = vadd.f32 %v2971_v5, %v13817_v15 }
 0x383   : > { %v2974_v62 = vpop.f32.mrf.mxu1 }
 0x384   : > { %v3668_v45 = vrot.slane %v3217_v46, 1  ;;  %v14056_v46 = vpack.c.bf16 %v2425_v43, %v13787_v9  ;;  %v2975_v15 = vadd.f32 %v2974_v62, %v13832_v35  ;;  %v17920_v9 = vld [vmem:[#allocation10_spill] sm:$0xff]  ;;  %v2427_v35 = vld [vmem:[#allocation2 + $0x1e8] sm:$0xff] }
 0x385   : > { %v2902_v4 = vpop.f32.mrf.mxu0 }
 0x386   : > { %17919 = vst [vmem:[#allocation46_spill] sm:$0xff] %v14056_v46 }
 0x388   : > { %3008 = vmatmul.bf16.gmra.mxu1 %v14043_v54  ;;  %3258 = vmatmul.bf16.gmra.mxu3 %v14043_v54  ;;  %v3092_v63 = vpop.f32.mrf.mxu2 }
 0x389   : > { %v3219_v21 = vpop.f32.mrf.mxu3  ;;  %3149 = vmatmul.bf16.gmra.mxu2 %v13920_v33 }
 0x38a   : > { %v3220_v0 = vadd.f32 %v3219_v21, %v3090_v13 }
 0x38b   : > { %v2976_v24 = vpop.f32.mrf.mxu1 }
 0x38c   : > { %v3669_v44 = vrot.slane %v3220_v0, 1 }
 0x38d   : > { %v14047_v50 = vpop.f32.mrf.mxu0 }
 0x38e   : > { %v3670_v48 = vsel %vm3652_vm5, %v3668_v45, %v3669_v44 }
 0x38f   : > { %v14052_v17 = vadd.f32 %v3670_v48, %v2972_v18 }
 0x390   : > { %2938 = vmatmul.bf16.gmra.mxu0 %v17918_v23  ;;  %v3095_v5 = vpop.f32.mrf.mxu2 }
 0x391   : > { %17917 = vst [vmem:[#allocation45_spill] sm:$0xff] %v14052_v17  ;;  %v3221_v40 = vpop.f32.mrf.mxu3 }
 0x392   : > { %v3222_v4 = vadd.f32 %v3221_v40, %v3092_v63 }
 0x393   : > { %v2978_v13 = vpop.f32.mrf.mxu1 }
 0x394   : > { %v3671_v24 = vrot.slane %v3222_v4, 1 }
 0x395   : > { %v14058_v21 = vpop.f32.mrf.mxu0 }
 0x396   : > { %v3672_v0 = vsel %vm3652_vm5, %v3669_v44, %v3671_v24  ;;  %v14068_v44 = vpack.c.bf16 %v13792_v7, %v2427_v35  ;;  %v11031_v35 = vld [vmem:[%s17705_s6 + $0x110] sm:$0xf] }
 0x397   : > { %v14064_v45 = vadd.f32 %v3672_v0, %v2975_v15  ;;  %v2979_v15 = vadd.f32 %v2978_v13, %v13860_v39 }
 0x398   : > { %3012 = vmatmul.bf16.gmra.mxu1 %v14056_v46  ;;  %3263 = vmatmul.bf16.gmra.mxu3 %v14056_v46  ;;  %v3097_v4 = vpop.f32.mrf.mxu2  ;;  %17921 = vst [vmem:[#allocation10_spill] sm:$0xff] %v14068_v44  ;;  %v2437_v46 = vld [vmem:[#allocation2 + $0x238] sm:$0xff] }
 0x399   : > { %v3224_v18 = vpop.f32.mrf.mxu3 }
 0x39a   : > { %v3225_v63 = vadd.f32 %v3224_v18, %v3095_v5 }
 0x39b   : > { %v2980_v48 = vpop.f32.mrf.mxu1 }
 0x39c   : > { %v3673_v62 = vrot.slane %v3225_v63, 1  ;;  %v2981_v7 = vadd.f32 %v2980_v48, %v13866_v37  ;;  %v2433_v37 = vld [vmem:[#allocation2 + $0x218] sm:$0xff] }
 0x39d   : > { %v2909_v40 = vpop.f32.mrf.mxu0 }
 0x3a0   : > { %3322 = vmatmul.bf16.vlgmr.msrb.gmra.mxu0 %v17920_v9  ;;  %v3100_v0 = vpop.f32.mrf.mxu2 }
 0x3a1   : > { %v3226_v43 = vpop.f32.mrf.mxu3 }
 0x3a2   : > { %v3227_v23 = vadd.f32 %v3226_v43, %v3097_v4  ;;  %v17924_v43 = vld [vmem:[#allocation11_spill] sm:$0xff] }
 0x3a3   : > { %v2983_v17 = vpop.f32.mrf.mxu1 }
 0x3a4   : > { %v3674_v54 = vrot.slane %v3227_v23, 1 }
 0x3a5   : > { %v14070_v24 = vpop.f32.mrf.mxu0 }
 0x3a6   : > { %v3675_v5 = vsel %vm3652_vm5, %v3673_v62, %v3674_v54  ;;  %v11947_v62 = vld [vmem:[%s17705_s6 + $0x118] sm:$0xf0] }
 0x3a7   : > { %v14076_v18 = vadd.f32 %v3675_v5, %v2979_v15  ;;  %v2431_v5 = vld [vmem:[#allocation2 + $0x208] sm:$0xff] }
 0x3a8   : > { %3016 = vmatmul.bf16.gmra.mxu1 %v14068_v44  ;;  %3268 = vmatmul.bf16.gmra.mxu3 %v14068_v44  ;;  %v3102_v9 = vpop.f32.mrf.mxu2  ;;  %v14091_v48 = vpack.c.bf16 %v2433_v37, %v2431_v5  ;;  %v17926_v37 = vld [vmem:[#allocation12_spill] sm:$0xff] }
 0x3a9   : > { %17922 = vst [vmem:[#allocation47_spill] sm:$0xff] %v14076_v18  ;;  %v3229_v17 = vpop.f32.mrf.mxu3 }
 0x3aa   : > { %v3230_v40 = vadd.f32 %v3229_v17, %v3100_v0  ;;  %v11032_v0 = vor.u32 %v11947_v62, %v11031_v35  ;;  %17925 = vst [vmem:[#allocation11_spill] sm:$0xff] %v14091_v48 }
 0x3ab   : > { %v2984_v63 = vpop.f32.mrf.mxu1 }
 0x3ac   : > { %v3676_v23 = vrot.slane %v3230_v40, 1  ;;  %3447 = vmatpush.bf16.msrb.mxu1 %v11032_v0  ;;  %v2985_v35 = vadd.f32 %v2984_v63, %v13881_v47 }
 0x3ad   : > { %v14078_v4 = vpop.f32.mrf.mxu0 }
 0x3ae   : > { %v3677_v39 = vsel %vm3652_vm5, %v3674_v54, %v3676_v23 }
 0x3af   : > { %v14082_v13 = vadd.f32 %v3677_v39, %v2981_v7 }
 0x3b0   : > { %3327 = vmatmul.bf16.gmra.mxu0 %v17924_v43  ;;  %v3105_v40 = vpop.f32.mrf.mxu2 }
 0x3b1   : > { %17923 = vst [vmem:[#allocation48_spill] sm:$0xff] %v14082_v13  ;;  %v3231_v15 = vpop.f32.mrf.mxu3 }
 0x3b2   : > { %v3232_v23 = vadd.f32 %v3231_v15, %v3102_v9 }
 0x3b3   : > { %v2987_v17 = vpop.f32.mrf.mxu1 }
 0x3b4   : > { %v3678_v13 = vrot.slane %v3232_v23, 1 }
 0x3b5   : > { %v2915_v54 = vpop.f32.mrf.mxu0 }
 0x3b8   : > { %3021 = vmatmul.bf16.gmra.mxu1 %v14091_v48  ;;  %3273 = vmatmul.bf16.gmra.mxu3 %v14091_v48  ;;  %v3107_v62 = vpop.f32.mrf.mxu2 }
 0x3b9   : > { %v3234_v7 = vpop.f32.mrf.mxu3 }
 0x3ba   : > { %v3235_v39 = vadd.f32 %v3234_v7, %v3105_v40  ;;  %v14103_v40 = vpack.c.bf16 %v2437_v46, %v13800_v60  ;;  %v2988_v7 = vadd.f32 %v2987_v17, %v13891_v26  ;;  %v17928_v60 = vld [vmem:[#allocation14_spill] sm:$0xff]  ;;  %v2439_v26 = vld [vmem:[#allocation2 + $0x248] sm:$0xff] }
 0x3bb   : > { %v2989_v43 = vpop.f32.mrf.mxu1 }
 0x3bc   : > { %v3679_v44 = vrot.slane %v3235_v39, 1  ;;  %17927 = vst [vmem:[#allocation12_spill] sm:$0xff] %v14103_v40 }
 0x3bd   : > { %v14095_v18 = vpop.f32.mrf.mxu0 }
 0x3be   : > { %v3680_v0 = vsel %vm3652_vm5, %v3678_v13, %v3679_v44 }
 0x3bf   : > { %v14099_v5 = vadd.f32 %v3680_v0, %v2985_v35 }
 0x3c0   : > { %3332 = vmatmul.bf16.gmra.mxu0 %v17926_v37  ;;  %v3110_v47 = vpop.f32.mrf.mxu2 }
 0x3c1   : > { %v3236_v54 = vpop.f32.mrf.mxu3 }
 0x3c2   : > { %v3237_v48 = vadd.f32 %v3236_v54, %v3107_v62 }
 0x3c3   : > { %v2991_v9 = vpop.f32.mrf.mxu1 }
 0x3c4   : > { %v3681_v15 = vrot.slane %v3237_v48, 1 }
 0x3c5   : > { %v14105_v23 = vpop.f32.mrf.mxu0 }
 0x3c6   : > { %v3682_v63 = vsel %vm3652_vm5, %v3679_v44, %v3681_v15  ;;  %v14115_v44 = vpack.c.bf16 %v13808_v28, %v2439_v26 }
 0x3c7   : > { %v14111_v13 = vadd.f32 %v3682_v63, %v2988_v7  ;;  %v2992_v7 = vadd.f32 %v2991_v9, %v13916_v59  ;;  %v11231_v59 = vld [vmem:[%s17705_s6 + $0x228] sm:$0xf]  ;;  %v11982_v9 = vld [vmem:[%s17705_s6 + $0x230] sm:$0xf0] }
 0x3c8   : > { %3025 = vmatmul.bf16.gmra.mxu1 %v14103_v40  ;;  %3278 = vmatmul.bf16.gmra.mxu3 %v14103_v40  ;;  %v3112_v62 = vpop.f32.mrf.mxu2  ;;  %17929 = vst [vmem:[#allocation14_spill] sm:$0xff] %v14115_v44  ;;  %v11232_v26 = vor.u32 %v11982_v9, %v11231_v59  ;;  %v2449_v40 = vld [vmem:[#allocation2 + $0x298] sm:$0xff] }
 0x3c9   : > { %v3239_v39 = vpop.f32.mrf.mxu3 }
 0x3ca   : > { %v3240_v43 = vadd.f32 %v3239_v39, %v3110_v47  ;;  %4455 = vmatpush.bf16.msra.mxu2 %v11232_v26 }
 0x3cb   : > { %v2993_v35 = vpop.f32.mrf.mxu1 }
 0x3cc   : > { %v3683_v17 = vrot.slane %v3240_v43, 1  ;;  %v2994_v28 = vadd.f32 %v2993_v35, %v13922_v1  ;;  %v11019_v1 = vld [vmem:[%s17705_s6 + $0xf8] sm:$0xf]  ;;  %v11944_v35 = vld [vmem:[%s17705_s6 + $0x100] sm:$0xf0] }
 0x3cd   : > { %v2922_v48 = vpop.f32.mrf.mxu0 }
 0x3d0   : > { %3337 = vmatmul.bf16.gmra.mxu0 %v17928_v60  ;;  %v3115_v63 = vpop.f32.mrf.mxu2 }
 0x3d1   : > { %v3241_v46 = vpop.f32.mrf.mxu3 }
 0x3d2   : > { %v3242_v0 = vadd.f32 %v3241_v46, %v3112_v62 }
 0x3d4   : > { %v3684_v54 = vrot.slane %v3242_v0, 1 }
 0x3d5   : > { %v2996_v37 = vpop.f32.mrf.mxu1  ;;  %v14117_v15 = vpop.f32.mrf.mxu0 }
 0x3d6   : > { %v3685_v47 = vsel %vm3652_vm5, %v3683_v17, %v3684_v54 }
 0x3d7   : > { %v14123_v39 = vadd.f32 %v3685_v47, %v2992_v7  ;;  %v17932_v7 = vld [vmem:[#allocation16_spill] sm:$0xff]  ;;  %v11020_v47 = vor.u32 %v11944_v35, %v11019_v1 }
 0x3d8   : > { %3029 = vmatmul.bf16.gmra.mxu1 %v14115_v44  ;;  %3283 = vmatmul.bf16.gmra.mxu3 %v14115_v44  ;;  %v3117_v0 = vpop.f32.mrf.mxu2 }
 0x3d9   : > { %17930 = vst [vmem:[#allocation49_spill] sm:$0xff] %v14123_v39  ;;  %3448 = vmatpush.bf16.msrb.mxu1 %v11020_v47 }
 0x3db   : > { %v3244_v48 = vpop.f32.mrf.mxu3 }
 0x3dc   : > { %v3245_v62 = vadd.f32 %v3244_v48, %v3115_v63  ;;  %v2443_v48 = vld [vmem:[#allocation2 + $0x268] sm:$0xff] }
 0x3dd   : > { %v2997_v43 = vpop.f32.mrf.mxu1  ;;  %v14125_v46 = vpop.f32.mrf.mxu0 }
 0x3de   : > { %v3686_v60 = vrot.slane %v3245_v62, 1  ;;  %v2998_v1 = vadd.f32 %v2997_v43, %v13938_v2 }
 0x3e0   : > { %v3687_v37 = vsel %vm3652_vm5, %v3684_v54, %v3686_v60  ;;  %3342 = vmatmul.bf16.gmra.mxu0 %v17932_v7  ;;  %v2445_v54 = vld [vmem:[#allocation2 + $0x278] sm:$0xff]  ;;  %v3120_v59 = vpop.f32.mrf.mxu2 }
 0x3e1   : > { %v14135_v17 = vadd.f32 %v3687_v37, %v2994_v28  ;;  %v14144_v60 = vpack.c.bf16 %v2445_v54, %v2443_v48  ;;  %v17934_v54 = vld [vmem:[#allocation17_spill] sm:$0xff] }
 0x3e3   : > { %17931 = vst [vmem:[#allocation50_spill] sm:$0xff] %v14135_v17  ;;  %v3246_v63 = vpop.f32.mrf.mxu3 }
 0x3e4   : > { %17933 = vst [vmem:[#allocation16_spill] sm:$0xff] %v14144_v60  ;;  %v3247_v9 = vadd.f32 %v3246_v63, %v3117_v0 }
 0x3e5   : > { %v3000_v62 = vpop.f32.mrf.mxu1  ;;  %v2928_v28 = vpop.f32.mrf.mxu0 }
 0x3e6   : > { %v3688_v17 = vrot.slane %v3247_v9, 1 }
 0x3e8   : > { %3034 = vmatmul.bf16.gmra.mxu1 %v14144_v60  ;;  %3288 = vmatmul.bf16.gmra.mxu3 %v14144_v60  ;;  %v3122_v35 = vpop.f32.mrf.mxu2 }
 0x3eb   : > { %v3249_v37 = vpop.f32.mrf.mxu3 }
 0x3ec   : > { %v3250_v26 = vadd.f32 %v3249_v37, %v3120_v59  ;;  %v14156_v59 = vpack.c.bf16 %v2449_v40, %v13776_v16  ;;  %v3001_v37 = vadd.f32 %v3000_v62, %v13947_v11  ;;  %v17937_v16 = vld [vmem:[#allocation19_spill] sm:$0xff]  ;;  %v11219_v11 = vld [vmem:[%s17705_s6 + $0x210] sm:$0xf] }
 0x3ed   : > { %v3002_v7 = vpop.f32.mrf.mxu1  ;;  %v14148_v39 = vpop.f32.mrf.mxu0  ;;  %v11979_v40 = vld [vmem:[%s17705_s6 + $0x218] sm:$0xf0] }
 0x3ee   : > { %v3689_v44 = vrot.slane %v3250_v26, 1  ;;  %17935 = vst [vmem:[#allocation17_spill] sm:$0xff] %v14156_v59  ;;  %v11220_v62 = vor.u32 %v11979_v40, %v11219_v11 }
 0x3f0   : > { %v3690_v47 = vsel %vm3652_vm5, %v3688_v17, %v3689_v44  ;;  %3347 = vmatmul.bf16.gmra.mxu0 %v17934_v54  ;;  %v3125_v2 = vpop.f32.mrf.mxu2  ;;  %4456 = vmatpush.bf16.msra.mxu2 %v11220_v62 }
 0x3f1   : > { %v14152_v48 = vadd.f32 %v3690_v47, %v2998_v1 }
 0x3f3   : > { %v3251_v28 = vpop.f32.mrf.mxu3 }
 0x3f4   : > { %v3252_v60 = vadd.f32 %v3251_v28, %v3122_v35  ;;  %v2451_v28 = vld [vmem:[#allocation2 + $0x2a8] sm:$0xff] }
 0x3f5   : > { %v3004_v0 = vpop.f32.mrf.mxu1  ;;  %v14158_v9 = vpop.f32.mrf.mxu0 }
 0x3f6   : > { %v3691_v63 = vrot.slane %v3252_v60, 1 }
 0x3f8   : > { %v3692_v43 = vsel %vm3652_vm5, %v3689_v44, %v3691_v63  ;;  %3038 = vmatmul.bf16.gmra.mxu1 %v14156_v59  ;;  %3293 = vmatmul.bf16.gmra.mxu3 %v14156_v59  ;;  %v3127_v35 = vpop.f32.mrf.mxu2 }
 0x3f9   : > { %v14164_v17 = vadd.f32 %v3692_v43, %v3001_v37 }
 0x3fb   : > { %17936 = vst [vmem:[#allocation51_spill] sm:$0xff] %v14164_v17  ;;  %v3254_v26 = vpop.f32.mrf.mxu3 }
 0x3fc   : > { %v3255_v7 = vadd.f32 %v3254_v26, %v3125_v2  ;;  %v14174_v2 = vpack.c.bf16 %v13764_v51, %v2451_v28  ;;  %v3005_v26 = vadd.f32 %v3004_v0, %v13968_v57  ;;  %v11007_v28 = vld [vmem:[%s17705_s6 + $0xe0] sm:$0xf] }
 0x3fd   : > { %v3006_v1 = vpop.f32.mrf.mxu1  ;;  %v2935_v60 = vpop.f32.mrf.mxu0 }
 0x3fe   : > { %v3693_v63 = vrot.slane %v3255_v7, 1  ;;  %17938 = vst [vmem:[#allocation19_spill] sm:$0xff] %v14174_v2  ;;  %v3007_v51 = vadd.f32 %v3006_v1, %v13975_v41  ;;  %v11327_v41 = vld [vmem:[%s17705_s6 + $0x2e8] sm:$0xf]  ;;  %v12006_v1 = vld [vmem:[%s17705_s6 + $0x2f0] sm:$0xf0] }
 0x400   : > { %3352 = vmatmul.bf16.gmra.mxu0 %v17937_v16  ;;  %v3130_v60 = vpop.f32.mrf.mxu2 }
 0x403   : > { %v3256_v44 = vpop.f32.mrf.mxu3 }
 0x404   : > { %v3257_v47 = vadd.f32 %v3256_v44, %v3127_v35 }
 0x405   : > { %v3009_v54 = vpop.f32.mrf.mxu1  ;;  %v14176_v43 = vpop.f32.mrf.mxu0 }
 0x406   : > { %v3694_v37 = vrot.slane %v3257_v47, 1  ;;  %v17941_v54 = vld [vmem:[#allocation21_spill] sm:$0xff] }
 0x408   : > { %v3695_v16 = vsel %vm3652_vm5, %v3693_v63, %v3694_v37  ;;  %3042 = vmatmul.bf16.gmra.mxu1 %v14174_v2  ;;  %3298 = vmatmul.bf16.gmra.mxu3 %v14174_v2  ;;  %v3132_v47 = vpop.f32.mrf.mxu2  ;;  %v11941_v63 = vld [vmem:[%s17705_s6 + $0xe8] sm:$0xf0] }
 0x409   : > { %v14182_v35 = vadd.f32 %v3695_v16, %v3005_v26  ;;  %v2455_v16 = vld [vmem:[#allocation2 + $0x2c8] sm:$0xff] }
 0x40b   : > { %17939 = vst [vmem:[#allocation52_spill] sm:$0xff] %v14182_v35  ;;  %v3259_v11 = vpop.f32.mrf.mxu3  ;;  %v3991_v35 = vld [vmem:[#allocation2 + $0x38] sm:$0xff] }
 0x40c   : > { %v3260_v40 = vadd.f32 %v3259_v11, %v3130_v60  ;;  %v11008_v60 = vor.u32 %v11941_v63, %v11007_v28  ;;  %v12003_v28 = vld [vmem:[%s17705_s6 + $0x2d8] sm:$0xf0] }
 0x40d   : > { %v3010_v7 = vpop.f32.mrf.mxu1  ;;  %v14184_v62 = vpop.f32.mrf.mxu0 }
 0x40e   : > { %v3696_v44 = vrot.slane %v3260_v40, 1  ;;  %3449 = vmatpush.bf16.msrb.mxu1 %v11008_v60  ;;  %v2457_v40 = vld [vmem:[#allocation2 + $0x2d8] sm:$0xff] }
 0x410   : > { %v3697_v57 = vsel %vm3652_vm5, %v3694_v37, %v3696_v44  ;;  %3357 = vmatmul.bf16.gmra.mxu0 %v17941_v54  ;;  %v11328_v37 = vor.u32 %v12006_v1, %v11327_v41  ;;  %v14203_v44 = vpack.c.bf16 %v2457_v40, %v2455_v16  ;;  %v11315_v54 = vld [vmem:[%s17705_s6 + $0x2d0] sm:$0xf]  ;;  %v11207_v41 = vld [vmem:[%s17705_s6 + $0x1f8] sm:$0xf]  ;;  %v11976_v1 = vld [vmem:[%s17705_s6 + $0x200] sm:$0xf0] }
 0x411   : > { %v14188_v0 = vadd.f32 %v3697_v57, %v3007_v51  ;;  %v3135_v57 = vpop.f32.mrf.mxu2  ;;  %v11316_v63 = vor.u32 %v12003_v28, %v11315_v54 }
 0x412   : > { %17942 = vst [vmem:[#allocation21_spill] sm:$0xff] %v14203_v44  ;;  %4568 = vmatpush.bf16.msrb.mxu3 %v11328_v37  ;;  %v11303_v37 = vld [vmem:[%s17705_s6 + $0x2b8] sm:$0xf] }
 0x413   : > { %17940 = vst [vmem:[#allocation53_spill] sm:$0xff] %v14188_v0  ;;  %v3261_v26 = vpop.f32.mrf.mxu3  ;;  %v3011_v0 = vadd.f32 %v3010_v7, %v14009_v30  ;;  %v11997_v30 = vld [vmem:[%s17705_s6 + $0x2a8] sm:$0xf0] }
 0x414   : > { %v3262_v60 = vadd.f32 %v3261_v26, %v3132_v47  ;;  %v12000_v47 = vld [vmem:[%s17705_s6 + $0x2c0] sm:$0xf0] }
 0x415   : > { %v3013_v11 = vpop.f32.mrf.mxu1  ;;  %v2941_v51 = vpop.f32.mrf.mxu0  ;;  %v11304_v54 = vor.u32 %v12000_v47, %v11303_v37 }
 0x416   : > { %4569 = vmatpush.bf16.msrb.mxu3 %v11316_v63  ;;  %v11208_v51 = vor.u32 %v11976_v1, %v11207_v41  ;;  %v3698_v28 = vrot.slane %v3262_v60, 1  ;;  %v11291_v60 = vld [vmem:[%s17705_s6 + $0x2a0] sm:$0xf] }
 0x417   : > { %v11292_v37 = vor.u32 %v11997_v30, %v11291_v60 }
 0x418   : > { %3047 = vmatmul.bf16.gmra.mxu1 %v14203_v44  ;;  %3303 = vmatmul.bf16.gmra.mxu3 %v14203_v44 }
 0x419   : > { %4457 = vmatpush.bf16.msra.mxu2 %v11208_v51  ;;  %v3137_v2 = vpop.f32.mrf.mxu2  ;;  %v2461_v51 = vld [vmem:[#allocation2 + $0x2f8] sm:$0xff] }
 0x41a   : > { %4570 = vmatpush.bf16.msrb.mxu3 %v11304_v54  ;;  %v11970_v54 = vld [vmem:[%s17705_s6 + $0x1d0] sm:$0xf0] }
 0x41b   : > { %v3264_v16 = vpop.f32.mrf.mxu3 }
 0x41c   : > { %v3265_v40 = vadd.f32 %v3264_v16, %v3135_v57  ;;  %v11195_v57 = vld [vmem:[%s17705_s6 + $0x1e0] sm:$0xf]  ;;  %v11973_v16 = vld [vmem:[%s17705_s6 + $0x1e8] sm:$0xf0] }
 0x41d   : > { %v3015_v26 = vpop.f32.mrf.mxu1  ;;  %v14225_v44 = vpop.f32.mrf.mxu0  ;;  %v11196_v1 = vor.u32 %v11973_v16, %v11195_v57 }
 0x41e   : > { %v3699_v63 = vrot.slane %v3265_v40, 1  ;;  %v2459_v40 = vld [vmem:[#allocation2 + $0x2e8] sm:$0xff]  ;;  %4571 = vmatpush.bf16.msrb.mxu3 %v11292_v37  ;;  %v3014_v37 = vadd.f32 %v3013_v11, %v14029_v34  ;;  %v11991_v11 = vld [vmem:[%s17705_s6 + $0x278] sm:$0xf0] }
 0x41f   : > { %4458 = vmatpush.bf16.msra.mxu2 %v11196_v1  ;;  %v11183_v26 = vld [vmem:[%s17705_s6 + $0x1c8] sm:$0xf]  ;;  %v14256_v1 = vpack.c.bf16 %v2461_v51, %v2459_v40  ;;  %v11267_v40 = vld [vmem:[%s17705_s6 + $0x270] sm:$0xf] }
 0x420   : > { %v3700_v41 = vsel %vm3652_vm5, %v3698_v28, %v3699_v63  ;;  %3362 = vmatmul.bf16.gmra.mxu0 %v13367_v52  ;;  %v11184_v57 = vor.u32 %v11970_v54, %v11183_v26  ;;  %v11994_v52 = vld [vmem:[%s17705_s6 + $0x290] sm:$0xf0]  ;;  %v11268_v54 = vor.u32 %v11991_v11, %v11267_v40 }
 0x421   : > { %v14241_v7 = vadd.f32 %v3700_v41, %v3011_v0  ;;  %v11279_v0 = vld [vmem:[%s17705_s6 + $0x288] sm:$0xf]  ;;  %17944 = vst [vmem:[#allocation55_spill] sm:$0xff] %v14256_v1 }
 0x422   : > { %v11280_v60 = vor.u32 %v11994_v52, %v11279_v0 }
 0x423   : > { %17943 = vst [vmem:[#allocation54_spill] sm:$0xff] %v14241_v7  ;;  %v3266_v47 = vpop.f32.mrf.mxu3  ;;  %4459 = vmatpush.bf16.msra.mxu2 %v11184_v57  ;;  %v3140_v7 = vpop.f32.mrf.mxu2  ;;  %v11255_v57 = vld [vmem:[%s17705_s6 + $0x258] sm:$0xf] }
 0x424   : > { %v3267_v28 = vadd.f32 %v3266_v47, %v3137_v2  ;;  %4572 = vmatpush.bf16.msrb.mxu3 %v11280_v60  ;;  %v11171_v2 = vld [vmem:[%s17705_s6 + $0x1b0] sm:$0xf]  ;;  %v11967_v47 = vld [vmem:[%s17705_s6 + $0x1b8] sm:$0xf0] }
 0x425   : > { %v3017_v16 = vpop.f32.mrf.mxu1  ;;  %v14258_v30 = vpop.f32.mrf.mxu0  ;;  %v11172_v34 = vor.u32 %v11967_v47, %v11171_v2 }
 0x426   : > { %v3701_v41 = vrot.slane %v3267_v28, 1  ;;  %v11159_v28 = vld [vmem:[%s17705_s6 + $0x198] sm:$0xf] }
 0x427   : > { %4460 = vmatpush.bf16.msra.mxu2 %v11172_v34  ;;  %v11147_v34 = vld [vmem:[%s17705_s6 + $0x180] sm:$0xf] }
 0x428   : > { %v3702_v51 = vsel %vm3652_vm5, %v3699_v63, %v3701_v41  ;;  %3051 = vmatmul.bf16.gmra.mxu1 %v14256_v1  ;;  %3308 = vmatmul.bf16.gmra.mxu3 %v14256_v1  ;;  %v11964_v63 = vld [vmem:[%s17705_s6 + $0x1a0] sm:$0xf0] }
 0x429   : > { %v14276_v26 = vadd.f32 %v3702_v51, %v3014_v37  ;;  %4573 = vmatpush.bf16.msrb.mxu3 %v11268_v54  ;;  %v11160_v60 = vor.u32 %v11964_v63, %v11159_v28  ;;  %v11988_v41 = vld [vmem:[%s17705_s6 + $0x260] sm:$0xf0]  ;;  %v10995_v51 = vld [vmem:[%s17705_s6 + $0xc8] sm:$0xf]  ;;  %v11961_v54 = vld [vmem:[%s17705_s6 + $0x188] sm:$0xf0] }
 0x42a   : > { %v11256_v2 = vor.u32 %v11988_v41, %v11255_v57  ;;  %v11985_v28 = vld [vmem:[%s17705_s6 + $0x248] sm:$0xf0]  ;;  %v11148_v63 = vor.u32 %v11961_v54, %v11147_v34  ;;  %v3992_v41 = vld [vmem:[#allocation2 + $0x40] sm:$0xff] }
 0x42b   : > { %17945 = vst [vmem:[#allocation56_spill] sm:$0xff] %v14276_v26  ;;  %v3269_v0 = vpop.f32.mrf.mxu3  ;;  %4461 = vmatpush.bf16.msra.mxu2 %v11160_v60  ;;  %v3142_v40 = vpop.f32.mrf.mxu2  ;;  %v3990_v60 = vld [vmem:[#allocation2 + $0x30] sm:$0xff] }
 0x42c   : > { %v3270_v52 = vadd.f32 %v3269_v0, %v3140_v7  ;;  %v11938_v7 = vld [vmem:[%s17705_s6 + $0xd0] sm:$0xf0]  ;;  %v11243_v0 = vld [vmem:[%s17705_s6 + $0x240] sm:$0xf] }
 0x42d   : > { %v3019_v37 = vpop.f32.mrf.mxu1  ;;  %v14290_v47 = vpop.f32.mrf.mxu0  ;;  %4574 = vmatpush.bf16.msrb.mxu3 %v11256_v2  ;;  %v10996_v11 = vor.u32 %v11938_v7, %v10995_v51  ;;  %v11244_v57 = vor.u32 %v11985_v28, %v11243_v0  ;;  %v14311_v51 = vpack.c.bf16 %v3992_v41, %v3990_v60  ;;  %v3993_v7 = vld [vmem:[#allocation2 + $0x48] sm:$0xff]  ;;  %v17947_v28 = vld [vmem:[#allocation24_spill] sm:$0xff] }
 0x42e   : > { %v3703_v59 = vrot.slane %v3270_v52, 1  ;;  %v14314_v34 = vpack.c.bf16 %v3993_v7, %v3991_v35  ;;  %v3020_v35 = vadd.f32 %v3019_v37, %v14058_v21  ;;  %v3996_v41 = vld [vmem:[#allocation2 + $0x60] sm:$0xff] }
 0x42f   : > { %3450 = vmatpush.bf16.msrb.mxu1 %v10996_v11  ;;  %4462 = vmatpush.bf16.msra.mxu2 %v11148_v63 }
 0x430   : > { %3367 = vmatmul.bf16.gmra.mxu0 %v13480_v61  ;;  %17946 = vst [vmem:[#allocation57_spill] sm:$0xff] %v14314_v34  ;;  %v3018_v61 = vadd.f32 %v3017_v16, %v14047_v50 }
 0x431   : > { %4575 = vmatpush.bf16.msrb.mxu3 %v11244_v57 }
 0x432   : > { %4463 = vmatmul.bf16.vlgmr.msra.gmra.mxu2 %v14311_v51 }
 0x433   : > { %v3271_v2 = vpop.f32.mrf.mxu3  ;;  %v3145_v11 = vpop.f32.mrf.mxu2 }
 0x434   : > { %v3272_v1 = vadd.f32 %v3271_v2, %v3142_v40 }
 0x435   : > { %v3022_v26 = vpop.f32.mrf.mxu1  ;;  %v14316_v54 = vpop.f32.mrf.mxu0 }
 0x436   : > { %v3704_v17 = vrot.slane %v3272_v1, 1 }
 0x438   : > { %v3705_v0 = vsel %vm3652_vm5, %v3703_v59, %v3704_v17  ;;  %3451 = vmatmul.bf16.vlgmr.msrb.gmra.mxu1 %v17947_v28  ;;  %4576 = vmatmul.bf16.vlgmr.msrb.gmra.mxu3 %v14314_v34  ;;  %v3994_v59 = vld [vmem:[#allocation2 + $0x50] sm:$0xff]  ;;  %v4000_v34 = vld [vmem:[#allocation2 + $0x80] sm:$0xff] }
 0x439   : > { %v14322_v40 = vadd.f32 %v3705_v0, %v3018_v61  ;;  %v14331_v7 = vpack.c.bf16 %v3996_v41, %v3994_v59  ;;  %v3995_v61 = vld [vmem:[#allocation2 + $0x58] sm:$0xff]  ;;  %v3997_v0 = vld [vmem:[#allocation2 + $0x68] sm:$0xff] }
 0x43a   : > { %v14334_v28 = vpack.c.bf16 %v3997_v0, %v3995_v61 }
 0x43b   : > { %v3274_v26 = vpop.f32.mrf.mxu3  ;;  %v3147_v60 = vpop.f32.mrf.mxu2 }
 0x43c   : > { %v3275_v52 = vadd.f32 %v3274_v26, %v3145_v11  ;;  %17949 = vst [vmem:[#allocation58_spill] sm:$0xff] %v14334_v28 }
 0x43d   : > { %v3023_v1 = vpop.f32.mrf.mxu1  ;;  %v14324_v57 = vpop.f32.mrf.mxu0 }
 0x43e   : > { %v3706_v63 = vrot.slane %v3275_v52, 1  ;;  %v3024_v41 = vadd.f32 %v3023_v1, %v14070_v24 }
 0x440   : > { %v3707_v50 = vsel %vm3652_vm5, %v3704_v17, %v3706_v63  ;;  %3372 = vmatmul.bf16.gmra.mxu0 %v13595_v10  ;;  %v17950_v17 = vld [vmem:[#allocation26_spill] sm:$0xff] }
 0x441   : > { %v14328_v16 = vadd.f32 %v3707_v50, %v3020_v35 }
 0x442   : > { %4468 = vmatmul.bf16.gmra.mxu2 %v14331_v7 }
 0x443   : > { %17948 = vst [vmem:[#allocation24_spill] sm:$0xff] %v14328_v16  ;;  %v3276_v2 = vpop.f32.mrf.mxu3  ;;  %v3150_v37 = vpop.f32.mrf.mxu2 }
 0x444   : > { %v3277_v10 = vadd.f32 %v3276_v2, %v3147_v60  ;;  %v3999_v2 = vld [vmem:[#allocation2 + $0x78] sm:$0xff] }
 0x445   : > { %v3026_v11 = vpop.f32.mrf.mxu1  ;;  %v14336_v21 = vpop.f32.mrf.mxu0 }
 0x446   : > { %v3708_v35 = vrot.slane %v3277_v10, 1 }
 0x448   : > { %3456 = vmatmul.bf16.gmra.mxu1 %v17950_v17  ;;  %4581 = vmatmul.bf16.gmra.mxu3 %v14334_v28  ;;  %v3998_v17 = vld [vmem:[#allocation2 + $0x70] sm:$0xff] }
 0x449   : > { %v14347_v60 = vpack.c.bf16 %v4000_v34, %v3998_v17  ;;  %v4004_v17 = vld [vmem:[#allocation2 + $0xa0] sm:$0xff] }
 0x44b   : > { %v3279_v26 = vpop.f32.mrf.mxu3  ;;  %v3152_v16 = vpop.f32.mrf.mxu2 }
 0x44c   : > { %v3280_v52 = vadd.f32 %v3279_v26, %v3150_v37  ;;  %v4001_v37 = vld [vmem:[#allocation2 + $0x88] sm:$0xff] }
 0x44d   : > { %v3028_v63 = vpop.f32.mrf.mxu1  ;;  %v14340_v59 = vpop.f32.mrf.mxu0  ;;  %v14350_v24 = vpack.c.bf16 %v4001_v37, %v3999_v2  ;;  %v4003_v37 = vld [vmem:[#allocation2 + $0x98] sm:$0xff] }
 0x44e   : > { %v3709_v50 = vrot.slane %v3280_v52, 1  ;;  %v3027_v63 = vadd.f32 %v3026_v11, %v14078_v4  ;;  %v4005_v11 = vld [vmem:[#allocation2 + $0xa8] sm:$0xff] }
 0x450   : > { %v3710_v61 = vsel %vm3652_vm5, %v3708_v35, %v3709_v50  ;;  %3377 = vmatmul.bf16.gmra.mxu0 %v13686_v20 }
 0x451   : > { %v14344_v0 = vadd.f32 %v3710_v61, %v3024_v41  ;;  %v4002_v61 = vld [vmem:[#allocation2 + $0x90] sm:$0xff] }
 0x452   : > { %4472 = vmatmul.bf16.gmra.mxu2 %v14347_v60  ;;  %v14364_v4 = vpack.c.bf16 %v4004_v17, %v4002_v61 }
 0x453   : > { %v3281_v28 = vpop.f32.mrf.mxu3 }
 0x454   : > { %v3282_v10 = vadd.f32 %v3281_v28, %v3152_v16 }
 0x455   : > { %v3030_v26 = vpop.f32.mrf.mxu1  ;;  %v14352_v1 = vpop.f32.mrf.mxu0 }
 0x456   : > { %v3711_v52 = vrot.slane %v3282_v10, 1 }
 0x458   : > { %v3712_v20 = vsel %vm3652_vm5, %v3709_v50, %v3711_v52  ;;  %3461 = vmatmul.bf16.gmra.mxu1 %v13782_v53  ;;  %4585 = vmatmul.bf16.gmra.mxu3 %v14350_v24 }
 0x459   : > { %v14358_v34 = vadd.f32 %v3712_v20, %v3027_v63  ;;  %v14368_v63 = vpack.c.bf16 %v4005_v11, %v4003_v37  ;;  %v11329_v37 = vld [vmem:[%s17705_s6 + $0x2f4] sm:$0xf0] }
 0x45b   : > { %v3284_v35 = vpop.f32.mrf.mxu3 }
 0x45c   : > { %v3285_v41 = vadd.f32 %v3284_v35, %v13691_v19  ;;  %v3031_v19 = vadd.f32 %v3030_v26, %v14095_v18  ;;  %v4007_v26 = vld [vmem:[#allocation2 + $0xb8] sm:$0xff] }
 0x45d   : > { %v3032_v16 = vpop.f32.mrf.mxu1  ;;  %v14360_v28 = vpop.f32.mrf.mxu0 }
 0x45e   : > { %v3713_v10 = vrot.slane %v3285_v41, 1  ;;  %v3033_v11 = vadd.f32 %v3032_v16, %v14105_v23 }
 0x460   : > { %3382 = vmatmul.bf16.gmra.mxu0 %v13811_v27 }
 0x462   : > { %4476 = vmatmul.bf16.gmra.mxu2 %v14364_v4 }
 0x463   : > { %v3286_v2 = vpop.f32.mrf.mxu3 }
 0x464   : > { %v3287_v53 = vadd.f32 %v3286_v2, %v13752_v49 }
 0x465   : > { %v3035_v50 = vpop.f32.mrf.mxu1  ;;  %v14370_v20 = vpop.f32.mrf.mxu0 }
 0x466   : > { %v3714_v52 = vrot.slane %v3287_v53, 1  ;;  %v12005_v50 = vld [vmem:[%s17705_s6 + $0x2ec] sm:$0xf] }
 0x468   : > { %v3715_v27 = vsel %vm3652_vm5, %v3713_v10, %v3714_v52  ;;  %3466 = vmatmul.bf16.gmra.mxu1 %v13825_v25  ;;  %4589 = vmatmul.bf16.gmra.mxu3 %v14368_v63  ;;  %v11981_v25 = vld [vmem:[%s17705_s6 + $0x22c] sm:$0xf]  ;;  %v4006_v10 = vld [vmem:[#allocation2 + $0xb0] sm:$0xff] }
 0x469   : > { %v14376_v35 = vadd.f32 %v3715_v27, %v3031_v19 }
 0x46b   : > { %v3289_v49 = vpop.f32.mrf.mxu3 }
 0x46c   : > { %v3290_v41 = vadd.f32 %v3289_v49, %v13803_v3  ;;  %v11233_v3 = vld [vmem:[%s17705_s6 + $0x234] sm:$0xf0]  ;;  %v4009_v49 = vld [vmem:[#allocation2 + $0xc8] sm:$0xff] }
 0x46d   : > { %v3036_v61 = vpop.f32.mrf.mxu1  ;;  %v14379_v2 = vpop.f32.mrf.mxu0  ;;  %v11236_v16 = vor.u32 %v11981_v25, %v11233_v3 }
 0x46e   : > { %v3716_v17 = vrot.slane %v3290_v41, 1  ;;  %v14401_v41 = vpack.c.bf16 %v4009_v49, %v4007_v26 }
 0x46f   : > { %4681 = vmatpush.bf16.msra.mxu0 %v11236_v16 }
 0x470   : > { %v3717_v53 = vsel %vm3652_vm5, %v3714_v52, %v3716_v17  ;;  %3387 = vmatmul.bf16.gmra.mxu0 %v13837_v12  ;;  %v4008_v12 = vld [vmem:[#allocation2 + $0xc0] sm:$0xff]  ;;  %v11332_v52 = vor.u32 %v12005_v50, %v11329_v37  ;;  %17952 = vst [vmem:[#allocation59_spill] sm:$0xff] %v14401_v41 }
 0x471   : > { %v14383_v18 = vadd.f32 %v3717_v53, %v3033_v11  ;;  %v14398_v19 = vpack.c.bf16 %v4008_v12, %v4006_v10  ;;  %v3037_v10 = vadd.f32 %v3036_v61, %v14117_v15 }
 0x472   : > { %4810 = vmatpush.bf16.msra.mxu1 %v11332_v52  ;;  %v4012_v52 = vld [vmem:[#allocation2 + $0xe0] sm:$0xff] }
 0x473   : > { %17951 = vst [vmem:[#allocation26_spill] sm:$0xff] %v14383_v18  ;;  %v3291_v23 = vpop.f32.mrf.mxu3  ;;  %4481 = vmatmul.bf16.gmra.mxu2 %v14398_v19 }
 0x474   : > { %v3292_v11 = vadd.f32 %v3291_v23, %v13820_v56  ;;  %v4011_v23 = vld [vmem:[#allocation2 + $0xd8] sm:$0xff] }
 0x475   : > { %v3039_v27 = vpop.f32.mrf.mxu1  ;;  %v14403_v17 = vpop.f32.mrf.mxu0 }
 0x476   : > { %v3718_v50 = vrot.slane %v3292_v11, 1 }
 0x478   : > { %3471 = vmatmul.bf16.gmra.mxu1 %v13856_v14  ;;  %4594 = vmatmul.bf16.gmra.mxu3 %v14401_v41  ;;  %v4010_v14 = vld [vmem:[#allocation2 + $0xd0] sm:$0xff] }
 0x479   : > { %v14416_v56 = vpack.c.bf16 %v4012_v52, %v4010_v14  ;;  %v4014_v52 = vld [vmem:[#allocation2 + $0xf0] sm:$0xff] }
 0x47b   : > { %v3294_v53 = vpop.f32.mrf.mxu3 }
 0x47c   : > { %v3295_v25 = vadd.f32 %v3294_v53, %v13834_v58  ;;  %v4013_v58 = vld [vmem:[#allocation2 + $0xe8] sm:$0xff] }
 0x47d   : > { %v3041_v3 = vpop.f32.mrf.mxu1  ;;  %v14409_v37 = vpop.f32.mrf.mxu0  ;;  %v14420_v15 = vpack.c.bf16 %v4013_v58, %v4011_v23  ;;  %v4015_v58 = vld [vmem:[#allocation2 + $0xf8] sm:$0xff] }
 0x47e   : > { %v3719_v16 = vrot.slane %v3295_v25, 1  ;;  %v3040_v3 = vadd.f32 %v3039_v27, %v14125_v46  ;;  %v4017_v27 = vld [vmem:[#allocation2 + $0x108] sm:$0xff] }
 0x47f   : > { %17954 = vst [vmem:[#allocation61_spill] sm:$0xff] %v14420_v15 }
 0x480   : > { %v3720_v26 = vsel %vm3652_vm5, %v3718_v50, %v3719_v16  ;;  %3392 = vmatmul.bf16.gmra.mxu0 %v13864_v6 }
 0x481   : > { %v14413_v12 = vadd.f32 %v3720_v26, %v3037_v10 }
 0x483   : > { %17953 = vst [vmem:[#allocation60_spill] sm:$0xff] %v14413_v12  ;;  %v3296_v49 = vpop.f32.mrf.mxu3  ;;  %4485 = vmatmul.bf16.gmra.mxu2 %v14416_v56 }
 0x484   : > { %v3297_v11 = vadd.f32 %v3296_v49, %v13840_v42  ;;  %v4016_v49 = vld [vmem:[#allocation2 + $0x100] sm:$0xff] }
 0x485   : > { %v3043_v53 = vpop.f32.mrf.mxu1  ;;  %v14422_v61 = vpop.f32.mrf.mxu0  ;;  %v14434_v46 = vpack.c.bf16 %v4016_v49, %v4014_v52  ;;  %v17959_v49 = vld [vmem:[#allocation27_spill] sm:$0xff] }
 0x486   : > { %v3721_v25 = vrot.slane %v3297_v11, 1 }
 0x488   : > { %v3722_v6 = vsel %vm3652_vm5, %v3719_v16, %v3721_v25  ;;  %3476 = vmatmul.bf16.gmra.mxu1 %v13872_v55  ;;  %4598 = vmatmul.bf16.gmra.mxu3 %v14420_v15 }
 0x489   : > { %v14428_v50 = vadd.f32 %v3722_v6, %v3040_v3  ;;  %v14438_v3 = vpack.c.bf16 %v4017_v27, %v4015_v58 }
 0x48b   : > { %17955 = vst [vmem:[#allocation62_spill] sm:$0xff] %v14428_v50  ;;  %v3299_v10 = vpop.f32.mrf.mxu3 }
 0x48c   : > { %v3300_v14 = vadd.f32 %v3299_v10, %v13862_v38  ;;  %17956 = vst [vmem:[#allocation63_spill] sm:$0xff] %v14438_v3  ;;  %v3044_v38 = vadd.f32 %v3043_v53, %v14148_v39  ;;  %v17957_v10 = vld [vmem:[#allocation29_spill] sm:$0xff]  ;;  %v4019_v53 = vld [vmem:[#allocation2 + $0x118] sm:$0xff] }
 0x48d   : > { %v3045_v42 = vpop.f32.mrf.mxu1  ;;  %v14430_v26 = vpop.f32.mrf.mxu0 }
 0x48e   : > { %v3723_v11 = vrot.slane %v3300_v14, 1  ;;  %v3046_v27 = vadd.f32 %v3045_v42, %v14158_v9 }
 0x490   : > { %3397 = vmatmul.bf16.gmra.mxu0 %v13879_v36 }
 0x493   : > { %v3301_v23 = vpop.f32.mrf.mxu3  ;;  %4489 = vmatmul.bf16.gmra.mxu2 %v14434_v46 }
 0x494   : > { %v3302_v55 = vadd.f32 %v3301_v23, %v13869_v22 }
 0x495   : > { %v3048_v16 = vpop.f32.mrf.mxu1  ;;  %v14440_v6 = vpop.f32.mrf.mxu0 }
 0x496   : > { %v3724_v25 = vrot.slane %v3302_v55, 1 }
 0x498   : > { %v3725_v36 = vsel %vm3652_vm5, %v3723_v11, %v3724_v25  ;;  %3481 = vmatmul.bf16.gmra.mxu1 %v17957_v10  ;;  %4602 = vmatmul.bf16.gmra.mxu3 %v14438_v3  ;;  %v11978_v11 = vld [vmem:[%s17705_s6 + $0x214] sm:$0xf] }
 0x499   : > { %v14446_v52 = vadd.f32 %v3725_v36, %v3044_v38  ;;  %v11221_v38 = vld [vmem:[%s17705_s6 + $0x21c] sm:$0xf0]  ;;  %v12002_v36 = vld [vmem:[%s17705_s6 + $0x2d4] sm:$0xf] }
 0x49a   : > { %v11224_v42 = vor.u32 %v11978_v11, %v11221_v38  ;;  %v4018_v10 = vld [vmem:[#allocation2 + $0x110] sm:$0xff]  ;;  %v17962_v11 = vld [vmem:[#allocation32_spill] sm:$0xff] }
 0x49b   : > { %17958 = vst [vmem:[#allocation29_spill] sm:$0xff] %v14446_v52  ;;  %v3304_v22 = vpop.f32.mrf.mxu3  ;;  %v17963_v38 = vld [vmem:[#allocation28_spill] sm:$0xff] }
 0x49c   : > { %v3305_v14 = vadd.f32 %v3304_v22, %v17959_v49  ;;  %4682 = vmatpush.bf16.msra.mxu0 %v11224_v42 }
 0x49d   : > { %v3049_v23 = vpop.f32.mrf.mxu1  ;;  %v14449_v16 = vpop.f32.mrf.mxu0 }
 0x49e   : > { %v3726_v55 = vrot.slane %v3305_v14, 1 }
 0x4a0   : > { %v3727_v58 = vsel %vm3652_vm5, %v3724_v25, %v3726_v55  ;;  %3402 = vmatmul.bf16.gmra.mxu0 %v13895_v31  ;;  %v11317_v25 = vld [vmem:[%s17705_s6 + $0x2dc] sm:$0xf0]  ;;  %v4021_v55 = vld [vmem:[#allocation2 + $0x128] sm:$0xff] }
 0x4a1   : > { %v14453_v39 = vadd.f32 %v3727_v58, %v3046_v27  ;;  %v4020_v31 = vld [vmem:[#allocation2 + $0x120] sm:$0xff]  ;;  %v11320_v22 = vor.u32 %v12002_v36, %v11317_v25  ;;  %v14471_v27 = vpack.c.bf16 %v4021_v55, %v4019_v53  ;;  %v17964_v36 = vld [vmem:[#allocation30_spill] sm:$0xff] }
 0x4a2   : > { %v14468_v49 = vpack.c.bf16 %v4020_v31, %v4018_v10 }
 0x4a3   : > { %17960 = vst [vmem:[#allocation27_spill] sm:$0xff] %v14453_v39  ;;  %v3306_v9 = vpop.f32.mrf.mxu3  ;;  %4811 = vmatpush.bf16.msra.mxu1 %v11320_v22  ;;  %v3050_v22 = vadd.f32 %v3049_v23, %v14176_v43 }
 0x4a4   : > { %4494 = vmatmul.bf16.gmra.mxu2 %v14468_v49  ;;  %17961 = vst [vmem:[#allocation64_spill] sm:$0xff] %v14471_v27  ;;  %v3307_v39 = vadd.f32 %v3306_v9, %v17963_v38  ;;  %v4023_v38 = vld [vmem:[#allocation2 + $0x138] sm:$0xff] }
 0x4a5   : > { %v3052_v14 = vpop.f32.mrf.mxu1  ;;  %v14473_v58 = vpop.f32.mrf.mxu0 }
 0x4a6   : > { %v3728_v31 = vrot.slane %v3307_v39, 1 }
 0x4a8   : > { %3486 = vmatmul.bf16.gmra.mxu1 %v17962_v11  ;;  %4607 = vmatmul.bf16.gmra.mxu3 %v14471_v27  ;;  %v4022_v11 = vld [vmem:[#allocation2 + $0x130] sm:$0xff]  ;;  %v4024_v27 = vld [vmem:[#allocation2 + $0x140] sm:$0xff] }
 0x4a9   : > { %v14486_v9 = vpack.c.bf16 %v4024_v27, %v4022_v11 }
 0x4ab   : > { %v3309_v3 = vpop.f32.mrf.mxu3 }
 0x4ac   : > { %v3310_v25 = vadd.f32 %v3309_v3, %v17964_v36  ;;  %v4025_v3 = vld [vmem:[#allocation2 + $0x148] sm:$0xff]  ;;  %v17966_v36 = vld [vmem:[#allocation31_spill] sm:$0xff] }
 0x4ad   : > { %v3054_v10 = vpop.f32.mrf.mxu1  ;;  %v14479_v52 = vpop.f32.mrf.mxu0  ;;  %v14490_v43 = vpack.c.bf16 %v4025_v3, %v4023_v38 }
 0x4ae   : > { %v3729_v42 = vrot.slane %v3310_v25, 1 }
 0x4af   : > { %17967 = vst [vmem:[#allocation28_spill] sm:$0xff] %v14490_v43 }
 0x4b0   : > { %v3730_v53 = vsel %vm3652_vm5, %v3728_v31, %v3729_v42  ;;  %3407 = vmatmul.bf16.gmra.mxu0 %v13920_v33  ;;  %v3053_v31 = vadd.f32 %v3052_v14, %v14184_v62 }
 0x4b1   : > { %v14483_v55 = vadd.f32 %v3730_v53, %v3050_v22  ;;  %v17968_v22 = vld [vmem:[#allocation34_spill] sm:$0xff] }
 0x4b3   : > { %17965 = vst [vmem:[#allocation32_spill] sm:$0xff] %v14483_v55  ;;  %v3311_v15 = vpop.f32.mrf.mxu3 }
 0x4b4   : > { %v3312_v39 = vadd.f32 %v3311_v15, %v17966_v36  ;;  %4498 = vmatmul.bf16.gmra.mxu2 %v14486_v9 }
 0x4b5   : > { %v3452_v25 = vpop.f32.mrf.mxu1  ;;  %v14492_v23 = vpop.f32.mrf.mxu0 }
 0x4b6   : > { %v3731_v10 = vrot.slane %v3312_v39, 1  ;;  %v4464_v53 = vpop.f32.mrf.mxu2  ;;  %v3453_v11 = vadd.f32 %v3452_v25, %v14225_v44  ;;  %v4029_v25 = vld [vmem:[#allocation2 + $0x168] sm:$0xff] }
 0x4b8   : > { %v3732_v33 = vsel %vm3652_vm5, %v3729_v42, %v3731_v10  ;;  %3491 = vmatmul.bf16.gmra.mxu1 %v17968_v22  ;;  %4611 = vmatmul.bf16.gmra.mxu3 %v14490_v43  ;;  %v3846_v62 = vrot.slane %v3453_v11, 2  ;;  %v17970_v10 = vld [vmem:[#allocation13_spill] sm:$0xff]  ;;  %v17971_v43 = vld [vmem:[#allocation35_spill] sm:$0xff] }
 0x4b9   : > { %v14498_v27 = vadd.f32 %v3732_v33, %v3053_v31  ;;  %v4026_v31 = vld [vmem:[#allocation2 + $0x150] sm:$0xff]  ;;  %v4028_v33 = vld [vmem:[#allocation2 + $0x160] sm:$0xff] }
 0x4ba   : > { %v14507_v44 = vpack.c.bf16 %v4028_v33, %v4026_v31 }
 0x4bb   : > { %17969 = vst [vmem:[#allocation30_spill] sm:$0xff] %v14498_v27  ;;  %v4577_v15 = vpop.f32.mrf.mxu3 }
 0x4bc   : > { %v4578_v36 = vadd.f32 %v4577_v15, %v4464_v53  ;;  %v4027_v15 = vld [vmem:[#allocation2 + $0x158] sm:$0xff] }
 0x4bd   : > { %v3454_v39 = vpop.f32.mrf.mxu1  ;;  %v14502_v3 = vpop.f32.mrf.mxu0 }
 0x4be   : > { %v3455_v38 = vadd.f32 %v3454_v39, %v14258_v30  ;;  %v4466_v42 = vpop.f32.mrf.mxu2 }
 0x4c0   : > { %v3847_v14 = vrot.slane %v3455_v38, 2  ;;  %3412 = vmatmul.bf16.gmra.mxu0 %v17970_v10  ;;  %v14513_v38 = vpack.c.bf16 %v4029_v25, %v4027_v15  ;;  %v17975_v10 = vld [vmem:[#allocation33_spill] sm:$0xff] }
 0x4c2   : > { %v3848_v22 = vsel %vm3845_vm6, %v3846_v62, %v3847_v14  ;;  %17973 = vst [vmem:[#allocation34_spill] sm:$0xff] %v14513_v38  ;;  %v17974_v62 = vld [vmem:[#allocation23_spill] sm:$0xff] }
 0x4c3   : > { %v3958_v27 = vadd.f32 %v3848_v22, %v17971_v43  ;;  %v4579_v55 = vpop.f32.mrf.mxu3  ;;  %v2955_v50 = vadd.f32 %v17975_v10, %v17974_v62  ;;  %v17976_v22 = vld [vmem:[#allocation37_spill] sm:$0xff]  ;;  %v4031_v62 = vld [vmem:[#allocation2 + $0x178] sm:$0xff] }
 0x4c4   : > { %v4580_v53 = vadd.f32 %v4579_v55, %v4466_v42  ;;  %4502 = vmatmul.bf16.gmra.mxu2 %v14507_v44  ;;  %v17977_v55 = vld [vmem:[#allocation36_spill] sm:$0xff]  ;;  %v17979_v10 = vld [vmem:[#allocation15_spill] sm:$0xff] }
 0x4c5   : > { %v3457_v30 = vpop.f32.mrf.mxu1  ;;  %v14509_v39 = vadd.f32 %v4578_v36, %v3958_v27  ;;  %v14517_v12 = vpop.f32.mrf.mxu0  ;;  %v3766_v42 = vadd.f32 %v17977_v55, %v2955_v50  ;;  %v11209_v50 = vld [vmem:[%s17705_s6 + $0x204] sm:$0xf0]  ;;  %v4030_v55 = vld [vmem:[#allocation2 + $0x170] sm:$0xff] }
 0x4c6   : > { %v3458_v11 = vadd.f32 %v3457_v30, %v14290_v47  ;;  %v4469_v27 = vpop.f32.mrf.mxu2 }
 0x4c7   : > { %17972 = vst [vmem:[#allocation31_spill] sm:$0xff] %v14509_v39  ;;  %v17982_v39 = vld [vmem:[#allocation38_spill] sm:$0xff] }
 0x4c8   : > { %v3849_v43 = vrot.slane %v3458_v11, 2  ;;  %3496 = vmatmul.bf16.gmra.mxu1 %v17976_v22  ;;  %4615 = vmatmul.bf16.gmra.mxu3 %v14513_v38  ;;  %v11975_v11 = vld [vmem:[%s17705_s6 + $0x1fc] sm:$0xf]  ;;  %v11305_v22 = vld [vmem:[%s17705_s6 + $0x2c4] sm:$0xf0] }
 0x4ca   : > { %v3850_v36 = vsel %vm3845_vm6, %v3847_v14, %v3849_v43  ;;  %v11999_v14 = vld [vmem:[%s17705_s6 + $0x2bc] sm:$0xf]  ;;  %v11212_v43 = vor.u32 %v11975_v11, %v11209_v50  ;;  %v17981_v50 = vld [vmem:[#allocation25_spill] sm:$0xff] }
 0x4cb   : > { %v3959_v47 = vadd.f32 %v3850_v36, %v3766_v42  ;;  %v4582_v31 = vpop.f32.mrf.mxu3  ;;  %v4032_v42 = vld [vmem:[#allocation2 + $0x180] sm:$0xff]  ;;  %v2959_v41 = vadd.f32 %v17982_v39, %v17981_v50 }
 0x4cc   : > { %v14541_v31 = vpack.c.bf16 %v4032_v42, %v4030_v55  ;;  %4683 = vmatpush.bf16.msra.mxu0 %v11212_v43 }
 0x4cd   : > { %v3459_v33 = vpop.f32.mrf.mxu1  ;;  %v14523_v25 = vadd.f32 %v4580_v53, %v3959_v47  ;;  %v14525_v30 = vpop.f32.mrf.mxu0  ;;  %v11308_v47 = vor.u32 %v11999_v14, %v11305_v22 }
 0x4ce   : > { %v4470_v15 = vpop.f32.mrf.mxu2  ;;  %v3460_v27 = vadd.f32 %v3459_v33, %v14316_v54 }
 0x4cf   : > { %17978 = vst [vmem:[#allocation13_spill] sm:$0xff] %v14523_v25  ;;  %v4033_v25 = vld [vmem:[#allocation2 + $0x188] sm:$0xff]  ;;  %4812 = vmatpush.bf16.msra.mxu1 %v11308_v47 }
 0x4d0   : > { %3417 = vmatmul.bf16.gmra.mxu0 %v17979_v10  ;;  %v14545_v11 = vpack.c.bf16 %v4033_v25, %v4031_v62  ;;  %v3851_v54 = vrot.slane %v3460_v27, 2  ;;  %v17984_v27 = vld [vmem:[#allocation40_spill] sm:$0xff] }
 0x4d2   : > { %17980 = vst [vmem:[#allocation35_spill] sm:$0xff] %v14545_v11 }
 0x4d3   : > { %v4583_v53 = vpop.f32.mrf.mxu3 }
 0x4d4   : > { %v4584_v36 = vadd.f32 %v4583_v53, %v4470_v15  ;;  %4507 = vmatmul.bf16.gmra.mxu2 %v14541_v31  ;;  %v3767_v15 = vadd.f32 %v13972_v29, %v2959_v41  ;;  %v4034_v29 = vld [vmem:[#allocation2 + $0x190] sm:$0xff]  ;;  %v4036_v41 = vld [vmem:[#allocation2 + $0x1a0] sm:$0xff] }
 0x4d5   : > { %v3462_v10 = vpop.f32.mrf.mxu1  ;;  %v14549_v18 = vpop.f32.mrf.mxu0  ;;  %v14563_v50 = vpack.c.bf16 %v4036_v41, %v4034_v29 }
 0x4d6   : > { %v3463_v38 = vadd.f32 %v3462_v10, %v14324_v57  ;;  %v4473_v14 = vpop.f32.mrf.mxu2 }
 0x4d8   : > { %v3852_v33 = vrot.slane %v3463_v38, 2  ;;  %3501 = vmatmul.bf16.gmra.mxu1 %v13964_v32  ;;  %4620 = vmatmul.bf16.gmra.mxu3 %v14545_v11  ;;  %v18020_v11 = vld [vmem:[#allocation14_spill] sm:$0xff] }
 0x4da   : > { %v3853_v57 = vsel %vm3845_vm6, %v3851_v54, %v3852_v33  ;;  %v4035_v54 = vld [vmem:[#allocation2 + $0x198] sm:$0xff] }
 0x4db   : > { %v3960_v53 = vadd.f32 %v3853_v57, %v3767_v15  ;;  %v4586_v43 = vpop.f32.mrf.mxu3 }
 0x4dc   : > { %v4587_v25 = vadd.f32 %v4586_v43, %v4473_v14 }
 0x4dd   : > { %v3464_v62 = vpop.f32.mrf.mxu1  ;;  %v14555_v22 = vadd.f32 %v4584_v36, %v3960_v53  ;;  %v14558_v55 = vpop.f32.mrf.mxu0  ;;  %v4037_v36 = vld [vmem:[#allocation2 + $0x1a8] sm:$0xff] }
 0x4de   : > { %v3465_v39 = vadd.f32 %v3464_v62, %v14336_v21  ;;  %v4475_v42 = vpop.f32.mrf.mxu2  ;;  %v14568_v21 = vpack.c.bf16 %v4037_v36, %v4035_v54  ;;  %v17988_v36 = vld [vmem:[#allocation18_spill] sm:$0xff] }
 0x4df   : > { %17983 = vst [vmem:[#allocation23_spill] sm:$0xff] %v14555_v22  ;;  %v18007_v22 = vld [vmem:[#allocation10_spill] sm:$0xff] }
 0x4e0   : > { %v3854_v38 = vrot.slane %v3465_v39, 2  ;;  %3422 = vmatmul.bf16.gmra.mxu0 %v13110_v8  ;;  %17986 = vst [vmem:[#allocation37_spill] sm:$0xff] %v14568_v21  ;;  %v17987_v8 = vld [vmem:[#allocation39_spill] sm:$0xff]  ;;  %v11197_v39 = vld [vmem:[%s17705_s6 + $0x1ec] sm:$0xf0] }
 0x4e2   : > { %v3855_v32 = vsel %vm3845_vm6, %v3852_v33, %v3854_v38 }
 0x4e3   : > { %v3961_v47 = vadd.f32 %v3855_v32, %v17984_v27  ;;  %v4588_v10 = vpop.f32.mrf.mxu3 }
 0x4e4   : > { %4511 = vmatmul.bf16.gmra.mxu2 %v14563_v50 }
 0x4e5   : > { %v3467_v15 = vpop.f32.mrf.mxu1  ;;  %v14565_v14 = vadd.f32 %v4587_v25, %v3961_v47  ;;  %v14570_v57 = vpop.f32.mrf.mxu0  ;;  %v11972_v25 = vld [vmem:[%s17705_s6 + $0x1e4] sm:$0xf]  ;;  %v11185_v47 = vld [vmem:[%s17705_s6 + $0x1d4] sm:$0xf0] }
 0x4e6   : > { %v4477_v33 = vpop.f32.mrf.mxu2  ;;  %v3468_v43 = vadd.f32 %v3467_v15, %v14340_v59  ;;  %v11200_v42 = vor.u32 %v11972_v25, %v11197_v39  ;;  %v11969_v59 = vld [vmem:[%s17705_s6 + $0x1cc] sm:$0xf] }
 0x4e7   : > { %17985 = vst [vmem:[#allocation33_spill] sm:$0xff] %v14565_v14  ;;  %v11188_v54 = vor.u32 %v11969_v59, %v11185_v47  ;;  %v4041_v39 = vld [vmem:[#allocation2 + $0x1c8] sm:$0xff]  ;;  %v4048_v14 = vld [vmem:[#allocation2 + $0x200] sm:$0xff] }
 0x4e8   : > { %3506 = vmatmul.bf16.gmra.mxu1 %v17987_v8  ;;  %4624 = vmatmul.bf16.gmra.mxu3 %v14568_v21  ;;  %v3856_v41 = vrot.slane %v3468_v43, 2  ;;  %v4040_v8 = vld [vmem:[#allocation2 + $0x1c0] sm:$0xff] }
 0x4e9   : > { %4684 = vmatpush.bf16.msra.mxu0 %v11200_v42  ;;  %v11966_v42 = vld [vmem:[%s17705_s6 + $0x1b4] sm:$0xf] }
 0x4eb   : > { %v4590_v53 = vpop.f32.mrf.mxu3 }
 0x4ec   : > { %v4591_v62 = vadd.f32 %v4590_v53, %v4477_v33  ;;  %v17989_v33 = vld [vmem:[#allocation42_spill] sm:$0xff] }
 0x4ed   : > { %v3469_v38 = vpop.f32.mrf.mxu1  ;;  %v14582_v29 = vpop.f32.mrf.mxu0  ;;  %4685 = vmatpush.bf16.msra.mxu0 %v11188_v54 }
 0x4ee   : > { %v3470_v32 = vadd.f32 %v3469_v38, %v14352_v1  ;;  %v4479_v10 = vpop.f32.mrf.mxu2  ;;  %v4038_v1 = vld [vmem:[#allocation2 + $0x1b0] sm:$0xff] }
 0x4ef   : > { %v14593_v25 = vpack.c.bf16 %v4040_v8, %v4038_v1  ;;  %v11963_v1 = vld [vmem:[%s17705_s6 + $0x19c] sm:$0xf]  ;;  %v11161_v8 = vld [vmem:[%s17705_s6 + $0x1a4] sm:$0xf0] }
 0x4f0   : > { %v3857_v27 = vrot.slane %v3470_v32, 2  ;;  %3427 = vmatmul.bf16.gmra.mxu0 %v17988_v36  ;;  %v11173_v32 = vld [vmem:[%s17705_s6 + $0x1bc] sm:$0xf0] }
 0x4f1   : > { %v11176_v47 = vor.u32 %v11966_v42, %v11173_v32 }
 0x4f2   : > { %v3858_v15 = vsel %vm3845_vm6, %v3856_v41, %v3857_v27  ;;  %v4039_v41 = vld [vmem:[#allocation2 + $0x1b8] sm:$0xff] }
 0x4f3   : > { %v3962_v53 = vadd.f32 %v3858_v15, %v17989_v33  ;;  %v4592_v43 = vpop.f32.mrf.mxu3  ;;  %v14605_v54 = vpack.c.bf16 %v4041_v39, %v4039_v41  ;;  %4686 = vmatpush.bf16.msra.mxu0 %v11176_v47  ;;  %v17993_v39 = vld [vmem:[#allocation43_spill] sm:$0xff]  ;;  %v11149_v41 = vld [vmem:[%s17705_s6 + $0x18c] sm:$0xf0] }
 0x4f4   : > { %v4593_v38 = vadd.f32 %v4592_v43, %v4479_v10  ;;  %4515 = vmatmul.bf16.gmra.mxu2 %v14593_v25 }
 0x4f5   : > { %v3472_v59 = vpop.f32.mrf.mxu1  ;;  %v14601_v36 = vadd.f32 %v4591_v62, %v3962_v53  ;;  %17991 = vst [vmem:[#allocation15_spill] sm:$0xff] %v14605_v54  ;;  %v14607_v10 = vpop.f32.mrf.mxu0  ;;  %v17992_v62 = vld [vmem:[#allocation41_spill] sm:$0xff] }
 0x4f6   : > { %v3473_v15 = vadd.f32 %v3472_v59, %v14360_v28  ;;  %v11164_v28 = vor.u32 %v11963_v1, %v11161_v8  ;;  %v4482_v53 = vpop.f32.mrf.mxu2  ;;  %v11960_v59 = vld [vmem:[%s17705_s6 + $0x184] sm:$0xf]  ;;  %v11983_v8 = vld [vmem:[%s17705_s6 + $0x238] sm:$0xf0] }
 0x4f7   : > { %17990 = vst [vmem:[#allocation36_spill] sm:$0xff] %v14601_v36  ;;  %v17995_v53 = vld [vmem:[#allocation20_spill] sm:$0xff] }
 0x4f8   : > { %v3859_v33 = vrot.slane %v3473_v15, 2  ;;  %3511 = vmatmul.bf16.gmra.mxu1 %v17992_v62  ;;  %4628 = vmatmul.bf16.gmra.mxu3 %v14605_v54  ;;  %v11152_v15 = vor.u32 %v11960_v59, %v11149_v41  ;;  %v4044_v59 = vld [vmem:[#allocation2 + $0x1e0] sm:$0xff]  ;;  %v4043_v41 = vld [vmem:[#allocation2 + $0x1d8] sm:$0xff] }
 0x4f9   : > { %4687 = vmatpush.bf16.msra.mxu0 %v11164_v28 }
 0x4fa   : > { %v3860_v43 = vsel %vm3845_vm6, %v3857_v27, %v3859_v33  ;;  %v11239_v27 = vld [vmem:[%s17705_s6 + $0x230] sm:$0xf] }
 0x4fb   : > { %v3963_v42 = vadd.f32 %v3860_v43, %v17993_v39  ;;  %v4595_v32 = vpop.f32.mrf.mxu3  ;;  %v11240_v33 = vor.u32 %v11983_v8, %v11239_v27  ;;  %v11293_v43 = vld [vmem:[%s17705_s6 + $0x2ac] sm:$0xf0] }
 0x4fc   : > { %v4042_v39 = vld [vmem:[#allocation2 + $0x1d0] sm:$0xff] }
 0x4fd   : > { %v3474_v47 = vpop.f32.mrf.mxu1  ;;  %v14625_v62 = vadd.f32 %v4593_v38, %v3963_v42  ;;  %v14627_v1 = vpop.f32.mrf.mxu0  ;;  %4688 = vmatpush.bf16.msra.mxu0 %v11152_v15  ;;  %4939 = vmatpush.bf16.msrb.mxu2 %v11240_v33  ;;  %v11996_v38 = vld [vmem:[%s17705_s6 + $0x2a4] sm:$0xf]  ;;  %v14643_v8 = vpack.c.bf16 %v4044_v59, %v4042_v39  ;;  %v4045_v33 = vld [vmem:[#allocation2 + $0x1e8] sm:$0xff] }
 0x4fe   : > { %v4483_v28 = vpop.f32.mrf.mxu2  ;;  %v11296_v32 = vor.u32 %v11996_v38, %v11293_v43  ;;  %v3475_v15 = vadd.f32 %v3474_v47, %v14370_v20  ;;  %v14647_v54 = vpack.c.bf16 %v4045_v33, %v4043_v41  ;;  %v17997_v43 = vld [vmem:[#allocation44_spill] sm:$0xff]  ;;  %v18000_v33 = vld [vmem:[#allocation22_spill] sm:$0xff] }
 0x4ff   : > { %17994 = vst [vmem:[#allocation25_spill] sm:$0xff] %v14625_v62 }
 0x500   : > { %3432 = vmatmul.bf16.gmra.mxu0 %v17995_v53  ;;  %4813 = vmatpush.bf16.msra.mxu1 %v11296_v32  ;;  %17996 = vst [vmem:[#allocation38_spill] sm:$0xff] %v14647_v54  ;;  %v3861_v21 = vrot.slane %v3475_v15, 2 }
 0x503   : > { %v4596_v42 = vpop.f32.mrf.mxu3 }
 0x504   : > { %v4597_v27 = vadd.f32 %v4596_v42, %v4483_v28  ;;  %4520 = vmatmul.bf16.gmra.mxu2 %v14643_v8  ;;  %v17998_v28 = vld [vmem:[#allocation45_spill] sm:$0xff] }
 0x505   : > { %v3477_v53 = vpop.f32.mrf.mxu1  ;;  %v14649_v36 = vpop.f32.mrf.mxu0 }
 0x506   : > { %v3478_v62 = vadd.f32 %v3477_v53, %v14379_v2  ;;  %v4486_v20 = vpop.f32.mrf.mxu2 }
 0x508   : > { %v3862_v38 = vrot.slane %v3478_v62, 2  ;;  %3516 = vmatmul.bf16.gmra.mxu1 %v17997_v43  ;;  %4633 = vmatmul.bf16.gmra.mxu3 %v14647_v54  ;;  %v4046_v54 = vld [vmem:[#allocation2 + $0x1f0] sm:$0xff] }
 0x50a   : > { %v3863_v47 = vsel %vm3845_vm6, %v3861_v21, %v3862_v38 }
 0x50b   : > { %v3964_v39 = vadd.f32 %v3863_v47, %v17998_v28  ;;  %v4599_v42 = vpop.f32.mrf.mxu3  ;;  %v14663_v28 = vpack.c.bf16 %v4048_v14, %v4046_v54 }
 0x50c   : > { %v4600_v32 = vadd.f32 %v4599_v42, %v4486_v20  ;;  %v4047_v20 = vld [vmem:[#allocation2 + $0x1f8] sm:$0xff] }
 0x50d   : > { %v3479_v2 = vpop.f32.mrf.mxu1  ;;  %v14655_v59 = vadd.f32 %v4597_v27, %v3964_v39  ;;  %v14658_v53 = vpop.f32.mrf.mxu0  ;;  %v4049_v27 = vld [vmem:[#allocation2 + $0x208] sm:$0xff] }
 0x50e   : > { %v3480_v41 = vadd.f32 %v3479_v2, %v14403_v17  ;;  %v4488_v62 = vpop.f32.mrf.mxu2  ;;  %v14668_v17 = vpack.c.bf16 %v4049_v27, %v4047_v20  ;;  %v4050_v20 = vld [vmem:[#allocation2 + $0x210] sm:$0xff]  ;;  %v4052_v27 = vld [vmem:[#allocation2 + $0x220] sm:$0xff] }
 0x50f   : > { %17999 = vst [vmem:[#allocation40_spill] sm:$0xff] %v14655_v59  ;;  %v14681_v59 = vpack.c.bf16 %v4052_v27, %v4050_v20 }
 0x510   : > { %v3864_v15 = vrot.slane %v3480_v41, 2  ;;  %3437 = vmatmul.bf16.gmra.mxu0 %v18000_v33  ;;  %18002 = vst [vmem:[#allocation18_spill] sm:$0xff] %v14668_v17  ;;  %v18003_v41 = vld [vmem:[#allocation46_spill] sm:$0xff] }
 0x512   : > { %v3865_v43 = vsel %vm3845_vm6, %v3862_v38, %v3864_v15 }
 0x513   : > { %v3965_v21 = vadd.f32 %v3865_v43, %v14064_v45  ;;  %v4601_v47 = vpop.f32.mrf.mxu3 }
 0x514   : > { %4524 = vmatmul.bf16.gmra.mxu2 %v14663_v28 }
 0x515   : > { %v3482_v39 = vpop.f32.mrf.mxu1  ;;  %v14665_v42 = vadd.f32 %v4600_v32, %v3965_v21  ;;  %v14670_v2 = vpop.f32.mrf.mxu0 }
 0x516   : > { %v4490_v38 = vpop.f32.mrf.mxu2  ;;  %v3483_v14 = vadd.f32 %v3482_v39, %v14409_v37  ;;  %v4053_v37 = vld [vmem:[#allocation2 + $0x228] sm:$0xff] }
 0x517   : > { %18001 = vst [vmem:[#allocation39_spill] sm:$0xff] %v14665_v42 }
 0x518   : > { %3521 = vmatmul.bf16.gmra.mxu1 %v18003_v41  ;;  %4637 = vmatmul.bf16.gmra.mxu3 %v14668_v17  ;;  %v3866_v33 = vrot.slane %v3483_v14, 2  ;;  %v18004_v41 = vld [vmem:[#allocation47_spill] sm:$0xff] }
 0x51b   : > { %v4603_v45 = vpop.f32.mrf.mxu3 }
 0x51c   : > { %v4604_v54 = vadd.f32 %v4603_v45, %v4490_v38 }
 0x51d   : > { %v3484_v15 = vpop.f32.mrf.mxu1  ;;  %v14676_v32 = vpop.f32.mrf.mxu0 }
 0x51e   : > { %v3485_v62 = vadd.f32 %v3484_v15, %v14422_v61  ;;  %v4492_v21 = vpop.f32.mrf.mxu2  ;;  %v4051_v61 = vld [vmem:[#allocation2 + $0x218] sm:$0xff] }
 0x51f   : > { %v14687_v15 = vpack.c.bf16 %v4053_v37, %v4051_v61  ;;  %v4054_v61 = vld [vmem:[#allocation2 + $0x230] sm:$0xff] }
 0x520   : > { %v3867_v43 = vrot.slane %v3485_v62, 2  ;;  %4689 = vmatmul.bf16.vlgmr.msra.gmra.mxu0 %v14311_v51 }
 0x521   : > { %18006 = vst [vmem:[#allocation41_spill] sm:$0xff] %v14687_v15 }
 0x522   : > { %v3868_v47 = vsel %vm3845_vm6, %v3866_v33, %v3867_v43 }
 0x523   : > { %v3966_v17 = vadd.f32 %v3868_v47, %v18004_v41  ;;  %v4605_v42 = vpop.f32.mrf.mxu3  ;;  %v11227_v41 = vld [vmem:[%s17705_s6 + $0x218] sm:$0xf] }
 0x524   : > { %v4606_v39 = vadd.f32 %v4605_v42, %v4492_v21  ;;  %4528 = vmatmul.bf16.gmra.mxu2 %v14681_v59  ;;  %v18008_v21 = vld [vmem:[#allocation48_spill] sm:$0xff] }
 0x525   : > { %v3487_v38 = vpop.f32.mrf.mxu1  ;;  %v14683_v45 = vadd.f32 %v4604_v54, %v3966_v17  ;;  %v14689_v62 = vpop.f32.mrf.mxu0 }
 0x526   : > { %v3488_v14 = vadd.f32 %v3487_v38, %v14430_v26 }
 0x527   : > { %18005 = vst [vmem:[#allocation42_spill] sm:$0xff] %v14683_v45  ;;  %v4495_v47 = vpop.f32.mrf.mxu2 }
 0x528   : > { %v3869_v33 = vrot.slane %v3488_v14, 2  ;;  %3526 = vmatmul.bf16.gmra.mxu1 %v18007_v22  ;;  %4641 = vmatmul.bf16.gmra.mxu3 %v14687_v15  ;;  %v11980_v22 = vld [vmem:[%s17705_s6 + $0x220] sm:$0xf0] }
 0x529   : > { %v11228_v37 = vor.u32 %v11980_v22, %v11227_v41  ;;  %v4056_v47 = vld [vmem:[#allocation2 + $0x240] sm:$0xff]  ;;  %v4057_v22 = vld [vmem:[#allocation2 + $0x248] sm:$0xff] }
 0x52a   : > { %v3870_v42 = vsel %vm3845_vm6, %v3867_v43, %v3869_v33  ;;  %v11993_v43 = vld [vmem:[%s17705_s6 + $0x28c] sm:$0xf] }
 0x52b   : > { %v3967_v20 = vadd.f32 %v3870_v42, %v18008_v21  ;;  %v4608_v17 = vpop.f32.mrf.mxu3  ;;  %4940 = vmatpush.bf16.msrb.mxu2 %v11228_v37  ;;  %v4055_v42 = vld [vmem:[#allocation2 + $0x238] sm:$0xff] }
 0x52c   : > { %v14713_v17 = vpack.c.bf16 %v4056_v47, %v4054_v61 }
 0x52d   : > { %v3489_v54 = vpop.f32.mrf.mxu1  ;;  %v14695_v27 = vadd.f32 %v4606_v39, %v3967_v20  ;;  %v14697_v26 = vpop.f32.mrf.mxu0  ;;  %v11281_v39 = vld [vmem:[%s17705_s6 + $0x294] sm:$0xf0] }
 0x52e   : > { %v11284_v33 = vor.u32 %v11993_v43, %v11281_v39  ;;  %v3490_v21 = vadd.f32 %v3489_v54, %v14440_v6  ;;  %v18011_v39 = vld [vmem:[#allocation11_spill] sm:$0xff] }
 0x52f   : > { %18009 = vst [vmem:[#allocation43_spill] sm:$0xff] %v14695_v27  ;;  %v4496_v38 = vpop.f32.mrf.mxu2  ;;  %v14717_v27 = vpack.c.bf16 %v4057_v22, %v4055_v42 }
 0x530   : > { %4694 = vmatmul.bf16.gmra.mxu0 %v14331_v7  ;;  %4814 = vmatpush.bf16.msra.mxu1 %v11284_v33  ;;  %v3871_v45 = vrot.slane %v3490_v21, 2 }
 0x531   : > { %18010 = vst [vmem:[#allocation20_spill] sm:$0xff] %v14717_v27 }
 0x533   : > { %v4609_v14 = vpop.f32.mrf.mxu3 }
 0x534   : > { %v4610_v20 = vadd.f32 %v4609_v14, %v4496_v38  ;;  %4533 = vmatmul.bf16.gmra.mxu2 %v14713_v17 }
 0x535   : > { %v3492_v41 = vpop.f32.mrf.mxu1  ;;  %v14719_v15 = vpop.f32.mrf.mxu0 }
 0x536   : > { %v3493_v37 = vadd.f32 %v3492_v41, %v14449_v16 }
 0x537   : > { %v4499_v6 = vpop.f32.mrf.mxu2 }
 0x538   : > { %v3872_v43 = vrot.slane %v3493_v37, 2  ;;  %3531 = vmatmul.bf16.gmra.mxu1 %v18011_v39  ;;  %4646 = vmatmul.bf16.gmra.mxu3 %v14717_v27  ;;  %v4058_v37 = vld [vmem:[#allocation2 + $0x250] sm:$0xff]  ;;  %v4060_v39 = vld [vmem:[#allocation2 + $0x260] sm:$0xff] }
 0x53a   : > { %v3873_v54 = vsel %vm3845_vm6, %v3871_v45, %v3872_v43 }
 0x53b   : > { %v3968_v38 = vadd.f32 %v3873_v54, %v14099_v5  ;;  %v4612_v61 = vpop.f32.mrf.mxu3  ;;  %v14733_v54 = vpack.c.bf16 %v4060_v39, %v4058_v37 }
 0x53c   : > { %v4613_v14 = vadd.f32 %v4612_v61, %v4499_v6  ;;  %v4059_v6 = vld [vmem:[#allocation2 + $0x258] sm:$0xff] }
 0x53d   : > { %v3494_v16 = vpop.f32.mrf.mxu1  ;;  %v14725_v33 = vadd.f32 %v4610_v20, %v3968_v38  ;;  %v14728_v42 = vpop.f32.mrf.mxu0  ;;  %v4061_v20 = vld [vmem:[#allocation2 + $0x268] sm:$0xff] }
 0x53e   : > { %v3495_v47 = vadd.f32 %v3494_v16, %v14473_v58  ;;  %v14738_v58 = vpack.c.bf16 %v4061_v20, %v4059_v6  ;;  %v4062_v20 = vld [vmem:[#allocation2 + $0x270] sm:$0xff] }
 0x53f   : > { %18012 = vst [vmem:[#allocation44_spill] sm:$0xff] %v14725_v33  ;;  %v4501_v41 = vpop.f32.mrf.mxu2 }
 0x540   : > { %v3874_v21 = vrot.slane %v3495_v47, 2  ;;  %4699 = vmatmul.bf16.gmra.mxu0 %v14347_v60  ;;  %18014 = vst [vmem:[#allocation22_spill] sm:$0xff] %v14738_v58  ;;  %v18015_v47 = vld [vmem:[#allocation12_spill] sm:$0xff] }
 0x542   : > { %v3875_v22 = vsel %vm3845_vm6, %v3872_v43, %v3874_v21 }
 0x543   : > { %v3969_v45 = vadd.f32 %v3875_v22, %v14111_v13  ;;  %v4614_v5 = vpop.f32.mrf.mxu3 }
 0x544   : > { %4537 = vmatmul.bf16.gmra.mxu2 %v14733_v54 }
 0x545   : > { %v3497_v38 = vpop.f32.mrf.mxu1  ;;  %v14735_v61 = vadd.f32 %v4613_v14, %v3969_v45  ;;  %v14740_v16 = vpop.f32.mrf.mxu0 }
 0x546   : > { %v3498_v21 = vadd.f32 %v3497_v38, %v14479_v52  ;;  %v4065_v52 = vld [vmem:[#allocation2 + $0x288] sm:$0xff] }
 0x547   : > { %18013 = vst [vmem:[#allocation45_spill] sm:$0xff] %v14735_v61  ;;  %v4503_v43 = vpop.f32.mrf.mxu2 }
 0x548   : > { %3536 = vmatmul.bf16.gmra.mxu1 %v18015_v47  ;;  %4650 = vmatmul.bf16.gmra.mxu3 %v14738_v58  ;;  %v3876_v39 = vrot.slane %v3498_v21, 2  ;;  %v4064_v47 = vld [vmem:[#allocation2 + $0x280] sm:$0xff]  ;;  %v18016_v58 = vld [vmem:[#allocation49_spill] sm:$0xff] }
 0x549   : > { %v14751_v27 = vpack.c.bf16 %v4064_v47, %v4062_v20  ;;  %v11215_v47 = vld [vmem:[%s17705_s6 + $0x200] sm:$0xf] }
 0x54b   : > { %v4616_v13 = vpop.f32.mrf.mxu3  ;;  %18017 = vst [vmem:[#allocation46_spill] sm:$0xff] %v14751_v27 }
 0x54c   : > { %v4617_v41 = vadd.f32 %v4616_v13, %v4503_v43 }
 0x54d   : > { %v3499_v22 = vpop.f32.mrf.mxu1  ;;  %v14746_v14 = vpop.f32.mrf.mxu0 }
 0x54e   : > { %v3500_v37 = vadd.f32 %v3499_v22, %v14492_v23  ;;  %v4063_v23 = vld [vmem:[#allocation2 + $0x278] sm:$0xff] }
 0x54f   : > { %v4505_v5 = vpop.f32.mrf.mxu2  ;;  %v14757_v22 = vpack.c.bf16 %v4065_v52, %v4063_v23  ;;  %v4066_v23 = vld [vmem:[#allocation2 + $0x290] sm:$0xff] }
 0x550   : > { %v3877_v45 = vrot.slane %v3500_v37, 2  ;;  %4704 = vmatmul.bf16.gmra.mxu0 %v14364_v4 }
 0x551   : > { %18019 = vst [vmem:[#allocation10_spill] sm:$0xff] %v14757_v22 }
 0x552   : > { %v3878_v6 = vsel %vm3845_vm6, %v3876_v39, %v3877_v45 }
 0x553   : > { %v3970_v61 = vadd.f32 %v3878_v6, %v18016_v58  ;;  %v4618_v33 = vpop.f32.mrf.mxu3 }
 0x554   : > { %v4619_v38 = vadd.f32 %v4618_v33, %v4505_v5  ;;  %4541 = vmatmul.bf16.gmra.mxu2 %v14751_v27  ;;  %v18021_v5 = vld [vmem:[#allocation50_spill] sm:$0xff] }
 0x555   : > { %v3502_v43 = vpop.f32.mrf.mxu1  ;;  %v14753_v13 = vadd.f32 %v4617_v41, %v3970_v61  ;;  %v14759_v37 = vpop.f32.mrf.mxu0 }
 0x556   : > { %v3503_v21 = vadd.f32 %v3502_v43, %v14502_v3 }
 0x557   : > { %18018 = vst [vmem:[#allocation47_spill] sm:$0xff] %v14753_v13  ;;  %v4508_v58 = vpop.f32.mrf.mxu2 }
 0x558   : > { %v3879_v39 = vrot.slane %v3503_v21, 2  ;;  %3541 = vmatmul.bf16.gmra.mxu1 %v18020_v11  ;;  %4654 = vmatmul.bf16.gmra.mxu3 %v14757_v22  ;;  %v11977_v11 = vld [vmem:[%s17705_s6 + $0x208] sm:$0xf0]  ;;  %v4068_v58 = vld [vmem:[#allocation2 + $0x2a0] sm:$0xff] }
 0x559   : > { %v11216_v52 = vor.u32 %v11977_v11, %v11215_v47  ;;  %v4069_v11 = vld [vmem:[#allocation2 + $0x2a8] sm:$0xff] }
 0x55a   : > { %v3880_v33 = vsel %vm3845_vm6, %v3877_v45, %v3879_v39  ;;  %v11990_v45 = vld [vmem:[%s17705_s6 + $0x274] sm:$0xf] }
 0x55b   : > { %v3971_v6 = vadd.f32 %v3880_v33, %v18021_v5  ;;  %v4621_v61 = vpop.f32.mrf.mxu3  ;;  %4941 = vmatpush.bf16.msrb.mxu2 %v11216_v52  ;;  %v4067_v33 = vld [vmem:[#allocation2 + $0x298] sm:$0xff] }
 0x55c   : > { %v14783_v61 = vpack.c.bf16 %v4068_v58, %v4066_v23 }
 0x55d   : > { %v3504_v41 = vpop.f32.mrf.mxu1  ;;  %v14765_v20 = vadd.f32 %v4619_v38, %v3971_v6  ;;  %v14767_v3 = vpop.f32.mrf.mxu0  ;;  %v11269_v38 = vld [vmem:[%s17705_s6 + $0x27c] sm:$0xf0] }
 0x55e   : > { %v11272_v39 = vor.u32 %v11990_v45, %v11269_v38  ;;  %v3505_v5 = vadd.f32 %v3504_v41, %v14517_v12  ;;  %18023 = vst [vmem:[#allocation11_spill] sm:$0xff] %v14783_v61  ;;  %v18025_v38 = vld [vmem:[#allocation16_spill] sm:$0xff] }
 0x55f   : > { %18022 = vst [vmem:[#allocation48_spill] sm:$0xff] %v14765_v20  ;;  %v4509_v43 = vpop.f32.mrf.mxu2  ;;  %v14787_v20 = vpack.c.bf16 %v4069_v11, %v4067_v33 }
 0x560   : > { %4709 = vmatmul.bf16.gmra.mxu0 %v14398_v19  ;;  %4815 = vmatpush.bf16.msra.mxu1 %v11272_v39  ;;  %v3881_v13 = vrot.slane %v3505_v5, 2 }
 0x561   : > { %18024 = vst [vmem:[#allocation12_spill] sm:$0xff] %v14787_v20 }
 0x563   : > { %v4622_v21 = vpop.f32.mrf.mxu3 }
 0x564   : > { %v4623_v6 = vadd.f32 %v4622_v21, %v4509_v43  ;;  %4546 = vmatmul.bf16.gmra.mxu2 %v14783_v61 }
 0x565   : > { %v3507_v47 = vpop.f32.mrf.mxu1  ;;  %v14789_v22 = vpop.f32.mrf.mxu0 }
 0x566   : > { %v3508_v52 = vadd.f32 %v3507_v47, %v14525_v30 }
 0x567   : > { %v4512_v12 = vpop.f32.mrf.mxu2 }
 0x568   : > { %v3882_v45 = vrot.slane %v3508_v52, 2  ;;  %3546 = vmatmul.bf16.gmra.mxu1 %v18025_v38  ;;  %4659 = vmatmul.bf16.gmra.mxu3 %v14787_v20  ;;  %v4070_v52 = vld [vmem:[#allocation2 + $0x2b0] sm:$0xff]  ;;  %v4072_v38 = vld [vmem:[#allocation2 + $0x2c0] sm:$0xff] }
 0x56a   : > { %v3883_v41 = vsel %vm3845_vm6, %v3881_v13, %v3882_v45  ;;  %v18027_v13 = vld [vmem:[#allocation51_spill] sm:$0xff] }
 0x56b   : > { %v3972_v43 = vadd.f32 %v3883_v41, %v14152_v48  ;;  %v4625_v23 = vpop.f32.mrf.mxu3  ;;  %v14803_v41 = vpack.c.bf16 %v4072_v38, %v4070_v52 }
 0x56c   : > { %v4626_v21 = vadd.f32 %v4625_v23, %v4512_v12  ;;  %v4071_v12 = vld [vmem:[#allocation2 + $0x2b8] sm:$0xff] }
 0x56d   : > { %v3509_v30 = vpop.f32.mrf.mxu1  ;;  %v14795_v39 = vadd.f32 %v4623_v6, %v3972_v43  ;;  %v14798_v33 = vpop.f32.mrf.mxu0  ;;  %18028 = vst [vmem:[#allocation14_spill] sm:$0xff] %v14803_v41  ;;  %v4073_v6 = vld [vmem:[#allocation2 + $0x2c8] sm:$0xff] }
 0x56e   : > { %v3510_v58 = vadd.f32 %v3509_v30, %v14549_v18  ;;  %v14808_v18 = vpack.c.bf16 %v4073_v6, %v4071_v12  ;;  %v4074_v6 = vld [vmem:[#allocation2 + $0x2d0] sm:$0xff] }
 0x56f   : > { %18026 = vst [vmem:[#allocation49_spill] sm:$0xff] %v14795_v39  ;;  %v4514_v47 = vpop.f32.mrf.mxu2 }
 0x570   : > { %v3884_v5 = vrot.slane %v3510_v58, 2  ;;  %4714 = vmatmul.bf16.gmra.mxu0 %v14416_v56  ;;  %18030 = vst [vmem:[#allocation16_spill] sm:$0xff] %v14808_v18  ;;  %v18031_v58 = vld [vmem:[#allocation17_spill] sm:$0xff] }
 0x572   : > { %v3885_v11 = vsel %vm3845_vm6, %v3882_v45, %v3884_v5 }
 0x573   : > { %v3973_v20 = vadd.f32 %v3885_v11, %v18027_v13  ;;  %v4627_v48 = vpop.f32.mrf.mxu3 }
 0x574   : > { %4550 = vmatmul.bf16.gmra.mxu2 %v14803_v41 }
 0x575   : > { %v3512_v43 = vpop.f32.mrf.mxu1  ;;  %v14805_v23 = vadd.f32 %v4626_v21, %v3973_v20  ;;  %v14810_v30 = vpop.f32.mrf.mxu0 }
 0x576   : > { %v3513_v47 = vadd.f32 %v3512_v43, %v14558_v55  ;;  %v4077_v43 = vld [vmem:[#allocation2 + $0x2e8] sm:$0xff] }
 0x577   : > { %18029 = vst [vmem:[#allocation50_spill] sm:$0xff] %v14805_v23  ;;  %v4516_v45 = vpop.f32.mrf.mxu2 }
 0x578   : > { %3551 = vmatmul.bf16.gmra.mxu1 %v18031_v58  ;;  %4663 = vmatmul.bf16.gmra.mxu3 %v14808_v18  ;;  %v3886_v21 = vrot.slane %v3513_v47, 2  ;;  %v4076_v58 = vld [vmem:[#allocation2 + $0x2e0] sm:$0xff] }
 0x579   : > { %v18032_v18 = vld [vmem:[#allocation52_spill] sm:$0xff]  ;;  %v14821_v55 = vpack.c.bf16 %v4076_v58, %v4074_v6 }
 0x57b   : > { %v4629_v5 = vpop.f32.mrf.mxu3  ;;  %18033 = vst [vmem:[#allocation51_spill] sm:$0xff] %v14821_v55 }
 0x57c   : > { %v4630_v11 = vadd.f32 %v4629_v5, %v4516_v45  ;;  %v4075_v5 = vld [vmem:[#allocation2 + $0x2d8] sm:$0xff] }
 0x57d   : > { %v3514_v52 = vpop.f32.mrf.mxu1  ;;  %v14816_v20 = vpop.f32.mrf.mxu0 }
 0x57e   : > { %v3515_v38 = vadd.f32 %v3514_v52, %v14570_v57 }
 0x57f   : > { %v4518_v48 = vpop.f32.mrf.mxu2 }
 0x580   : > { %v3887_v13 = vrot.slane %v3515_v38, 2  ;;  %4719 = vmatmul.bf16.gmra.mxu0 %v14434_v46  ;;  %v14827_v38 = vpack.c.bf16 %v4077_v43, %v4075_v5  ;;  %v11203_v5 = vld [vmem:[%s17705_s6 + $0x1e8] sm:$0xf] }
 0x582   : > { %v3888_v12 = vsel %vm3845_vm6, %v3886_v21, %v3887_v13  ;;  %18035 = vst [vmem:[#allocation52_spill] sm:$0xff] %v14827_v38  ;;  %v12286_v21 = vld [vmem:[%s12994_s21 + $0x78] sm:$0xff]  }
 0x583   : > { %v3974_v23 = vadd.f32 %v3888_v12, %v18032_v18  ;;  %v4631_v39 = vpop.f32.mrf.mxu3  ;;  %v12190_v61 = vunpack.c.l.bf16 %v12286_v21  ;;  %v18036_v12 = vld [vmem:[#allocation19_spill] sm:$0xff] }
 0x584   : > { %v4632_v45 = vadd.f32 %v4631_v39, %v4518_v48  ;;  %4554 = vmatmul.bf16.gmra.mxu2 %v14821_v55  ;;  %v4081_v55 = vld [vmem:[#allocation2 + $0x308] sm:$0xff] }
 0x585   : > { %v3517_v57 = vpop.f32.mrf.mxu1  ;;  %v14823_v52 = vadd.f32 %v4630_v11, %v3974_v23  ;;  %v14830_v41 = vpop.f32.mrf.mxu0  ;;  %v14834_v48 = vrot.slane %v12190_v61, 7  ;;  %v18037_v11 = vld [vmem:[#allocation53_spill] sm:$0xff]  ;;  %v11974_v61 = vld [vmem:[%s17705_s6 + $0x1f0] sm:$0xf0] }
 0x586   : > { %v3518_v47 = vadd.f32 %v3517_v57, %v14582_v29 }
 0x587   : > { %18034 = vst [vmem:[#allocation17_spill] sm:$0xff] %v14823_v52  ;;  %v4521_v39 = vpop.f32.mrf.mxu2 }
 0x588   : > { %v3889_v18 = vrot.slane %v3518_v47, 2  ;;  %3556 = vmatmul.bf16.gmra.mxu1 %v18036_v12  ;;  %4667 = vmatmul.bf16.gmra.mxu3 %v14827_v38  ;;  %2186 = vst [vmem:[#allocation2 + $0x300] sm:$0xfe] %v14834_v48  ;;  %v11204_v47 = vor.u32 %v11974_v61, %v11203_v5  ;;  %v11257_v12 = vld [vmem:[%s17705_s6 + $0x264] sm:$0xf0]  ;;  %v4078_v39 = vld [vmem:[#allocation2 + $0x2f0] sm:$0xff] }
 0x589   : > { %v12007_v5 = vld [vmem:[%s17705_s6 + $0x2f8] sm:$0xf0] }
 0x58a   : > { %v3890_v23 = vsel %vm3845_vm6, %v3887_v13, %v3889_v18  ;;  %v4079_v18 = vld [vmem:[#allocation2 + $0x2f8] sm:$0xff]  ;;  %4942 = vmatpush.bf16.msrb.mxu2 %v11204_v47 }
 0x58b   : > { %v3975_v29 = vadd.f32 %v3890_v23, %v18037_v11  ;;  %v4634_v6 = vpop.f32.mrf.mxu3 }
 0x58c   : > { %v11335_v6 = vld [vmem:[%s17705_s6 + $0x2f0] sm:$0xf] }
 0x58d   : > { %v3519_v58 = vpop.f32.mrf.mxu1  ;;  %v14839_v43 = vadd.f32 %v4632_v45, %v3975_v29  ;;  %v14841_v57 = vpop.f32.mrf.mxu0  ;;  %v11987_v45 = vld [vmem:[%s17705_s6 + $0x25c] sm:$0xf]  ;;  %v11336_v38 = vor.u32 %v12007_v5, %v11335_v6  ;;  %v11311_v5 = vld [vmem:[%s17705_s6 + $0x2c0] sm:$0xf] }
 0x58e   : > { %v11260_v11 = vor.u32 %v11987_v45, %v11257_v12  ;;  %v3520_v61 = vadd.f32 %v3519_v58, %v14607_v10  ;;  %v14867_v12 = vpack.c.bf16 %v4081_v55, %v4079_v18  ;;  %v11323_v10 = vld [vmem:[%s17705_s6 + $0x2d8] sm:$0xf]  ;;  %v12004_v58 = vld [vmem:[%s17705_s6 + $0x2e0] sm:$0xf0]  ;;  %v18041_v18 = vld [vmem:[#allocation54_spill] sm:$0xff] }
 0x58f   : > { %18038 = vst [vmem:[#allocation19_spill] sm:$0xff] %v14839_v43  ;;  %v4522_v13 = vpop.f32.mrf.mxu2  ;;  %v4080_v29 = vld [vmem:[#allocation2 + $0x300] sm:$0xff]  ;;  %5068 = vmatpush.bf16.msra.mxu3 %v11336_v38 }
 0x590   : > { %4724 = vmatmul.bf16.gmra.mxu0 %v14468_v49  ;;  %v14863_v43 = vpack.c.bf16 %v4080_v29, %v4078_v39  ;;  %4816 = vmatpush.bf16.msra.mxu1 %v11260_v11  ;;  %18039 = vst [vmem:[#allocation53_spill] sm:$0xff] %v14867_v12  ;;  %v3891_v39 = vrot.slane %v3520_v61, 2  ;;  %v18040_v11 = vld [vmem:[#allocation21_spill] sm:$0xff] }
 0x593   : > { %v4635_v23 = vpop.f32.mrf.mxu3 }
 0x594   : > { %v4636_v47 = vadd.f32 %v4635_v23, %v4522_v13  ;;  %4559 = vmatmul.bf16.gmra.mxu2 %v14863_v43  ;;  %v12191_v13 = vunpack.c.h.bf16 %v12286_v21  ;;  %v12001_v21 = vld [vmem:[%s17705_s6 + $0x2c8] sm:$0xf0] }
 0x595   : > { %v3522_v52 = vpop.f32.mrf.mxu1  ;;  %v14869_v27 = vpop.f32.mrf.mxu0 }
 0x596   : > { %v3523_v45 = vadd.f32 %v3522_v52, %v14627_v1  ;;  %v11324_v1 = vor.u32 %v12004_v58, %v11323_v10  ;;  %v2090_v52 = vrot.slane %v12191_v13, 7 }
 0x597   : > { %v4525_v55 = vpop.f32.mrf.mxu2 }
 0x598   : > { %v3892_v23 = vrot.slane %v3523_v45, 2  ;;  %3561 = vmatmul.bf16.gmra.mxu1 %v18040_v11  ;;  %4672 = vmatmul.bf16.gmra.mxu3 %v14867_v12  ;;  %2188 = vst [vmem:[#allocation2 + $0x320] sm:$0x1] %v2090_v52  ;;  %v11312_v45 = vor.u32 %v12001_v21, %v11311_v5  ;;  %v11299_v11 = vld [vmem:[%s17705_s6 + $0x2a8] sm:$0xf]  ;;  %v18043_v5 = vld [vmem:[#allocation56_spill] sm:$0xff] }
 0x599   : > { %5069 = vmatpush.bf16.msra.mxu3 %v11324_v1  ;;  %v11998_v1 = vld [vmem:[%s17705_s6 + $0x2b0] sm:$0xf0]  ;;  %v18047_v12 = vld [vmem:[#allocation57_spill] sm:$0xff] }
 0x59a   : > { %v3893_v38 = vsel %vm3845_vm6, %v3891_v39, %v3892_v23 }
 0x59b   : > { %v3976_v29 = vadd.f32 %v3893_v38, %v18041_v18  ;;  %v4638_v6 = vpop.f32.mrf.mxu3  ;;  %v11300_v18 = vor.u32 %v11998_v1, %v11299_v11 }
 0x59c   : > { %v4639_v61 = vadd.f32 %v4638_v6, %v4525_v55  ;;  %v4083_v6 = vld [vmem:[#allocation2 + $0x318] sm:$0xff] }
 0x59d   : > { %v3524_v10 = vpop.f32.mrf.mxu1  ;;  %v14887_v58 = vadd.f32 %v4636_v47, %v3976_v29  ;;  %5070 = vmatpush.bf16.msra.mxu3 %v11312_v45  ;;  %v14890_v39 = vpop.f32.mrf.mxu0 }
 0x59e   : > { %v3525_v13 = vadd.f32 %v3524_v10, %v14649_v36  ;;  %v2091_v36 = vsel %vm2043_vm4, %v14834_v48, %v2090_v52  ;;  %v11287_v48 = vld [vmem:[%s17705_s6 + $0x290] sm:$0xf]  ;;  %v11995_v52 = vld [vmem:[%s17705_s6 + $0x298] sm:$0xf0] }
 0x59f   : > { %18042 = vst [vmem:[#allocation21_spill] sm:$0xff] %v14887_v58  ;;  %v4527_v55 = vpop.f32.mrf.mxu2  ;;  %v4084_v29 = vld [vmem:[#allocation2 + $0x320] sm:$0xff]  ;;  %v4085_v58 = vld [vmem:[#allocation2 + $0x328] sm:$0xff] }
 0x5a0   : > { %v3894_v38 = vrot.slane %v3525_v13, 2  ;;  %4729 = vmatmul.bf16.gmra.mxu0 %v14486_v9  ;;  %2187 = vst [vmem:[#allocation2 + $0x310] sm:$0xff] %v2091_v36  ;;  %v14903_v10 = vpack.c.bf16 %v4084_v29, %v2091_v36  ;;  %v11191_v13 = vld [vmem:[%s17705_s6 + $0x1d0] sm:$0xf]  ;;  %v14920_v55 = vpack.c.bf16 %v4085_v58, %v4083_v6  ;;  %v11179_v36 = vld [vmem:[%s17705_s6 + $0x1b8] sm:$0xf] }
 0x5a1   : > { %5071 = vmatpush.bf16.msra.mxu3 %v11300_v18  ;;  %v11968_v29 = vld [vmem:[%s17705_s6 + $0x1c0] sm:$0xf0] }
 0x5a2   : > { %v3895_v47 = vsel %vm3845_vm6, %v3892_v23, %v3894_v38  ;;  %v11971_v23 = vld [vmem:[%s17705_s6 + $0x1d8] sm:$0xf0]  ;;  %v11288_v38 = vor.u32 %v11995_v52, %v11287_v48  ;;  %18045 = vst [vmem:[#allocation56_spill] sm:$0xff] %v14920_v55  ;;  %v11180_v58 = vor.u32 %v11968_v29, %v11179_v36  ;;  %v11992_v6 = vld [vmem:[%s17705_s6 + $0x280] sm:$0xf0] }
 0x5a3   : > { %v3977_v21 = vadd.f32 %v3895_v47, %v18043_v5  ;;  %v4640_v45 = vpop.f32.mrf.mxu3  ;;  %v11192_v11 = vor.u32 %v11971_v23, %v11191_v13  ;;  %v18046_v5 = vld [vmem:[#allocation55_spill] sm:$0xff]  ;;  %v11167_v23 = vld [vmem:[%s17705_s6 + $0x1a0] sm:$0xf]  ;;  %v11989_v29 = vld [vmem:[%s17705_s6 + $0x268] sm:$0xf0] }
 0x5a4   : > { %4563 = vmatmul.bf16.gmra.mxu2 %v14903_v10  ;;  %v11263_v48 = vld [vmem:[%s17705_s6 + $0x260] sm:$0xf] }
 0x5a5   : > { %v3527_v1 = vpop.f32.mrf.mxu1  ;;  %v14917_v18 = vadd.f32 %v4639_v61, %v3977_v21  ;;  %v14922_v47 = vpop.f32.mrf.mxu0  ;;  %4943 = vmatpush.bf16.msrb.mxu2 %v11192_v11  ;;  %5072 = vmatpush.bf16.msra.mxu3 %v11288_v38  ;;  %v11275_v61 = vld [vmem:[%s17705_s6 + $0x278] sm:$0xf]  ;;  %v11965_v11 = vld [vmem:[%s17705_s6 + $0x1a8] sm:$0xf0] }
 0x5a6   : > { %v11276_v45 = vor.u32 %v11992_v6, %v11275_v61  ;;  %v3528_v52 = vadd.f32 %v3527_v1, %v14658_v53  ;;  %v11168_v36 = vor.u32 %v11965_v11, %v11167_v23  ;;  %v11245_v53 = vld [vmem:[%s17705_s6 + $0x24c] sm:$0xf0]  ;;  %v11155_v1 = vld [vmem:[%s17705_s6 + $0x188] sm:$0xf] }
 0x5a7   : > { %18044 = vst [vmem:[#allocation54_spill] sm:$0xff] %v14917_v18  ;;  %v4529_v21 = vpop.f32.mrf.mxu2  ;;  %v11251_v11 = vld [vmem:[%s17705_s6 + $0x248] sm:$0xf] }
 0x5a8   : > { %3566 = vmatmul.bf16.gmra.mxu1 %v18046_v5  ;;  %4676 = vmatmul.bf16.gmra.mxu3 %v14920_v55  ;;  %v11264_v5 = vor.u32 %v11989_v29, %v11263_v48  ;;  %v11986_v29 = vld [vmem:[%s17705_s6 + $0x250] sm:$0xf0] }
 0x5a9   : > { %4944 = vmatpush.bf16.msrb.mxu2 %v11180_v58  ;;  %5073 = vmatpush.bf16.msra.mxu3 %v11276_v45  ;;  %v11984_v45 = vld [vmem:[%s17705_s6 + $0x244] sm:$0xf] }
 0x5aa   : > { %v11248_v23 = vor.u32 %v11984_v45, %v11245_v53 }
 0x5ab   : > { %v4642_v13 = vpop.f32.mrf.mxu3 }
 0x5ac   : > { %v4643_v38 = vadd.f32 %v4642_v13, %v4529_v21  ;;  %v3896_v21 = vrot.slane %v3528_v52, 2  ;;  %4817 = vmatpush.bf16.msra.mxu1 %v11248_v23  ;;  %v18048_v23 = vld [vmem:[#allocation24_spill] sm:$0xff] }
 0x5ad   : > { %v3529_v61 = vpop.f32.mrf.mxu1  ;;  %v14952_v6 = vpop.f32.mrf.mxu0  ;;  %4945 = vmatpush.bf16.msrb.mxu2 %v11168_v36  ;;  %5074 = vmatpush.bf16.msra.mxu3 %v11264_v5 }
 0x5ae   : > { %v3530_v58 = vadd.f32 %v3529_v61, %v14670_v2  ;;  %v11962_v2 = vld [vmem:[%s17705_s6 + $0x190] sm:$0xf0]  ;;  %v11252_v61 = vor.u32 %v11986_v29, %v11251_v11 }
 0x5af   : > { %v4531_v48 = vpop.f32.mrf.mxu2  ;;  %v11156_v36 = vor.u32 %v11962_v2, %v11155_v1 }
 0x5b0   : > { %v3897_v13 = vrot.slane %v3530_v58, 2  ;;  %4734 = vmatmul.bf16.gmra.mxu0 %v14507_v44 }
 0x5b1   : > { %4946 = vmatpush.bf16.msrb.mxu2 %v11156_v36  ;;  %5075 = vmatpush.bf16.msra.mxu3 %v11252_v61 }
 0x5b2   : > { %v3898_v52 = vsel %vm3845_vm6, %v3896_v21, %v3897_v13 }
 0x5b3   : > { %v3978_v5 = vadd.f32 %v3898_v52, %v14322_v40  ;;  %v4644_v58 = vpop.f32.mrf.mxu3 }
 0x5b4   : > { %v4645_v45 = vadd.f32 %v4644_v58, %v4531_v48  ;;  %4947 = vmatmul.bf16.vlgmr.msrb.gmra.mxu2 %v14311_v51 }
 0x5b5   : > { %v3532_v53 = vpop.f32.mrf.mxu1  ;;  %v14975_v55 = vadd.f32 %v4643_v38, %v3978_v5  ;;  %v14979_v2 = vpop.f32.mrf.mxu0 }
 0x5b6   : > { %v3533_v1 = vadd.f32 %v3532_v53, %v14676_v32 }
 0x5b7   : > { %v4534_v21 = vpop.f32.mrf.mxu2 }
 0x5b8   : > { %v3899_v18 = vrot.slane %v3533_v1, 2  ;;  %4818 = vmatmul.bf16.vlgmr.msra.gmra.mxu1 %v18047_v12  ;;  %5076 = vmatmul.bf16.vlgmr.msra.gmra.mxu3 %v18047_v12 }
 0x5ba   : > { %v3900_v40 = vsel %vm3845_vm6, %v3897_v13, %v3899_v18 }
 0x5bb   : > { %v3979_v11 = vadd.f32 %v3900_v40, %v18048_v23  ;;  %v4647_v48 = vpop.f32.mrf.mxu3 }
 0x5bd   : > { %v3534_v36 = vpop.f32.mrf.mxu1  ;;  %v14985_v38 = vadd.f32 %v4645_v45, %v3979_v11  ;;  %v14987_v29 = vpop.f32.mrf.mxu0  ;;  %v18049_v45 = vld [vmem:[#allocation58_spill] sm:$0xff] }
 0x5be   : > { %v3535_v52 = vadd.f32 %v3534_v36, %v14689_v62 }
 0x5bf   : > { %v4535_v32 = vpop.f32.mrf.mxu2 }
 0x5c0   : > { %4739 = vmatmul.bf16.gmra.mxu0 %v14541_v31  ;;  %v3901_v13 = vrot.slane %v3535_v52, 2 }
 0x5c3   : > { %v4648_v51 = vpop.f32.mrf.mxu3 }
 0x5c4   : > { %v4649_v61 = vadd.f32 %v4648_v51, %v4535_v32  ;;  %4952 = vmatmul.bf16.gmra.mxu2 %v14331_v7 }
 0x5c5   : > { %v3537_v5 = vpop.f32.mrf.mxu1  ;;  %v14993_v18 = vpop.f32.mrf.mxu0 }
 0x5c6   : > { %v3538_v12 = vadd.f32 %v3537_v5, %v14697_v26 }
 0x5c7   : > { %v4538_v53 = vpop.f32.mrf.mxu2 }
 0x5c8   : > { %v3902_v58 = vrot.slane %v3538_v12, 2  ;;  %4823 = vmatmul.bf16.gmra.mxu1 %v18049_v45  ;;  %5081 = vmatmul.bf16.gmra.mxu3 %v18049_v45 }
 0x5ca   : > { %v3903_v1 = vsel %vm3845_vm6, %v3901_v13, %v3902_v58 }
 0x5cb   : > { %v3980_v21 = vadd.f32 %v3903_v1, %v14344_v0  ;;  %v4651_v62 = vpop.f32.mrf.mxu3 }
 0x5cc   : > { %v4652_v40 = vadd.f32 %v4651_v62, %v4538_v53 }
 0x5cd   : > { %v3539_v23 = vpop.f32.mrf.mxu1  ;;  %v14999_v11 = vadd.f32 %v4649_v61, %v3980_v21  ;;  %v15002_v26 = vpop.f32.mrf.mxu0 }
 0x5ce   : > { %v3540_v7 = vadd.f32 %v3539_v23, %v14719_v15 }
 0x5cf   : > { %v4540_v36 = vpop.f32.mrf.mxu2 }
 0x5d0   : > { %v3904_v48 = vrot.slane %v3540_v7, 2  ;;  %4744 = vmatmul.bf16.gmra.mxu0 %v14563_v50 }
 0x5d2   : > { %v3905_v32 = vsel %vm3845_vm6, %v3902_v58, %v3904_v48 }
 0x5d3   : > { %v3981_v51 = vadd.f32 %v3905_v32, %v14358_v34  ;;  %v4653_v52 = vpop.f32.mrf.mxu3 }
 0x5d4   : > { %4957 = vmatmul.bf16.gmra.mxu2 %v14347_v60 }
 0x5d5   : > { %v3542_v5 = vpop.f32.mrf.mxu1  ;;  %v15007_v0 = vadd.f32 %v4652_v40, %v3981_v51  ;;  %v15010_v61 = vpop.f32.mrf.mxu0 }
 0x5d6   : > { %v3543_v13 = vadd.f32 %v3542_v5, %v14728_v42 }
 0x5d7   : > { %v4542_v15 = vpop.f32.mrf.mxu2 }
 0x5d8   : > { %4828 = vmatmul.bf16.gmra.mxu1 %v14350_v24  ;;  %5086 = vmatmul.bf16.gmra.mxu3 %v14350_v24  ;;  %v3906_v1 = vrot.slane %v3543_v13, 2 }
 0x5db   : > { %v4655_v12 = vpop.f32.mrf.mxu3 }
 0x5dc   : > { %v4656_v45 = vadd.f32 %v4655_v12, %v4542_v15 }
 0x5dd   : > { %v3544_v58 = vpop.f32.mrf.mxu1  ;;  %v15016_v53 = vpop.f32.mrf.mxu0 }
 0x5de   : > { %v3545_v34 = vadd.f32 %v3544_v58, %v14740_v16 }
 0x5df   : > { %v4544_v62 = vpop.f32.mrf.mxu2 }
 0x5e0   : > { %v3907_v21 = vrot.slane %v3545_v34, 2  ;;  %4749 = vmatmul.bf16.gmra.mxu0 %v14593_v25 }
 0x5e2   : > { %v3908_v60 = vsel %vm3845_vm6, %v3906_v1, %v3907_v21  ;;  %v12054_v1 = vld [vmem:[%s17705_s6 + $0x470] sm:$0xf0] }
 0x5e3   : > { %v3982_v40 = vadd.f32 %v3908_v60, %v14376_v35  ;;  %v4657_v24 = vpop.f32.mrf.mxu3  ;;  %v18050_v35 = vld [vmem:[#allocation26_spill] sm:$0xff] }
 0x5e4   : > { %v4658_v23 = vadd.f32 %v4657_v24, %v4544_v62  ;;  %4962 = vmatmul.bf16.gmra.mxu2 %v14364_v4  ;;  %v11487_v4 = vld [vmem:[%s17705_s6 + $0x3a8] sm:$0xf] }
 0x5e5   : > { %v3547_v7 = vpop.f32.mrf.mxu1  ;;  %v15021_v48 = vadd.f32 %v4656_v45, %v3982_v40  ;;  %v15025_v16 = vpop.f32.mrf.mxu0  ;;  %v11583_v45 = vld [vmem:[%s17705_s6 + $0x468] sm:$0xf] }
 0x5e6   : > { %v3548_v42 = vadd.f32 %v3547_v7, %v14746_v14  ;;  %v11584_v60 = vor.u32 %v12054_v1, %v11583_v45 }
 0x5e7   : > { %v4547_v32 = vpop.f32.mrf.mxu2 }
 0x5e8   : > { %v3909_v36 = vrot.slane %v3548_v42, 2  ;;  %4833 = vmatmul.bf16.gmra.mxu1 %v14368_v63  ;;  %5091 = vmatmul.bf16.gmra.mxu3 %v14368_v63  ;;  %v12030_v63 = vld [vmem:[%s17705_s6 + $0x3b0] sm:$0xf0] }
 0x5e9   : > { %v11488_v34 = vor.u32 %v12030_v63, %v11487_v4  ;;  %6192 = vmatpush.bf16.msrb.mxu1 %v11584_v60 }
 0x5ea   : > { %v3910_v51 = vsel %vm3845_vm6, %v3907_v21, %v3909_v36  ;;  %v18051_v36 = vld [vmem:[#allocation59_spill] sm:$0xff] }
 0x5eb   : > { %v3983_v52 = vadd.f32 %v3910_v51, %v18050_v35  ;;  %v4660_v5 = vpop.f32.mrf.mxu3  ;;  %6079 = vmatpush.bf16.msrb.mxu0 %v11488_v34  ;;  %v18052_v51 = vld [vmem:[#allocation60_spill] sm:$0xff] }
 0x5ed   : > { %v3549_v15 = vpop.f32.mrf.mxu1  ;;  %v15031_v12 = vadd.f32 %v4658_v23, %v3983_v52  ;;  %v15033_v13 = vpop.f32.mrf.mxu0 }
 0x5ee   : > { %v3550_v21 = vadd.f32 %v3549_v15, %v14759_v37 }
 0x5ef   : > { %v4548_v14 = vpop.f32.mrf.mxu2 }
 0x5f0   : > { %4754 = vmatmul.bf16.gmra.mxu0 %v14643_v8  ;;  %v3911_v7 = vrot.slane %v3550_v21, 2 }
 0x5f3   : > { %v4661_v58 = vpop.f32.mrf.mxu3 }
 0x5f4   : > { %v4662_v62 = vadd.f32 %v4661_v58, %v4548_v14  ;;  %4967 = vmatmul.bf16.gmra.mxu2 %v14398_v19  ;;  %v18053_v58 = vld [vmem:[#allocation62_spill] sm:$0xff] }
 0x5f5   : > { %v3552_v40 = vpop.f32.mrf.mxu1  ;;  %v15051_v23 = vpop.f32.mrf.mxu0 }
 0x5f6   : > { %v3553_v24 = vadd.f32 %v3552_v40, %v14767_v3  ;;  %v18054_v40 = vld [vmem:[#allocation61_spill] sm:$0xff] }
 0x5f7   : > { %v4551_v32 = vpop.f32.mrf.mxu2 }
 0x5f8   : > { %v3912_v42 = vrot.slane %v3553_v24, 2  ;;  %4838 = vmatmul.bf16.gmra.mxu1 %v18051_v36  ;;  %5096 = vmatmul.bf16.gmra.mxu3 %v18051_v36 }
 0x5fa   : > { %v3913_v37 = vsel %vm3845_vm6, %v3911_v7, %v3912_v42 }
 0x5fb   : > { %v3984_v35 = vadd.f32 %v3913_v37, %v18052_v51  ;;  %v4664_v52 = vpop.f32.mrf.mxu3 }
 0x5fc   : > { %v4665_v5 = vadd.f32 %v4664_v52, %v4551_v32 }
 0x5fd   : > { %v3554_v15 = vpop.f32.mrf.mxu1  ;;  %v15057_v3 = vadd.f32 %v4662_v62, %v3984_v35  ;;  %v15060_v14 = vpop.f32.mrf.mxu0 }
 0x5fe   : > { %v3555_v19 = vadd.f32 %v3554_v15, %v14789_v22 }
 0x5ff   : > { %v4553_v63 = vpop.f32.mrf.mxu2 }
 0x600   : > { %v3914_v4 = vrot.slane %v3555_v19, 2  ;;  %4759 = vmatmul.bf16.gmra.mxu0 %v14663_v28 }
 0x602   : > { %v3915_v45 = vsel %vm3845_vm6, %v3912_v42, %v3914_v4 }
 0x603   : > { %v3985_v34 = vadd.f32 %v3915_v45, %v18053_v58  ;;  %v4666_v1 = vpop.f32.mrf.mxu3 }
 0x604   : > { %4972 = vmatmul.bf16.gmra.mxu2 %v14416_v56 }
 0x605   : > { %v3557_v21 = vpop.f32.mrf.mxu1  ;;  %v15065_v60 = vadd.f32 %v4665_v5, %v3985_v34  ;;  %v15068_v62 = vpop.f32.mrf.mxu0  ;;  %v18055_v5 = vld [vmem:[#allocation29_spill] sm:$0xff]  ;;  %v18056_v34 = vld [vmem:[#allocation63_spill] sm:$0xff] }
 0x606   : > { %v3558_v7 = vadd.f32 %v3557_v21, %v14798_v33 }
 0x607   : > { %v4555_v22 = vpop.f32.mrf.mxu2 }
 0x608   : > { %4843 = vmatmul.bf16.gmra.mxu1 %v18054_v40  ;;  %5101 = vmatmul.bf16.gmra.mxu3 %v18054_v40  ;;  %v3916_v51 = vrot.slane %v3558_v7, 2  ;;  %v18057_v40 = vld [vmem:[#allocation27_spill] sm:$0xff] }
 0x60b   : > { %v4668_v24 = vpop.f32.mrf.mxu3 }
 0x60c   : > { %v4669_v36 = vadd.f32 %v4668_v24, %v4555_v22 }
 0x60d   : > { %v3559_v42 = vpop.f32.mrf.mxu1  ;;  %v15074_v37 = vpop.f32.mrf.mxu0 }
 0x60e   : > { %v3560_v32 = vadd.f32 %v3559_v42, %v14810_v30 }
 0x60f   : > { %v4557_v52 = vpop.f32.mrf.mxu2 }
 0x610   : > { %v3917_v35 = vrot.slane %v3560_v32, 2  ;;  %4764 = vmatmul.bf16.gmra.mxu0 %v14681_v59  ;;  %v12027_v32 = vld [vmem:[%s17705_s6 + $0x398] sm:$0xf0] }
 0x612   : > { %v3918_v56 = vsel %vm3845_vm6, %v3916_v51, %v3917_v35  ;;  %v11571_v51 = vld [vmem:[%s17705_s6 + $0x450] sm:$0xf] }
 0x613   : > { %v3986_v15 = vadd.f32 %v3918_v56, %v18055_v5  ;;  %v4670_v19 = vpop.f32.mrf.mxu3  ;;  %v12051_v56 = vld [vmem:[%s17705_s6 + $0x458] sm:$0xf0] }
 0x614   : > { %v4671_v4 = vadd.f32 %v4670_v19, %v4557_v52  ;;  %4977 = vmatmul.bf16.gmra.mxu2 %v14434_v46  ;;  %v11475_v46 = vld [vmem:[%s17705_s6 + $0x390] sm:$0xf]  ;;  %v11572_v19 = vor.u32 %v12051_v56, %v11571_v51 }
 0x615   : > { %v3562_v63 = vpop.f32.mrf.mxu1  ;;  %v15079_v45 = vadd.f32 %v4669_v36, %v3986_v15  ;;  %v15083_v30 = vpop.f32.mrf.mxu0  ;;  %v11476_v52 = vor.u32 %v12027_v32, %v11475_v46 }
 0x616   : > { %v3563_v33 = vadd.f32 %v3562_v63, %v14816_v20  ;;  %6193 = vmatpush.bf16.msrb.mxu1 %v11572_v19 }
 0x617   : > { %v4560_v1 = vpop.f32.mrf.mxu2  ;;  %6080 = vmatpush.bf16.msrb.mxu0 %v11476_v52  ;;  %v18060_v52 = vld [vmem:[#allocation30_spill] sm:$0xff] }
 0x618   : > { %v3919_v58 = vrot.slane %v3563_v33, 2  ;;  %4848 = vmatmul.bf16.gmra.mxu1 %v18056_v34  ;;  %5106 = vmatmul.bf16.gmra.mxu3 %v18056_v34  ;;  %v18058_v1 = vld [vmem:[#allocation64_spill] sm:$0xff] }
 0x61a   : > { %v3920_v21 = vsel %vm3845_vm6, %v3917_v35, %v3919_v58 }
 0x61b   : > { %v3987_v22 = vadd.f32 %v3920_v21, %v18057_v40  ;;  %v4673_v24 = vpop.f32.mrf.mxu3  ;;  %v18059_v40 = vld [vmem:[#allocation32_spill] sm:$0xff] }
 0x61d   : > { %v3564_v7 = vpop.f32.mrf.mxu1  ;;  %v15089_v36 = vadd.f32 %v4671_v4, %v3987_v22  ;;  %v15091_v42 = vpop.f32.mrf.mxu0 }
 0x61e   : > { %v3565_v5 = vadd.f32 %v3564_v7, %v14830_v41 }
 0x61f   : > { %v4561_v20 = vpop.f32.mrf.mxu2 }
 0x620   : > { %4769 = vmatmul.bf16.gmra.mxu0 %v14713_v17  ;;  %v3921_v58 = vrot.slane %v3565_v5, 2 }
 0x623   : > { %v4674_v35 = vpop.f32.mrf.mxu3 }
 0x624   : > { %v4675_v15 = vadd.f32 %v4674_v35, %v4561_v20  ;;  %4982 = vmatmul.bf16.gmra.mxu2 %v14468_v49 }
 0x625   : > { %v3567_v4 = vpop.f32.mrf.mxu1  ;;  %v15109_v33 = vpop.f32.mrf.mxu0 }
 0x626   : > { %v3568_v63 = vadd.f32 %v3567_v4, %v14841_v57 }
 0x627   : > { %v4564_v21 = vpop.f32.mrf.mxu2 }
 0x628   : > { %v3922_v34 = vrot.slane %v3568_v63, 2  ;;  %4853 = vmatmul.bf16.gmra.mxu1 %v18058_v1  ;;  %5111 = vmatmul.bf16.gmra.mxu3 %v18058_v1  ;;  %v18061_v63 = vld [vmem:[#allocation28_spill] sm:$0xff] }
 0x62a   : > { %v3923_v41 = vsel %vm3845_vm6, %v3921_v58, %v3922_v34 }
 0x62b   : > { %v3988_v22 = vadd.f32 %v3923_v41, %v18059_v40  ;;  %v4677_v24 = vpop.f32.mrf.mxu3 }
 0x62c   : > { %v4678_v7 = vadd.f32 %v4677_v24, %v4564_v21 }
 0x62d   : > { %v3569_v20 = vpop.f32.mrf.mxu1  ;;  %v15115_v57 = vadd.f32 %v4675_v15, %v3988_v22  ;;  %v15118_v46 = vpop.f32.mrf.mxu0 }
 0x62e   : > { %v3570_v49 = vadd.f32 %v3569_v20, %v14869_v27 }
 0x62f   : > { %v4566_v51 = vpop.f32.mrf.mxu2 }
 0x630   : > { %v3924_v32 = vrot.slane %v3570_v49, 2  ;;  %4774 = vmatmul.bf16.gmra.mxu0 %v14733_v54 }
 0x632   : > { %v3925_v35 = vsel %vm3845_vm6, %v3922_v34, %v3924_v32  ;;  %v18063_v32 = vld [vmem:[#allocation31_spill] sm:$0xff] }
 0x633   : > { %v3989_v56 = vadd.f32 %v3925_v35, %v18060_v52  ;;  %v4679_v5 = vpop.f32.mrf.mxu3 }
 0x634   : > { %4987 = vmatmul.bf16.gmra.mxu2 %v14486_v9  ;;  %v18062_v9 = vld [vmem:[#allocation46_spill] sm:$0xff] }
 0x635   : > { %v4819_v19 = vpop.f32.mrf.mxu1  ;;  %v15123_v4 = vadd.f32 %v4678_v7, %v3989_v56  ;;  %v15126_v15 = vpop.f32.mrf.mxu0 }
 0x636   : > { %v4820_v1 = vadd.f32 %v4819_v19, %v14890_v39 }
 0x637   : > { %v4948_v27 = vpop.f32.mrf.mxu2 }
 0x638   : > { %4858 = vmatmul.bf16.gmra.mxu1 %v18061_v63  ;;  %5116 = vmatmul.bf16.gmra.mxu3 %v18061_v63  ;;  %v5277_v22 = vrot.slane %v4820_v1, 1  ;;  %v18064_v63 = vld [vmem:[#allocation34_spill] sm:$0xff] }
 0x63b   : > { %v5077_v58 = vpop.f32.mrf.mxu3 }
 0x63c   : > { %v5078_v21 = vadd.f32 %v5077_v58, %v4948_v27 }
 0x63d   : > { %v4821_v34 = vpop.f32.mrf.mxu1  ;;  %v15132_v40 = vpop.f32.mrf.mxu0 }
 0x63e   : > { %v4822_v41 = vadd.f32 %v4821_v34, %v14922_v47  ;;  %v5469_v56 = vrot.slane %v5078_v21, 2  ;;  %v18065_v21 = vld [vmem:[#allocation13_spill] sm:$0xff] }
 0x63f   : > { %v4950_v7 = vpop.f32.mrf.mxu2 }
 0x640   : > { %v5278_v24 = vrot.slane %v4822_v41, 1  ;;  %4779 = vmatmul.bf16.gmra.mxu0 %v18062_v9 }
 0x642   : > { %v5279_v20 = vsel %vm3652_vm5, %v5277_v22, %v5278_v24 }
 0x643   : > { %v5079_v49 = vpop.f32.mrf.mxu3  ;;  %v5389_v51 = vadd.f32 %v5279_v20, %v18063_v32 }
 0x644   : > { %v5080_v35 = vadd.f32 %v5079_v49, %v4950_v7  ;;  %4992 = vmatmul.bf16.gmra.mxu2 %v14507_v44 }
 0x645   : > { %v4824_v52 = vpop.f32.mrf.mxu1  ;;  %v15139_v47 = vpop.f32.mrf.mxu0 }
 0x646   : > { %v5470_v39 = vrot.slane %v5080_v35, 2  ;;  %v4825_v5 = vadd.f32 %v4824_v52, %v14952_v6  ;;  %v18066_v52 = vld [vmem:[#allocation11_spill] sm:$0xff] }
 0x647   : > { %v4953_v58 = vpop.f32.mrf.mxu2 }
 0x648   : > { %v5280_v19 = vrot.slane %v4825_v5, 1  ;;  %4863 = vmatmul.bf16.gmra.mxu1 %v18064_v63  ;;  %5121 = vmatmul.bf16.gmra.mxu3 %v18064_v63  ;;  %v5471_v27 = vsel %vm3845_vm6, %v5469_v56, %v5470_v39  ;;  %v11559_v56 = vld [vmem:[%s17705_s6 + $0x438] sm:$0xf] }
 0x649   : > { %v15144_v1 = vadd.f32 %v5471_v27, %v5389_v51  ;;  %v11463_v51 = vld [vmem:[%s17705_s6 + $0x378] sm:$0xf] }
 0x64a   : > { %v5281_v34 = vsel %vm3652_vm5, %v5278_v24, %v5280_v19  ;;  %v12024_v24 = vld [vmem:[%s17705_s6 + $0x380] sm:$0xf0] }
 0x64b   : > { %v5390_v41 = vadd.f32 %v5281_v34, %v18065_v21  ;;  %v5082_v22 = vpop.f32.mrf.mxu3  ;;  %v11464_v19 = vor.u32 %v12024_v24, %v11463_v51 }
 0x64c   : > { %v5083_v6 = vadd.f32 %v5082_v22, %v4953_v58 }
 0x64d   : > { %v4826_v7 = vpop.f32.mrf.mxu1  ;;  %v15148_v20 = vpop.f32.mrf.mxu0  ;;  %6081 = vmatpush.bf16.msrb.mxu0 %v11464_v19 }
 0x64e   : > { %v5472_v44 = vrot.slane %v5083_v6, 2  ;;  %v4827_v63 = vadd.f32 %v4826_v7, %v14979_v2  ;;  %v18068_v7 = vld [vmem:[#allocation23_spill] sm:$0xff] }
 0x64f   : > { %v4955_v32 = vpop.f32.mrf.mxu2 }
 0x650   : > { %v5473_v49 = vsel %vm3845_vm6, %v5470_v39, %v5472_v44  ;;  %4784 = vmatmul.bf16.gmra.mxu0 %v18066_v52  ;;  %v12048_v39 = vld [vmem:[%s17705_s6 + $0x440] sm:$0xf0]  ;;  %v5282_v22 = vrot.slane %v4827_v63, 1  ;;  %v18067_v44 = vld [vmem:[#allocation35_spill] sm:$0xff] }
 0x651   : > { %v15151_v35 = vadd.f32 %v5473_v49, %v5390_v41  ;;  %v11560_v58 = vor.u32 %v12048_v39, %v11559_v56 }
 0x653   : > { %v5084_v5 = vpop.f32.mrf.mxu3  ;;  %6194 = vmatpush.bf16.msrb.mxu1 %v11560_v58 }
 0x654   : > { %v5085_v27 = vadd.f32 %v5084_v5, %v4955_v32  ;;  %4997 = vmatmul.bf16.gmra.mxu2 %v14541_v31 }
 0x655   : > { %v4829_v34 = vpop.f32.mrf.mxu1  ;;  %v15169_v41 = vpop.f32.mrf.mxu0 }
 0x656   : > { %v4830_v21 = vadd.f32 %v4829_v34, %v14987_v29  ;;  %v5474_v29 = vrot.slane %v5085_v27, 2 }
 0x657   : > { %v4958_v49 = vpop.f32.mrf.mxu2 }
 0x658   : > { %v5283_v6 = vrot.slane %v4830_v21, 1  ;;  %4868 = vmatmul.bf16.gmra.mxu1 %v18067_v44  ;;  %5126 = vmatmul.bf16.gmra.mxu3 %v18067_v44  ;;  %v18070_v21 = vld [vmem:[#allocation14_spill] sm:$0xff] }
 0x65a   : > { %v5284_v2 = vsel %vm3652_vm5, %v5282_v22, %v5283_v6 }
 0x65b   : > { %v5391_v32 = vadd.f32 %v5284_v2, %v18068_v7  ;;  %v5087_v51 = vpop.f32.mrf.mxu3  ;;  %v18071_v2 = vld [vmem:[#allocation33_spill] sm:$0xff] }
 0x65c   : > { %v5088_v24 = vadd.f32 %v5087_v51, %v4958_v49 }
 0x65d   : > { %v4831_v56 = vpop.f32.mrf.mxu1  ;;  %v15176_v19 = vpop.f32.mrf.mxu0 }
 0x65e   : > { %v5475_v5 = vrot.slane %v5088_v24, 2  ;;  %v4832_v31 = vadd.f32 %v4831_v56, %v14993_v18  ;;  %v18072_v24 = vld [vmem:[#allocation37_spill] sm:$0xff] }
 0x65f   : > { %v4960_v58 = vpop.f32.mrf.mxu2 }
 0x660   : > { %v5476_v39 = vsel %vm3845_vm6, %v5474_v29, %v5475_v5  ;;  %v5285_v63 = vrot.slane %v4832_v31, 1  ;;  %4789 = vmatmul.bf16.gmra.mxu0 %v18070_v21 }
 0x661   : > { %v15179_v34 = vadd.f32 %v5476_v39, %v5391_v32 }
 0x662   : > { %v5286_v22 = vsel %vm3652_vm5, %v5283_v6, %v5285_v63  ;;  %v11451_v63 = vld [vmem:[%s17705_s6 + $0x360] sm:$0xf] }
 0x663   : > { %18069 = vst [vmem:[#allocation55_spill] sm:$0xff] %v15179_v34  ;;  %v5089_v44 = vpop.f32.mrf.mxu3  ;;  %v5392_v49 = vadd.f32 %v5286_v22, %v18071_v2 }
 0x664   : > { %v5090_v7 = vadd.f32 %v5089_v44, %v4960_v58  ;;  %5002 = vmatmul.bf16.gmra.mxu2 %v14563_v50  ;;  %v12021_v50 = vld [vmem:[%s17705_s6 + $0x368] sm:$0xf0] }
 0x665   : > { %v4834_v27 = vpop.f32.mrf.mxu1  ;;  %v15185_v18 = vpop.f32.mrf.mxu0  ;;  %v11452_v22 = vor.u32 %v12021_v50, %v11451_v63  ;;  %v11427_v63 = vld [vmem:[%s17705_s6 + $0x330] sm:$0xf]  ;;  %v12015_v50 = vld [vmem:[%s17705_s6 + $0x338] sm:$0xf0] }
 0x666   : > { %v5477_v51 = vrot.slane %v5090_v7, 2  ;;  %v4835_v31 = vadd.f32 %v4834_v27, %v15002_v26  ;;  %v11439_v26 = vld [vmem:[%s17705_s6 + $0x348] sm:$0xf]  ;;  %v12018_v7 = vld [vmem:[%s17705_s6 + $0x350] sm:$0xf0] }
 0x667   : > { %v4963_v56 = vpop.f32.mrf.mxu2  ;;  %6082 = vmatpush.bf16.msrb.mxu0 %v11452_v22  ;;  %v11428_v22 = vor.u32 %v12015_v50, %v11427_v63  ;;  %v18078_v63 = vld [vmem:[#allocation25_spill] sm:$0xff] }
 0x668   : > { %4873 = vmatmul.bf16.gmra.mxu1 %v18072_v24  ;;  %5131 = vmatmul.bf16.gmra.mxu3 %v18072_v24  ;;  %v5478_v32 = vsel %vm3845_vm6, %v5475_v5, %v5477_v51  ;;  %v5287_v2 = vrot.slane %v4835_v31, 1  ;;  %v11440_v51 = vor.u32 %v12018_v7, %v11439_v26  ;;  %v18074_v24 = vld [vmem:[#allocation51_spill] sm:$0xff] }
 0x669   : > { %v15190_v29 = vadd.f32 %v5478_v32, %v5392_v49 }
 0x66b   : > { %18073 = vst [vmem:[#allocation57_spill] sm:$0xff] %v15190_v29  ;;  %v5092_v6 = vpop.f32.mrf.mxu3  ;;  %6083 = vmatpush.bf16.msrb.mxu0 %v11440_v51  ;;  %v12012_v51 = vld [vmem:[%s17705_s6 + $0x320] sm:$0xf0] }
 0x66c   : > { %v5093_v39 = vadd.f32 %v5092_v6, %v4963_v56  ;;  %v18075_v56 = vld [vmem:[#allocation36_spill] sm:$0xff] }
 0x66d   : > { %v4836_v58 = vpop.f32.mrf.mxu1  ;;  %v15200_v5 = vpop.f32.mrf.mxu0 }
 0x66e   : > { %v4837_v44 = vadd.f32 %v4836_v58, %v15010_v61 }
 0x66f   : > { %v4965_v27 = vpop.f32.mrf.mxu2  ;;  %6084 = vmatpush.bf16.msrb.mxu0 %v11428_v22 }
 0x670   : > { %v5288_v49 = vrot.slane %v4837_v44, 1  ;;  %4794 = vmatmul.bf16.gmra.mxu0 %v18074_v24  ;;  %v5479_v44 = vrot.slane %v5093_v39, 2 }
 0x672   : > { %v5289_v32 = vsel %vm3652_vm5, %v5287_v2, %v5288_v49 }
 0x673   : > { %v5094_v61 = vpop.f32.mrf.mxu3  ;;  %v5393_v6 = vadd.f32 %v5289_v32, %v18075_v56 }
 0x674   : > { %v5095_v31 = vadd.f32 %v5094_v61, %v4965_v27  ;;  %5007 = vmatmul.bf16.gmra.mxu2 %v14593_v25  ;;  %v11415_v27 = vld [vmem:[%s17705_s6 + $0x318] sm:$0xf] }
 0x675   : > { %v4839_v58 = vpop.f32.mrf.mxu1  ;;  %v15219_v2 = vpop.f32.mrf.mxu0  ;;  %v18076_v61 = vld [vmem:[#allocation15_spill] sm:$0xff]  ;;  %v11416_v39 = vor.u32 %v12012_v51, %v11415_v27  ;;  %v12009_v27 = vld [vmem:[%s17705_s6 + $0x308] sm:$0xf0] }
 0x676   : > { %v5480_v26 = vrot.slane %v5095_v31, 2  ;;  %v4840_v7 = vadd.f32 %v4839_v58, %v15016_v53 }
 0x677   : > { %v4968_v25 = vpop.f32.mrf.mxu2  ;;  %6085 = vmatpush.bf16.msrb.mxu0 %v11416_v39 }
 0x678   : > { %v5290_v32 = vrot.slane %v4840_v7, 1  ;;  %4878 = vmatmul.bf16.gmra.mxu1 %v18076_v61  ;;  %5136 = vmatmul.bf16.gmra.mxu3 %v18076_v61  ;;  %v5481_v53 = vsel %vm3845_vm6, %v5479_v44, %v5480_v26  ;;  %v11403_v7 = vld [vmem:[%s17705_s6 + $0x300] sm:$0xf] }
 0x679   : > { %v15230_v56 = vadd.f32 %v5481_v53, %v5393_v6  ;;  %v11404_v44 = vor.u32 %v12009_v27, %v11403_v7 }
 0x67a   : > { %v5291_v31 = vsel %vm3652_vm5, %v5288_v49, %v5290_v32  ;;  %v12029_v49 = vld [vmem:[%s17705_s6 + $0x3ac] sm:$0xf]  ;;  %v11489_v32 = vld [vmem:[%s17705_s6 + $0x3b4] sm:$0xf0] }
 0x67b   : > { %18077 = vst [vmem:[#allocation24_spill] sm:$0xff] %v15230_v56  ;;  %v5394_v50 = vadd.f32 %v5291_v31, %v18078_v63  ;;  %v5097_v58 = vpop.f32.mrf.mxu3  ;;  %6086 = vmatpush.bf16.msrb.mxu0 %v11404_v44  ;;  %v11492_v53 = vor.u32 %v12029_v49, %v11489_v32  ;;  %v11547_v63 = vld [vmem:[%s17705_s6 + $0x420] sm:$0xf] }
 0x67c   : > { %v5098_v22 = vadd.f32 %v5097_v58, %v4968_v25  ;;  %v12045_v58 = vld [vmem:[%s17705_s6 + $0x428] sm:$0xf0] }
 0x67d   : > { %v4841_v51 = vpop.f32.mrf.mxu1  ;;  %v15240_v6 = vpop.f32.mrf.mxu0  ;;  %6305 = vmatpush.bf16.msra.mxu2 %v11492_v53  ;;  %v11548_v7 = vor.u32 %v12045_v58, %v11547_v63  ;;  %v18081_v58 = vld [vmem:[#allocation40_spill] sm:$0xff] }
 0x67e   : > { %v5482_v61 = vrot.slane %v5098_v22, 2  ;;  %v4842_v27 = vadd.f32 %v4841_v51, %v15025_v16 }
 0x67f   : > { %v4970_v25 = vpop.f32.mrf.mxu2  ;;  %6195 = vmatpush.bf16.msrb.mxu1 %v11548_v7 }
 0x680   : > { %v5483_v39 = vsel %vm3845_vm6, %v5480_v26, %v5482_v61  ;;  %4799 = vmatmul.bf16.gmra.mxu0 %v14863_v43  ;;  %v5292_v49 = vrot.slane %v4842_v27, 1 }
 0x681   : > { %v15249_v31 = vadd.f32 %v5483_v39, %v5394_v50  ;;  %v18080_v39 = vld [vmem:[#allocation38_spill] sm:$0xff] }
 0x683   : > { %18079 = vst [vmem:[#allocation58_spill] sm:$0xff] %v15249_v31  ;;  %v5099_v22 = vpop.f32.mrf.mxu3 }
 0x684   : > { %v5100_v26 = vadd.f32 %v5099_v22, %v4970_v25  ;;  %5012 = vmatmul.bf16.gmra.mxu2 %v14643_v8 }
 0x685   : > { %v4844_v44 = vpop.f32.mrf.mxu1  ;;  %v15261_v61 = vpop.f32.mrf.mxu0 }
 0x686   : > { %v4845_v50 = vadd.f32 %v4844_v44, %v15033_v13  ;;  %v5484_v7 = vrot.slane %v5100_v26, 2 }
 0x687   : > { %v4973_v53 = vpop.f32.mrf.mxu2 }
 0x688   : > { %v5293_v32 = vrot.slane %v4845_v50, 1  ;;  %4883 = vmatmul.bf16.gmra.mxu1 %v18080_v39  ;;  %5141 = vmatmul.bf16.gmra.mxu3 %v18080_v39 }
 0x68a   : > { %v5294_v63 = vsel %vm3652_vm5, %v5292_v49, %v5293_v32 }
 0x68b   : > { %v5395_v16 = vadd.f32 %v5294_v63, %v18081_v58  ;;  %v5102_v51 = vpop.f32.mrf.mxu3  ;;  %v18083_v63 = vld [vmem:[#allocation39_spill] sm:$0xff] }
 0x68c   : > { %v5103_v25 = vadd.f32 %v5102_v51, %v4973_v53 }
 0x68d   : > { %v4846_v22 = vpop.f32.mrf.mxu1  ;;  %v15268_v44 = vpop.f32.mrf.mxu0 }
 0x68e   : > { %v5485_v13 = vrot.slane %v5103_v25, 2  ;;  %v4847_v8 = vadd.f32 %v4846_v22, %v15051_v23  ;;  %v18084_v25 = vld [vmem:[#allocation18_spill] sm:$0xff] }
 0x68f   : > { %v4975_v31 = vpop.f32.mrf.mxu2 }
 0x690   : > { %v5486_v27 = vsel %vm3845_vm6, %v5484_v7, %v5485_v13  ;;  %v5295_v50 = vrot.slane %v4847_v8, 1  ;;  %4804 = vmatmul.bf16.gmra.mxu0 %v14903_v10  ;;  %v5616_v8 = vld [vmem:[#allocation2 + $0x70] sm:$0xff] }
 0x691   : > { %v15271_v56 = vadd.f32 %v5486_v27, %v5395_v16 }
 0x692   : > { %v5296_v49 = vsel %vm3652_vm5, %v5293_v32, %v5295_v50  ;;  %v5614_v32 = vld [vmem:[#allocation2 + $0x60] sm:$0xff] }
 0x693   : > { %18082 = vst [vmem:[#allocation26_spill] sm:$0xff] %v15271_v56  ;;  %v5104_v39 = vpop.f32.mrf.mxu3  ;;  %v5396_v53 = vadd.f32 %v5296_v49, %v18083_v63 }
 0x694   : > { %v5105_v58 = vadd.f32 %v5104_v39, %v4975_v31  ;;  %5017 = vmatmul.bf16.gmra.mxu2 %v14663_v28  ;;  %v15285_v39 = vpack.c.bf16 %v5616_v8, %v5614_v32 }
 0x695   : > { %v4849_v26 = vpop.f32.mrf.mxu1  ;;  %v15277_v23 = vpop.f32.mrf.mxu0 }
 0x696   : > { %v5487_v51 = vrot.slane %v5105_v58, 2  ;;  %v4850_v31 = vadd.f32 %v4849_v26, %v15060_v14 }
 0x697   : > { %v4978_v22 = vpop.f32.mrf.mxu2 }
 0x698   : > { %4888 = vmatmul.bf16.gmra.mxu1 %v18084_v25  ;;  %5146 = vmatmul.bf16.gmra.mxu3 %v18084_v25  ;;  %v5488_v16 = vsel %vm3845_vm6, %v5485_v13, %v5487_v51  ;;  %v5297_v58 = vrot.slane %v4850_v31, 1  ;;  %v18086_v51 = vld [vmem:[#allocation42_spill] sm:$0xff] }
 0x699   : > { %v15282_v7 = vadd.f32 %v5488_v16, %v5396_v53 }
 0x69b   : > { %18085 = vst [vmem:[#allocation59_spill] sm:$0xff] %v15282_v7  ;;  %v5107_v27 = vpop.f32.mrf.mxu3 }
 0x69c   : > { %v5108_v50 = vadd.f32 %v5107_v27, %v4978_v22  ;;  %v18087_v27 = vld [vmem:[#allocation41_spill] sm:$0xff] }
 0x69d   : > { %v4851_v49 = vpop.f32.mrf.mxu1  ;;  %v15288_v63 = vpop.f32.mrf.mxu0 }
 0x69e   : > { %v4852_v28 = vadd.f32 %v4851_v49, %v15068_v62  ;;  %v5489_v26 = vrot.slane %v5108_v50, 2  ;;  %v5618_v50 = vld [vmem:[#allocation2 + $0x80] sm:$0xff] }
 0x69f   : > { %v4980_v56 = vpop.f32.mrf.mxu2 }
 0x6a0   : > { %v5298_v25 = vrot.slane %v4852_v28, 1  ;;  %6087 = vmatmul.bf16.vlgmr.msrb.gmra.mxu0 %v15285_v39 }
 0x6a2   : > { %v5299_v13 = vsel %vm3652_vm5, %v5297_v58, %v5298_v25  ;;  %v18089_v58 = vld [vmem:[#allocation43_spill] sm:$0xff] }
 0x6a3   : > { %v5109_v53 = vpop.f32.mrf.mxu3  ;;  %v5397_v16 = vadd.f32 %v5299_v13, %v18086_v51 }
 0x6a4   : > { %v5110_v7 = vadd.f32 %v5109_v53, %v4980_v56  ;;  %5022 = vmatmul.bf16.gmra.mxu2 %v14681_v59 }
 0x6a5   : > { %v4854_v14 = vpop.f32.mrf.mxu1  ;;  %v15295_v62 = vpop.f32.mrf.mxu0 }
 0x6a6   : > { %v5490_v22 = vrot.slane %v5110_v7, 2  ;;  %v4855_v32 = vadd.f32 %v4854_v14, %v15074_v37  ;;  %v5620_v7 = vld [vmem:[#allocation2 + $0x90] sm:$0xff] }
 0x6a7   : > { %v4983_v49 = vpop.f32.mrf.mxu2  ;;  %v15304_v51 = vpack.c.bf16 %v5620_v7, %v5618_v50 }
 0x6a8   : > { %v5300_v8 = vrot.slane %v4855_v32, 1  ;;  %4893 = vmatmul.bf16.gmra.mxu1 %v18087_v27  ;;  %5151 = vmatmul.bf16.gmra.mxu3 %v18087_v27  ;;  %v5491_v31 = vsel %vm3845_vm6, %v5489_v26, %v5490_v22  ;;  %v12026_v26 = vld [vmem:[%s17705_s6 + $0x394] sm:$0xf] }
 0x6a9   : > { %v15300_v28 = vadd.f32 %v5491_v31, %v5397_v16 }
 0x6aa   : > { %v5301_v56 = vsel %vm3652_vm5, %v5298_v25, %v5300_v8  ;;  %v11477_v25 = vld [vmem:[%s17705_s6 + $0x39c] sm:$0xf0] }
 0x6ab   : > { %18088 = vst [vmem:[#allocation60_spill] sm:$0xff] %v15300_v28  ;;  %v5398_v37 = vadd.f32 %v5301_v56, %v18089_v58  ;;  %v5112_v13 = vpop.f32.mrf.mxu3  ;;  %v11480_v8 = vor.u32 %v12026_v26, %v11477_v25  ;;  %v12042_v56 = vld [vmem:[%s17705_s6 + $0x410] sm:$0xf0]  ;;  %v18091_v25 = vld [vmem:[#allocation20_spill] sm:$0xff] }
 0x6ac   : > { %v5113_v59 = vadd.f32 %v5112_v13, %v4983_v49  ;;  %v11535_v49 = vld [vmem:[%s17705_s6 + $0x408] sm:$0xf] }
 0x6ad   : > { %v4856_v53 = vpop.f32.mrf.mxu1  ;;  %v15306_v32 = vpop.f32.mrf.mxu0  ;;  %6306 = vmatpush.bf16.msra.mxu2 %v11480_v8  ;;  %v11536_v7 = vor.u32 %v12042_v56, %v11535_v49  ;;  %v5622_v49 = vld [vmem:[#allocation2 + $0xa0] sm:$0xff] }
 0x6ae   : > { %v5492_v14 = vrot.slane %v5113_v59, 2  ;;  %v4857_v58 = vadd.f32 %v4856_v53, %v15083_v30  ;;  %v5624_v30 = vld [vmem:[#allocation2 + $0xb0] sm:$0xff]  ;;  %v18092_v53 = vld [vmem:[#allocation44_spill] sm:$0xff] }
 0x6af   : > { %v4985_v27 = vpop.f32.mrf.mxu2  ;;  %6196 = vmatpush.bf16.msrb.mxu1 %v11536_v7  ;;  %v15333_v7 = vpack.c.bf16 %v5624_v30, %v5622_v49 }
 0x6b0   : > { %v5493_v16 = vsel %vm3845_vm6, %v5490_v22, %v5492_v14  ;;  %6092 = vmatmul.bf16.gmra.mxu0 %v15304_v51  ;;  %v5302_v14 = vrot.slane %v4857_v58, 1 }
 0x6b1   : > { %v15315_v31 = vadd.f32 %v5493_v16, %v5398_v37 }
 0x6b3   : > { %18090 = vst [vmem:[#allocation62_spill] sm:$0xff] %v15315_v31  ;;  %v5114_v50 = vpop.f32.mrf.mxu3 }
 0x6b4   : > { %v5115_v22 = vadd.f32 %v5114_v50, %v4985_v27  ;;  %5027 = vmatmul.bf16.gmra.mxu2 %v14713_v17 }
 0x6b5   : > { %v4859_v13 = vpop.f32.mrf.mxu1  ;;  %v15327_v59 = vpop.f32.mrf.mxu0 }
 0x6b6   : > { %v4860_v37 = vadd.f32 %v4859_v13, %v15091_v42  ;;  %v5494_v17 = vrot.slane %v5115_v22, 2 }
 0x6b7   : > { %v4988_v16 = vpop.f32.mrf.mxu2 }
 0x6b8   : > { %v5303_v26 = vrot.slane %v4860_v37, 1  ;;  %4898 = vmatmul.bf16.gmra.mxu1 %v18091_v25  ;;  %5156 = vmatmul.bf16.gmra.mxu3 %v18091_v25 }
 0x6ba   : > { %v5304_v8 = vsel %vm3652_vm5, %v5302_v14, %v5303_v26 }
 0x6bb   : > { %v5399_v27 = vadd.f32 %v5304_v8, %v18092_v53  ;;  %v5117_v56 = vpop.f32.mrf.mxu3  ;;  %v18094_v53 = vld [vmem:[#allocation45_spill] sm:$0xff] }
 0x6bc   : > { %v5118_v50 = vadd.f32 %v5117_v56, %v4988_v16 }
 0x6bd   : > { %v4861_v42 = vpop.f32.mrf.mxu1  ;;  %v15336_v37 = vpop.f32.mrf.mxu0 }
 0x6be   : > { %v5495_v13 = vrot.slane %v5118_v50, 2  ;;  %v4862_v58 = vadd.f32 %v4861_v42, %v15109_v33  ;;  %v18095_v50 = vld [vmem:[#allocation22_spill] sm:$0xff] }
 0x6bf   : > { %v4990_v28 = vpop.f32.mrf.mxu2 }
 0x6c0   : > { %v5496_v25 = vsel %vm3845_vm6, %v5494_v17, %v5495_v13  ;;  %v5305_v31 = vrot.slane %v4862_v58, 1  ;;  %6096 = vmatmul.bf16.gmra.mxu0 %v15333_v7 }
 0x6c1   : > { %v15339_v14 = vadd.f32 %v5496_v25, %v5399_v27 }
 0x6c2   : > { %v5306_v8 = vsel %vm3652_vm5, %v5303_v26, %v5305_v31  ;;  %v5626_v31 = vld [vmem:[#allocation2 + $0xc0] sm:$0xff]  ;;  %v5628_v26 = vld [vmem:[#allocation2 + $0xd0] sm:$0xff] }
 0x6c3   : > { %18093 = vst [vmem:[#allocation61_spill] sm:$0xff] %v15339_v14  ;;  %v5119_v16 = vpop.f32.mrf.mxu3  ;;  %v5400_v49 = vadd.f32 %v5306_v8, %v18094_v53 }
 0x6c4   : > { %v5120_v30 = vadd.f32 %v5119_v16, %v4990_v28  ;;  %5032 = vmatmul.bf16.gmra.mxu2 %v14733_v54  ;;  %v15353_v16 = vpack.c.bf16 %v5628_v26, %v5626_v31 }
 0x6c5   : > { %v4864_v22 = vpop.f32.mrf.mxu1  ;;  %v15345_v33 = vpop.f32.mrf.mxu0 }
 0x6c6   : > { %v5497_v56 = vrot.slane %v5120_v30, 2  ;;  %v4865_v28 = vadd.f32 %v4864_v22, %v15118_v46 }
 0x6c7   : > { %v4993_v42 = vpop.f32.mrf.mxu2 }
 0x6c8   : > { %4903 = vmatmul.bf16.gmra.mxu1 %v18095_v50  ;;  %5161 = vmatmul.bf16.gmra.mxu3 %v18095_v50  ;;  %v5498_v27 = vsel %vm3845_vm6, %v5495_v13, %v5497_v56  ;;  %v5307_v30 = vrot.slane %v4865_v28, 1  ;;  %v18097_v56 = vld [vmem:[#allocation47_spill] sm:$0xff] }
 0x6c9   : > { %v15350_v17 = vadd.f32 %v5498_v27, %v5400_v49 }
 0x6cb   : > { %18096 = vst [vmem:[#allocation29_spill] sm:$0xff] %v15350_v17  ;;  %v5122_v58 = vpop.f32.mrf.mxu3 }
 0x6cc   : > { %v5123_v25 = vadd.f32 %v5122_v58, %v4993_v42  ;;  %v18098_v58 = vld [vmem:[#allocation10_spill] sm:$0xff] }
 0x6cd   : > { %v4866_v8 = vpop.f32.mrf.mxu1  ;;  %v15356_v53 = vpop.f32.mrf.mxu0 }
 0x6ce   : > { %v4867_v54 = vadd.f32 %v4866_v8, %v15126_v15  ;;  %v5499_v22 = vrot.slane %v5123_v25, 2  ;;  %v5630_v25 = vld [vmem:[#allocation2 + $0xe0] sm:$0xff] }
 0x6cf   : > { %v4995_v14 = vpop.f32.mrf.mxu2 }
 0x6d0   : > { %v5308_v50 = vrot.slane %v4867_v54, 1  ;;  %6100 = vmatmul.bf16.gmra.mxu0 %v15353_v16 }
 0x6d2   : > { %v5309_v13 = vsel %vm3652_vm5, %v5307_v30, %v5308_v50  ;;  %v18100_v30 = vld [vmem:[#allocation48_spill] sm:$0xff] }
 0x6d3   : > { %v5124_v49 = vpop.f32.mrf.mxu3  ;;  %v5401_v27 = vadd.f32 %v5309_v13, %v18097_v56 }
 0x6d4   : > { %v5125_v17 = vadd.f32 %v5124_v49, %v4995_v14  ;;  %5037 = vmatmul.bf16.gmra.mxu2 %v18062_v9 }
 0x6d5   : > { %v4869_v46 = vpop.f32.mrf.mxu1  ;;  %v15363_v15 = vpop.f32.mrf.mxu0 }
 0x6d6   : > { %v5500_v42 = vrot.slane %v5125_v17, 2  ;;  %v4870_v31 = vadd.f32 %v4869_v46, %v15132_v40  ;;  %v5632_v17 = vld [vmem:[#allocation2 + $0xf0] sm:$0xff] }
 0x6d7   : > { %v4998_v8 = vpop.f32.mrf.mxu2  ;;  %v15372_v56 = vpack.c.bf16 %v5632_v17, %v5630_v25 }
 0x6d8   : > { %v5310_v26 = vrot.slane %v4870_v31, 1  ;;  %4908 = vmatmul.bf16.gmra.mxu1 %v18098_v58  ;;  %5166 = vmatmul.bf16.gmra.mxu3 %v18098_v58  ;;  %v5501_v28 = vsel %vm3845_vm6, %v5499_v22, %v5500_v42  ;;  %v12023_v22 = vld [vmem:[%s17705_s6 + $0x37c] sm:$0xf] }
 0x6d9   : > { %v15368_v54 = vadd.f32 %v5501_v28, %v5401_v27 }
 0x6da   : > { %v5311_v14 = vsel %vm3652_vm5, %v5308_v50, %v5310_v26  ;;  %v11465_v50 = vld [vmem:[%s17705_s6 + $0x384] sm:$0xf0] }
 0x6db   : > { %18099 = vst [vmem:[#allocation63_spill] sm:$0xff] %v15368_v54  ;;  %v5402_v40 = vadd.f32 %v5311_v14, %v18100_v30  ;;  %v5127_v13 = vpop.f32.mrf.mxu3  ;;  %v11468_v26 = vor.u32 %v12023_v22, %v11465_v50  ;;  %v12039_v14 = vld [vmem:[%s17705_s6 + $0x3f8] sm:$0xf0]  ;;  %v18102_v50 = vld [vmem:[#allocation12_spill] sm:$0xff] }
 0x6dc   : > { %v5128_v9 = vadd.f32 %v5127_v13, %v4998_v8  ;;  %v11523_v8 = vld [vmem:[%s17705_s6 + $0x3f0] sm:$0xf] }
 0x6dd   : > { %v4871_v49 = vpop.f32.mrf.mxu1  ;;  %v15374_v31 = vpop.f32.mrf.mxu0  ;;  %6307 = vmatpush.bf16.msra.mxu2 %v11468_v26  ;;  %v11524_v17 = vor.u32 %v12039_v14, %v11523_v8  ;;  %v5634_v8 = vld [vmem:[#allocation2 + $0x100] sm:$0xff] }
 0x6de   : > { %v5502_v46 = vrot.slane %v5128_v9, 2  ;;  %v4872_v30 = vadd.f32 %v4871_v49, %v15139_v47  ;;  %v5636_v47 = vld [vmem:[#allocation2 + $0x110] sm:$0xff]  ;;  %v18103_v49 = vld [vmem:[#allocation49_spill] sm:$0xff] }
 0x6df   : > { %v5000_v58 = vpop.f32.mrf.mxu2  ;;  %6197 = vmatpush.bf16.msrb.mxu1 %v11524_v17  ;;  %v15401_v17 = vpack.c.bf16 %v5636_v47, %v5634_v8 }
 0x6e0   : > { %v5503_v27 = vsel %vm3845_vm6, %v5500_v42, %v5502_v46  ;;  %6105 = vmatmul.bf16.gmra.mxu0 %v15372_v56  ;;  %v5312_v46 = vrot.slane %v4872_v30, 1 }
 0x6e1   : > { %v15383_v28 = vadd.f32 %v5503_v27, %v5402_v40 }
 0x6e3   : > { %18101 = vst [vmem:[#allocation27_spill] sm:$0xff] %v15383_v28  ;;  %v5129_v25 = vpop.f32.mrf.mxu3 }
 0x6e4   : > { %v5130_v42 = vadd.f32 %v5129_v25, %v5000_v58  ;;  %5042 = vmatmul.bf16.gmra.mxu2 %v18066_v52 }
 0x6e5   : > { %v4874_v13 = vpop.f32.mrf.mxu1  ;;  %v15395_v9 = vpop.f32.mrf.mxu0 }
 0x6e6   : > { %v4875_v40 = vadd.f32 %v4874_v13, %v15148_v20  ;;  %v5504_v52 = vrot.slane %v5130_v42, 2 }
 0x6e7   : > { %v5003_v27 = vpop.f32.mrf.mxu2 }
 0x6e8   : > { %v5313_v22 = vrot.slane %v4875_v40, 1  ;;  %4913 = vmatmul.bf16.gmra.mxu1 %v18102_v50  ;;  %5171 = vmatmul.bf16.gmra.mxu3 %v18102_v50 }
 0x6ea   : > { %v5314_v26 = vsel %vm3652_vm5, %v5312_v46, %v5313_v22 }
 0x6eb   : > { %v5403_v58 = vadd.f32 %v5314_v26, %v18103_v49  ;;  %v5132_v14 = vpop.f32.mrf.mxu3  ;;  %v18105_v49 = vld [vmem:[#allocation50_spill] sm:$0xff] }
 0x6ec   : > { %v5133_v25 = vadd.f32 %v5132_v14, %v5003_v27 }
 0x6ed   : > { %v4876_v20 = vpop.f32.mrf.mxu1  ;;  %v15404_v40 = vpop.f32.mrf.mxu0 }
 0x6ee   : > { %v5505_v13 = vrot.slane %v5133_v25, 2  ;;  %v4877_v30 = vadd.f32 %v4876_v20, %v15169_v41  ;;  %v18106_v25 = vld [vmem:[#allocation16_spill] sm:$0xff] }
 0x6ef   : > { %v5005_v54 = vpop.f32.mrf.mxu2 }
 0x6f0   : > { %v5506_v50 = vsel %vm3845_vm6, %v5504_v52, %v5505_v13  ;;  %v5315_v28 = vrot.slane %v4877_v30, 1  ;;  %6109 = vmatmul.bf16.gmra.mxu0 %v15401_v17 }
 0x6f1   : > { %v15407_v46 = vadd.f32 %v5506_v50, %v5403_v58 }
 0x6f2   : > { %v5316_v26 = vsel %vm3652_vm5, %v5313_v22, %v5315_v28  ;;  %v5638_v28 = vld [vmem:[#allocation2 + $0x120] sm:$0xff]  ;;  %v5640_v22 = vld [vmem:[#allocation2 + $0x130] sm:$0xff] }
 0x6f3   : > { %18104 = vst [vmem:[#allocation64_spill] sm:$0xff] %v15407_v46  ;;  %v5134_v27 = vpop.f32.mrf.mxu3  ;;  %v5404_v8 = vadd.f32 %v5316_v26, %v18105_v49 }
 0x6f4   : > { %v5135_v47 = vadd.f32 %v5134_v27, %v5005_v54  ;;  %5047 = vmatmul.bf16.gmra.mxu2 %v18070_v21  ;;  %v15421_v27 = vpack.c.bf16 %v5640_v22, %v5638_v28 }
 0x6f5   : > { %v4879_v42 = vpop.f32.mrf.mxu1  ;;  %v15413_v41 = vpop.f32.mrf.mxu0 }
 0x6f6   : > { %v5507_v14 = vrot.slane %v5135_v47, 2  ;;  %v4880_v54 = vadd.f32 %v4879_v42, %v15176_v19 }
 0x6f7   : > { %v5008_v20 = vpop.f32.mrf.mxu2 }
 0x6f8   : > { %4918 = vmatmul.bf16.gmra.mxu1 %v18106_v25  ;;  %5176 = vmatmul.bf16.gmra.mxu3 %v18106_v25  ;;  %v5508_v58 = vsel %vm3845_vm6, %v5505_v13, %v5507_v14  ;;  %v5317_v47 = vrot.slane %v4880_v54, 1  ;;  %v18108_v14 = vld [vmem:[#allocation17_spill] sm:$0xff] }
 0x6f9   : > { %v15418_v52 = vadd.f32 %v5508_v58, %v5404_v8 }
 0x6fb   : > { %18107 = vst [vmem:[#allocation32_spill] sm:$0xff] %v15418_v52  ;;  %v5137_v30 = vpop.f32.mrf.mxu3 }
 0x6fc   : > { %v5138_v50 = vadd.f32 %v5137_v30, %v5008_v20  ;;  %v18109_v30 = vld [vmem:[#allocation52_spill] sm:$0xff] }
 0x6fd   : > { %v4881_v26 = vpop.f32.mrf.mxu1  ;;  %v15424_v49 = vpop.f32.mrf.mxu0 }
 0x6fe   : > { %v4882_v21 = vadd.f32 %v4881_v26, %v15185_v18  ;;  %v5509_v42 = vrot.slane %v5138_v50, 2  ;;  %v5642_v50 = vld [vmem:[#allocation2 + $0x140] sm:$0xff] }
 0x6ff   : > { %v5010_v46 = vpop.f32.mrf.mxu2 }
 0x700   : > { %v5318_v25 = vrot.slane %v4882_v21, 1  ;;  %6113 = vmatmul.bf16.gmra.mxu0 %v15421_v27 }
 0x702   : > { %v5319_v13 = vsel %vm3652_vm5, %v5317_v47, %v5318_v25  ;;  %v18111_v47 = vld [vmem:[#allocation19_spill] sm:$0xff] }
 0x703   : > { %v5139_v8 = vpop.f32.mrf.mxu3  ;;  %v5405_v58 = vadd.f32 %v5319_v13, %v18108_v14 }
 0x704   : > { %v5140_v52 = vadd.f32 %v5139_v8, %v5010_v46  ;;  %5052 = vmatmul.bf16.gmra.mxu2 %v18074_v24 }
 0x705   : > { %v4884_v19 = vpop.f32.mrf.mxu1  ;;  %v15431_v18 = vpop.f32.mrf.mxu0 }
 0x706   : > { %v5510_v20 = vrot.slane %v5140_v52, 2  ;;  %v4885_v28 = vadd.f32 %v4884_v19, %v15200_v5  ;;  %v5644_v52 = vld [vmem:[#allocation2 + $0x150] sm:$0xff] }
 0x707   : > { %v5013_v26 = vpop.f32.mrf.mxu2  ;;  %v15440_v14 = vpack.c.bf16 %v5644_v52, %v5642_v50 }
 0x708   : > { %v5320_v22 = vrot.slane %v4885_v28, 1  ;;  %4923 = vmatmul.bf16.gmra.mxu1 %v18109_v30  ;;  %5181 = vmatmul.bf16.gmra.mxu3 %v18109_v30  ;;  %v5511_v54 = vsel %vm3845_vm6, %v5509_v42, %v5510_v20  ;;  %v12020_v42 = vld [vmem:[%s17705_s6 + $0x364] sm:$0xf] }
 0x709   : > { %v15436_v21 = vadd.f32 %v5511_v54, %v5405_v58 }
 0x70a   : > { %v5321_v46 = vsel %vm3652_vm5, %v5318_v25, %v5320_v22  ;;  %v11453_v25 = vld [vmem:[%s17705_s6 + $0x36c] sm:$0xf0] }
 0x70b   : > { %18110 = vst [vmem:[#allocation30_spill] sm:$0xff] %v15436_v21  ;;  %v5406_v5 = vadd.f32 %v5321_v46, %v18111_v47  ;;  %v5142_v13 = vpop.f32.mrf.mxu3  ;;  %v11456_v22 = vor.u32 %v12020_v42, %v11453_v25  ;;  %v12036_v46 = vld [vmem:[%s17705_s6 + $0x3e0] sm:$0xf0]  ;;  %v11585_v47 = vld [vmem:[%s17705_s6 + $0x474] sm:$0xf0] }
 0x70c   : > { %v5143_v24 = vadd.f32 %v5142_v13, %v5013_v26  ;;  %v11511_v26 = vld [vmem:[%s17705_s6 + $0x3d8] sm:$0xf] }
 0x70d   : > { %v4886_v8 = vpop.f32.mrf.mxu1  ;;  %v15442_v28 = vpop.f32.mrf.mxu0  ;;  %6308 = vmatpush.bf16.msra.mxu2 %v11456_v22  ;;  %v11512_v52 = vor.u32 %v12036_v46, %v11511_v26  ;;  %v11573_v22 = vld [vmem:[%s17705_s6 + $0x45c] sm:$0xf0] }
 0x70e   : > { %v5512_v19 = vrot.slane %v5143_v24, 2 }
 0x70f   : > { %v5015_v30 = vpop.f32.mrf.mxu2  ;;  %6198 = vmatpush.bf16.msrb.mxu1 %v11512_v52  ;;  %v18114_v52 = vld [vmem:[#allocation21_spill] sm:$0xff] }
 0x710   : > { %v5513_v58 = vsel %vm3845_vm6, %v5510_v20, %v5512_v19  ;;  %6118 = vmatmul.bf16.gmra.mxu0 %v15440_v14  ;;  %v12053_v20 = vld [vmem:[%s17705_s6 + $0x46c] sm:$0xf] }
 0x711   : > { %v15451_v54 = vadd.f32 %v5513_v58, %v5406_v5  ;;  %v4887_v5 = vadd.f32 %v4886_v8, %v15219_v2  ;;  %v11588_v24 = vor.u32 %v12053_v20, %v11585_v47  ;;  %v12050_v58 = vld [vmem:[%s17705_s6 + $0x454] sm:$0xf] }
 0x713   : > { %18112 = vst [vmem:[#allocation28_spill] sm:$0xff] %v15451_v54  ;;  %v5144_v50 = vpop.f32.mrf.mxu3  ;;  %6434 = vmatpush.bf16.msrb.mxu3 %v11588_v24  ;;  %v5322_v2 = vrot.slane %v4887_v5, 1  ;;  %v12047_v24 = vld [vmem:[%s17705_s6 + $0x43c] sm:$0xf]  ;;  %v11561_v5 = vld [vmem:[%s17705_s6 + $0x444] sm:$0xf0] }
 0x714   : > { %v5145_v13 = vadd.f32 %v5144_v50, %v5015_v30  ;;  %5057 = vmatmul.bf16.gmra.mxu2 %v14863_v43  ;;  %v18113_v30 = vld [vmem:[#allocation53_spill] sm:$0xff]  ;;  %v5646_v43 = vld [vmem:[#allocation2 + $0x160] sm:$0xff]  ;;  %v5648_v50 = vld [vmem:[#allocation2 + $0x170] sm:$0xff] }
 0x715   : > { %v4889_v19 = vpop.f32.mrf.mxu1  ;;  %v15469_v25 = vpop.f32.mrf.mxu0 }
 0x716   : > { %v4890_v42 = vadd.f32 %v4889_v19, %v15240_v6  ;;  %v11576_v6 = vor.u32 %v12050_v58, %v11573_v22  ;;  %v15487_v22 = vpack.c.bf16 %v5648_v50, %v5646_v43 }
 0x717   : > { %v5018_v26 = vpop.f32.mrf.mxu2 }
 0x718   : > { %v5323_v8 = vrot.slane %v4890_v42, 1  ;;  %4928 = vmatmul.bf16.gmra.mxu1 %v18113_v30  ;;  %5186 = vmatmul.bf16.gmra.mxu3 %v18113_v30  ;;  %v11564_v42 = vor.u32 %v12047_v24, %v11561_v5  ;;  %v5514_v30 = vrot.slane %v5145_v13, 2  ;;  %v12017_v24 = vld [vmem:[%s17705_s6 + $0x34c] sm:$0xf]  ;;  %v11441_v5 = vld [vmem:[%s17705_s6 + $0x354] sm:$0xf0] }
 0x719   : > { %6435 = vmatpush.bf16.msrb.mxu3 %v11576_v6 }
 0x71a   : > { %v5324_v46 = vsel %vm3652_vm5, %v5322_v2, %v5323_v8 }
 0x71b   : > { %v5407_v20 = vadd.f32 %v5324_v46, %v18114_v52  ;;  %v5147_v47 = vpop.f32.mrf.mxu3  ;;  %v12044_v52 = vld [vmem:[%s17705_s6 + $0x424] sm:$0xf] }
 0x71c   : > { %v5148_v19 = vadd.f32 %v5147_v47, %v5018_v26  ;;  %v11549_v26 = vld [vmem:[%s17705_s6 + $0x42c] sm:$0xf0] }
 0x71d   : > { %v4891_v58 = vpop.f32.mrf.mxu1  ;;  %6436 = vmatpush.bf16.msrb.mxu3 %v11564_v42  ;;  %v15490_v46 = vpop.f32.mrf.mxu0  ;;  %v11552_v50 = vor.u32 %v12044_v52, %v11549_v26  ;;  %v12014_v26 = vld [vmem:[%s17705_s6 + $0x334] sm:$0xf] }
 0x71e   : > { %v5515_v2 = vrot.slane %v5148_v19, 2  ;;  %v4892_v6 = vadd.f32 %v4891_v58, %v15261_v61  ;;  %v12041_v19 = vld [vmem:[%s17705_s6 + $0x40c] sm:$0xf]  ;;  %v11444_v58 = vor.u32 %v12017_v24, %v11441_v5 }
 0x71f   : > { %v5020_v43 = vpop.f32.mrf.mxu2 }
 0x720   : > { %v5516_v54 = vsel %vm3845_vm6, %v5514_v30, %v5515_v2  ;;  %v5325_v21 = vrot.slane %v4892_v6, 1  ;;  %6122 = vmatmul.bf16.gmra.mxu0 %v15487_v22  ;;  %6309 = vmatpush.bf16.msra.mxu2 %v11444_v58  ;;  %v5652_v58 = vld [vmem:[#allocation2 + $0x190] sm:$0xff] }
 0x721   : > { %v15499_v13 = vadd.f32 %v5516_v54, %v5407_v20  ;;  %6437 = vmatpush.bf16.msrb.mxu3 %v11552_v50  ;;  %v18116_v54 = vld [vmem:[#allocation54_spill] sm:$0xff] }
 0x722   : > { %v5326_v61 = vsel %vm3652_vm5, %v5323_v8, %v5325_v21  ;;  %v11537_v21 = vld [vmem:[%s17705_s6 + $0x414] sm:$0xf0]  ;;  %v12038_v50 = vld [vmem:[%s17705_s6 + $0x3f4] sm:$0xf] }
 0x723   : > { %18115 = vst [vmem:[#allocation46_spill] sm:$0xff] %v15499_v13  ;;  %v5149_v47 = vpop.f32.mrf.mxu3  ;;  %v5408_v20 = vadd.f32 %v5326_v61, %v18116_v54  ;;  %v11540_v30 = vor.u32 %v12041_v19, %v11537_v21  ;;  %v18117_v61 = vld [vmem:[#allocation56_spill] sm:$0xff] }
 0x724   : > { %v5150_v42 = vadd.f32 %v5149_v47, %v5020_v43  ;;  %5062 = vmatmul.bf16.gmra.mxu2 %v14903_v10  ;;  %v11429_v43 = vld [vmem:[%s17705_s6 + $0x33c] sm:$0xf0] }
 0x725   : > { %v4894_v8 = vpop.f32.mrf.mxu1  ;;  %v15517_v52 = vpop.f32.mrf.mxu0  ;;  %6438 = vmatpush.bf16.msrb.mxu3 %v11540_v30  ;;  %v11432_v10 = vor.u32 %v12014_v26, %v11429_v43  ;;  %v11525_v47 = vld [vmem:[%s17705_s6 + $0x3fc] sm:$0xf0]  ;;  %v12011_v30 = vld [vmem:[%s17705_s6 + $0x31c] sm:$0xf]  ;;  %v11417_v26 = vld [vmem:[%s17705_s6 + $0x324] sm:$0xf0] }
 0x726   : > { %v5517_v6 = vrot.slane %v5150_v42, 2  ;;  %v11528_v19 = vor.u32 %v12038_v50, %v11525_v47  ;;  %v5650_v42 = vld [vmem:[#allocation2 + $0x180] sm:$0xff]  ;;  %v11420_v43 = vor.u32 %v12011_v30, %v11417_v26  ;;  %v11513_v50 = vld [vmem:[%s17705_s6 + $0x3e4] sm:$0xf0]  ;;  %v11501_v26 = vld [vmem:[%s17705_s6 + $0x3cc] sm:$0xf0] }
 0x727   : > { %v5023_v5 = vpop.f32.mrf.mxu2  ;;  %6310 = vmatpush.bf16.msra.mxu2 %v11432_v10  ;;  %v15549_v47 = vpack.c.bf16 %v5652_v58, %v5650_v42  ;;  %v12008_v42 = vld [vmem:[%s17705_s6 + $0x304] sm:$0xf] }
 0x728   : > { %4933 = vmatmul.bf16.gmra.mxu1 %v18117_v61  ;;  %5191 = vmatmul.bf16.gmra.mxu3 %v18117_v61  ;;  %v5518_v24 = vsel %vm3845_vm6, %v5515_v2, %v5517_v6  ;;  %v12035_v2 = vld [vmem:[%s17705_s6 + $0x3dc] sm:$0xf]  ;;  %v12032_v30 = vld [vmem:[%s17705_s6 + $0x3c4] sm:$0xf] }
 0x729   : > { %v15534_v54 = vadd.f32 %v5518_v24, %v5408_v20  ;;  %6439 = vmatpush.bf16.msrb.mxu3 %v11528_v19  ;;  %v4895_v20 = vadd.f32 %v4894_v8, %v15268_v44  ;;  %v11516_v10 = vor.u32 %v12035_v2, %v11513_v50  ;;  %18119 = vst [vmem:[#allocation34_spill] sm:$0xff] %v15549_v47 }
 0x72b   : > { %18118 = vst [vmem:[#allocation31_spill] sm:$0xff] %v15534_v54  ;;  %v5152_v21 = vpop.f32.mrf.mxu3  ;;  %6311 = vmatpush.bf16.msra.mxu2 %v11420_v43  ;;  %v11499_v54 = vld [vmem:[%s17705_s6 + $0x3c0] sm:$0xf]  ;;  %v5327_v44 = vrot.slane %v4895_v20, 1  ;;  %v11504_v43 = vor.u32 %v12032_v30, %v11501_v26 }
 0x72c   : > { %v5153_v6 = vadd.f32 %v5152_v21, %v5023_v5  ;;  %v12033_v5 = vld [vmem:[%s17705_s6 + $0x3c8] sm:$0xf0] }
 0x72d   : > { %v4896_v61 = vpop.f32.mrf.mxu1  ;;  %v6093_v19 = vpop.f32.mrf.mxu0  ;;  %6440 = vmatpush.bf16.msrb.mxu3 %v11516_v10  ;;  %v11500_v21 = vor.u32 %v12033_v5, %v11499_v54  ;;  %v5617_v54 = vld [vmem:[#allocation2 + $0x78] sm:$0xff] }
 0x72e   : > { %v4897_v24 = vadd.f32 %v4896_v61, %v15277_v23  ;;  %v11405_v23 = vld [vmem:[%s17705_s6 + $0x30c] sm:$0xf0]  ;;  %v5615_v19 = vld [vmem:[#allocation2 + $0x68] sm:$0xff]  ;;  %v5519_v5 = vrot.slane %v5153_v6, 2 }
 0x72f   : > { %v5025_v58 = vpop.f32.mrf.mxu2  ;;  %v11408_v20 = vor.u32 %v12008_v42, %v11405_v23  ;;  %6199 = vmatpush.bf16.msrb.mxu1 %v11500_v21  ;;  %v15574_v34 = vpack.c.bf16 %v5617_v54, %v5615_v19  ;;  %v5654_v21 = vld [vmem:[#allocation2 + $0x1a0] sm:$0xff] }
 0x730   : > { %v5328_v8 = vrot.slane %v4897_v24, 1  ;;  %6126 = vmatmul.bf16.gmra.mxu0 %v15549_v47 }
 0x731   : > { %6312 = vmatpush.bf16.msra.mxu2 %v11408_v20  ;;  %6441 = vmatpush.bf16.msrb.mxu3 %v11504_v43 }
 0x732   : > { %v5329_v2 = vsel %vm3652_vm5, %v5327_v44, %v5328_v8 }
 0x733   : > { %v5154_v50 = vpop.f32.mrf.mxu3  ;;  %v5409_v61 = vadd.f32 %v5329_v2, %v14975_v55 }
 0x734   : > { %v5155_v10 = vadd.f32 %v5154_v50, %v5025_v58  ;;  %6313 = vmatmul.bf16.vlgmr.msra.gmra.mxu2 %v15285_v39 }
 0x735   : > { %v4899_v24 = vpop.f32.mrf.mxu1  ;;  %v15576_v47 = vpop.f32.mrf.mxu0 }
 0x736   : > { %v5520_v13 = vrot.slane %v5155_v10, 2  ;;  %v4900_v29 = vadd.f32 %v4899_v24, %v15288_v63  ;;  %v5656_v63 = vld [vmem:[#allocation2 + $0x1b0] sm:$0xff] }
 0x737   : > { %v5028_v42 = vpop.f32.mrf.mxu2  ;;  %v15586_v20 = vpack.c.bf16 %v5656_v63, %v5654_v21 }
 0x738   : > { %v5330_v44 = vrot.slane %v4900_v29, 1  ;;  %6200 = vmatmul.bf16.vlgmr.msrb.gmra.mxu1 %v15574_v34  ;;  %6442 = vmatmul.bf16.vlgmr.msrb.gmra.mxu3 %v15574_v34  ;;  %v5521_v55 = vsel %vm3845_vm6, %v5519_v5, %v5520_v13  ;;  %v5621_v5 = vld [vmem:[#allocation2 + $0x98] sm:$0xff] }
 0x739   : > { %v15582_v58 = vadd.f32 %v5521_v55, %v5409_v61  ;;  %v5619_v61 = vld [vmem:[#allocation2 + $0x88] sm:$0xff] }
 0x73a   : > { %v5331_v6 = vsel %vm3652_vm5, %v5328_v8, %v5330_v44  ;;  %v15596_v55 = vpack.c.bf16 %v5621_v5, %v5619_v61 }
 0x73b   : > { %v5410_v23 = vadd.f32 %v5331_v6, %v14985_v38  ;;  %v5157_v30 = vpop.f32.mrf.mxu3 }
 0x73c   : > { %v5158_v26 = vadd.f32 %v5157_v30, %v5028_v42 }
 0x73d   : > { %v4901_v2 = vpop.f32.mrf.mxu1  ;;  %v15588_v43 = vpop.f32.mrf.mxu0 }
 0x73e   : > { %v5522_v29 = vrot.slane %v5158_v26, 2  ;;  %v4902_v24 = vadd.f32 %v4901_v2, %v15295_v62  ;;  %v5658_v62 = vld [vmem:[#allocation2 + $0x1c0] sm:$0xff] }
 0x73f   : > { %v5030_v54 = vpop.f32.mrf.mxu2 }
 0x740   : > { %v5523_v50 = vsel %vm3845_vm6, %v5520_v13, %v5522_v29  ;;  %6131 = vmatmul.bf16.gmra.mxu0 %v15586_v20  ;;  %v5332_v13 = vrot.slane %v4902_v24, 1 }
 0x741   : > { %v15591_v10 = vadd.f32 %v5523_v50, %v5410_v23  ;;  %v5660_v23 = vld [vmem:[#allocation2 + $0x1d0] sm:$0xff] }
 0x742   : > { %v15603_v29 = vpack.c.bf16 %v5660_v23, %v5658_v62 }
 0x743   : > { %v5159_v8 = vpop.f32.mrf.mxu3 }
 0x744   : > { %v5160_v38 = vadd.f32 %v5159_v8, %v5030_v54  ;;  %6318 = vmatmul.bf16.gmra.mxu2 %v15304_v51 }
 0x745   : > { %v4904_v19 = vpop.f32.mrf.mxu1  ;;  %v6099_v42 = vpop.f32.mrf.mxu0 }
 0x746   : > { %v4905_v44 = vadd.f32 %v4904_v19, %v15306_v32  ;;  %v5524_v50 = vrot.slane %v5160_v38, 2 }
 0x747   : > { %v5033_v21 = vpop.f32.mrf.mxu2 }
 0x748   : > { %v5333_v6 = vrot.slane %v4905_v44, 1  ;;  %6205 = vmatmul.bf16.gmra.mxu1 %v15596_v55  ;;  %6447 = vmatmul.bf16.gmra.mxu3 %v15596_v55 }
 0x74a   : > { %v5334_v63 = vsel %vm3652_vm5, %v5332_v13, %v5333_v6  ;;  %v5623_v13 = vld [vmem:[#allocation2 + $0xa8] sm:$0xff] }
 0x74b   : > { %v5411_v30 = vadd.f32 %v5334_v63, %v14999_v11  ;;  %v5162_v26 = vpop.f32.mrf.mxu3 }
 0x74c   : > { %v5163_v32 = vadd.f32 %v5162_v26, %v5033_v21  ;;  %v5625_v21 = vld [vmem:[#allocation2 + $0xb8] sm:$0xff] }
 0x74d   : > { %v4906_v2 = vpop.f32.mrf.mxu1  ;;  %v15606_v61 = vpop.f32.mrf.mxu0  ;;  %v15614_v23 = vpack.c.bf16 %v5625_v21, %v5623_v13 }
 0x74e   : > { %v5525_v54 = vrot.slane %v5163_v32, 2  ;;  %v4907_v8 = vadd.f32 %v4906_v2, %v15327_v59  ;;  %v5662_v2 = vld [vmem:[#allocation2 + $0x1e0] sm:$0xff] }
 0x74f   : > { %v5035_v5 = vpop.f32.mrf.mxu2  ;;  %18120 = vst [vmem:[#allocation13_spill] sm:$0xff] %v15614_v23 }
 0x750   : > { %v5526_v24 = vsel %vm3845_vm6, %v5524_v50, %v5525_v54  ;;  %v5335_v19 = vrot.slane %v4907_v8, 1  ;;  %6135 = vmatmul.bf16.gmra.mxu0 %v15603_v29 }
 0x751   : > { %v15609_v44 = vadd.f32 %v5526_v24, %v5411_v30 }
 0x752   : > { %v5336_v11 = vsel %vm3652_vm5, %v5333_v6, %v5335_v19 }
 0x753   : > { %v5164_v42 = vpop.f32.mrf.mxu3  ;;  %v5412_v38 = vadd.f32 %v5336_v11, %v15007_v0  ;;  %v5664_v0 = vld [vmem:[#allocation2 + $0x1f0] sm:$0xff] }
 0x754   : > { %v5165_v63 = vadd.f32 %v5164_v42, %v5035_v5  ;;  %6323 = vmatmul.bf16.gmra.mxu2 %v15333_v7  ;;  %v15625_v5 = vpack.c.bf16 %v5664_v0, %v5662_v2 }
 0x755   : > { %v4909_v62 = vpop.f32.mrf.mxu1  ;;  %v15616_v26 = vpop.f32.mrf.mxu0 }
 0x756   : > { %v5527_v59 = vrot.slane %v5165_v63, 2  ;;  %v4910_v8 = vadd.f32 %v4909_v62, %v15336_v37  ;;  %v5627_v62 = vld [vmem:[#allocation2 + $0xc8] sm:$0xff] }
 0x757   : > { %v5038_v30 = vpop.f32.mrf.mxu2 }
 0x758   : > { %6209 = vmatmul.bf16.gmra.mxu1 %v15614_v23  ;;  %6452 = vmatmul.bf16.gmra.mxu3 %v15614_v23  ;;  %v5528_v6 = vsel %vm3845_vm6, %v5525_v54, %v5527_v59  ;;  %v5337_v13 = vrot.slane %v4910_v8, 1  ;;  %v5629_v59 = vld [vmem:[#allocation2 + $0xd8] sm:$0xff] }
 0x759   : > { %v15622_v32 = vadd.f32 %v5528_v6, %v5412_v38 }
 0x75b   : > { %v5167_v50 = vpop.f32.mrf.mxu3 }
 0x75c   : > { %v5168_v24 = vadd.f32 %v5167_v50, %v5038_v30 }
 0x75d   : > { %v4911_v19 = vpop.f32.mrf.mxu1  ;;  %v6106_v42 = vpop.f32.mrf.mxu0 }
 0x75e   : > { %v4912_v11 = vadd.f32 %v4911_v19, %v15345_v33  ;;  %v5529_v30 = vrot.slane %v5168_v24, 2  ;;  %v15632_v33 = vpack.c.bf16 %v5629_v59, %v5627_v62  ;;  %v5666_v24 = vld [vmem:[#allocation2 + $0x200] sm:$0xff] }
 0x75f   : > { %v5040_v63 = vpop.f32.mrf.mxu2 }
 0x760   : > { %v5338_v21 = vrot.slane %v4912_v11, 1  ;;  %6139 = vmatmul.bf16.gmra.mxu0 %v15625_v5 }
 0x762   : > { %v5339_v54 = vsel %vm3652_vm5, %v5337_v13, %v5338_v21 }
 0x763   : > { %v5169_v38 = vpop.f32.mrf.mxu3  ;;  %v5413_v6 = vadd.f32 %v5339_v54, %v15021_v48 }
 0x764   : > { %v5170_v23 = vadd.f32 %v5169_v38, %v5040_v63  ;;  %6328 = vmatmul.bf16.gmra.mxu2 %v15353_v16 }
 0x765   : > { %v4914_v37 = vpop.f32.mrf.mxu1  ;;  %v15634_v50 = vpop.f32.mrf.mxu0 }
 0x766   : > { %v5530_v2 = vrot.slane %v5170_v23, 2  ;;  %v4915_v0 = vadd.f32 %v4914_v37, %v15356_v53  ;;  %v5668_v53 = vld [vmem:[#allocation2 + $0x210] sm:$0xff] }
 0x767   : > { %v5043_v19 = vpop.f32.mrf.mxu2  ;;  %v15644_v38 = vpack.c.bf16 %v5668_v53, %v5666_v24 }
 0x768   : > { %v5340_v8 = vrot.slane %v4915_v0, 1  ;;  %6213 = vmatmul.bf16.gmra.mxu1 %v15632_v33  ;;  %6457 = vmatmul.bf16.gmra.mxu3 %v15632_v33  ;;  %v5531_v48 = vsel %vm3845_vm6, %v5529_v30, %v5530_v2 }
 0x769   : > { %v15640_v11 = vadd.f32 %v5531_v48, %v5413_v6  ;;  %18121 = vst [vmem:[#allocation11_spill] sm:$0xff] %v15644_v38  ;;  %v11591_v6 = vld [vmem:[%s17705_s6 + $0x470] sm:$0xf] }
 0x76a   : > { %v5341_v23 = vsel %vm3652_vm5, %v5338_v21, %v5340_v8  ;;  %v11495_v21 = vld [vmem:[%s17705_s6 + $0x3b0] sm:$0xf] }
 0x76b   : > { %v5414_v42 = vadd.f32 %v5341_v23, %v15031_v12  ;;  %v5172_v13 = vpop.f32.mrf.mxu3  ;;  %v12031_v12 = vld [vmem:[%s17705_s6 + $0x3b8] sm:$0xf0] }
 0x76c   : > { %v5173_v63 = vadd.f32 %v5172_v13, %v5043_v19  ;;  %v11496_v48 = vor.u32 %v12031_v12, %v11495_v21  ;;  %v5631_v19 = vld [vmem:[#allocation2 + $0xe8] sm:$0xff]  ;;  %v5633_v13 = vld [vmem:[#allocation2 + $0xf8] sm:$0xff] }
 0x76d   : > { %v4916_v54 = vpop.f32.mrf.mxu1  ;;  %v15646_v37 = vpop.f32.mrf.mxu0 }
 0x76e   : > { %v5532_v59 = vrot.slane %v5173_v63, 2  ;;  %v4917_v23 = vadd.f32 %v4916_v54, %v15363_v15  ;;  %6563 = vmatpush.bf16.msra.mxu0 %v11496_v48 }
 0x76f   : > { %v5045_v30 = vpop.f32.mrf.mxu2 }
 0x770   : > { %v5533_v62 = vsel %vm3845_vm6, %v5530_v2, %v5532_v59  ;;  %6144 = vmatmul.bf16.gmra.mxu0 %v15644_v38  ;;  %v12055_v2 = vld [vmem:[%s17705_s6 + $0x478] sm:$0xf0]  ;;  %v15666_v59 = vpack.c.bf16 %v5633_v13, %v5631_v19  ;;  %v5342_v21 = vrot.slane %v4917_v23, 1 }
 0x771   : > { %v15649_v0 = vadd.f32 %v5533_v62, %v5414_v42  ;;  %v11592_v53 = vor.u32 %v12055_v2, %v11591_v6  ;;  %v5672_v6 = vld [vmem:[#allocation2 + $0x230] sm:$0xff] }
 0x772   : > { %18122 = vst [vmem:[#allocation35_spill] sm:$0xff] %v15666_v59 }
 0x773   : > { %v5174_v8 = vpop.f32.mrf.mxu3  ;;  %6692 = vmatpush.bf16.msra.mxu1 %v11592_v53 }
 0x774   : > { %v5175_v24 = vadd.f32 %v5174_v8, %v5045_v30  ;;  %6333 = vmatmul.bf16.gmra.mxu2 %v15372_v56  ;;  %v5670_v30 = vld [vmem:[#allocation2 + $0x220] sm:$0xff] }
 0x775   : > { %v4919_v42 = vpop.f32.mrf.mxu1  ;;  %v6112_v62 = vpop.f32.mrf.mxu0  ;;  %v15673_v19 = vpack.c.bf16 %v5672_v6, %v5670_v30  ;;  %v5637_v30 = vld [vmem:[#allocation2 + $0x118] sm:$0xff] }
 0x776   : > { %v4920_v63 = vadd.f32 %v4919_v42, %v15374_v31  ;;  %v5534_v53 = vrot.slane %v5175_v24, 2 }
 0x777   : > { %v5048_v15 = vpop.f32.mrf.mxu2  ;;  %18123 = vst [vmem:[#allocation23_spill] sm:$0xff] %v15673_v19 }
 0x778   : > { %v5343_v12 = vrot.slane %v4920_v63, 1  ;;  %6218 = vmatmul.bf16.gmra.mxu1 %v15666_v59  ;;  %6462 = vmatmul.bf16.gmra.mxu3 %v15666_v59 }
 0x77a   : > { %v5344_v54 = vsel %vm3652_vm5, %v5342_v21, %v5343_v12 }
 0x77b   : > { %v5415_v8 = vadd.f32 %v5344_v54, %v15057_v3  ;;  %v5177_v31 = vpop.f32.mrf.mxu3  ;;  %v5635_v54 = vld [vmem:[#allocation2 + $0x108] sm:$0xff] }
 0x77c   : > { %v5178_v48 = vadd.f32 %v5177_v31, %v5048_v15 }
 0x77d   : > { %v4921_v2 = vpop.f32.mrf.mxu1  ;;  %v15676_v13 = vpop.f32.mrf.mxu0 }
 0x77e   : > { %v5535_v42 = vrot.slane %v5178_v48, 2  ;;  %v4922_v23 = vadd.f32 %v4921_v2, %v15395_v9  ;;  %v15684_v48 = vpack.c.bf16 %v5637_v30, %v5635_v54 }
 0x77f   : > { %v5050_v59 = vpop.f32.mrf.mxu2 }
 0x780   : > { %v5536_v63 = vsel %vm3845_vm6, %v5534_v53, %v5535_v42  ;;  %v5345_v62 = vrot.slane %v4922_v23, 1  ;;  %6148 = vmatmul.bf16.gmra.mxu0 %v15673_v19  ;;  %18125 = vst [vmem:[#allocation33_spill] sm:$0xff] %v15684_v48  ;;  %v5674_v23 = vld [vmem:[#allocation2 + $0x240] sm:$0xff] }
 0x781   : > { %v15679_v21 = vadd.f32 %v5536_v63, %v5415_v8 }
 0x782   : > { %v5346_v3 = vsel %vm3652_vm5, %v5343_v12, %v5345_v62 }
 0x783   : > { %18124 = vst [vmem:[#allocation14_spill] sm:$0xff] %v15679_v21  ;;  %v5179_v15 = vpop.f32.mrf.mxu3  ;;  %v5416_v24 = vadd.f32 %v5346_v3, %v15065_v60  ;;  %v5676_v60 = vld [vmem:[#allocation2 + $0x250] sm:$0xff] }
 0x784   : > { %v5180_v6 = vadd.f32 %v5179_v15, %v5050_v59  ;;  %6338 = vmatmul.bf16.gmra.mxu2 %v15401_v17  ;;  %v15695_v15 = vpack.c.bf16 %v5676_v60, %v5674_v23 }
 0x785   : > { %v4924_v31 = vpop.f32.mrf.mxu1  ;;  %v15686_v2 = vpop.f32.mrf.mxu0 }
 0x786   : > { %v5537_v9 = vrot.slane %v5180_v6, 2  ;;  %v4925_v63 = vadd.f32 %v4924_v31, %v15404_v40  ;;  %v5639_v31 = vld [vmem:[#allocation2 + $0x128] sm:$0xff] }
 0x787   : > { %v5053_v8 = vpop.f32.mrf.mxu2 }
 0x788   : > { %6222 = vmatmul.bf16.gmra.mxu1 %v15684_v48  ;;  %6467 = vmatmul.bf16.gmra.mxu3 %v15684_v48  ;;  %v5538_v12 = vsel %vm3845_vm6, %v5535_v42, %v5537_v9  ;;  %v5347_v6 = vrot.slane %v4925_v63, 1  ;;  %v5641_v9 = vld [vmem:[#allocation2 + $0x138] sm:$0xff] }
 0x789   : > { %v15692_v53 = vadd.f32 %v5538_v12, %v5416_v24 }
 0x78b   : > { %18126 = vst [vmem:[#allocation37_spill] sm:$0xff] %v15692_v53  ;;  %v5182_v59 = vpop.f32.mrf.mxu3 }
 0x78c   : > { %v5183_v62 = vadd.f32 %v5182_v59, %v5053_v8 }
 0x78d   : > { %v4926_v3 = vpop.f32.mrf.mxu1  ;;  %v6119_v30 = vpop.f32.mrf.mxu0 }
 0x78e   : > { %v4927_v54 = vadd.f32 %v4926_v3, %v15413_v41  ;;  %v5539_v8 = vrot.slane %v5183_v62, 2  ;;  %v15702_v41 = vpack.c.bf16 %v5641_v9, %v5639_v31  ;;  %v5678_v62 = vld [vmem:[#allocation2 + $0x260] sm:$0xff] }
 0x78f   : > { %v5055_v48 = vpop.f32.mrf.mxu2 }
 0x790   : > { %v5348_v21 = vrot.slane %v4927_v54, 1  ;;  %6152 = vmatmul.bf16.gmra.mxu0 %v15695_v15  ;;  %18127 = vst [vmem:[#allocation51_spill] sm:$0xff] %v15702_v41 }
 0x792   : > { %v5349_v42 = vsel %vm3652_vm5, %v5347_v6, %v5348_v21 }
 0x793   : > { %v5184_v24 = vpop.f32.mrf.mxu3  ;;  %v5417_v12 = vadd.f32 %v5349_v42, %v15079_v45 }
 0x794   : > { %v5185_v53 = vadd.f32 %v5184_v24, %v5055_v48  ;;  %6343 = vmatmul.bf16.gmra.mxu2 %v15421_v27 }
 0x795   : > { %v4929_v40 = vpop.f32.mrf.mxu1  ;;  %v15704_v59 = vpop.f32.mrf.mxu0 }
 0x796   : > { %v5540_v23 = vrot.slane %v5185_v53, 2  ;;  %v4930_v60 = vadd.f32 %v4929_v40, %v15424_v49  ;;  %v5680_v49 = vld [vmem:[#allocation2 + $0x270] sm:$0xff] }
 0x797   : > { %v5058_v48 = vpop.f32.mrf.mxu2  ;;  %v15714_v24 = vpack.c.bf16 %v5680_v49, %v5678_v62 }
 0x798   : > { %v5350_v63 = vrot.slane %v4930_v60, 1  ;;  %6226 = vmatmul.bf16.gmra.mxu1 %v15702_v41  ;;  %6472 = vmatmul.bf16.gmra.mxu3 %v15702_v41  ;;  %v5541_v45 = vsel %vm3845_vm6, %v5539_v8, %v5540_v23 }
 0x799   : > { %v15710_v3 = vadd.f32 %v5541_v45, %v5417_v12  ;;  %v11579_v12 = vld [vmem:[%s17705_s6 + $0x458] sm:$0xf] }
 0x79a   : > { %v5351_v53 = vsel %vm3652_vm5, %v5348_v21, %v5350_v63  ;;  %v11483_v21 = vld [vmem:[%s17705_s6 + $0x398] sm:$0xf] }
 0x79b   : > { %18128 = vst [vmem:[#allocation36_spill] sm:$0xff] %v15710_v3  ;;  %v5418_v54 = vadd.f32 %v5351_v53, %v15089_v36  ;;  %v5187_v30 = vpop.f32.mrf.mxu3  ;;  %v12028_v36 = vld [vmem:[%s17705_s6 + $0x3a0] sm:$0xf0] }
 0x79c   : > { %v5188_v6 = vadd.f32 %v5187_v30, %v5058_v48  ;;  %v11484_v45 = vor.u32 %v12028_v36, %v11483_v21  ;;  %v5643_v48 = vld [vmem:[#allocation2 + $0x148] sm:$0xff]  ;;  %v5645_v30 = vld [vmem:[#allocation2 + $0x158] sm:$0xff] }
 0x79d   : > { %v4931_v42 = vpop.f32.mrf.mxu1  ;;  %v15716_v40 = vpop.f32.mrf.mxu0 }
 0x79e   : > { %v5542_v9 = vrot.slane %v5188_v6, 2  ;;  %v4932_v53 = vadd.f32 %v4931_v42, %v15431_v18  ;;  %6564 = vmatpush.bf16.msra.mxu0 %v11484_v45 }
 0x79f   : > { %v5060_v8 = vpop.f32.mrf.mxu2 }
 0x7a0   : > { %v5543_v31 = vsel %vm3845_vm6, %v5540_v23, %v5542_v9  ;;  %6157 = vmatmul.bf16.gmra.mxu0 %v15714_v24  ;;  %v12052_v23 = vld [vmem:[%s17705_s6 + $0x460] sm:$0xf0]  ;;  %v15736_v9 = vpack.c.bf16 %v5645_v30, %v5643_v48  ;;  %v5352_v21 = vrot.slane %v4932_v53, 1 }
 0x7a1   : > { %v15719_v60 = vadd.f32 %v5543_v31, %v5418_v54  ;;  %v11580_v49 = vor.u32 %v12052_v23, %v11579_v12  ;;  %v5684_v12 = vld [vmem:[#allocation2 + $0x290] sm:$0xff] }
 0x7a2   : > { %18130 = vst [vmem:[#allocation25_spill] sm:$0xff] %v15736_v9 }
 0x7a3   : > { %18129 = vst [vmem:[#allocation15_spill] sm:$0xff] %v15719_v60  ;;  %v5189_v63 = vpop.f32.mrf.mxu3  ;;  %6693 = vmatpush.bf16.msra.mxu1 %v11580_v49 }
 0x7a4   : > { %v5190_v62 = vadd.f32 %v5189_v63, %v5060_v8  ;;  %6348 = vmatmul.bf16.gmra.mxu2 %v15440_v14  ;;  %v5682_v8 = vld [vmem:[#allocation2 + $0x280] sm:$0xff] }
 0x7a5   : > { %v4934_v54 = vpop.f32.mrf.mxu1  ;;  %v6125_v31 = vpop.f32.mrf.mxu0  ;;  %v15743_v48 = vpack.c.bf16 %v5684_v12, %v5682_v8  ;;  %v5649_v8 = vld [vmem:[#allocation2 + $0x178] sm:$0xff] }
 0x7a6   : > { %v4935_v6 = vadd.f32 %v4934_v54, %v15442_v28  ;;  %v5544_v49 = vrot.slane %v5190_v62, 2 }
 0x7a7   : > { %v5063_v18 = vpop.f32.mrf.mxu2 }
 0x7a8   : > { %v5353_v36 = vrot.slane %v4935_v6, 1  ;;  %6231 = vmatmul.bf16.gmra.mxu1 %v15736_v9  ;;  %6477 = vmatmul.bf16.gmra.mxu3 %v15736_v9 }
 0x7aa   : > { %v5354_v42 = vsel %vm3652_vm5, %v5352_v21, %v5353_v36 }
 0x7ab   : > { %v5419_v63 = vadd.f32 %v5354_v42, %v15115_v57  ;;  %v5192_v28 = vpop.f32.mrf.mxu3  ;;  %v5647_v42 = vld [vmem:[#allocation2 + $0x168] sm:$0xff] }
 0x7ac   : > { %v5193_v45 = vadd.f32 %v5192_v28, %v5063_v18 }
 0x7ad   : > { %v4936_v23 = vpop.f32.mrf.mxu1  ;;  %v15746_v30 = vpop.f32.mrf.mxu0 }
 0x7ae   : > { %v5545_v54 = vrot.slane %v5193_v45, 2  ;;  %v4937_v53 = vadd.f32 %v4936_v23, %v15469_v25  ;;  %v15755_v23 = vpack.c.bf16 %v5649_v8, %v5647_v42 }
 0x7af   : > { %v5065_v9 = vpop.f32.mrf.mxu2 }
 0x7b0   : > { %v5546_v6 = vsel %vm3845_vm6, %v5544_v49, %v5545_v54  ;;  %v5355_v31 = vrot.slane %v4937_v53, 1  ;;  %6161 = vmatmul.bf16.gmra.mxu0 %v15743_v48  ;;  %18132 = vst [vmem:[#allocation40_spill] sm:$0xff] %v15755_v23  ;;  %v5686_v53 = vld [vmem:[#allocation2 + $0x2a0] sm:$0xff] }
 0x7b1   : > { %v15749_v21 = vadd.f32 %v5546_v6, %v5419_v63  ;;  %v5688_v6 = vld [vmem:[#allocation2 + $0x2b0] sm:$0xff] }
 0x7b2   : > { %v5356_v57 = vsel %vm3652_vm5, %v5353_v36, %v5355_v31 }
 0x7b3   : > { %18131 = vst [vmem:[#allocation38_spill] sm:$0xff] %v15749_v21  ;;  %v5194_v18 = vpop.f32.mrf.mxu3  ;;  %v5420_v62 = vadd.f32 %v5356_v57, %v15123_v4 }
 0x7b4   : > { %v5195_v12 = vadd.f32 %v5194_v18, %v5065_v9  ;;  %6353 = vmatmul.bf16.gmra.mxu2 %v15487_v22  ;;  %v15766_v18 = vpack.c.bf16 %v5688_v6, %v5686_v53  ;;  %v18135_v53 = vld [vmem:[#allocation34_spill] sm:$0xff] }
 0x7b5   : > { %v6201_v28 = vpop.f32.mrf.mxu1  ;;  %v15757_v49 = vpop.f32.mrf.mxu0 }
 0x7b6   : > { %v5547_v25 = vrot.slane %v5195_v12, 2  ;;  %v6202_v45 = vadd.f32 %v6201_v28, %v15490_v46 }
 0x7b7   : > { %v6314_v9 = vpop.f32.mrf.mxu2 }
 0x7b8   : > { %v6821_v63 = vadd.f32 %v6202_v45, %v15144_v1  ;;  %6235 = vmatmul.bf16.gmra.mxu1 %v15755_v23  ;;  %6482 = vmatmul.bf16.gmra.mxu3 %v15755_v23  ;;  %v5548_v36 = vsel %vm3845_vm6, %v5545_v54, %v5547_v25  ;;  %v5653_v54 = vld [vmem:[#allocation2 + $0x198] sm:$0xff]  ;;  %v5651_v45 = vld [vmem:[#allocation2 + $0x188] sm:$0xff] }
 0x7b9   : > { %v15764_v4 = vadd.f32 %v5548_v36, %v5420_v62 }
 0x7bb   : > { %18133 = vst [vmem:[#allocation39_spill] sm:$0xff] %v15764_v4  ;;  %v6443_v46 = vpop.f32.mrf.mxu3  ;;  %v15771_v4 = vpack.c.bf16 %v5653_v54, %v5651_v45  ;;  %v18137_v45 = vld [vmem:[#allocation55_spill] sm:$0xff] }
 0x7bc   : > { %v6444_v31 = vadd.f32 %v6443_v46, %v6314_v9  ;;  %v5690_v46 = vld [vmem:[#allocation2 + $0x2c0] sm:$0xff] }
 0x7bd   : > { %v6203_v57 = vpop.f32.mrf.mxu1  ;;  %v6132_v8 = vpop.f32.mrf.mxu0  ;;  %18134 = vst [vmem:[#allocation18_spill] sm:$0xff] %v15771_v4 }
 0x7be   : > { %v6204_v42 = vadd.f32 %v6203_v57, %v15517_v52  ;;  %v6901_v36 = vrot.slane %v6444_v31, 1  ;;  %v5692_v57 = vld [vmem:[#allocation2 + $0x2d0] sm:$0xff] }
 0x7bf   : > { %v6316_v12 = vpop.f32.mrf.mxu2 }
 0x7c0   : > { %v6822_v1 = vadd.f32 %v6204_v42, %v15151_v35  ;;  %6165 = vmatmul.bf16.gmra.mxu0 %v15766_v18 }
 0x7c3   : > { %v6445_v28 = vpop.f32.mrf.mxu3 }
 0x7c4   : > { %v6446_v62 = vadd.f32 %v6445_v28, %v6316_v12  ;;  %6358 = vmatmul.bf16.gmra.mxu2 %v18135_v53  ;;  %v15781_v12 = vpack.c.bf16 %v5692_v57, %v5690_v46  ;;  %v5655_v57 = vld [vmem:[#allocation2 + $0x1a8] sm:$0xff] }
 0x7c5   : > { %v6206_v25 = vpop.f32.mrf.mxu1  ;;  %v15773_v9 = vpop.f32.mrf.mxu0 }
 0x7c6   : > { %v6902_v23 = vrot.slane %v6446_v62, 1 }
 0x7c7   : > { %v6319_v6 = vpop.f32.mrf.mxu2 }
 0x7c8   : > { %v6903_v52 = vsel %vm3652_vm5, %v6901_v36, %v6902_v23  ;;  %6239 = vmatmul.bf16.gmra.mxu1 %v15771_v4  ;;  %6487 = vmatmul.bf16.gmra.mxu3 %v15771_v4 }
 0x7c9   : > { %v15779_v35 = vadd.f32 %v6903_v52, %v6821_v63  ;;  %v11471_v52 = vld [vmem:[%s17705_s6 + $0x380] sm:$0xf] }
 0x7cb   : > { %18136 = vst [vmem:[#allocation42_spill] sm:$0xff] %v15779_v35  ;;  %v6448_v42 = vpop.f32.mrf.mxu3 }
 0x7cc   : > { %v6449_v31 = vadd.f32 %v6448_v42, %v6319_v6  ;;  %v12025_v6 = vld [vmem:[%s17705_s6 + $0x388] sm:$0xf0] }
 0x7cd   : > { %v6207_v8 = vpop.f32.mrf.mxu1  ;;  %v15784_v62 = vpop.f32.mrf.mxu0  ;;  %v11472_v46 = vor.u32 %v12025_v6, %v11471_v52 }
 0x7ce   : > { %v6904_v28 = vrot.slane %v6449_v31, 1  ;;  %v6208_v54 = vadd.f32 %v6207_v8, %v15576_v47  ;;  %v11567_v47 = vld [vmem:[%s17705_s6 + $0x440] sm:$0xf] }
 0x7cf   : > { %v6321_v63 = vpop.f32.mrf.mxu2  ;;  %6565 = vmatpush.bf16.msra.mxu0 %v11472_v46 }
 0x7d0   : > { %v6905_v25 = vsel %vm3652_vm5, %v6902_v23, %v6904_v28  ;;  %v6823_v36 = vadd.f32 %v6208_v54, %v18137_v45  ;;  %6170 = vmatmul.bf16.gmra.mxu0 %v15781_v12  ;;  %v5657_v28 = vld [vmem:[#allocation2 + $0x1b8] sm:$0xff] }
 0x7d1   : > { %v15788_v4 = vadd.f32 %v6905_v25, %v6822_v1  ;;  %v12049_v1 = vld [vmem:[%s17705_s6 + $0x448] sm:$0xf0]  ;;  %v15804_v25 = vpack.c.bf16 %v5657_v28, %v5655_v57 }
 0x7d2   : > { %v11568_v31 = vor.u32 %v12049_v1, %v11567_v47  ;;  %v5696_v47 = vld [vmem:[#allocation2 + $0x2f0] sm:$0xff] }
 0x7d3   : > { %18138 = vst [vmem:[#allocation41_spill] sm:$0xff] %v15788_v4  ;;  %v6450_v23 = vpop.f32.mrf.mxu3  ;;  %v18140_v4 = vld [vmem:[#allocation57_spill] sm:$0xff] }
 0x7d4   : > { %v6451_v42 = vadd.f32 %v6450_v23, %v6321_v63  ;;  %6694 = vmatpush.bf16.msra.mxu1 %v11568_v31  ;;  %18139 = vst [vmem:[#allocation43_spill] sm:$0xff] %v15804_v25  ;;  %6363 = vmatmul.bf16.gmra.mxu2 %v15586_v20  ;;  %v5694_v63 = vld [vmem:[#allocation2 + $0x2e0] sm:$0xff] }
 0x7d5   : > { %v6210_v8 = vpop.f32.mrf.mxu1  ;;  %v6138_v45 = vpop.f32.mrf.mxu0  ;;  %v15810_v35 = vpack.c.bf16 %v5696_v47, %v5694_v63 }
 0x7d6   : > { %v6211_v54 = vadd.f32 %v6210_v8, %v15588_v43  ;;  %v6906_v43 = vrot.slane %v6451_v42, 1  ;;  %v5659_v45 = vld [vmem:[#allocation2 + $0x1c8] sm:$0xff] }
 0x7d7   : > { %v6324_v6 = vpop.f32.mrf.mxu2 }
 0x7d8   : > { %v6824_v52 = vadd.f32 %v6211_v54, %v18140_v4  ;;  %6244 = vmatmul.bf16.gmra.mxu1 %v15804_v25  ;;  %6492 = vmatmul.bf16.gmra.mxu3 %v15804_v25  ;;  %v5661_v25 = vld [vmem:[#allocation2 + $0x1d8] sm:$0xff] }
 0x7d9   : > { %v15819_v47 = vpack.c.bf16 %v5661_v25, %v5659_v45  ;;  %v11459_v25 = vld [vmem:[%s17705_s6 + $0x368] sm:$0xf] }
 0x7db   : > { %v6453_v23 = vpop.f32.mrf.mxu3  ;;  %18142 = vst [vmem:[#allocation44_spill] sm:$0xff] %v15819_v47 }
 0x7dc   : > { %v6454_v46 = vadd.f32 %v6453_v23, %v6324_v6  ;;  %v18143_v23 = vld [vmem:[#allocation24_spill] sm:$0xff] }
 0x7dd   : > { %v6212_v1 = vpop.f32.mrf.mxu1  ;;  %v15812_v31 = vpop.f32.mrf.mxu0 }
 0x7de   : > { %v6907_v57 = vrot.slane %v6454_v46, 1 }
 0x7df   : > { %v6326_v4 = vpop.f32.mrf.mxu2 }
 0x7e0   : > { %v6908_v8 = vsel %vm3652_vm5, %v6906_v43, %v6907_v57  ;;  %6174 = vmatmul.bf16.gmra.mxu0 %v15810_v35 }
 0x7e1   : > { %v15815_v28 = vadd.f32 %v6908_v8, %v6823_v36  ;;  %v5700_v8 = vld [vmem:[#allocation2 + $0x310] sm:$0xff] }
 0x7e3   : > { %18141 = vst [vmem:[#allocation20_spill] sm:$0xff] %v15815_v28  ;;  %v6455_v54 = vpop.f32.mrf.mxu3 }
 0x7e4   : > { %v6456_v21 = vadd.f32 %v6455_v54, %v6326_v4  ;;  %6368 = vmatmul.bf16.gmra.mxu2 %v15603_v29 }
 0x7e5   : > { %v6214_v41 = vpop.f32.mrf.mxu1  ;;  %v15821_v42 = vpop.f32.mrf.mxu0 }
 0x7e6   : > { %v6909_v6 = vrot.slane %v6456_v21, 1  ;;  %v6215_v63 = vadd.f32 %v6214_v41, %v15606_v61  ;;  %v5698_v21 = vld [vmem:[#allocation2 + $0x300] sm:$0xff] }
 0x7e7   : > { %v6329_v43 = vpop.f32.mrf.mxu2  ;;  %v15836_v45 = vpack.c.bf16 %v5700_v8, %v5698_v21  ;;  %v5665_v8 = vld [vmem:[#allocation2 + $0x1f8] sm:$0xff] }
 0x7e8   : > { %v6910_v36 = vsel %vm3652_vm5, %v6907_v57, %v6909_v6  ;;  %v6825_v46 = vadd.f32 %v6215_v63, %v18143_v23  ;;  %6248 = vmatmul.bf16.gmra.mxu1 %v15819_v47  ;;  %6497 = vmatmul.bf16.gmra.mxu3 %v15819_v47  ;;  %v12022_v57 = vld [vmem:[%s17705_s6 + $0x370] sm:$0xf0]  ;;  %v11447_v23 = vld [vmem:[%s17705_s6 + $0x350] sm:$0xf] }
 0x7e9   : > { %v15828_v1 = vadd.f32 %v6910_v36, %v6824_v52  ;;  %v11460_v54 = vor.u32 %v12022_v57, %v11459_v25  ;;  %v18145_v63 = vld [vmem:[#allocation58_spill] sm:$0xff]  ;;  %v11435_v57 = vld [vmem:[%s17705_s6 + $0x338] sm:$0xf] }
 0x7eb   : > { %18144 = vst [vmem:[#allocation45_spill] sm:$0xff] %v15828_v1  ;;  %v6458_v61 = vpop.f32.mrf.mxu3  ;;  %6566 = vmatpush.bf16.msra.mxu0 %v11460_v54 }
 0x7ec   : > { %v6459_v41 = vadd.f32 %v6458_v61, %v6329_v43  ;;  %v12019_v43 = vld [vmem:[%s17705_s6 + $0x358] sm:$0xf0] }
 0x7ed   : > { %v6216_v4 = vpop.f32.mrf.mxu1  ;;  %v6145_v6 = vpop.f32.mrf.mxu0  ;;  %v11448_v61 = vor.u32 %v12019_v43, %v11447_v23 }
 0x7ee   : > { %v6217_v52 = vadd.f32 %v6216_v4, %v15616_v26  ;;  %v12016_v4 = vld [vmem:[%s17705_s6 + $0x340] sm:$0xf0] }
 0x7ef   : > { %v6331_v25 = vpop.f32.mrf.mxu2  ;;  %6567 = vmatpush.bf16.msra.mxu0 %v11448_v61  ;;  %v11436_v6 = vor.u32 %v12016_v4, %v11435_v57  ;;  %v11423_v61 = vld [vmem:[%s17705_s6 + $0x320] sm:$0xf]  ;;  %v5704_v4 = vld [vmem:[#allocation2 + $0x330] sm:$0xff] }
 0x7f0   : > { %v6826_v36 = vadd.f32 %v6217_v52, %v18145_v63  ;;  %6178 = vmatmul.bf16.gmra.mxu0 %v15836_v45  ;;  %v5663_v52 = vld [vmem:[#allocation2 + $0x1e8] sm:$0xff]  ;;  %v6911_v63 = vrot.slane %v6459_v41, 1  ;;  %v5702_v57 = vld [vmem:[#allocation2 + $0x320] sm:$0xff] }
 0x7f1   : > { %v15853_v43 = vpack.c.bf16 %v5665_v8, %v5663_v52 }
 0x7f3   : > { %v6460_v21 = vpop.f32.mrf.mxu3  ;;  %18146 = vst [vmem:[#allocation22_spill] sm:$0xff] %v15853_v43  ;;  %6568 = vmatpush.bf16.msra.mxu0 %v11436_v6  ;;  %v11411_v6 = vld [vmem:[%s17705_s6 + $0x308] sm:$0xf] }
 0x7f4   : > { %v6461_v26 = vadd.f32 %v6460_v21, %v6331_v25  ;;  %6373 = vmatmul.bf16.gmra.mxu2 %v15625_v5  ;;  %v12013_v25 = vld [vmem:[%s17705_s6 + $0x328] sm:$0xf0] }
 0x7f5   : > { %v6219_v54 = vpop.f32.mrf.mxu1  ;;  %v15855_v47 = vpop.f32.mrf.mxu0  ;;  %v11424_v41 = vor.u32 %v12013_v25, %v11423_v61 }
 0x7f6   : > { %v6912_v23 = vrot.slane %v6461_v26, 1 }
 0x7f7   : > { %v6334_v26 = vpop.f32.mrf.mxu2  ;;  %6569 = vmatpush.bf16.msra.mxu0 %v11424_v41  ;;  %v12078_v41 = vld [vmem:[#allocation6 + $0xb0] sm:$0xf0] }
 0x7f8   : > { %v6913_v21 = vsel %vm3652_vm5, %v6911_v63, %v6912_v23  ;;  %6252 = vmatmul.bf16.gmra.mxu1 %v15853_v43  ;;  %6502 = vmatmul.bf16.gmra.mxu3 %v15853_v43  ;;  %v12010_v63 = vld [vmem:[%s17705_s6 + $0x310] sm:$0xf0]  ;;  %v15875_v43 = vpack.c.bf16 %v5704_v4, %v5702_v57 }
 0x7f9   : > { %v15867_v8 = vadd.f32 %v6913_v21, %v6825_v46  ;;  %v11412_v28 = vor.u32 %v12010_v63, %v11411_v6  ;;  %v11679_v21 = vld [vmem:[#allocation6 + $0xa8] sm:$0xf] }
 0x7fa   : > { %v11680_v60 = vor.u32 %v12078_v41, %v11679_v21 }
 0x7fb   : > { %18147 = vst [vmem:[#allocation47_spill] sm:$0xff] %v15867_v8  ;;  %v6463_v54 = vpop.f32.mrf.mxu3  ;;  %6570 = vmatpush.bf16.msra.mxu0 %v11412_v28  ;;  %v12046_v28 = vld [vmem:[%s17705_s6 + $0x430] sm:$0xf0] }
 0x7fc   : > { %v6464_v52 = vadd.f32 %v6463_v54, %v6334_v26  ;;  %v18148_v54 = vld [vmem:[#allocation26_spill] sm:$0xff]  ;;  %7634 = vmatpush.bf16.msrb.mxu2 %v11680_v60 }
 0x7fd   : > { %v6220_v1 = vpop.f32.mrf.mxu1  ;;  %v15878_v25 = vpop.f32.mrf.mxu0 }
 0x7fe   : > { %v6914_v46 = vrot.slane %v6464_v52, 1  ;;  %v6221_v61 = vadd.f32 %v6220_v1, %v15634_v50  ;;  %v11555_v50 = vld [vmem:[%s17705_s6 + $0x428] sm:$0xf] }
 0x7ff   : > { %v6336_v57 = vpop.f32.mrf.mxu2  ;;  %v11556_v4 = vor.u32 %v12046_v28, %v11555_v50  ;;  %v15898_v28 = vld [vmem:[#allocation2 + $0x10] sm:$0xff] }
 0x800   : > { %v6915_v26 = vsel %vm3652_vm5, %v6912_v23, %v6914_v46  ;;  %v6827_v8 = vadd.f32 %v6221_v61, %v18148_v54  ;;  %6183 = vmatmul.bf16.gmra.mxu0 %v15875_v43  ;;  %v5667_v23 = vld [vmem:[#allocation2 + $0x208] sm:$0xff]  ;;  %v18151_v61 = vld [vmem:[#allocation59_spill] sm:$0xff] }
 0x801   : > { %v15882_v3 = vadd.f32 %v6915_v26, %v6826_v36  ;;  %6695 = vmatpush.bf16.msra.mxu1 %v11556_v4  ;;  %v5669_v36 = vld [vmem:[#allocation2 + $0x218] sm:$0xff]  ;;  %v5708_v26 = vld [vmem:[#allocation2 + $0x350] sm:$0xff] }
 0x802   : > { %v15892_v46 = vpack.c.bf16 %v5669_v36, %v5667_v23 }
 0x803   : > { %18149 = vst [vmem:[#allocation10_spill] sm:$0xff] %v15882_v3  ;;  %v6465_v1 = vpop.f32.mrf.mxu3 }
 0x804   : > { %v6466_v52 = vadd.f32 %v6465_v1, %v6336_v57  ;;  %18150 = vst [vmem:[#allocation48_spill] sm:$0xff] %v15892_v46  ;;  %6378 = vmatmul.bf16.gmra.mxu2 %v15644_v38  ;;  %v5675_v38 = vld [vmem:[#allocation2 + $0x248] sm:$0xff] }
 0x805   : > { %v6223_v6 = vpop.f32.mrf.mxu1  ;;  %v6151_v60 = vpop.f32.mrf.mxu0 }
 0x806   : > { %v6224_v63 = vadd.f32 %v6223_v6, %v15646_v37  ;;  %v15901_v37 = vpack.c.bf16 %v5708_v26, %v15898_v28  ;;  %v6916_v1 = vrot.slane %v6466_v52, 1 }
 0x807   : > { %v6339_v41 = vpop.f32.mrf.mxu2 }
 0x808   : > { %v6828_v21 = vadd.f32 %v6224_v63, %v18151_v61  ;;  %6257 = vmatmul.bf16.gmra.mxu1 %v15892_v46  ;;  %6507 = vmatmul.bf16.gmra.mxu3 %v15892_v46  ;;  %v5671_v61 = vld [vmem:[#allocation2 + $0x228] sm:$0xff] }
 0x80b   : > { %v6468_v54 = vpop.f32.mrf.mxu3 }
 0x80c   : > { %v6469_v57 = vadd.f32 %v6468_v54, %v6339_v41  ;;  %v5673_v41 = vld [vmem:[#allocation2 + $0x238] sm:$0xff] }
 0x80d   : > { %v6225_v50 = vpop.f32.mrf.mxu1  ;;  %v15903_v23 = vpop.f32.mrf.mxu0  ;;  %v15910_v3 = vpack.c.bf16 %v5673_v41, %v5671_v61 }
 0x80e   : > { %v6917_v4 = vrot.slane %v6469_v57, 1  ;;  %v18154_v57 = vld [vmem:[#allocation60_spill] sm:$0xff] }
 0x80f   : > { %v6341_v63 = vpop.f32.mrf.mxu2  ;;  %18153 = vst [vmem:[#allocation49_spill] sm:$0xff] %v15910_v3 }
 0x810   : > { %v6918_v6 = vsel %vm3652_vm5, %v6916_v1, %v6917_v4  ;;  %6187 = vmatmul.bf16.gmra.mxu0 %v15901_v37 }
 0x811   : > { %v15906_v36 = vadd.f32 %v6918_v6, %v6827_v8 }
 0x813   : > { %18152 = vst [vmem:[#allocation12_spill] sm:$0xff] %v15906_v36  ;;  %v6470_v60 = vpop.f32.mrf.mxu3 }
 0x814   : > { %v6471_v54 = vadd.f32 %v6470_v60, %v6341_v63  ;;  %6383 = vmatmul.bf16.gmra.mxu2 %v15673_v19 }
 0x815   : > { %v6227_v50 = vpop.f32.mrf.mxu1  ;;  %v15912_v52 = vpop.f32.mrf.mxu0 }
 0x816   : > { %v6919_v46 = vrot.slane %v6471_v54, 1  ;;  %v6228_v26 = vadd.f32 %v6227_v50, %v15676_v13  ;;  %v18156_v50 = vld [vmem:[#allocation62_spill] sm:$0xff] }
 0x817   : > { %v6344_v63 = vpop.f32.mrf.mxu2 }
 0x818   : > { %v6920_v8 = vsel %vm3652_vm5, %v6917_v4, %v6919_v46  ;;  %v6829_v1 = vadd.f32 %v6228_v26, %v18154_v57  ;;  %6261 = vmatmul.bf16.gmra.mxu1 %v15910_v3  ;;  %6512 = vmatmul.bf16.gmra.mxu3 %v15910_v3  ;;  %v5677_v26 = vld [vmem:[#allocation2 + $0x258] sm:$0xff] }
 0x819   : > { %v15919_v6 = vadd.f32 %v6920_v8, %v6828_v21  ;;  %v15924_v8 = vpack.c.bf16 %v5677_v26, %v5675_v38 }
 0x81b   : > { %18155 = vst [vmem:[#allocation50_spill] sm:$0xff] %v15919_v6  ;;  %v6473_v60 = vpop.f32.mrf.mxu3 }
 0x81c   : > { %v6474_v54 = vadd.f32 %v6473_v60, %v6344_v63 }
 0x81d   : > { %v6229_v13 = vpop.f32.mrf.mxu1  ;;  %v6158_v41 = vpop.f32.mrf.mxu0 }
 0x81e   : > { %v6230_v61 = vadd.f32 %v6229_v13, %v15686_v2  ;;  %v6921_v3 = vrot.slane %v6474_v54, 1  ;;  %v11667_v41 = vld [vmem:[#allocation6 + $0x90] sm:$0xf] }
 0x81f   : > { %v6346_v46 = vpop.f32.mrf.mxu2 }
 0x820   : > { %v6830_v36 = vadd.f32 %v6230_v61, %v18156_v50  ;;  %6571 = vmatmul.bf16.vlgmr.msra.gmra.mxu0 %v15285_v39  ;;  %v12075_v50 = vld [vmem:[#allocation6 + $0x98] sm:$0xf0] }
 0x821   : > { %v11668_v26 = vor.u32 %v12075_v50, %v11667_v41  ;;  %v18159_v41 = vld [vmem:[#allocation29_spill] sm:$0xff] }
 0x823   : > { %v6475_v4 = vpop.f32.mrf.mxu3  ;;  %7635 = vmatpush.bf16.msrb.mxu2 %v11668_v26 }
 0x824   : > { %v6476_v57 = vadd.f32 %v6475_v4, %v6346_v46  ;;  %6388 = vmatmul.bf16.gmra.mxu2 %v15695_v15 }
 0x825   : > { %v6232_v19 = vpop.f32.mrf.mxu1  ;;  %v15926_v6 = vpop.f32.mrf.mxu0 }
 0x826   : > { %v6922_v21 = vrot.slane %v6476_v57, 1 }
 0x827   : > { %v6349_v63 = vpop.f32.mrf.mxu2 }
 0x828   : > { %v6923_v2 = vsel %vm3652_vm5, %v6921_v3, %v6922_v21  ;;  %6265 = vmatmul.bf16.gmra.mxu1 %v15924_v8  ;;  %6517 = vmatmul.bf16.gmra.mxu3 %v15924_v8  ;;  %v18157_v3 = vld [vmem:[#allocation61_spill] sm:$0xff] }
 0x829   : > { %v15932_v39 = vadd.f32 %v6923_v2, %v6829_v1  ;;  %v11543_v2 = vld [vmem:[%s17705_s6 + $0x410] sm:$0xf] }
 0x82b   : > { %v6478_v60 = vpop.f32.mrf.mxu3 }
 0x82c   : > { %v6479_v19 = vadd.f32 %v6478_v60, %v6349_v63 }
 0x82d   : > { %v6233_v13 = vpop.f32.mrf.mxu1  ;;  %v15935_v61 = vpop.f32.mrf.mxu0 }
 0x82e   : > { %v6924_v54 = vrot.slane %v6479_v19, 1  ;;  %v6234_v38 = vadd.f32 %v6233_v13, %v15704_v59  ;;  %v12043_v59 = vld [vmem:[%s17705_s6 + $0x418] sm:$0xf0] }
 0x82f   : > { %v6351_v1 = vpop.f32.mrf.mxu2  ;;  %v11544_v60 = vor.u32 %v12043_v59, %v11543_v2 }
 0x830   : > { %v6925_v46 = vsel %vm3652_vm5, %v6922_v21, %v6924_v54  ;;  %v6831_v4 = vadd.f32 %v6234_v38, %v18157_v3  ;;  %6576 = vmatmul.bf16.gmra.mxu0 %v15304_v51  ;;  %v5679_v21 = vld [vmem:[#allocation2 + $0x268] sm:$0xff] }
 0x831   : > { %v15939_v57 = vadd.f32 %v6925_v46, %v6830_v36  ;;  %6696 = vmatpush.bf16.msra.mxu1 %v11544_v60  ;;  %v5681_v36 = vld [vmem:[#allocation2 + $0x278] sm:$0xff] }
 0x832   : > { %v15949_v51 = vpack.c.bf16 %v5681_v36, %v5679_v21  ;;  %v5683_v36 = vld [vmem:[#allocation2 + $0x288] sm:$0xff] }
 0x833   : > { %v6480_v63 = vpop.f32.mrf.mxu3 }
 0x834   : > { %v6481_v19 = vadd.f32 %v6480_v63, %v6351_v1  ;;  %18158 = vst [vmem:[#allocation16_spill] sm:$0xff] %v15949_v51  ;;  %6393 = vmatmul.bf16.gmra.mxu2 %v15714_v24 }
 0x835   : > { %v6236_v13 = vpop.f32.mrf.mxu1  ;;  %v6164_v38 = vpop.f32.mrf.mxu0 }
 0x836   : > { %v6237_v54 = vadd.f32 %v6236_v13, %v15716_v40  ;;  %v6926_v2 = vrot.slane %v6481_v19, 1 }
 0x837   : > { %v6354_v46 = vpop.f32.mrf.mxu2 }
 0x838   : > { %v6832_v50 = vadd.f32 %v6237_v54, %v18159_v41  ;;  %6270 = vmatmul.bf16.gmra.mxu1 %v15949_v51  ;;  %6522 = vmatmul.bf16.gmra.mxu3 %v15949_v51  ;;  %v5685_v54 = vld [vmem:[#allocation2 + $0x298] sm:$0xff] }
 0x83b   : > { %v6483_v3 = vpop.f32.mrf.mxu3 }
 0x83c   : > { %v6484_v26 = vadd.f32 %v6483_v3, %v6354_v46  ;;  %v15962_v3 = vpack.c.bf16 %v5685_v54, %v5683_v36  ;;  %v18164_v54 = vld [vmem:[#allocation27_spill] sm:$0xff] }
 0x83d   : > { %v6238_v1 = vpop.f32.mrf.mxu1  ;;  %v15955_v63 = vpop.f32.mrf.mxu0 }
 0x83e   : > { %v6927_v59 = vrot.slane %v6484_v26, 1  ;;  %18161 = vst [vmem:[#allocation52_spill] sm:$0xff] %v15962_v3  ;;  %v18162_v26 = vld [vmem:[#allocation63_spill] sm:$0xff] }
 0x83f   : > { %v6356_v21 = vpop.f32.mrf.mxu2 }
 0x840   : > { %v6928_v40 = vsel %vm3652_vm5, %v6926_v2, %v6927_v59  ;;  %6581 = vmatmul.bf16.gmra.mxu0 %v15333_v7 }
 0x841   : > { %v15958_v60 = vadd.f32 %v6928_v40, %v6831_v4 }
 0x843   : > { %18160 = vst [vmem:[#allocation17_spill] sm:$0xff] %v15958_v60  ;;  %v6485_v13 = vpop.f32.mrf.mxu3  ;;  %v5687_v60 = vld [vmem:[#allocation2 + $0x2a8] sm:$0xff] }
 0x844   : > { %v6486_v38 = vadd.f32 %v6485_v13, %v6356_v21  ;;  %6398 = vmatmul.bf16.gmra.mxu2 %v15743_v48 }
 0x845   : > { %v6240_v41 = vpop.f32.mrf.mxu1  ;;  %v15964_v19 = vpop.f32.mrf.mxu0 }
 0x846   : > { %v6929_v51 = vrot.slane %v6486_v38, 1  ;;  %v6241_v46 = vadd.f32 %v6240_v41, %v15746_v30  ;;  %v5689_v41 = vld [vmem:[#allocation2 + $0x2b8] sm:$0xff] }
 0x847   : > { %v6359_v2 = vpop.f32.mrf.mxu2 }
 0x848   : > { %v6930_v4 = vsel %vm3652_vm5, %v6927_v59, %v6929_v51  ;;  %v6833_v1 = vadd.f32 %v6241_v46, %v18162_v26  ;;  %6274 = vmatmul.bf16.gmra.mxu1 %v15962_v3  ;;  %6527 = vmatmul.bf16.gmra.mxu3 %v15962_v3 }
 0x849   : > { %v15971_v7 = vadd.f32 %v6930_v4, %v6832_v50  ;;  %v15976_v4 = vpack.c.bf16 %v5689_v41, %v5687_v60 }
 0x84b   : > { %18163 = vst [vmem:[#allocation19_spill] sm:$0xff] %v15971_v7  ;;  %v6488_v40 = vpop.f32.mrf.mxu3 }
 0x84c   : > { %v6489_v21 = vadd.f32 %v6488_v40, %v6359_v2 }
 0x84d   : > { %v6242_v30 = vpop.f32.mrf.mxu1  ;;  %v6171_v36 = vpop.f32.mrf.mxu0 }
 0x84e   : > { %v6243_v13 = vadd.f32 %v6242_v30, %v15757_v49  ;;  %v6931_v3 = vrot.slane %v6489_v21, 1 }
 0x84f   : > { %v6361_v51 = vpop.f32.mrf.mxu2 }
 0x850   : > { %v6834_v38 = vadd.f32 %v6243_v13, %v18164_v54  ;;  %6586 = vmatmul.bf16.gmra.mxu0 %v15353_v16  ;;  %v11655_v54 = vld [vmem:[#allocation6 + $0x78] sm:$0xf] }
 0x853   : > { %v6490_v59 = vpop.f32.mrf.mxu3 }
 0x854   : > { %v6491_v46 = vadd.f32 %v6490_v59, %v6361_v51  ;;  %6403 = vmatmul.bf16.gmra.mxu2 %v15766_v18  ;;  %v12072_v51 = vld [vmem:[#allocation6 + $0x80] sm:$0xf0] }
 0x855   : > { %v6245_v26 = vpop.f32.mrf.mxu1  ;;  %v15978_v7 = vpop.f32.mrf.mxu0 }
 0x856   : > { %v6932_v50 = vrot.slane %v6491_v46, 1  ;;  %v11656_v46 = vor.u32 %v12072_v51, %v11655_v54  ;;  %v18167_v54 = vld [vmem:[#allocation32_spill] sm:$0xff] }
 0x857   : > { %v6364_v2 = vpop.f32.mrf.mxu2 }
 0x858   : > { %v6933_v49 = vsel %vm3652_vm5, %v6931_v3, %v6932_v50  ;;  %6278 = vmatmul.bf16.gmra.mxu1 %v15976_v4  ;;  %6532 = vmatmul.bf16.gmra.mxu3 %v15976_v4  ;;  %v18165_v3 = vld [vmem:[#allocation64_spill] sm:$0xff] }
 0x859   : > { %v15984_v16 = vadd.f32 %v6933_v49, %v6833_v1  ;;  %7636 = vmatpush.bf16.msrb.mxu2 %v11656_v46  ;;  %v11531_v49 = vld [vmem:[%s17705_s6 + $0x3f8] sm:$0xf] }
 0x85b   : > { %v6493_v40 = vpop.f32.mrf.mxu3 }
 0x85c   : > { %v6494_v30 = vadd.f32 %v6493_v40, %v6364_v2 }
 0x85d   : > { %v6246_v13 = vpop.f32.mrf.mxu1  ;;  %v15987_v36 = vpop.f32.mrf.mxu0 }
 0x85e   : > { %v6934_v21 = vrot.slane %v6494_v30, 1  ;;  %v6247_v60 = vadd.f32 %v6246_v13, %v15773_v9  ;;  %v12040_v9 = vld [vmem:[%s17705_s6 + $0x400] sm:$0xf0] }
 0x85f   : > { %v6366_v1 = vpop.f32.mrf.mxu2  ;;  %v11532_v40 = vor.u32 %v12040_v9, %v11531_v49 }
 0x860   : > { %v6935_v59 = vsel %vm3652_vm5, %v6932_v50, %v6934_v21  ;;  %v6835_v41 = vadd.f32 %v6247_v60, %v18165_v3  ;;  %6591 = vmatmul.bf16.gmra.mxu0 %v15372_v56  ;;  %v5691_v50 = vld [vmem:[#allocation2 + $0x2c8] sm:$0xff] }
 0x861   : > { %v15991_v26 = vadd.f32 %v6935_v59, %v6834_v38  ;;  %6697 = vmatpush.bf16.msra.mxu1 %v11532_v40  ;;  %v5693_v38 = vld [vmem:[#allocation2 + $0x2d8] sm:$0xff] }
 0x862   : > { %v16001_v56 = vpack.c.bf16 %v5693_v38, %v5691_v50  ;;  %v5695_v38 = vld [vmem:[#allocation2 + $0x2e8] sm:$0xff] }
 0x863   : > { %v6495_v2 = vpop.f32.mrf.mxu3 }
 0x864   : > { %v6496_v30 = vadd.f32 %v6495_v2, %v6366_v1  ;;  %18166 = vst [vmem:[#allocation53_spill] sm:$0xff] %v16001_v56  ;;  %6408 = vmatmul.bf16.gmra.mxu2 %v15781_v12 }
 0x865   : > { %v6249_v13 = vpop.f32.mrf.mxu1  ;;  %v6177_v60 = vpop.f32.mrf.mxu0 }
 0x866   : > { %v6250_v21 = vadd.f32 %v6249_v13, %v15784_v62  ;;  %v6936_v49 = vrot.slane %v6496_v30, 1 }
 0x867   : > { %v6369_v59 = vpop.f32.mrf.mxu2 }
 0x868   : > { %v6836_v51 = vadd.f32 %v6250_v21, %v18167_v54  ;;  %6283 = vmatmul.bf16.gmra.mxu1 %v16001_v56  ;;  %6537 = vmatmul.bf16.gmra.mxu3 %v16001_v56  ;;  %v5697_v21 = vld [vmem:[#allocation2 + $0x2f8] sm:$0xff] }
 0x86b   : > { %v6498_v3 = vpop.f32.mrf.mxu3 }
 0x86c   : > { %v6499_v46 = vadd.f32 %v6498_v3, %v6369_v59  ;;  %v16014_v3 = vpack.c.bf16 %v5697_v21, %v5695_v38  ;;  %v18172_v21 = vld [vmem:[#allocation28_spill] sm:$0xff] }
 0x86d   : > { %v6251_v1 = vpop.f32.mrf.mxu1  ;;  %v16007_v2 = vpop.f32.mrf.mxu0 }
 0x86e   : > { %v6937_v9 = vrot.slane %v6499_v46, 1  ;;  %18169 = vst [vmem:[#allocation54_spill] sm:$0xff] %v16014_v3  ;;  %v18170_v46 = vld [vmem:[#allocation30_spill] sm:$0xff] }
 0x86f   : > { %v6371_v50 = vpop.f32.mrf.mxu2 }
 0x870   : > { %v6938_v62 = vsel %vm3652_vm5, %v6936_v49, %v6937_v9  ;;  %6596 = vmatmul.bf16.gmra.mxu0 %v15401_v17 }
 0x871   : > { %v16010_v40 = vadd.f32 %v6938_v62, %v6835_v41 }
 0x873   : > { %18168 = vst [vmem:[#allocation21_spill] sm:$0xff] %v16010_v40  ;;  %v6500_v13 = vpop.f32.mrf.mxu3  ;;  %v5699_v40 = vld [vmem:[#allocation2 + $0x308] sm:$0xff] }
 0x874   : > { %v6501_v60 = vadd.f32 %v6500_v13, %v6371_v50  ;;  %6413 = vmatmul.bf16.gmra.mxu2 %v15810_v35 }
 0x875   : > { %v6253_v54 = vpop.f32.mrf.mxu1  ;;  %v16016_v30 = vpop.f32.mrf.mxu0 }
 0x876   : > { %v6939_v56 = vrot.slane %v6501_v60, 1  ;;  %v6254_v59 = vadd.f32 %v6253_v54, %v15812_v31  ;;  %v5701_v54 = vld [vmem:[#allocation2 + $0x318] sm:$0xff] }
 0x877   : > { %v6374_v49 = vpop.f32.mrf.mxu2 }
 0x878   : > { %v6940_v41 = vsel %vm3652_vm5, %v6937_v9, %v6939_v56  ;;  %v6837_v1 = vadd.f32 %v6254_v59, %v18170_v46  ;;  %6287 = vmatmul.bf16.gmra.mxu1 %v16014_v3  ;;  %6542 = vmatmul.bf16.gmra.mxu3 %v16014_v3 }
 0x879   : > { %v16023_v17 = vadd.f32 %v6940_v41, %v6836_v51  ;;  %v16028_v41 = vpack.c.bf16 %v5701_v54, %v5699_v40 }
 0x87b   : > { %18171 = vst [vmem:[#allocation56_spill] sm:$0xff] %v16023_v17  ;;  %v6503_v62 = vpop.f32.mrf.mxu3 }
 0x87c   : > { %v6504_v50 = vadd.f32 %v6503_v62, %v6374_v49 }
 0x87d   : > { %v6255_v31 = vpop.f32.mrf.mxu1  ;;  %v6184_v38 = vpop.f32.mrf.mxu0 }
 0x87e   : > { %v6256_v13 = vadd.f32 %v6255_v31, %v15821_v42  ;;  %v6941_v3 = vrot.slane %v6504_v50, 1 }
 0x87f   : > { %v6376_v56 = vpop.f32.mrf.mxu2 }
 0x880   : > { %v6838_v60 = vadd.f32 %v6256_v13, %v18172_v21  ;;  %6601 = vmatmul.bf16.gmra.mxu0 %v15421_v27  ;;  %v11643_v21 = vld [vmem:[#allocation6 + $0x60] sm:$0xf] }
 0x883   : > { %v6505_v9 = vpop.f32.mrf.mxu3 }
 0x884   : > { %v6506_v59 = vadd.f32 %v6505_v9, %v6376_v56  ;;  %6418 = vmatmul.bf16.gmra.mxu2 %v15836_v45  ;;  %v12069_v56 = vld [vmem:[#allocation6 + $0x68] sm:$0xf0] }
 0x885   : > { %v6258_v46 = vpop.f32.mrf.mxu1  ;;  %v16030_v17 = vpop.f32.mrf.mxu0 }
 0x886   : > { %v6942_v51 = vrot.slane %v6506_v59, 1  ;;  %v11644_v59 = vor.u32 %v12069_v56, %v11643_v21 }
 0x887   : > { %v6379_v49 = vpop.f32.mrf.mxu2 }
 0x888   : > { %v6943_v42 = vsel %vm3652_vm5, %v6941_v3, %v6942_v51  ;;  %6291 = vmatmul.bf16.gmra.mxu1 %v16028_v41  ;;  %6547 = vmatmul.bf16.gmra.mxu3 %v16028_v41  ;;  %v18173_v3 = vld [vmem:[#allocation46_spill] sm:$0xff] }
 0x889   : > { %v16036_v27 = vadd.f32 %v6943_v42, %v6837_v1  ;;  %7637 = vmatpush.bf16.msrb.mxu2 %v11644_v59  ;;  %v11519_v42 = vld [vmem:[%s17705_s6 + $0x3e0] sm:$0xf] }
 0x88b   : > { %v6508_v62 = vpop.f32.mrf.mxu3 }
 0x88c   : > { %v6509_v31 = vadd.f32 %v6508_v62, %v6379_v49 }
 0x88d   : > { %v6259_v13 = vpop.f32.mrf.mxu1  ;;  %v16039_v38 = vpop.f32.mrf.mxu0 }
 0x88e   : > { %v6944_v50 = vrot.slane %v6509_v31, 1  ;;  %v6260_v40 = vadd.f32 %v6259_v13, %v15855_v47  ;;  %v12037_v47 = vld [vmem:[%s17705_s6 + $0x3e8] sm:$0xf0]  ;;  %v5705_v31 = vld [vmem:[#allocation2 + $0x338] sm:$0xff] }
 0x88f   : > { %v6381_v1 = vpop.f32.mrf.mxu2  ;;  %v11520_v62 = vor.u32 %v12037_v47, %v11519_v42 }
 0x890   : > { %v6945_v9 = vsel %vm3652_vm5, %v6942_v51, %v6944_v50  ;;  %v6839_v54 = vadd.f32 %v6260_v40, %v18173_v3  ;;  %6606 = vmatmul.bf16.gmra.mxu0 %v15440_v14  ;;  %v5703_v51 = vld [vmem:[#allocation2 + $0x328] sm:$0xff]  ;;  %v18175_v40 = vld [vmem:[#allocation31_spill] sm:$0xff] }
 0x891   : > { %v16043_v46 = vadd.f32 %v6945_v9, %v6838_v60  ;;  %6698 = vmatpush.bf16.msra.mxu1 %v11520_v62  ;;  %v16053_v50 = vpack.c.bf16 %v5705_v31, %v5703_v51 }
 0x893   : > { %18174 = vst [vmem:[#allocation34_spill] sm:$0xff] %v16043_v46  ;;  %v6510_v49 = vpop.f32.mrf.mxu3 }
 0x894   : > { %6423 = vmatmul.bf16.gmra.mxu2 %v15875_v43  ;;  %v6511_v56 = vadd.f32 %v6510_v49, %v6381_v1 }
 0x895   : > { %v6262_v13 = vpop.f32.mrf.mxu1  ;;  %v6190_v14 = vpop.f32.mrf.mxu0 }
 0x896   : > { %v6263_v60 = vadd.f32 %v6262_v13, %v15878_v25  ;;  %v6946_v47 = vrot.slane %v6511_v56, 1  ;;  %v5709_v13 = vld [vmem:[#allocation2 + $0x358] sm:$0xff] }
 0x897   : > { %v6384_v9 = vpop.f32.mrf.mxu2  ;;  %v16066_v1 = vpack.c.bf16 %v5709_v13, %v15898_v28 }
 0x898   : > { %v6840_v21 = vadd.f32 %v6263_v60, %v18175_v40  ;;  %6296 = vmatmul.bf16.gmra.mxu1 %v16053_v50  ;;  %6552 = vmatmul.bf16.gmra.mxu3 %v16053_v50 }
 0x89b   : > { %v6513_v3 = vpop.f32.mrf.mxu3 }
 0x89c   : > { %v6514_v59 = vadd.f32 %v6513_v3, %v6384_v9 }
 0x89d   : > { %v6264_v42 = vpop.f32.mrf.mxu1  ;;  %v16059_v46 = vpop.f32.mrf.mxu0 }
 0x89e   : > { %v6947_v62 = vrot.slane %v6514_v59, 1 }
 0x89f   : > { %v6386_v31 = vpop.f32.mrf.mxu2 }
 0x8a0   : > { %v6948_v25 = vsel %vm3652_vm5, %v6946_v47, %v6947_v62  ;;  %6611 = vmatmul.bf16.gmra.mxu0 %v15487_v22 }
 0x8a1   : > { %v16062_v51 = vadd.f32 %v6948_v25, %v6839_v54 }
 0x8a3   : > { %v6515_v60 = vpop.f32.mrf.mxu3 }
 0x8a4   : > { %v6516_v14 = vadd.f32 %v6515_v60, %v6386_v31  ;;  %6428 = vmatmul.bf16.gmra.mxu2 %v15901_v37 }
 0x8a5   : > { %v6266_v49 = vpop.f32.mrf.mxu1  ;;  %v16069_v9 = vpop.f32.mrf.mxu0 }
 0x8a6   : > { %v6949_v40 = vrot.slane %v6516_v14, 1  ;;  %v6267_v56 = vadd.f32 %v6266_v49, %v15903_v23 }
 0x8a7   : > { %v6389_v59 = vpop.f32.mrf.mxu2 }
 0x8a8   : > { %v6950_v54 = vsel %vm3652_vm5, %v6947_v62, %v6949_v40  ;;  %v6841_v3 = vadd.f32 %v6267_v56, %v15582_v58  ;;  %6300 = vmatmul.bf16.gmra.mxu1 %v16066_v1  ;;  %6557 = vmatmul.bf16.gmra.mxu3 %v16066_v1  ;;  %v11507_v62 = vld [vmem:[%s17705_s6 + $0x3c8] sm:$0xf]  ;;  %v12034_v58 = vld [vmem:[%s17705_s6 + $0x3d0] sm:$0xf0] }
 0x8a9   : > { %v16076_v22 = vadd.f32 %v6950_v54, %v6840_v21  ;;  %v11508_v21 = vor.u32 %v12034_v58, %v11507_v62 }
 0x8ab   : > { %v6518_v42 = vpop.f32.mrf.mxu3  ;;  %6699 = vmatpush.bf16.msra.mxu1 %v11508_v21 }
 0x8ac   : > { %v6519_v47 = vadd.f32 %v6518_v42, %v6389_v59 }
 0x8ad   : > { %v6268_v25 = vpop.f32.mrf.mxu1  ;;  %v16079_v31 = vpop.f32.mrf.mxu0 }
 0x8ae   : > { %v6269_v23 = vadd.f32 %v6268_v25, %v15912_v52  ;;  %v6951_v40 = vrot.slane %v6519_v47, 1  ;;  %v12066_v47 = vld [vmem:[#allocation6 + $0x50] sm:$0xf0] }
 0x8af   : > { %v6391_v60 = vpop.f32.mrf.mxu2 }
 0x8b0   : > { %v6842_v13 = vadd.f32 %v6269_v23, %v15591_v10  ;;  %6616 = vmatmul.bf16.gmra.mxu0 %v18135_v53 }
 0x8b3   : > { %v6520_v14 = vpop.f32.mrf.mxu3 }
 0x8b4   : > { %v6521_v49 = vadd.f32 %v6520_v14, %v6391_v60  ;;  %v11631_v60 = vld [vmem:[#allocation6 + $0x48] sm:$0xf] }
 0x8b5   : > { %v6271_v52 = vpop.f32.mrf.mxu1  ;;  %v16089_v54 = vpop.f32.mrf.mxu0 }
 0x8b6   : > { %v6952_v56 = vrot.slane %v6521_v49, 1  ;;  %v11632_v52 = vor.u32 %v12066_v47, %v11631_v60 }
 0x8b7   : > { %v6394_v25 = vpop.f32.mrf.mxu2 }
 0x8b8   : > { %v6953_v59 = vsel %vm3652_vm5, %v6951_v40, %v6952_v56  ;;  %6700 = vmatmul.bf16.vlgmr.msra.gmra.mxu1 %v15574_v34  ;;  %7638 = vmatpush.bf16.msrb.mxu2 %v11632_v52 }
 0x8b9   : > { %v16093_v42 = vadd.f32 %v6953_v59, %v6841_v3 }
 0x8bb   : > { %v6523_v10 = vpop.f32.mrf.mxu3 }
 0x8bc   : > { %v6524_v23 = vadd.f32 %v6523_v10, %v6394_v25 }
 0x8bd   : > { %v6272_v62 = vpop.f32.mrf.mxu1  ;;  %v16096_v21 = vpop.f32.mrf.mxu0 }
 0x8be   : > { %v6954_v53 = vrot.slane %v6524_v23, 1  ;;  %v6273_v58 = vadd.f32 %v6272_v62, %v15926_v6 }
 0x8bf   : > { %v6396_v34 = vpop.f32.mrf.mxu2 }
 0x8c0   : > { %v6955_v14 = vsel %vm3652_vm5, %v6952_v56, %v6954_v53  ;;  %v6843_v49 = vadd.f32 %v6273_v58, %v15609_v44  ;;  %6621 = vmatmul.bf16.gmra.mxu0 %v15586_v20 }
 0x8c1   : > { %v16100_v40 = vadd.f32 %v6955_v14, %v6842_v13 }
 0x8c3   : > { %v6525_v3 = vpop.f32.mrf.mxu3 }
 0x8c4   : > { %v6526_v56 = vadd.f32 %v6525_v3, %v6396_v34 }
 0x8c5   : > { %v6275_v59 = vpop.f32.mrf.mxu1  ;;  %v16104_v6 = vpop.f32.mrf.mxu0 }
 0x8c6   : > { %v6276_v25 = vadd.f32 %v6275_v59, %v15935_v61  ;;  %v6956_v53 = vrot.slane %v6526_v56, 1  ;;  %v18176_v56 = vld [vmem:[#allocation13_spill] sm:$0xff] }
 0x8c7   : > { %v6399_v23 = vpop.f32.mrf.mxu2 }
 0x8c8   : > { %v6844_v10 = vadd.f32 %v6276_v25, %v15622_v32  ;;  %6705 = vmatmul.bf16.gmra.mxu1 %v15596_v55 }
 0x8cb   : > { %v6528_v44 = vpop.f32.mrf.mxu3 }
 0x8cc   : > { %v6529_v62 = vadd.f32 %v6528_v44, %v6399_v23 }
 0x8cd   : > { %v6277_v13 = vpop.f32.mrf.mxu1  ;;  %v16108_v20 = vpop.f32.mrf.mxu0 }
 0x8ce   : > { %v6957_v58 = vrot.slane %v6529_v62, 1 }
 0x8cf   : > { %v6401_v61 = vpop.f32.mrf.mxu2 }
 0x8d0   : > { %v6958_v60 = vsel %vm3652_vm5, %v6956_v53, %v6957_v58  ;;  %6626 = vmatmul.bf16.gmra.mxu0 %v15603_v29 }
 0x8d1   : > { %v16111_v47 = vadd.f32 %v6958_v60, %v6843_v49 }
 0x8d3   : > { %v6530_v14 = vpop.f32.mrf.mxu3 }
 0x8d4   : > { %v6531_v32 = vadd.f32 %v6530_v14, %v6401_v61 }
 0x8d5   : > { %v6279_v52 = vpop.f32.mrf.mxu1  ;;  %v16115_v3 = vpop.f32.mrf.mxu0 }
 0x8d6   : > { %v6959_v55 = vrot.slane %v6531_v32, 1  ;;  %v6280_v34 = vadd.f32 %v6279_v52, %v15955_v63 }
 0x8d7   : > { %v6404_v49 = vpop.f32.mrf.mxu2 }
 0x8d8   : > { %v6960_v59 = vsel %vm3652_vm5, %v6957_v58, %v6959_v55  ;;  %v6845_v25 = vadd.f32 %v6280_v34, %v15640_v11  ;;  %6710 = vmatmul.bf16.gmra.mxu1 %v18176_v56 }
 0x8d9   : > { %v16120_v23 = vadd.f32 %v6960_v59, %v6844_v10 }
 0x8db   : > { %v6533_v44 = vpop.f32.mrf.mxu3 }
 0x8dc   : > { %v6534_v29 = vadd.f32 %v6533_v44, %v6404_v49  ;;  %v11619_v44 = vld [vmem:[#allocation6 + $0x30] sm:$0xf] }
 0x8dd   : > { %v6281_v62 = vpop.f32.mrf.mxu1  ;;  %v16123_v53 = vpop.f32.mrf.mxu0 }
 0x8de   : > { %v6282_v13 = vadd.f32 %v6281_v62, %v15964_v19  ;;  %v6961_v14 = vrot.slane %v6534_v29, 1  ;;  %v12063_v29 = vld [vmem:[#allocation6 + $0x38] sm:$0xf0] }
 0x8df   : > { %v6406_v60 = vpop.f32.mrf.mxu2 }
 0x8e0   : > { %v6846_v63 = vadd.f32 %v6282_v13, %v15649_v0  ;;  %6631 = vmatmul.bf16.gmra.mxu0 %v15625_v5  ;;  %v18178_v13 = vld [vmem:[#allocation14_spill] sm:$0xff] }
 0x8e3   : > { %v6535_v58 = vpop.f32.mrf.mxu3 }
 0x8e4   : > { %v6536_v61 = vadd.f32 %v6535_v58, %v6406_v60  ;;  %v11620_v58 = vor.u32 %v12063_v29, %v11619_v44 }
 0x8e5   : > { %v6284_v11 = vpop.f32.mrf.mxu1  ;;  %v16127_v10 = vpop.f32.mrf.mxu0 }
 0x8e6   : > { %v6962_v32 = vrot.slane %v6536_v61, 1  ;;  %7639 = vmatpush.bf16.msrb.mxu2 %v11620_v58 }
 0x8e7   : > { %v6409_v19 = vpop.f32.mrf.mxu2 }
 0x8e8   : > { %v6963_v52 = vsel %vm3652_vm5, %v6961_v14, %v6962_v32  ;;  %6715 = vmatmul.bf16.gmra.mxu1 %v15632_v33  ;;  %v18180_v33 = vld [vmem:[#allocation11_spill] sm:$0xff] }
 0x8e9   : > { %v16131_v55 = vadd.f32 %v6963_v52, %v6845_v25 }
 0x8eb   : > { %18177 = vst [vmem:[#allocation55_spill] sm:$0xff] %v16131_v55  ;;  %v6538_v34 = vpop.f32.mrf.mxu3 }
 0x8ec   : > { %v6539_v59 = vadd.f32 %v6538_v34, %v6409_v19  ;;  %v18181_v19 = vld [vmem:[#allocation37_spill] sm:$0xff] }
 0x8ed   : > { %v6285_v0 = vpop.f32.mrf.mxu1  ;;  %v16134_v49 = vpop.f32.mrf.mxu0 }
 0x8ee   : > { %v6964_v56 = vrot.slane %v6539_v59, 1  ;;  %v6286_v5 = vadd.f32 %v6285_v0, %v15978_v7  ;;  %v18182_v59 = vld [vmem:[#allocation35_spill] sm:$0xff] }
 0x8ef   : > { %v6411_v25 = vpop.f32.mrf.mxu2 }
 0x8f0   : > { %v6965_v62 = vsel %vm3652_vm5, %v6962_v32, %v6964_v56  ;;  %v6847_v60 = vadd.f32 %v6286_v5, %v18178_v13  ;;  %6636 = vmatmul.bf16.gmra.mxu0 %v18180_v33 }
 0x8f1   : > { %v16138_v61 = vadd.f32 %v6965_v62, %v6846_v63 }
 0x8f3   : > { %18179 = vst [vmem:[#allocation57_spill] sm:$0xff] %v16138_v61  ;;  %v6540_v11 = vpop.f32.mrf.mxu3 }
 0x8f4   : > { %v6541_v32 = vadd.f32 %v6540_v11, %v6411_v25 }
 0x8f5   : > { %v6288_v14 = vpop.f32.mrf.mxu1  ;;  %v16142_v7 = vpop.f32.mrf.mxu0 }
 0x8f6   : > { %v6289_v52 = vadd.f32 %v6288_v14, %v15987_v36  ;;  %v6966_v44 = vrot.slane %v6541_v32, 1  ;;  %v18184_v36 = vld [vmem:[#allocation23_spill] sm:$0xff] }
 0x8f7   : > { %v6414_v0 = vpop.f32.mrf.mxu2 }
 0x8f8   : > { %v6848_v34 = vadd.f32 %v6289_v52, %v18181_v19  ;;  %6720 = vmatmul.bf16.gmra.mxu1 %v18182_v59 }
 0x8fb   : > { %v6543_v56 = vpop.f32.mrf.mxu3 }
 0x8fc   : > { %v6544_v5 = vadd.f32 %v6543_v56, %v6414_v0  ;;  %v18185_v0 = vld [vmem:[#allocation36_spill] sm:$0xff] }
 0x8fd   : > { %v6290_v63 = vpop.f32.mrf.mxu1  ;;  %v16146_v62 = vpop.f32.mrf.mxu0 }
 0x8fe   : > { %v6967_v29 = vrot.slane %v6544_v5, 1  ;;  %v18186_v5 = vld [vmem:[#allocation33_spill] sm:$0xff] }
 0x8ff   : > { %v6416_v33 = vpop.f32.mrf.mxu2 }
 0x900   : > { %v6968_v13 = vsel %vm3652_vm5, %v6966_v44, %v6967_v29  ;;  %6641 = vmatmul.bf16.gmra.mxu0 %v18184_v36 }
 0x901   : > { %v16149_v58 = vadd.f32 %v6968_v13, %v6847_v60 }
 0x903   : > { %18183 = vst [vmem:[#allocation24_spill] sm:$0xff] %v16149_v58  ;;  %v6545_v14 = vpop.f32.mrf.mxu3 }
 0x904   : > { %v6546_v52 = vadd.f32 %v6545_v14, %v6416_v33 }
 0x905   : > { %v6292_v19 = vpop.f32.mrf.mxu1  ;;  %v16153_v11 = vpop.f32.mrf.mxu0 }
 0x906   : > { %v6969_v59 = vrot.slane %v6546_v52, 1  ;;  %v6293_v25 = vadd.f32 %v6292_v19, %v16007_v2  ;;  %v18188_v52 = vld [vmem:[#allocation15_spill] sm:$0xff] }
 0x907   : > { %v6419_v60 = vpop.f32.mrf.mxu2 }
 0x908   : > { %v6970_v32 = vsel %vm3652_vm5, %v6967_v29, %v6969_v59  ;;  %v6849_v56 = vadd.f32 %v6293_v25, %v18185_v0  ;;  %6725 = vmatmul.bf16.gmra.mxu1 %v18186_v5  ;;  %v12077_v25 = vld [vmem:[#allocation6 + $0xac] sm:$0xf]  ;;  %v11681_v0 = vld [vmem:[#allocation6 + $0xb4] sm:$0xf0] }
 0x909   : > { %v16158_v63 = vadd.f32 %v6970_v32, %v6848_v34  ;;  %v11684_v34 = vor.u32 %v12077_v25, %v11681_v0  ;;  %v11657_v25 = vld [vmem:[#allocation6 + $0x84] sm:$0xf0] }
 0x90b   : > { %18187 = vst [vmem:[#allocation58_spill] sm:$0xff] %v16158_v63  ;;  %v6548_v44 = vpop.f32.mrf.mxu3  ;;  %7747 = vmatpush.bf16.msra.mxu3 %v11684_v34 }
 0x90c   : > { %v6549_v13 = vadd.f32 %v6548_v44, %v6419_v60  ;;  %v18189_v60 = vld [vmem:[#allocation51_spill] sm:$0xff]  ;;  %v12074_v44 = vld [vmem:[#allocation6 + $0x94] sm:$0xf] }
 0x90d   : > { %v6294_v36 = vpop.f32.mrf.mxu1  ;;  %v16161_v14 = vpop.f32.mrf.mxu0 }
 0x90e   : > { %v6295_v33 = vadd.f32 %v6294_v36, %v16016_v30  ;;  %v6971_v32 = vrot.slane %v6549_v13, 1  ;;  %v11669_v36 = vld [vmem:[#allocation6 + $0x9c] sm:$0xf0] }
 0x90f   : > { %v6421_v19 = vpop.f32.mrf.mxu2 }
 0x910   : > { %v6850_v2 = vadd.f32 %v6295_v33, %v18188_v52  ;;  %6646 = vmatmul.bf16.gmra.mxu0 %v15695_v15  ;;  %v11672_v15 = vor.u32 %v12074_v44, %v11669_v36 }
 0x912   : > { %7748 = vmatpush.bf16.msra.mxu3 %v11672_v15  ;;  %v11645_v15 = vld [vmem:[#allocation6 + $0x6c] sm:$0xf0] }
 0x913   : > { %v6550_v29 = vpop.f32.mrf.mxu3 }
 0x914   : > { %v6551_v59 = vadd.f32 %v6550_v29, %v6421_v19 }
 0x915   : > { %v6297_v5 = vpop.f32.mrf.mxu1  ;;  %v16165_v58 = vpop.f32.mrf.mxu0 }
 0x916   : > { %v6972_v63 = vrot.slane %v6551_v59, 1  ;;  %v12071_v5 = vld [vmem:[#allocation6 + $0x7c] sm:$0xf] }
 0x917   : > { %v6424_v52 = vpop.f32.mrf.mxu2  ;;  %v11660_v59 = vor.u32 %v12071_v5, %v11657_v25  ;;  %v12065_v5 = vld [vmem:[#allocation6 + $0x4c] sm:$0xf]  ;;  %v11633_v25 = vld [vmem:[#allocation6 + $0x54] sm:$0xf0] }
 0x918   : > { %v6973_v30 = vsel %vm3652_vm5, %v6971_v32, %v6972_v63  ;;  %6730 = vmatmul.bf16.gmra.mxu1 %v18189_v60  ;;  %v11607_v32 = vld [vmem:[#allocation6 + $0x18] sm:$0xf]  ;;  %v12060_v60 = vld [vmem:[#allocation6 + $0x20] sm:$0xf0] }
 0x919   : > { %v16169_v33 = vadd.f32 %v6973_v30, %v6849_v56  ;;  %7749 = vmatpush.bf16.msra.mxu3 %v11660_v59  ;;  %v18191_v30 = vld [vmem:[#allocation38_spill] sm:$0xff]  ;;  %v11608_v36 = vor.u32 %v12060_v60, %v11607_v32  ;;  %v11636_v59 = vor.u32 %v12065_v5, %v11633_v25 }
 0x91a   : > { %v11621_v60 = vld [vmem:[#allocation6 + $0x3c] sm:$0xf0] }
 0x91b   : > { %18190 = vst [vmem:[#allocation26_spill] sm:$0xff] %v16169_v33  ;;  %v6553_v19 = vpop.f32.mrf.mxu3  ;;  %v12068_v33 = vld [vmem:[#allocation6 + $0x64] sm:$0xf]  ;;  %7640 = vmatpush.bf16.msrb.mxu2 %v11608_v36 }
 0x91c   : > { %v6554_v29 = vadd.f32 %v6553_v19, %v6424_v52  ;;  %v11648_v19 = vor.u32 %v12068_v33, %v11645_v15  ;;  %v12062_v33 = vld [vmem:[#allocation6 + $0x34] sm:$0xf] }
 0x91d   : > { %v6298_v13 = vpop.f32.mrf.mxu1  ;;  %v16172_v61 = vpop.f32.mrf.mxu0 }
 0x91e   : > { %v6974_v0 = vrot.slane %v6554_v29, 1  ;;  %v6299_v34 = vadd.f32 %v6298_v13, %v16030_v17  ;;  %7750 = vmatpush.bf16.msra.mxu3 %v11648_v19  ;;  %v12059_v19 = vld [vmem:[#allocation6 + $0x1c] sm:$0xf] }
 0x91f   : > { %v6426_v29 = vpop.f32.mrf.mxu2 }
 0x920   : > { %v6975_v56 = vsel %vm3652_vm5, %v6972_v63, %v6974_v0  ;;  %v6851_v44 = vadd.f32 %v6299_v34, %v18191_v30  ;;  %6651 = vmatmul.bf16.gmra.mxu0 %v15714_v24  ;;  %v18193_v34 = vld [vmem:[#allocation39_spill] sm:$0xff]  ;;  %v11624_v24 = vor.u32 %v12062_v33, %v11621_v60  ;;  %v11595_v60 = vld [vmem:[#allocation6] sm:$0xf] }
 0x921   : > { %v16176_v52 = vadd.f32 %v6975_v56, %v6850_v2  ;;  %v18194_v2 = vld [vmem:[#allocation25_spill] sm:$0xff] }
 0x922   : > { %7751 = vmatpush.bf16.msra.mxu3 %v11636_v59 }
 0x923   : > { %18192 = vst [vmem:[#allocation59_spill] sm:$0xff] %v16176_v52  ;;  %v6555_v17 = vpop.f32.mrf.mxu3  ;;  %v11609_v52 = vld [vmem:[#allocation6 + $0x24] sm:$0xf0] }
 0x924   : > { %v6556_v56 = vadd.f32 %v6555_v17, %v6426_v29  ;;  %v11612_v25 = vor.u32 %v12059_v19, %v11609_v52  ;;  %v7402_v52 = vld [vmem:[#allocation3] sm:$0xff] }
 0x925   : > { %v6301_v13 = vpop.f32.mrf.mxu1  ;;  %v16180_v0 = vpop.f32.mrf.mxu0 }
 0x926   : > { %v6302_v63 = vadd.f32 %v6301_v13, %v16039_v38  ;;  %7752 = vmatpush.bf16.msra.mxu3 %v11624_v24  ;;  %v6976_v38 = vrot.slane %v6556_v56, 1  ;;  %v12057_v24 = vld [vmem:[#allocation6 + $0x8] sm:$0xf0] }
 0x927   : > { %v6429_v30 = vpop.f32.mrf.mxu2 }
 0x928   : > { %v6852_v32 = vadd.f32 %v6302_v63, %v18193_v34  ;;  %6735 = vmatmul.bf16.gmra.mxu1 %v18194_v2  ;;  %v12056_v63 = vld [vmem:[#allocation6 + $0x4] sm:$0xf]  ;;  %v11597_v34 = vld [vmem:[#allocation6 + $0xc] sm:$0xf0] }
 0x929   : > { %v11600_v29 = vor.u32 %v12056_v63, %v11597_v34 }
 0x92a   : > { %7753 = vmatpush.bf16.msra.mxu3 %v11612_v25 }
 0x92b   : > { %v6558_v36 = vpop.f32.mrf.mxu3 }
 0x92c   : > { %v6559_v15 = vadd.f32 %v6558_v36, %v6429_v30  ;;  %v11596_v30 = vor.u32 %v12057_v24, %v11595_v60  ;;  %v16191_v36 = vpack.c.bf16 %v15898_v28, %v7402_v52 }
 0x92d   : > { %v6303_v5 = vpop.f32.mrf.mxu1  ;;  %v16184_v55 = vpop.f32.mrf.mxu0 }
 0x92e   : > { %v6977_v13 = vrot.slane %v6559_v15, 1  ;;  %7754 = vmatpush.bf16.msra.mxu3 %v11600_v29  ;;  %7641 = vmatpush.bf16.msrb.mxu2 %v11596_v30  ;;  %v18196_v5 = vld [vmem:[#allocation40_spill] sm:$0xff]  ;;  %v18199_v30 = vld [vmem:[#allocation18_spill] sm:$0xff] }
 0x92f   : > { %v6431_v17 = vpop.f32.mrf.mxu2 }
 0x930   : > { %v6978_v59 = vsel %vm3652_vm5, %v6976_v38, %v6977_v13  ;;  %6656 = vmatmul.bf16.gmra.mxu0 %v15743_v48 }
 0x931   : > { %v16187_v2 = vadd.f32 %v6978_v59, %v6851_v44  ;;  %7755 = vmatmul.bf16.vlgmr.msra.gmra.mxu3 %v16191_v36  ;;  %7642 = vmatmul.bf16.vlgmr.msrb.gmra.mxu2 %v16191_v36 }
 0x933   : > { %18195 = vst [vmem:[#allocation60_spill] sm:$0xff] %v16187_v2  ;;  %v6560_v33 = vpop.f32.mrf.mxu3 }
 0x934   : > { %v6561_v56 = vadd.f32 %v6560_v33, %v6431_v17  ;;  %v16208_v17 = vld [vmem:[%s17706_s7] ss:$0 sm:$0xff] }
 0x935   : > { %v6701_v15 = vpop.f32.mrf.mxu1  ;;  %v16194_v44 = vpop.f32.mrf.mxu0 }
 0x936   : > { %v6979_v19 = vrot.slane %v6561_v56, 1  ;;  %v6702_v38 = vadd.f32 %v6701_v15, %v16059_v46 }
 0x938   : > { %v6980_v48 = vsel %vm3652_vm5, %v6977_v13, %v6979_v19  ;;  %6740 = vmatmul.bf16.gmra.mxu1 %v18196_v5  ;;  %v7093_v34 = vrot.slane %v6702_v38, 2  ;;  %v18198_v13 = vld [vmem:[#allocation42_spill] sm:$0xff]  ;;  %v18200_v19 = vld [vmem:[#allocation41_spill] sm:$0xff] }
 0x939   : > { %v16198_v25 = vadd.f32 %v6980_v48, %v6852_v32 }
 0x93b   : > { %18197 = vst [vmem:[#allocation62_spill] sm:$0xff] %v16198_v25 }
 0x93d   : > { %v6703_v59 = vpop.f32.mrf.mxu1  ;;  %v16203_v63 = vpop.f32.mrf.mxu0 }
 0x93e   : > { %v6704_v28 = vadd.f32 %v6703_v59, %v16069_v9 }
 0x940   : > { %v7094_v29 = vrot.slane %v6704_v28, 2  ;;  %6661 = vmatmul.bf16.gmra.mxu0 %v15766_v18  ;;  %v7404_v28 = vld [vmem:[#allocation3 + $0x10] sm:$0xff] }
 0x942   : > { %v7095_v32 = vsel %vm3845_vm6, %v7093_v34, %v7094_v29 }
 0x943   : > { %v7205_v33 = vadd.f32 %v7095_v32, %v18198_v13 }
 0x945   : > { %v7240_v46 = vadd.f32 %v16208_v17, %v7205_v33  ;;  %v6706_v60 = vpop.f32.mrf.mxu1  ;;  %v16215_v24 = vpop.f32.mrf.mxu0 }
 0x946   : > { %v6707_v9 = vadd.f32 %v6706_v60, %v16079_v31 }
 0x947   : > { %vm7272_vm7 = vcmp.ge.f32.partialorder %v7240_v46, 0.0  ;;  %v7304_v52 = vmul.f32 0.01, %v7240_v46 }
 0x948   : > { %v7096_v56 = vrot.slane %v6707_v9, 2  ;;  %6745 = vmatmul.bf16.gmra.mxu1 %v18199_v30 }
 0x949   : > { %v7336_v15 = vsel %vm7272_vm7, %v7240_v46, %v7304_v52 }
 0x94a   : > { %7369 = vst [vmem:[#allocation3 + $0x19] sm:$0xff] %v7336_v15  ;;  %v7097_v18 = vsel %vm3845_vm6, %v7094_v29, %v7096_v56  ;;  %v18201_v56 = vld [vmem:[#allocation43_spill] sm:$0xff] }
 0x94b   : > { %v7206_v48 = vadd.f32 %v7097_v18, %v18200_v19  ;;  %v18202_v18 = vld [vmem:[#allocation20_spill] sm:$0xff] }
 0x94d   : > { %v7241_v5 = vadd.f32 %v16208_v17, %v7206_v48  ;;  %v6708_v38 = vpop.f32.mrf.mxu1  ;;  %v16221_v59 = vpop.f32.mrf.mxu0 }
 0x94e   : > { %v6709_v33 = vadd.f32 %v6708_v38, %v16089_v54 }
 0x94f   : > { %vm7273_vm8 = vcmp.ge.f32.partialorder %v7241_v5, 0.0  ;;  %v7305_v31 = vmul.f32 0.01, %v7241_v5 }
 0x950   : > { %6666 = vmatmul.bf16.gmra.mxu0 %v15781_v12  ;;  %v7098_v9 = vrot.slane %v6709_v33, 2  ;;  %v12079_v33 = vld [vmem:[#allocation6 + $0xb8] sm:$0xf0] }
 0x951   : > { %v7337_v34 = vsel %vm7273_vm8, %v7241_v5, %v7305_v31  ;;  %v7405_v32 = vld [vmem:[#allocation3 + $0x18] sm:$0xff] }
 0x952   : > { %7370 = vst [vmem:[#allocation3 + $0x21] sm:$0xff] %v7337_v34  ;;  %v16224_v13 = vpack.c.bf16 %v7405_v32, %v7404_v28  ;;  %v11687_v34 = vld [vmem:[#allocation6 + $0xb0] sm:$0xf] }
 0x954   : > { %7647 = vmatmul.bf16.gmra.mxu2 %v16224_v13  ;;  %7760 = vmatmul.bf16.gmra.mxu3 %v16224_v13 }
 0x955   : > { %v6711_v29 = vpop.f32.mrf.mxu1  ;;  %v16230_v60 = vpop.f32.mrf.mxu0 }
 0x956   : > { %v6712_v46 = vadd.f32 %v6711_v29, %v16096_v21 }
 0x958   : > { %v7099_v52 = vrot.slane %v6712_v46, 2  ;;  %6750 = vmatmul.bf16.gmra.mxu1 %v18201_v56  ;;  %v11688_v46 = vor.u32 %v12079_v33, %v11687_v34  ;;  %v18203_v56 = vld [vmem:[#allocation45_spill] sm:$0xff] }
 0x959   : > { %v7406_v30 = vld [vmem:[#allocation3 + $0x20] sm:$0xff]  ;;  %v7407_v31 = vld [vmem:[#allocation3 + $0x28] sm:$0xff] }
 0x95a   : > { %v7100_v12 = vsel %vm3845_vm6, %v7098_v9, %v7099_v52  ;;  %v16234_v15 = vpack.c.bf16 %v7406_v30, %v7405_v32  ;;  %v16243_v9 = vpack.c.bf16 %v7407_v31, %v7406_v30  ;;  %7876 = vmatpush.bf16.msrb.mxu0 %v11688_v46  ;;  %v18204_v30 = vld [vmem:[#allocation44_spill] sm:$0xff] }
 0x95b   : > { %v7207_v54 = vadd.f32 %v7100_v12, %v18202_v18  ;;  %v12076_v18 = vld [vmem:[#allocation6 + $0xa0] sm:$0xf0] }
 0x95d   : > { %v7242_v19 = vadd.f32 %v16208_v17, %v7207_v54  ;;  %v6713_v48 = vpop.f32.mrf.mxu1  ;;  %v16239_v38 = vpop.f32.mrf.mxu0 }
 0x95e   : > { %v6714_v5 = vadd.f32 %v6713_v48, %v16104_v6  ;;  %v11675_v6 = vld [vmem:[#allocation6 + $0x98] sm:$0xf] }
 0x95f   : > { %vm7274_vm9 = vcmp.ge.f32.partialorder %v7242_v19, 0.0  ;;  %v7306_v21 = vmul.f32 0.01, %v7242_v19  ;;  %v11676_v48 = vor.u32 %v12076_v18, %v11675_v6 }
 0x960   : > { %v7101_v28 = vrot.slane %v6714_v5, 2  ;;  %6671 = vmatmul.bf16.gmra.mxu0 %v15810_v35 }
 0x961   : > { %v7338_v29 = vsel %vm7274_vm9, %v7242_v19, %v7306_v21  ;;  %7877 = vmatpush.bf16.msrb.mxu0 %v11676_v48  ;;  %v12073_v21 = vld [vmem:[#allocation6 + $0x88] sm:$0xf0] }
 0x962   : > { %7371 = vst [vmem:[#allocation3 + $0x31] sm:$0xff] %v7338_v29  ;;  %v7102_v32 = vsel %vm3845_vm6, %v7099_v52, %v7101_v28  ;;  %v11663_v52 = vld [vmem:[#allocation6 + $0x80] sm:$0xf] }
 0x963   : > { %v7208_v12 = vadd.f32 %v7102_v32, %v18203_v56  ;;  %v11664_v34 = vor.u32 %v12073_v21, %v11663_v52  ;;  %v11651_v32 = vld [vmem:[#allocation6 + $0x68] sm:$0xf]  ;;  %v12070_v56 = vld [vmem:[#allocation6 + $0x70] sm:$0xf0] }
 0x964   : > { %7651 = vmatmul.bf16.gmra.mxu2 %v16243_v9  ;;  %7765 = vmatmul.bf16.gmra.mxu3 %v16243_v9  ;;  %v11652_v6 = vor.u32 %v12070_v56, %v11651_v32  ;;  %v12064_v32 = vld [vmem:[#allocation6 + $0x40] sm:$0xf0] }
 0x965   : > { %v7243_v54 = vadd.f32 %v16208_v17, %v7208_v12  ;;  %v6716_v19 = vpop.f32.mrf.mxu1  ;;  %v16249_v5 = vpop.f32.mrf.mxu0  ;;  %7878 = vmatpush.bf16.msrb.mxu0 %v11664_v34  ;;  %v18206_v34 = vld [vmem:[#allocation47_spill] sm:$0xff] }
 0x966   : > { %v6717_v46 = vadd.f32 %v6716_v19, %v16108_v20 }
 0x967   : > { %vm7275_vm10 = vcmp.ge.f32.partialorder %v7243_v54, 0.0  ;;  %v7307_v35 = vmul.f32 0.01, %v7243_v54 }
 0x968   : > { %6755 = vmatmul.bf16.gmra.mxu1 %v18204_v30  ;;  %v7103_v30 = vrot.slane %v6717_v46, 2  ;;  %v11627_v46 = vld [vmem:[#allocation6 + $0x38] sm:$0xf] }
 0x969   : > { %v7339_v28 = vsel %vm7275_vm10, %v7243_v54, %v7307_v35  ;;  %v7408_v33 = vld [vmem:[#allocation3 + $0x30] sm:$0xff]  ;;  %7879 = vmatpush.bf16.msrb.mxu0 %v11652_v6  ;;  %v11639_v54 = vld [vmem:[#allocation6 + $0x50] sm:$0xf]  ;;  %v12067_v35 = vld [vmem:[#allocation6 + $0x58] sm:$0xf0]  ;;  %v11628_v6 = vor.u32 %v12064_v32, %v11627_v46 }
 0x96a   : > { %7372 = vst [vmem:[#allocation3 + $0x39] sm:$0xff] %v7339_v28  ;;  %v16252_v29 = vpack.c.bf16 %v7408_v33, %v7407_v31  ;;  %v11640_v21 = vor.u32 %v12067_v35, %v11639_v54  ;;  %v18207_v35 = vld [vmem:[#allocation22_spill] sm:$0xff]  ;;  %v11603_v46 = vld [vmem:[#allocation6 + $0x8] sm:$0xf] }
 0x96d   : > { %v6718_v12 = vpop.f32.mrf.mxu1  ;;  %v16256_v48 = vpop.f32.mrf.mxu0  ;;  %7880 = vmatpush.bf16.msrb.mxu0 %v11640_v21 }
 0x96e   : > { %v6719_v18 = vadd.f32 %v6718_v12, %v16115_v3 }
 0x970   : > { %v7104_v25 = vrot.slane %v6719_v18, 2  ;;  %6676 = vmatmul.bf16.gmra.mxu0 %v15836_v45 }
 0x971   : > { %v7409_v52 = vld [vmem:[#allocation3 + $0x38] sm:$0xff]  ;;  %v7410_v31 = vld [vmem:[#allocation3 + $0x40] sm:$0xff]  ;;  %7881 = vmatpush.bf16.msrb.mxu0 %v11628_v6 }
 0x972   : > { %v7105_v20 = vsel %vm3845_vm6, %v7103_v30, %v7104_v25  ;;  %v16260_v19 = vpack.c.bf16 %v7409_v52, %v7408_v33  ;;  %v16262_v28 = vpack.c.bf16 %v7410_v31, %v7409_v52  ;;  %v11615_v30 = vld [vmem:[#allocation6 + $0x20] sm:$0xf]  ;;  %v12061_v52 = vld [vmem:[#allocation6 + $0x28] sm:$0xf0] }
 0x973   : > { %v7209_v3 = vadd.f32 %v7105_v20, %v18206_v34  ;;  %v11616_v20 = vor.u32 %v12061_v52, %v11615_v30 }
 0x974   : > { %18205 = vst [vmem:[#allocation61_spill] sm:$0xff] %v16262_v28  ;;  %7655 = vmatmul.bf16.gmra.mxu2 %v16260_v19  ;;  %7770 = vmatmul.bf16.gmra.mxu3 %v16260_v19 }
 0x975   : > { %v7244_v56 = vadd.f32 %v16208_v17, %v7209_v3  ;;  %v6721_v12 = vpop.f32.mrf.mxu1  ;;  %v16269_v18 = vpop.f32.mrf.mxu0  ;;  %v18208_v3 = vld [vmem:[#allocation10_spill] sm:$0xff]  ;;  %7882 = vmatpush.bf16.msrb.mxu0 %v11616_v20 }
 0x976   : > { %v6722_v45 = vadd.f32 %v6721_v12, %v16123_v53  ;;  %v12058_v53 = vld [vmem:[#allocation6 + $0x10] sm:$0xf0] }
 0x977   : > { %vm7276_vm11 = vcmp.ge.f32.partialorder %v7244_v56, 0.0  ;;  %v7308_v33 = vmul.f32 0.01, %v7244_v56  ;;  %v11604_v28 = vor.u32 %v12058_v53, %v11603_v46 }
 0x978   : > { %v7106_v54 = vrot.slane %v6722_v45, 2  ;;  %6760 = vmatmul.bf16.gmra.mxu1 %v18207_v35  ;;  %v12101_v35 = vld [vmem:[#allocation6 + $0x16c] sm:$0xf] }
 0x979   : > { %v7340_v21 = vsel %vm7276_vm11, %v7244_v56, %v7308_v33  ;;  %7883 = vmatpush.bf16.msrb.mxu0 %v11604_v28  ;;  %v11777_v56 = vld [vmem:[#allocation6 + $0x174] sm:$0xf0] }
 0x97a   : > { %7373 = vst [vmem:[#allocation3 + $0x49] sm:$0xff] %v7340_v21  ;;  %v7107_v34 = vsel %vm3845_vm6, %v7104_v25, %v7106_v54  ;;  %v11780_v30 = vor.u32 %v12101_v35, %v11777_v56  ;;  %v11775_v54 = vld [vmem:[#allocation6 + $0x168] sm:$0xf]  ;;  %v12102_v21 = vld [vmem:[#allocation6 + $0x170] sm:$0xf0] }
 0x97b   : > { %v7210_v2 = vadd.f32 %v7107_v34, %v18208_v3 }
 0x97c   : > { %8767 = vmatpush.bf16.msra.mxu2 %v11780_v30 }
 0x97d   : > { %v7245_v32 = vadd.f32 %v16208_v17, %v7210_v2  ;;  %v6723_v12 = vpop.f32.mrf.mxu1  ;;  %v16275_v6 = vpop.f32.mrf.mxu0  ;;  %v11776_v2 = vor.u32 %v12102_v21, %v11775_v54 }
 0x97e   : > { %v6724_v20 = vadd.f32 %v6723_v12, %v16127_v10  ;;  %v18210_v10 = vld [vmem:[#allocation12_spill] sm:$0xff] }
 0x97f   : > { %vm7277_vm12 = vcmp.ge.f32.partialorder %v7245_v32, 0.0  ;;  %v7309_v45 = vmul.f32 0.01, %v7245_v32  ;;  %8654 = vmatpush.bf16.msrb.mxu1 %v11776_v2 }
 0x980   : > { %6681 = vmatmul.bf16.gmra.mxu0 %v15875_v43  ;;  %v7108_v43 = vrot.slane %v6724_v20, 2 }
 0x981   : > { %v7341_v33 = vsel %vm7277_vm12, %v7245_v32, %v7309_v45  ;;  %v7411_v52 = vld [vmem:[#allocation3 + $0x48] sm:$0xff] }
 0x982   : > { %7374 = vst [vmem:[#allocation3 + $0x51] sm:$0xff] %v7341_v33  ;;  %v16278_v25 = vpack.c.bf16 %v7411_v52, %v7410_v31  ;;  %v18209_v31 = vld [vmem:[#allocation48_spill] sm:$0xff] }
 0x984   : > { %7660 = vmatmul.bf16.gmra.mxu2 %v16278_v25  ;;  %7775 = vmatmul.bf16.gmra.mxu3 %v16278_v25 }
 0x985   : > { %v6726_v28 = vpop.f32.mrf.mxu1  ;;  %v16284_v3 = vpop.f32.mrf.mxu0 }
 0x986   : > { %v6727_v34 = vadd.f32 %v6726_v28, %v16134_v49  ;;  %v18211_v28 = vld [vmem:[#allocation50_spill] sm:$0xff] }
 0x988   : > { %v7109_v46 = vrot.slane %v6727_v34, 2  ;;  %6765 = vmatmul.bf16.gmra.mxu1 %v18209_v31 }
 0x989   : > { %v7412_v53 = vld [vmem:[#allocation3 + $0x50] sm:$0xff]  ;;  %v7413_v54 = vld [vmem:[#allocation3 + $0x58] sm:$0xff] }
 0x98a   : > { %v7110_v32 = vsel %vm3845_vm6, %v7108_v43, %v7109_v46  ;;  %v16288_v45 = vpack.c.bf16 %v7412_v53, %v7411_v52  ;;  %v16297_v20 = vpack.c.bf16 %v7413_v54, %v7412_v53 }
 0x98b   : > { %v7211_v12 = vadd.f32 %v7110_v32, %v18210_v10  ;;  %v18212_v10 = vld [vmem:[#allocation49_spill] sm:$0xff] }
 0x98d   : > { %v7246_v35 = vadd.f32 %v16208_v17, %v7211_v12  ;;  %v6728_v56 = vpop.f32.mrf.mxu1  ;;  %v16293_v30 = vpop.f32.mrf.mxu0 }
 0x98e   : > { %v6729_v33 = vadd.f32 %v6728_v56, %v16142_v7 }
 0x98f   : > { %vm7278_vm13 = vcmp.ge.f32.partialorder %v7246_v35, 0.0  ;;  %v7310_v49 = vmul.f32 0.01, %v7246_v35 }
 0x990   : > { %v7111_v21 = vrot.slane %v6729_v33, 2  ;;  %6686 = vmatmul.bf16.gmra.mxu0 %v15901_v37 }
 0x991   : > { %v7342_v2 = vsel %vm7278_vm13, %v7246_v35, %v7310_v49 }
 0x992   : > { %7375 = vst [vmem:[#allocation3 + $0x61] sm:$0xff] %v7342_v2  ;;  %v7112_v52 = vsel %vm3845_vm6, %v7109_v46, %v7111_v21 }
 0x993   : > { %v7212_v34 = vadd.f32 %v7112_v52, %v18211_v28 }
 0x994   : > { %7664 = vmatmul.bf16.gmra.mxu2 %v16297_v20  ;;  %7780 = vmatmul.bf16.gmra.mxu3 %v16297_v20 }
 0x995   : > { %v7247_v7 = vadd.f32 %v16208_v17, %v7212_v34  ;;  %v6731_v43 = vpop.f32.mrf.mxu1  ;;  %v16303_v31 = vpop.f32.mrf.mxu0 }
 0x996   : > { %v6732_v53 = vadd.f32 %v6731_v43, %v16146_v62 }
 0x997   : > { %vm7279_vm14 = vcmp.ge.f32.partialorder %v7247_v7, 0.0  ;;  %v7311_v32 = vmul.f32 0.01, %v7247_v7 }
 0x998   : > { %6770 = vmatmul.bf16.gmra.mxu1 %v18212_v10  ;;  %v7113_v49 = vrot.slane %v6732_v53, 2 }
 0x999   : > { %v7343_v37 = vsel %vm7279_vm14, %v7247_v7, %v7311_v32  ;;  %v7414_v12 = vld [vmem:[#allocation3 + $0x60] sm:$0xff] }
 0x99a   : > { %7376 = vst [vmem:[#allocation3 + $0x69] sm:$0xff] %v7343_v37  ;;  %v16306_v46 = vpack.c.bf16 %v7414_v12, %v7413_v54 }
 0x99d   : > { %v6733_v35 = vpop.f32.mrf.mxu1  ;;  %v16310_v33 = vpop.f32.mrf.mxu0 }
 0x99e   : > { %v6734_v56 = vadd.f32 %v6733_v35, %v16153_v11  ;;  %v12098_v35 = vld [vmem:[#allocation6 + $0x154] sm:$0xf] }
 0x9a0   : > { %v7114_v21 = vrot.slane %v6734_v56, 2  ;;  %7884 = vmatmul.bf16.vlgmr.msrb.gmra.mxu0 %v16191_v36  ;;  %v11765_v56 = vld [vmem:[#allocation6 + $0x15c] sm:$0xf0] }
 0x9a1   : > { %v7415_v2 = vld [vmem:[#allocation3 + $0x68] sm:$0xff] }
 0x9a2   : > { %v7115_v52 = vsel %vm3845_vm6, %v7113_v49, %v7114_v21  ;;  %v16314_v28 = vpack.c.bf16 %v7415_v2, %v7414_v12  ;;  %v11768_v2 = vor.u32 %v12098_v35, %v11765_v56 }
 0x9a3   : > { %v7213_v34 = vadd.f32 %v7115_v52, %v15932_v39  ;;  %v7416_v52 = vld [vmem:[#allocation3 + $0x70] sm:$0xff] }
 0x9a4   : > { %7668 = vmatmul.bf16.gmra.mxu2 %v16314_v28  ;;  %7785 = vmatmul.bf16.gmra.mxu3 %v16314_v28 }
 0x9a5   : > { %v7248_v62 = vadd.f32 %v16208_v17, %v7213_v34  ;;  %v6736_v11 = vpop.f32.mrf.mxu1  ;;  %v16321_v7 = vpop.f32.mrf.mxu0  ;;  %8768 = vmatpush.bf16.msra.mxu2 %v11768_v2 }
 0x9a6   : > { %v6737_v54 = vadd.f32 %v6736_v11, %v16161_v14 }
 0x9a7   : > { %vm7280_vm15 = vcmp.ge.f32.partialorder %v7248_v62, 0.0  ;;  %v7312_v43 = vmul.f32 0.01, %v7248_v62 }
 0x9a8   : > { %v7116_v36 = vrot.slane %v6737_v54, 2  ;;  %6775 = vmatmul.bf16.gmra.mxu1 %v15924_v8 }
 0x9a9   : > { %v7344_v32 = vsel %vm7280_vm15, %v7248_v62, %v7312_v43 }
 0x9aa   : > { %7377 = vst [vmem:[#allocation3 + $0x79] sm:$0xff] %v7344_v32  ;;  %v7117_v39 = vsel %vm3845_vm6, %v7114_v21, %v7116_v36  ;;  %v11763_v21 = vld [vmem:[#allocation6 + $0x150] sm:$0xf] }
 0x9ab   : > { %v7214_v10 = vadd.f32 %v7117_v39, %v15939_v57  ;;  %v12099_v57 = vld [vmem:[#allocation6 + $0x158] sm:$0xf0]  ;;  %v18213_v39 = vld [vmem:[#allocation16_spill] sm:$0xff] }
 0x9ac   : > { %v11764_v62 = vor.u32 %v12099_v57, %v11763_v21 }
 0x9ad   : > { %v7249_v37 = vadd.f32 %v16208_v17, %v7214_v10  ;;  %v6738_v12 = vpop.f32.mrf.mxu1  ;;  %v16327_v53 = vpop.f32.mrf.mxu0 }
 0x9ae   : > { %v6739_v11 = vadd.f32 %v6738_v12, %v16165_v58  ;;  %8655 = vmatpush.bf16.msrb.mxu1 %v11764_v62 }
 0x9af   : > { %vm7281_vm0 = vcmp.ge.f32.partialorder %v7249_v37, 0.0  ;;  %v7313_v14 = vmul.f32 0.01, %v7249_v37 }
 0x9b0   : > { %7889 = vmatmul.bf16.gmra.mxu0 %v16224_v13  ;;  %v7118_v13 = vrot.slane %v6739_v11, 2 }
 0x9b1   : > { %v7345_v49 = vsel %vm7281_vm0, %v7249_v37, %v7313_v14  ;;  %v7417_v34 = vld [vmem:[#allocation3 + $0x78] sm:$0xff]  ;;  %v18214_v14 = vld [vmem:[#allocation17_spill] sm:$0xff] }
 0x9b2   : > { %7378 = vst [vmem:[#allocation3 + $0x81] sm:$0xff] %v7345_v49  ;;  %v16330_v8 = vpack.c.bf16 %v7417_v34, %v7416_v52 }
 0x9b4   : > { %7673 = vmatmul.bf16.gmra.mxu2 %v16330_v8  ;;  %7790 = vmatmul.bf16.gmra.mxu3 %v16330_v8  ;;  %v7756_v10 = vpop.f32.mrf.mxu3 }
 0x9b5   : > { %v6741_v54 = vpop.f32.mrf.mxu1  ;;  %v16336_v36 = vpop.f32.mrf.mxu0 }
 0x9b6   : > { %v6742_v43 = vadd.f32 %v6741_v54, %v16172_v61  ;;  %v8085_v54 = vrot.slane %v7756_v10, 1  ;;  %v18216_v10 = vld [vmem:[#allocation52_spill] sm:$0xff] }
 0x9b8   : > { %v7119_v32 = vrot.slane %v6742_v43, 2  ;;  %6780 = vmatmul.bf16.gmra.mxu1 %v18213_v39  ;;  %v7643_v39 = vpop.f32.mrf.mxu2 }
 0x9b9   : > { %v7418_v2 = vld [vmem:[#allocation3 + $0x80] sm:$0xff]  ;;  %v7419_v52 = vld [vmem:[#allocation3 + $0x88] sm:$0xff] }
 0x9ba   : > { %v7120_v37 = vsel %vm3845_vm6, %v7118_v13, %v7119_v32  ;;  %v16347_v11 = vpack.c.bf16 %v7419_v52, %v7418_v2  ;;  %v18215_v13 = vld [vmem:[#allocation19_spill] sm:$0xff] }
 0x9bb   : > { %v7215_v35 = vadd.f32 %v7120_v37, %v18214_v14 }
 0x9bc   : > { %v7758_v57 = vpop.f32.mrf.mxu3 }
 0x9bd   : > { %v7250_v58 = vadd.f32 %v16208_v17, %v7215_v35  ;;  %v6743_v12 = vpop.f32.mrf.mxu1  ;;  %v16343_v49 = vpop.f32.mrf.mxu0  ;;  %v8086_v43 = vrot.slane %v7758_v57, 1 }
 0x9be   : > { %v6744_v56 = vadd.f32 %v6743_v12, %v16180_v0 }
 0x9bf   : > { %vm7282_vm1 = vcmp.ge.f32.partialorder %v7250_v58, 0.0  ;;  %v7314_v61 = vmul.f32 0.01, %v7250_v58  ;;  %v8087_v37 = vsel %vm3652_vm5, %v8085_v54, %v8086_v43 }
 0x9c0   : > { %v7121_v34 = vrot.slane %v6744_v56, 2  ;;  %7894 = vmatmul.bf16.gmra.mxu0 %v16243_v9  ;;  %v16354_v9 = vadd.f32 %v8087_v37, %v7643_v39 }
 0x9c1   : > { %v7346_v21 = vsel %vm7282_vm1, %v7250_v58, %v7314_v61 }
 0x9c2   : > { %7379 = vst [vmem:[#allocation3 + $0x91] sm:$0xff] %v7346_v21  ;;  %v7122_v62 = vsel %vm3845_vm6, %v7119_v32, %v7121_v34  ;;  %v7645_v34 = vpop.f32.mrf.mxu2 }
 0x9c3   : > { %v7216_v0 = vadd.f32 %v7122_v62, %v18215_v13 }
 0x9c4   : > { %7677 = vmatmul.bf16.gmra.mxu2 %v16347_v11  ;;  %7795 = vmatmul.bf16.gmra.mxu3 %v16347_v11 }
 0x9c5   : > { %v7251_v14 = vadd.f32 %v16208_v17, %v7216_v0  ;;  %v6746_v35 = vpop.f32.mrf.mxu1  ;;  %v16356_v58 = vpop.f32.mrf.mxu0 }
 0x9c6   : > { %v6747_v56 = vadd.f32 %v6746_v35, %v16184_v55 }
 0x9c7   : > { %vm7283_vm2 = vcmp.ge.f32.partialorder %v7251_v14, 0.0  ;;  %v7315_v32 = vmul.f32 0.01, %v7251_v14 }
 0x9c8   : > { %6785 = vmatmul.bf16.gmra.mxu1 %v18216_v10  ;;  %v7123_v21 = vrot.slane %v6747_v56, 2 }
 0x9c9   : > { %v7347_v12 = vsel %vm7283_vm2, %v7251_v14, %v7315_v32  ;;  %v7420_v62 = vld [vmem:[#allocation3 + $0x90] sm:$0xff] }
 0x9ca   : > { %7380 = vst [vmem:[#allocation3 + $0x99] sm:$0xff] %v7347_v12 }
 0x9cd   : > { %v6748_v61 = vpop.f32.mrf.mxu1  ;;  %v16361_v52 = vpop.f32.mrf.mxu0 }
 0x9ce   : > { %v6749_v2 = vadd.f32 %v6748_v61, %v16194_v44 }
 0x9d0   : > { %v7124_v57 = vrot.slane %v6749_v2, 2  ;;  %7899 = vmatmul.bf16.gmra.mxu0 %v16260_v19 }
 0x9d1   : > { %v7421_v54 = vld [vmem:[#allocation3 + $0x98] sm:$0xff] }
 0x9d2   : > { %v7125_v13 = vsel %vm3845_vm6, %v7123_v21, %v7124_v57  ;;  %v16365_v0 = vpack.c.bf16 %v7421_v54, %v7420_v62 }
 0x9d3   : > { %v7217_v39 = vadd.f32 %v7125_v13, %v15984_v16 }
 0x9d4   : > { %7681 = vmatmul.bf16.gmra.mxu2 %v16365_v0  ;;  %7800 = vmatmul.bf16.gmra.mxu3 %v16365_v0 }
 0x9d5   : > { %v7252_v55 = vadd.f32 %v16208_v17, %v7217_v39  ;;  %v6751_v44 = vpop.f32.mrf.mxu1  ;;  %v16372_v14 = vpop.f32.mrf.mxu0 }
 0x9d6   : > { %v6752_v37 = vadd.f32 %v6751_v44, %v16203_v63  ;;  %v11753_v44 = vld [vmem:[#allocation6 + $0x144] sm:$0xf0] }
 0x9d7   : > { %vm7284_vm3 = vcmp.ge.f32.partialorder %v7252_v55, 0.0  ;;  %v7316_v35 = vmul.f32 0.01, %v7252_v55  ;;  %v7648_v19 = vpop.f32.mrf.mxu2  ;;  %v7761_v10 = vpop.f32.mrf.mxu3 }
 0x9d8   : > { %v7126_v32 = vrot.slane %v6752_v37, 2  ;;  %6790 = vmatmul.bf16.gmra.mxu1 %v15976_v4  ;;  %v8088_v16 = vrot.slane %v7761_v10, 1  ;;  %v12095_v4 = vld [vmem:[#allocation6 + $0x13c] sm:$0xf]  ;;  %v7422_v37 = vld [vmem:[#allocation3 + $0xa0] sm:$0xff] }
 0x9d9   : > { %v7348_v12 = vsel %vm7284_vm3, %v7252_v55, %v7316_v35  ;;  %v12096_v10 = vld [vmem:[#allocation6 + $0x140] sm:$0xf0] }
 0x9da   : > { %7381 = vst [vmem:[#allocation3 + $0xa9] sm:$0xff] %v7348_v12  ;;  %v7127_v56 = vsel %vm3845_vm6, %v7124_v57, %v7126_v32  ;;  %v8089_v2 = vsel %vm3652_vm5, %v8086_v43, %v8088_v16  ;;  %v11756_v57 = vor.u32 %v12095_v4, %v11753_v44 }
 0x9db   : > { %v7218_v61 = vadd.f32 %v7127_v56, %v15991_v26  ;;  %v16378_v21 = vadd.f32 %v8089_v2, %v7645_v34  ;;  %v8438_v26 = vld [vmem:[#allocation3 + $0xa0] sm:$0xff]  ;;  %v11751_v34 = vld [vmem:[#allocation6 + $0x138] sm:$0xf] }
 0x9dc   : > { %8769 = vmatpush.bf16.msra.mxu2 %v11756_v57  ;;  %v11752_v16 = vor.u32 %v12096_v10, %v11751_v34 }
 0x9dd   : > { %v7253_v63 = vadd.f32 %v16208_v17, %v7218_v61  ;;  %v6753_v62 = vpop.f32.mrf.mxu1  ;;  %v16381_v54 = vpop.f32.mrf.mxu0 }
 0x9de   : > { %v6754_v56 = vadd.f32 %v6753_v62, %v16215_v24  ;;  %8656 = vmatpush.bf16.msrb.mxu1 %v11752_v16 }
 0x9df   : > { %vm7285_vm4 = vcmp.ge.f32.partialorder %v7253_v63, 0.0  ;;  %v7317_v13 = vmul.f32 0.01, %v7253_v63  ;;  %v7649_v39 = vpop.f32.mrf.mxu2  ;;  %v7763_v55 = vpop.f32.mrf.mxu3 }
 0x9e0   : > { %7904 = vmatmul.bf16.gmra.mxu0 %v16278_v25 }
 0x9e1   : > { %v7349_v35 = vsel %vm7285_vm4, %v7253_v63, %v7317_v13  ;;  %v7423_v19 = vld [vmem:[#allocation3 + $0xa8] sm:$0xff]  ;;  %v7128_v13 = vrot.slane %v6754_v56, 2 }
 0x9e2   : > { %v8439_v32 = vld [vmem:[#allocation3 + $0xa8] sm:$0xff]  ;;  %7382 = vst [vmem:[#allocation3 + $0xb1] sm:$0xff] %v7349_v35  ;;  %v16384_v43 = vpack.c.bf16 %v7423_v19, %v7422_v37  ;;  %v8090_v35 = vrot.slane %v7763_v55, 1 }
 0x9e3   : > { %v16386_v12 = vpack.c.bf16 %v8439_v32, %v8438_v26  ;;  %v18218_v37 = vld [vmem:[#allocation53_spill] sm:$0xff] }
 0x9e4   : > { %7686 = vmatmul.bf16.gmra.mxu2 %v16384_v43  ;;  %7805 = vmatmul.bf16.gmra.mxu3 %v16384_v43  ;;  %v18219_v26 = vld [vmem:[#allocation21_spill] sm:$0xff] }
 0x9e5   : > { %18217 = vst [vmem:[#allocation29_spill] sm:$0xff] %v16386_v12  ;;  %v6756_v61 = vpop.f32.mrf.mxu1  ;;  %v16392_v25 = vpop.f32.mrf.mxu0 }
 0x9e6   : > { %v6757_v2 = vadd.f32 %v6756_v61, %v16221_v59 }
 0x9e7   : > { %v7652_v63 = vpop.f32.mrf.mxu2  ;;  %v7766_v44 = vpop.f32.mrf.mxu3 }
 0x9e8   : > { %v7129_v4 = vrot.slane %v6757_v2, 2  ;;  %6795 = vmatmul.bf16.gmra.mxu1 %v18218_v37  ;;  %v8091_v57 = vrot.slane %v7766_v44, 1 }
 0x9e9   : > { %v8440_v19 = vld [vmem:[#allocation3 + $0xb0] sm:$0xff]  ;;  %v8441_v62 = vld [vmem:[#allocation3 + $0xb8] sm:$0xff] }
 0x9ea   : > { %v7130_v24 = vsel %vm3845_vm6, %v7128_v13, %v7129_v4  ;;  %v8092_v34 = vsel %vm3652_vm5, %v8090_v35, %v8091_v57  ;;  %v16398_v10 = vpack.c.bf16 %v8441_v62, %v8440_v19  ;;  %v7424_v13 = vld [vmem:[#allocation3 + $0xb0] sm:$0xff]  ;;  %v7425_v37 = vld [vmem:[#allocation3 + $0xb8] sm:$0xff]  ;;  %v18222_v62 = vld [vmem:[#allocation56_spill] sm:$0xff] }
 0x9eb   : > { %v7219_v32 = vadd.f32 %v7130_v24, %v18219_v26  ;;  %v16400_v59 = vadd.f32 %v8092_v34, %v7649_v39  ;;  %v16408_v19 = vpack.c.bf16 %v7425_v37, %v7424_v13 }
 0x9ec   : > { %18220 = vst [vmem:[#allocation63_spill] sm:$0xff] %v16398_v10 }
 0x9ed   : > { %v7254_v16 = vadd.f32 %v16208_v17, %v7219_v32  ;;  %v6758_v56 = vpop.f32.mrf.mxu1  ;;  %v16404_v2 = vpop.f32.mrf.mxu0 }
 0x9ee   : > { %v6759_v61 = vadd.f32 %v6758_v56, %v16230_v60  ;;  %18221 = vst [vmem:[#allocation27_spill] sm:$0xff] %v16404_v2 }
 0x9ef   : > { %vm7286_vm7 = vcmp.ge.f32.partialorder %v7254_v16, 0.0  ;;  %v7318_v55 = vmul.f32 0.01, %v7254_v16  ;;  %v7654_v44 = vpop.f32.mrf.mxu2  ;;  %v7768_v24 = vpop.f32.mrf.mxu3 }
 0x9f0   : > { %v7131_v12 = vrot.slane %v6759_v61, 2  ;;  %v8093_v35 = vrot.slane %v7768_v24, 1  ;;  %7909 = vmatmul.bf16.gmra.mxu0 %v16297_v20 }
 0x9f1   : > { %v7350_v26 = vsel %vm7286_vm7, %v7254_v16, %v7318_v55  ;;  %v18224_v55 = vld [vmem:[#allocation54_spill] sm:$0xff] }
 0x9f2   : > { %7383 = vst [vmem:[#allocation3 + $0xc1] sm:$0xff] %v7350_v26  ;;  %v7132_v39 = vsel %vm3845_vm6, %v7129_v4, %v7131_v12  ;;  %v8094_v32 = vsel %vm3652_vm5, %v8091_v57, %v8093_v35 }
 0x9f3   : > { %v7220_v60 = vadd.f32 %v7132_v39, %v18222_v62  ;;  %v16414_v34 = vadd.f32 %v8094_v32, %v7652_v63 }
 0x9f4   : > { %7690 = vmatmul.bf16.gmra.mxu2 %v16408_v19  ;;  %7810 = vmatmul.bf16.gmra.mxu3 %v16408_v19 }
 0x9f5   : > { %v7255_v16 = vadd.f32 %v16208_v17, %v7220_v60  ;;  %v6761_v56 = vpop.f32.mrf.mxu1  ;;  %v16417_v61 = vpop.f32.mrf.mxu0 }
 0x9f6   : > { %18223 = vst [vmem:[#allocation64_spill] sm:$0xff] %v16417_v61  ;;  %v6762_v57 = vadd.f32 %v6761_v56, %v16239_v38 }
 0x9f7   : > { %vm7287_vm8 = vcmp.ge.f32.partialorder %v7255_v16, 0.0  ;;  %v7319_v20 = vmul.f32 0.01, %v7255_v16  ;;  %v7656_v12 = vpop.f32.mrf.mxu2  ;;  %v7771_v4 = vpop.f32.mrf.mxu3 }
 0x9f8   : > { %6800 = vmatmul.bf16.gmra.mxu1 %v18224_v55  ;;  %v7133_v26 = vrot.slane %v6762_v57, 2  ;;  %v8095_v60 = vrot.slane %v7771_v4, 1 }
 0x9f9   : > { %v7351_v44 = vsel %vm7287_vm8, %v7255_v16, %v7319_v20  ;;  %v7426_v62 = vld [vmem:[#allocation3 + $0xc0] sm:$0xff] }
 0x9fa   : > { %7384 = vst [vmem:[#allocation3 + $0xc9] sm:$0xff] %v7351_v44  ;;  %v8442_v61 = vld [vmem:[#allocation3 + $0xc0] sm:$0xff] }
 0x9fd   : > { %v6763_v13 = vpop.f32.mrf.mxu1  ;;  %v16422_v63 = vpop.f32.mrf.mxu0 }
 0x9fe   : > { %v6764_v37 = vadd.f32 %v6763_v13, %v16249_v5 }
 0x9ff   : > { %v7658_v24 = vpop.f32.mrf.mxu2  ;;  %v7773_v39 = vpop.f32.mrf.mxu3 }
 0xa00   : > { %v7134_v35 = vrot.slane %v6764_v37, 2  ;;  %v8096_v32 = vrot.slane %v7773_v39, 1  ;;  %7914 = vmatmul.bf16.gmra.mxu0 %v16314_v28 }
 0xa01   : > { %v7427_v10 = vld [vmem:[#allocation3 + $0xc8] sm:$0xff] }
 0xa02   : > { %v8443_v2 = vld [vmem:[#allocation3 + $0xc8] sm:$0xff]  ;;  %v7135_v16 = vsel %vm3845_vm6, %v7133_v26, %v7134_v35  ;;  %v16426_v38 = vpack.c.bf16 %v7427_v10, %v7426_v62  ;;  %v8097_v20 = vsel %vm3652_vm5, %v8095_v60, %v8096_v32  ;;  %v18226_v26 = vld [vmem:[#allocation34_spill] sm:$0xff] }
 0xa03   : > { %v16428_v56 = vpack.c.bf16 %v8443_v2, %v8442_v61  ;;  %v7221_v5 = vadd.f32 %v7135_v16, %v16036_v27  ;;  %v16434_v4 = vadd.f32 %v8097_v20, %v7656_v12 }
 0xa04   : > { %7694 = vmatmul.bf16.gmra.mxu2 %v16426_v38  ;;  %7815 = vmatmul.bf16.gmra.mxu3 %v16426_v38 }
 0xa05   : > { %18225 = vst [vmem:[#allocation32_spill] sm:$0xff] %v16428_v56  ;;  %v7256_v55 = vadd.f32 %v16208_v17, %v7221_v5  ;;  %v6766_v44 = vpop.f32.mrf.mxu1  ;;  %v16438_v57 = vpop.f32.mrf.mxu0 }
 0xa06   : > { %v6767_v28 = vadd.f32 %v6766_v44, %v16256_v48 }
 0xa07   : > { %vm7288_vm9 = vcmp.ge.f32.partialorder %v7256_v55, 0.0  ;;  %v7320_v10 = vmul.f32 0.01, %v7256_v55  ;;  %v7661_v2 = vpop.f32.mrf.mxu2  ;;  %v7776_v27 = vpop.f32.mrf.mxu3 }
 0xa08   : > { %v7136_v61 = vrot.slane %v6767_v28, 2  ;;  %6805 = vmatmul.bf16.gmra.mxu1 %v16028_v41  ;;  %v8098_v37 = vrot.slane %v7776_v27, 1  ;;  %v11741_v28 = vld [vmem:[#allocation6 + $0x12c] sm:$0xf0]  ;;  %v8444_v27 = vld [vmem:[#allocation3 + $0xd0] sm:$0xff] }
 0xa09   : > { %v7352_v13 = vsel %vm7288_vm9, %v7256_v55, %v7320_v10  ;;  %v12092_v55 = vld [vmem:[#allocation6 + $0x124] sm:$0xf] }
 0xa0a   : > { %7385 = vst [vmem:[#allocation3 + $0xd9] sm:$0xff] %v7352_v13  ;;  %v7137_v12 = vsel %vm3845_vm6, %v7134_v35, %v7136_v61  ;;  %v8099_v62 = vsel %vm3652_vm5, %v8096_v32, %v8098_v37  ;;  %v7428_v10 = vld [vmem:[#allocation3 + $0xd0] sm:$0xff]  ;;  %v11744_v35 = vor.u32 %v12092_v55, %v11741_v28  ;;  %v12093_v37 = vld [vmem:[#allocation6 + $0x128] sm:$0xf0] }
 0xa0b   : > { %v7222_v39 = vadd.f32 %v7137_v12, %v18226_v26  ;;  %v16444_v60 = vadd.f32 %v8099_v62, %v7658_v24  ;;  %v11739_v32 = vld [vmem:[#allocation6 + $0x120] sm:$0xf] }
 0xa0c   : > { %8770 = vmatpush.bf16.msra.mxu2 %v11744_v35  ;;  %v11740_v26 = vor.u32 %v12093_v37, %v11739_v32 }
 0xa0d   : > { %v7257_v48 = vadd.f32 %v16208_v17, %v7222_v39  ;;  %v6768_v16 = vpop.f32.mrf.mxu1  ;;  %v16447_v5 = vpop.f32.mrf.mxu0 }
 0xa0e   : > { %v6769_v39 = vadd.f32 %v6768_v16, %v16269_v18  ;;  %8657 = vmatpush.bf16.msrb.mxu1 %v11740_v26 }
 0xa0f   : > { %vm7289_vm10 = vcmp.ge.f32.partialorder %v7257_v48, 0.0  ;;  %v7321_v20 = vmul.f32 0.01, %v7257_v48  ;;  %v7662_v44 = vpop.f32.mrf.mxu2  ;;  %v7778_v41 = vpop.f32.mrf.mxu3 }
 0xa10   : > { %7919 = vmatmul.bf16.gmra.mxu0 %v16330_v8  ;;  %v7138_v55 = vrot.slane %v6769_v39, 2 }
 0xa11   : > { %v7353_v2 = vsel %vm7289_vm10, %v7257_v48, %v7321_v20  ;;  %v7429_v61 = vld [vmem:[#allocation3 + $0xd8] sm:$0xff] }
 0xa12   : > { %v8445_v13 = vld [vmem:[#allocation3 + $0xd8] sm:$0xff]  ;;  %7386 = vst [vmem:[#allocation3 + $0xe1] sm:$0xff] %v7353_v2  ;;  %v16450_v24 = vpack.c.bf16 %v7429_v61, %v7428_v10  ;;  %v8100_v2 = vrot.slane %v7778_v41, 1 }
 0xa13   : > { %v16452_v12 = vpack.c.bf16 %v8445_v13, %v8444_v27 }
 0xa14   : > { %7699 = vmatmul.bf16.gmra.mxu2 %v16450_v24  ;;  %7820 = vmatmul.bf16.gmra.mxu3 %v16450_v24 }
 0xa15   : > { %18227 = vst [vmem:[#allocation30_spill] sm:$0xff] %v16452_v12  ;;  %v6771_v62 = vpop.f32.mrf.mxu1  ;;  %v16458_v8 = vpop.f32.mrf.mxu0 }
 0xa16   : > { %v6772_v48 = vadd.f32 %v6771_v62, %v16275_v6 }
 0xa17   : > { %v7665_v20 = vpop.f32.mrf.mxu2  ;;  %v7781_v10 = vpop.f32.mrf.mxu3 }
 0xa18   : > { %v7139_v28 = vrot.slane %v6772_v48, 2  ;;  %6810 = vmatmul.bf16.gmra.mxu1 %v16053_v50  ;;  %v8101_v35 = vrot.slane %v7781_v10, 1 }
 0xa19   : > { %v8446_v61 = vld [vmem:[#allocation3 + $0xe0] sm:$0xff]  ;;  %v8447_v16 = vld [vmem:[#allocation3 + $0xe8] sm:$0xff] }
 0xa1a   : > { %v7140_v18 = vsel %vm3845_vm6, %v7138_v55, %v7139_v28  ;;  %v8102_v13 = vsel %vm3652_vm5, %v8100_v2, %v8101_v35  ;;  %v16464_v32 = vpack.c.bf16 %v8447_v16, %v8446_v61  ;;  %v7430_v48 = vld [vmem:[#allocation3 + $0xe0] sm:$0xff]  ;;  %v7431_v55 = vld [vmem:[#allocation3 + $0xe8] sm:$0xff] }
 0xa1b   : > { %v7223_v27 = vadd.f32 %v7140_v18, %v16062_v51  ;;  %v16466_v6 = vadd.f32 %v8102_v13, %v7662_v44  ;;  %v16472_v2 = vpack.c.bf16 %v7431_v55, %v7430_v48  ;;  %v12090_v16 = vld [vmem:[#allocation6 + $0x110] sm:$0xf0] }
 0xa1c   : > { %18228 = vst [vmem:[#allocation28_spill] sm:$0xff] %v16464_v32 }
 0xa1d   : > { %v7258_v37 = vadd.f32 %v16208_v17, %v7223_v27  ;;  %v6773_v26 = vpop.f32.mrf.mxu1  ;;  %v7885_v50 = vpop.f32.mrf.mxu0 }
 0xa1e   : > { %v6774_v39 = vadd.f32 %v6773_v26, %v16284_v3  ;;  %v11727_v3 = vld [vmem:[#allocation6 + $0x108] sm:$0xf]  ;;  %v8277_v26 = vrot.slane %v7885_v50, 2 }
 0xa1f   : > { %vm7290_vm11 = vcmp.ge.f32.partialorder %v7258_v37, 0.0  ;;  %v7322_v41 = vmul.f32 0.01, %v7258_v37  ;;  %v7667_v62 = vpop.f32.mrf.mxu2  ;;  %v7783_v12 = vpop.f32.mrf.mxu3  ;;  %v11728_v13 = vor.u32 %v12090_v16, %v11727_v3 }
 0xa20   : > { %v7141_v10 = vrot.slane %v6774_v39, 2  ;;  %v8103_v18 = vrot.slane %v7783_v12, 1  ;;  %7924 = vmatmul.bf16.gmra.mxu0 %v16347_v11 }
 0xa21   : > { %v7354_v51 = vsel %vm7290_vm11, %v7258_v37, %v7322_v41  ;;  %8658 = vmatpush.bf16.msrb.mxu1 %v11728_v13  ;;  %v11715_v41 = vld [vmem:[#allocation6 + $0xf0] sm:$0xf]  ;;  %v12081_v13 = vld [vmem:[#allocation6 + $0xc8] sm:$0xf0] }
 0xa22   : > { %7387 = vst [vmem:[#allocation3 + $0xf1] sm:$0xff] %v7354_v51  ;;  %v7142_v44 = vsel %vm3845_vm6, %v7139_v28, %v7141_v10  ;;  %v8104_v27 = vsel %vm3652_vm5, %v8101_v35, %v8103_v18  ;;  %v12087_v35 = vld [vmem:[#allocation6 + $0xf8] sm:$0xf0]  ;;  %v12084_v51 = vld [vmem:[#allocation6 + $0xe0] sm:$0xf0] }
 0xa23   : > { %v7224_v61 = vadd.f32 %v7142_v44, %v16076_v22  ;;  %v16478_v37 = vadd.f32 %v8104_v27, %v7665_v20  ;;  %v11716_v10 = vor.u32 %v12087_v35, %v11715_v41  ;;  %v11691_v27 = vld [vmem:[#allocation6 + $0xc0] sm:$0xf] }
 0xa24   : > { %7703 = vmatmul.bf16.gmra.mxu2 %v16472_v2  ;;  %7825 = vmatmul.bf16.gmra.mxu3 %v16472_v2  ;;  %v11692_v35 = vor.u32 %v12081_v13, %v11691_v27 }
 0xa25   : > { %v7259_v11 = vadd.f32 %v16208_v17, %v7224_v61  ;;  %v6776_v12 = vpop.f32.mrf.mxu1  ;;  %v7887_v28 = vpop.f32.mrf.mxu0  ;;  %8659 = vmatpush.bf16.msrb.mxu1 %v11716_v10  ;;  %v11703_v17 = vld [vmem:[#allocation6 + $0xd8] sm:$0xf] }
 0xa26   : > { %v8278_v62 = vrot.slane %v7887_v28, 2  ;;  %v6777_v18 = vadd.f32 %v6776_v12, %v16293_v30  ;;  %v11704_v44 = vor.u32 %v12084_v51, %v11703_v17 }
 0xa27   : > { %vm7291_vm12 = vcmp.ge.f32.partialorder %v7259_v11, 0.0  ;;  %v7323_v39 = vmul.f32 0.01, %v7259_v11  ;;  %v7669_v22 = vpop.f32.mrf.mxu2  ;;  %v7786_v48 = vpop.f32.mrf.mxu3 }
 0xa28   : > { %6815 = vmatmul.bf16.gmra.mxu1 %v16066_v1  ;;  %v8279_v20 = vsel %vm3845_vm6, %v8277_v26, %v8278_v62  ;;  %v7143_v28 = vrot.slane %v6777_v18, 2 }
 0xa29   : > { %v7355_v55 = vsel %vm7291_vm12, %v7259_v11, %v7323_v39  ;;  %v16484_v50 = vadd.f32 %v8279_v20, %v16354_v9  ;;  %8660 = vmatpush.bf16.msrb.mxu1 %v11704_v44  ;;  %v7432_v41 = vld [vmem:[#allocation3 + $0xf0] sm:$0xff] }
 0xa2a   : > { %7388 = vst [vmem:[#allocation3 + $0xf9] sm:$0xff] %v7355_v55  ;;  %v8105_v55 = vrot.slane %v7786_v48, 1  ;;  %v8448_v20 = vld [vmem:[#allocation3 + $0xf0] sm:$0xff] }
 0xa2d   : > { %v6778_v61 = vpop.f32.mrf.mxu1  ;;  %v7890_v16 = vpop.f32.mrf.mxu0  ;;  %8661 = vmatpush.bf16.msrb.mxu1 %v11692_v35 }
 0xa2e   : > { %v6779_v3 = vadd.f32 %v6778_v61, %v16303_v31  ;;  %v8280_v11 = vrot.slane %v7890_v16, 2 }
 0xa2f   : > { %v7671_v1 = vpop.f32.mrf.mxu2  ;;  %v7788_v39 = vpop.f32.mrf.mxu3 }
 0xa30   : > { %v7144_v26 = vrot.slane %v6779_v3, 2  ;;  %v8106_v9 = vrot.slane %v7788_v39, 1  ;;  %7929 = vmatmul.bf16.gmra.mxu0 %v16365_v0  ;;  %v8281_v17 = vsel %vm3845_vm6, %v8278_v62, %v8280_v11  ;;  %v16507_v62 = vld [vmem:[%s17706_s7] ss:$0 sm:$0xff] }
 0xa31   : > { %v7433_v10 = vld [vmem:[#allocation3 + $0xf8] sm:$0xff]  ;;  %v16497_v44 = vadd.f32 %v8281_v17, %v16378_v21  ;;  %v7434_v17 = vld [vmem:[#allocation3 + $0x100] sm:$0xff] }
 0xa32   : > { %v8449_v30 = vld [vmem:[#allocation3 + $0xf8] sm:$0xff]  ;;  %v7145_v31 = vsel %vm3845_vm6, %v7143_v28, %v7144_v26  ;;  %v16490_v12 = vpack.c.bf16 %v7433_v10, %v7432_v41  ;;  %v8107_v48 = vsel %vm3652_vm5, %v8105_v55, %v8106_v9 }
 0xa33   : > { %v16493_v51 = vpack.c.bf16 %v8449_v30, %v8448_v20  ;;  %v7225_v18 = vadd.f32 %v7145_v31, %v16093_v42  ;;  %v16502_v0 = vadd.f32 %v8107_v48, %v7669_v22 }
 0xa34   : > { %7707 = vmatmul.bf16.gmra.mxu2 %v16490_v12  ;;  %7830 = vmatmul.bf16.gmra.mxu3 %v16490_v12 }
 0xa35   : > { %18229 = vst [vmem:[#allocation46_spill] sm:$0xff] %v16493_v51  ;;  %v7260_v61 = vadd.f32 %v16507_v62, %v7225_v18  ;;  %v6781_v42 = vpop.f32.mrf.mxu1  ;;  %v7892_v21 = vpop.f32.mrf.mxu0 }
 0xa36   : > { %v6782_v3 = vadd.f32 %v6781_v42, %v16310_v33  ;;  %v8282_v18 = vrot.slane %v7892_v21, 2  ;;  %v12089_v42 = vld [vmem:[#allocation6 + $0x10c] sm:$0xf] }
 0xa37   : > { %vm7292_vm13 = vcmp.ge.f32.partialorder %v7260_v61, 0.0  ;;  %v7324_v16 = vmul.f32 0.01, %v7260_v61  ;;  %v7674_v27 = vpop.f32.mrf.mxu2  ;;  %v7791_v11 = vpop.f32.mrf.mxu3 }
 0xa38   : > { %v7146_v13 = vrot.slane %v6782_v3, 2  ;;  %8662 = vmatmul.bf16.vlgmr.msrb.gmra.mxu1 %v16234_v15  ;;  %v8108_v28 = vrot.slane %v7791_v11, 1  ;;  %v11729_v3 = vld [vmem:[#allocation6 + $0x114] sm:$0xf0]  ;;  %v8450_v27 = vld [vmem:[#allocation3 + $0x100] sm:$0xff] }
 0xa39   : > { %v7356_v22 = vsel %vm7292_vm13, %v7260_v61, %v7324_v16  ;;  %v11732_v16 = vor.u32 %v12089_v42, %v11729_v3 }
 0xa3a   : > { %7389 = vst [vmem:[#allocation3 + $0x109] sm:$0xff] %v7356_v22  ;;  %v7147_v39 = vsel %vm3845_vm6, %v7144_v26, %v7146_v13  ;;  %v8109_v35 = vsel %vm3652_vm5, %v8106_v9, %v8108_v28 }
 0xa3b   : > { %v7226_v41 = vadd.f32 %v7147_v39, %v16100_v40  ;;  %v16515_v55 = vadd.f32 %v8109_v35, %v7671_v1  ;;  %8771 = vmatpush.bf16.msra.mxu2 %v11732_v16 }
 0xa3d   : > { %v7261_v33 = vadd.f32 %v16507_v62, %v7226_v41  ;;  %v6783_v10 = vpop.f32.mrf.mxu1  ;;  %v7895_v20 = vpop.f32.mrf.mxu0 }
 0xa3e   : > { %v8283_v48 = vrot.slane %v7895_v20, 2  ;;  %v6784_v22 = vadd.f32 %v6783_v10, %v16321_v7 }
 0xa3f   : > { %vm7293_vm14 = vcmp.ge.f32.partialorder %v7261_v33, 0.0  ;;  %v7325_v30 = vmul.f32 0.01, %v7261_v33  ;;  %v7675_v31 = vpop.f32.mrf.mxu2  ;;  %v7793_v61 = vpop.f32.mrf.mxu3 }
 0xa40   : > { %7934 = vmatmul.bf16.gmra.mxu0 %v16384_v43  ;;  %v8284_v13 = vsel %vm3845_vm6, %v8282_v18, %v8283_v48 }
 0xa41   : > { %v7357_v26 = vsel %vm7293_vm14, %v7261_v33, %v7325_v30  ;;  %v7435_v40 = vld [vmem:[#allocation3 + $0x108] sm:$0xff]  ;;  %v16525_v21 = vadd.f32 %v8284_v13, %v16400_v59  ;;  %v7148_v33 = vrot.slane %v6784_v22, 2 }
 0xa42   : > { %v8451_v9 = vld [vmem:[#allocation3 + $0x108] sm:$0xff]  ;;  %7390 = vst [vmem:[#allocation3 + $0x111] sm:$0xff] %v7357_v26  ;;  %v16519_v1 = vpack.c.bf16 %v7435_v40, %v7434_v17  ;;  %v8110_v17 = vrot.slane %v7793_v61, 1 }
 0xa43   : > { %v16522_v11 = vpack.c.bf16 %v8451_v9, %v8450_v27 }
 0xa44   : > { %7712 = vmatmul.bf16.gmra.mxu2 %v16519_v1  ;;  %7835 = vmatmul.bf16.gmra.mxu3 %v16519_v1 }
 0xa45   : > { %18230 = vst [vmem:[#allocation31_spill] sm:$0xff] %v16522_v11  ;;  %v6786_v28 = vpop.f32.mrf.mxu1  ;;  %v7897_v39 = vpop.f32.mrf.mxu0  ;;  %v11783_v11 = vld [vmem:[#allocation6 + $0x170] sm:$0xf] }
 0xa46   : > { %v6787_v43 = vadd.f32 %v6786_v28, %v16327_v53  ;;  %v8285_v35 = vrot.slane %v7897_v39, 2 }
 0xa47   : > { %v7678_v41 = vpop.f32.mrf.mxu2  ;;  %v7796_v30 = vpop.f32.mrf.mxu3 }
 0xa48   : > { %v7149_v20 = vrot.slane %v6787_v43, 2  ;;  %8667 = vmatmul.bf16.gmra.mxu1 %v16252_v29  ;;  %v8111_v59 = vrot.slane %v7796_v30, 1  ;;  %v8286_v7 = vsel %vm3845_vm6, %v8283_v48, %v8285_v35 }
 0xa49   : > { %v16537_v53 = vadd.f32 %v8286_v7, %v16414_v34  ;;  %v7436_v13 = vld [vmem:[#allocation3 + $0x110] sm:$0xff]  ;;  %v7437_v48 = vld [vmem:[#allocation3 + $0x118] sm:$0xff] }
 0xa4a   : > { %v7150_v18 = vsel %vm3845_vm6, %v7148_v33, %v7149_v20  ;;  %v8112_v42 = vsel %vm3652_vm5, %v8110_v17, %v8111_v59 }
 0xa4b   : > { %v7227_v10 = vadd.f32 %v7150_v18, %v16111_v47  ;;  %v16539_v3 = vadd.f32 %v8112_v42, %v7675_v31  ;;  %v16545_v31 = vpack.c.bf16 %v7437_v48, %v7436_v13  ;;  %v18231_v42 = vld [vmem:[#allocation61_spill] sm:$0xff] }
 0xa4d   : > { %v7262_v26 = vadd.f32 %v16507_v62, %v7227_v10  ;;  %v6788_v16 = vpop.f32.mrf.mxu1  ;;  %v7900_v61 = vpop.f32.mrf.mxu0 }
 0xa4e   : > { %v6789_v40 = vadd.f32 %v6788_v16, %v16336_v36 }
 0xa4f   : > { %vm7294_vm15 = vcmp.ge.f32.partialorder %v7262_v26, 0.0  ;;  %v7326_v27 = vmul.f32 0.01, %v7262_v26  ;;  %v7680_v9 = vpop.f32.mrf.mxu2  ;;  %v7798_v47 = vpop.f32.mrf.mxu3 }
 0xa50   : > { %v7151_v22 = vrot.slane %v6789_v40, 2  ;;  %v8113_v43 = vrot.slane %v7798_v47, 1  ;;  %7939 = vmatmul.bf16.gmra.mxu0 %v16408_v19 }
 0xa51   : > { %v7358_v28 = vsel %vm7294_vm15, %v7262_v26, %v7326_v27 }
 0xa52   : > { %7391 = vst [vmem:[#allocation3 + $0x121] sm:$0xff] %v7358_v28  ;;  %v7152_v34 = vsel %vm3845_vm6, %v7149_v20, %v7151_v22  ;;  %v8114_v36 = vsel %vm3652_vm5, %v8111_v59, %v8113_v43  ;;  %v8287_v20 = vrot.slane %v7900_v61, 2 }
 0xa53   : > { %v7228_v39 = vadd.f32 %v7152_v34, %v16120_v23  ;;  %v16551_v35 = vadd.f32 %v8114_v36, %v7678_v41 }
 0xa54   : > { %7716 = vmatmul.bf16.gmra.mxu2 %v16545_v31  ;;  %7840 = vmatmul.bf16.gmra.mxu3 %v16545_v31 }
 0xa55   : > { %v7263_v33 = vadd.f32 %v16507_v62, %v7228_v39  ;;  %v6791_v30 = vpop.f32.mrf.mxu1  ;;  %v7902_v17 = vpop.f32.mrf.mxu0  ;;  %v18232_v39 = vld [vmem:[#allocation55_spill] sm:$0xff] }
 0xa56   : > { %v8288_v7 = vrot.slane %v7902_v17, 2  ;;  %v6792_v41 = vadd.f32 %v6791_v30, %v16343_v49 }
 0xa57   : > { %vm7295_vm0 = vcmp.ge.f32.partialorder %v7263_v33, 0.0  ;;  %v7327_v19 = vmul.f32 0.01, %v7263_v33  ;;  %v7682_v18 = vpop.f32.mrf.mxu2  ;;  %v7801_v10 = vpop.f32.mrf.mxu3 }
 0xa58   : > { %8671 = vmatmul.bf16.gmra.mxu1 %v18231_v42  ;;  %v8289_v59 = vsel %vm3845_vm6, %v8287_v20, %v8288_v7  ;;  %v7153_v61 = vrot.slane %v6792_v41, 2  ;;  %v8115_v47 = vrot.slane %v7801_v10, 1 }
 0xa59   : > { %v7359_v23 = vsel %vm7295_vm0, %v7263_v33, %v7327_v19  ;;  %v16557_v26 = vadd.f32 %v8289_v59, %v16434_v4  ;;  %v16561_v43 = vld [vmem:[#allocation3 + $0x120] sm:$0xff] }
 0xa5a   : > { %7392 = vst [vmem:[#allocation3 + $0x129] sm:$0xff] %v7359_v23 }
 0xa5d   : > { %v6793_v16 = vpop.f32.mrf.mxu1  ;;  %v7905_v27 = vpop.f32.mrf.mxu0 }
 0xa5e   : > { %v6794_v40 = vadd.f32 %v6793_v16, %v16356_v58  ;;  %v8290_v13 = vrot.slane %v7905_v27, 2 }
 0xa5f   : > { %v7684_v9 = vpop.f32.mrf.mxu2  ;;  %v7803_v22 = vpop.f32.mrf.mxu3 }
 0xa60   : > { %v7154_v48 = vrot.slane %v6794_v40, 2  ;;  %v8116_v28 = vrot.slane %v7803_v22, 1  ;;  %7944 = vmatmul.bf16.gmra.mxu0 %v16426_v38  ;;  %v8291_v58 = vsel %vm3845_vm6, %v8288_v7, %v8290_v13 }
 0xa61   : > { %v7439_v34 = vld [vmem:[#allocation3 + $0x128] sm:$0xff]  ;;  %v16571_v33 = vadd.f32 %v8291_v58, %v16444_v60 }
 0xa62   : > { %v7155_v4 = vsel %vm3845_vm6, %v7153_v61, %v7154_v48  ;;  %v16566_v49 = vpack.c.bf16 %v7439_v34, %v16561_v43  ;;  %v8117_v30 = vsel %vm3652_vm5, %v8115_v47, %v8116_v28 }
 0xa63   : > { %v7229_v36 = vadd.f32 %v7155_v4, %v18232_v39  ;;  %v16576_v17 = vadd.f32 %v8117_v30, %v7682_v18  ;;  %v18233_v18 = vld [vmem:[#allocation57_spill] sm:$0xff]  ;;  %v12086_v30 = vld [vmem:[#allocation6 + $0xf4] sm:$0xf] }
 0xa64   : > { %7720 = vmatmul.bf16.gmra.mxu2 %v16566_v49  ;;  %7845 = vmatmul.bf16.gmra.mxu3 %v16566_v49 }
 0xa65   : > { %v7264_v38 = vadd.f32 %v16507_v62, %v7229_v36  ;;  %v6796_v19 = vpop.f32.mrf.mxu1  ;;  %v7907_v10 = vpop.f32.mrf.mxu0 }
 0xa66   : > { %v6797_v20 = vadd.f32 %v6796_v19, %v16361_v52  ;;  %v8292_v58 = vrot.slane %v7907_v10, 2 }
 0xa67   : > { %vm7296_vm1 = vcmp.ge.f32.partialorder %v7264_v38, 0.0  ;;  %v7328_v7 = vmul.f32 0.01, %v7264_v38  ;;  %v7687_v23 = vpop.f32.mrf.mxu2  ;;  %v7806_v60 = vpop.f32.mrf.mxu3 }
 0xa68   : > { %v7156_v59 = vrot.slane %v6797_v20, 2  ;;  %8675 = vmatmul.bf16.gmra.mxu1 %v16288_v45  ;;  %v8118_v16 = vrot.slane %v7806_v60, 1  ;;  %v16587_v20 = vld [vmem:[#allocation3 + $0x130] sm:$0xff] }
 0xa69   : > { %v7360_v41 = vsel %vm7296_vm1, %v7264_v38, %v7328_v7  ;;  %v11717_v38 = vld [vmem:[#allocation6 + $0xfc] sm:$0xf0] }
 0xa6a   : > { %7393 = vst [vmem:[#allocation3 + $0x139] sm:$0xff] %v7360_v41  ;;  %v7157_v40 = vsel %vm3845_vm6, %v7154_v48, %v7156_v59  ;;  %v8119_v13 = vsel %vm3652_vm5, %v8116_v28, %v8118_v16  ;;  %v11720_v48 = vor.u32 %v12086_v30, %v11717_v38 }
 0xa6b   : > { %v7230_v27 = vadd.f32 %v7157_v40, %v18233_v18  ;;  %v16584_v61 = vadd.f32 %v8119_v13, %v7684_v9 }
 0xa6c   : > { %8772 = vmatpush.bf16.msra.mxu2 %v11720_v48 }
 0xa6d   : > { %v7265_v52 = vadd.f32 %v16507_v62, %v7230_v27  ;;  %v6798_v22 = vpop.f32.mrf.mxu1  ;;  %v7910_v47 = vpop.f32.mrf.mxu0 }
 0xa6e   : > { %v8293_v39 = vrot.slane %v7910_v47, 2  ;;  %v6799_v23 = vadd.f32 %v6798_v22, %v16372_v14  ;;  %v18234_v22 = vld [vmem:[#allocation24_spill] sm:$0xff] }
 0xa6f   : > { %vm7297_vm2 = vcmp.ge.f32.partialorder %v7265_v52, 0.0  ;;  %v7329_v34 = vmul.f32 0.01, %v7265_v52  ;;  %v7688_v4 = vpop.f32.mrf.mxu2  ;;  %v7808_v36 = vpop.f32.mrf.mxu3 }
 0xa70   : > { %7949 = vmatmul.bf16.gmra.mxu0 %v16450_v24  ;;  %v8294_v28 = vsel %vm3845_vm6, %v8292_v58, %v8293_v39  ;;  %v7158_v40 = vrot.slane %v6799_v23, 2  ;;  %v8120_v13 = vrot.slane %v7808_v36, 1 }
 0xa71   : > { %v7361_v19 = vsel %vm7297_vm2, %v7265_v52, %v7329_v34  ;;  %v7441_v7 = vld [vmem:[#allocation3 + $0x138] sm:$0xff]  ;;  %v16595_v10 = vadd.f32 %v8294_v28, %v16466_v6 }
 0xa72   : > { %7394 = vst [vmem:[#allocation3 + $0x141] sm:$0xff] %v7361_v19  ;;  %v16591_v9 = vpack.c.bf16 %v7441_v7, %v16587_v20 }
 0xa74   : > { %7725 = vmatmul.bf16.gmra.mxu2 %v16591_v9  ;;  %7850 = vmatmul.bf16.gmra.mxu3 %v16591_v9 }
 0xa75   : > { %v6801_v59 = vpop.f32.mrf.mxu1  ;;  %v7912_v24 = vpop.f32.mrf.mxu0 }
 0xa76   : > { %v6802_v60 = vadd.f32 %v6801_v59, %v16381_v54  ;;  %v8295_v16 = vrot.slane %v7912_v24, 2 }
 0xa77   : > { %v7691_v41 = vpop.f32.mrf.mxu2  ;;  %v7811_v27 = vpop.f32.mrf.mxu3 }
 0xa78   : > { %v7159_v18 = vrot.slane %v6802_v60, 2  ;;  %8680 = vmatmul.bf16.gmra.mxu1 %v16306_v46  ;;  %v8121_v6 = vrot.slane %v7811_v27, 1  ;;  %v8296_v14 = vsel %vm3845_vm6, %v8293_v39, %v8295_v16 }
 0xa79   : > { %v16607_v54 = vadd.f32 %v8296_v14, %v16478_v37  ;;  %v16613_v28 = vld [vmem:[#allocation3 + $0x140] sm:$0xff]  ;;  %v7443_v39 = vld [vmem:[#allocation3 + $0x148] sm:$0xff]  ;;  %v12352_v14 = vld [vmem:[#allocation3 + $0x70] sm:$0xff] }
 0xa7a   : > { %v7160_v52 = vsel %vm3845_vm6, %v7158_v40, %v7159_v18  ;;  %v8122_v34 = vsel %vm3652_vm5, %v8120_v13, %v8121_v6  ;;  %v16621_v40 = vld [vmem:[#allocation3 + $0x68] sm:$0xff] }
 0xa7b   : > { %v7231_v47 = vadd.f32 %v7160_v52, %v18234_v22  ;;  %v16609_v58 = vadd.f32 %v8122_v34, %v7688_v4  ;;  %v16618_v4 = vpack.c.bf16 %v7443_v39, %v16613_v28 }
 0xa7d   : > { %v7266_v30 = vadd.f32 %v16507_v62, %v7231_v47  ;;  %v6803_v38 = vpop.f32.mrf.mxu1  ;;  %v7915_v36 = vpop.f32.mrf.mxu0 }
 0xa7e   : > { %v6804_v19 = vadd.f32 %v6803_v38, %v16392_v25  ;;  %v18235_v25 = vld [vmem:[#allocation58_spill] sm:$0xff] }
 0xa7f   : > { %vm7298_vm3 = vcmp.ge.f32.partialorder %v7266_v30, 0.0  ;;  %v7330_v48 = vmul.f32 0.01, %v7266_v30  ;;  %v7693_v7 = vpop.f32.mrf.mxu2  ;;  %v7813_v59 = vpop.f32.mrf.mxu3 }
 0xa80   : > { %v7161_v23 = vrot.slane %v6804_v19, 2  ;;  %v8123_v24 = vrot.slane %v7813_v59, 1  ;;  %7954 = vmatmul.bf16.gmra.mxu0 %v16472_v2  ;;  %v18236_v7 = vld [vmem:[#allocation27_spill] sm:$0xff]  ;;  %v18237_v59 = vld [vmem:[#allocation64_spill] sm:$0xff] }
 0xa81   : > { %v7362_v60 = vsel %vm7298_vm3, %v7266_v30, %v7330_v48  ;;  %v8297_v30 = vrot.slane %v7915_v36, 2 }
 0xa82   : > { %7395 = vst [vmem:[#allocation3 + $0x151] sm:$0xff] %v7362_v60  ;;  %v7162_v37 = vsel %vm3845_vm6, %v7159_v18, %v7161_v23  ;;  %v8124_v27 = vsel %vm3652_vm5, %v8121_v6, %v8123_v24  ;;  %v16630_v18 = vpack.c.bf16 %v12352_v14, %v16621_v40 }
 0xa83   : > { %v7232_v16 = vadd.f32 %v7162_v37, %v18235_v25  ;;  %v16626_v13 = vadd.f32 %v8124_v27, %v7691_v41 }
 0xa84   : > { %7729 = vmatmul.bf16.gmra.mxu2 %v16618_v4  ;;  %7855 = vmatmul.bf16.gmra.mxu3 %v16618_v4 }
 0xa85   : > { %v7267_v2 = vadd.f32 %v16507_v62, %v7232_v16  ;;  %v6806_v52 = vpop.f32.mrf.mxu1  ;;  %v7917_v22 = vpop.f32.mrf.mxu0 }
 0xa86   : > { %v8298_v38 = vrot.slane %v7917_v22, 2  ;;  %v6807_v39 = vadd.f32 %v6806_v52, %v18236_v7 }
 0xa87   : > { %vm7299_vm4 = vcmp.ge.f32.partialorder %v7267_v2, 0.0  ;;  %v7331_v47 = vmul.f32 0.01, %v7267_v2  ;;  %v7695_v34 = vpop.f32.mrf.mxu2  ;;  %v7816_v6 = vpop.f32.mrf.mxu3 }
 0xa88   : > { %8684 = vmatmul.bf16.gmra.mxu1 %v16630_v18  ;;  %v8299_v41 = vsel %vm3845_vm6, %v8297_v30, %v8298_v38  ;;  %v7163_v36 = vrot.slane %v6807_v39, 2  ;;  %v8125_v14 = vrot.slane %v7816_v6, 1 }
 0xa89   : > { %v7363_v19 = vsel %vm7299_vm4, %v7267_v2, %v7331_v47  ;;  %v16635_v48 = vadd.f32 %v8299_v41, %v16502_v0  ;;  %v16639_v2 = vld [vmem:[#allocation3 + $0x150] sm:$0xff] }
 0xa8a   : > { %7396 = vst [vmem:[#allocation3 + $0x159] sm:$0xff] %v7363_v19  ;;  %v18238_v19 = vld [vmem:[#allocation26_spill] sm:$0xff] }
 0xa8d   : > { %v6808_v23 = vpop.f32.mrf.mxu1  ;;  %v7920_v24 = vpop.f32.mrf.mxu0 }
 0xa8e   : > { %v6809_v60 = vadd.f32 %v6808_v23, %v18237_v59  ;;  %v8300_v25 = vrot.slane %v7920_v24, 2  ;;  %v16657_v59 = vld [vmem:[#allocation3 + $0x78] sm:$0xff] }
 0xa8f   : > { %v7697_v37 = vpop.f32.mrf.mxu2  ;;  %v7818_v27 = vpop.f32.mrf.mxu3 }
 0xa90   : > { %v7164_v16 = vrot.slane %v6809_v60, 2  ;;  %v8126_v22 = vrot.slane %v7818_v27, 1  ;;  %7959 = vmatmul.bf16.gmra.mxu0 %v16490_v12  ;;  %v8301_v30 = vsel %vm3845_vm6, %v8298_v38, %v8300_v25  ;;  %v12353_v60 = vld [vmem:[#allocation3 + $0x80] sm:$0xff] }
 0xa91   : > { %v7445_v47 = vld [vmem:[#allocation3 + $0x158] sm:$0xff]  ;;  %v16649_v7 = vadd.f32 %v8301_v30, %v16515_v55  ;;  %v16661_v24 = vpack.c.bf16 %v12353_v60, %v16657_v59 }
 0xa92   : > { %v7165_v0 = vsel %vm3845_vm6, %v7163_v36, %v7164_v16  ;;  %v16644_v52 = vpack.c.bf16 %v7445_v47, %v16639_v2  ;;  %v8127_v6 = vsel %vm3652_vm5, %v8125_v14, %v8126_v22  ;;  %v18239_v30 = vld [vmem:[#allocation59_spill] sm:$0xff] }
 0xa93   : > { %v7233_v41 = vadd.f32 %v7165_v0, %v18238_v19  ;;  %v16654_v39 = vadd.f32 %v8127_v6, %v7695_v34 }
 0xa94   : > { %7733 = vmatmul.bf16.gmra.mxu2 %v16644_v52  ;;  %7860 = vmatmul.bf16.gmra.mxu3 %v16644_v52 }
 0xa95   : > { %v7268_v12 = vadd.f32 %v16507_v62, %v7233_v41  ;;  %v6811_v23 = vpop.f32.mrf.mxu1  ;;  %v7922_v55 = vpop.f32.mrf.mxu0 }
 0xa96   : > { %v6812_v38 = vadd.f32 %v6811_v23, %v16422_v63  ;;  %v8302_v51 = vrot.slane %v7922_v55, 2  ;;  %v11771_v55 = vld [vmem:[#allocation6 + $0x158] sm:$0xf] }
 0xa97   : > { %vm7300_vm7 = vcmp.ge.f32.partialorder %v7268_v12, 0.0  ;;  %v7332_v25 = vmul.f32 0.01, %v7268_v12  ;;  %v7700_v36 = vpop.f32.mrf.mxu2  ;;  %v7821_v14 = vpop.f32.mrf.mxu3 }
 0xa98   : > { %v7166_v27 = vrot.slane %v6812_v38, 2  ;;  %8688 = vmatmul.bf16.gmra.mxu1 %v16661_v24  ;;  %v8128_v47 = vrot.slane %v7821_v14, 1  ;;  %v12083_v14 = vld [vmem:[#allocation6 + $0xdc] sm:$0xf] }
 0xa99   : > { %v7364_v34 = vsel %vm7300_vm7, %v7268_v12, %v7332_v25 }
 0xa9a   : > { %7397 = vst [vmem:[#allocation3 + $0x169] sm:$0xff] %v7364_v34  ;;  %v7167_v0 = vsel %vm3845_vm6, %v7164_v16, %v7166_v27  ;;  %v8129_v63 = vsel %vm3652_vm5, %v8126_v22, %v8128_v47  ;;  %v11705_v34 = vld [vmem:[#allocation6 + $0xe4] sm:$0xf0] }
 0xa9b   : > { %v7234_v19 = vadd.f32 %v7167_v0, %v18239_v30  ;;  %v16667_v41 = vadd.f32 %v8129_v63, %v7697_v37  ;;  %v11708_v27 = vor.u32 %v12083_v14, %v11705_v34  ;;  %v16670_v0 = vld [vmem:[#allocation3 + $0x160] sm:$0xff]  ;;  %v12103_v37 = vld [vmem:[#allocation6 + $0x178] sm:$0xf0]  ;;  %v12100_v63 = vld [vmem:[#allocation6 + $0x160] sm:$0xf0] }
 0xa9c   : > { %18240 = vst [vmem:[#allocation13_spill] sm:$0xff] %v16670_v0  ;;  %v11784_v30 = vor.u32 %v12103_v37, %v11783_v11  ;;  %v11772_v14 = vor.u32 %v12100_v63, %v11771_v55 }
 0xa9d   : > { %v7269_v6 = vadd.f32 %v16507_v62, %v7234_v19  ;;  %v6813_v23 = vpop.f32.mrf.mxu1  ;;  %v7925_v60 = vpop.f32.mrf.mxu0  ;;  %8773 = vmatpush.bf16.msra.mxu2 %v11708_v27  ;;  %v11759_v27 = vld [vmem:[#allocation6 + $0x140] sm:$0xf] }
 0xa9e   : > { %v8303_v12 = vrot.slane %v7925_v60, 2  ;;  %8896 = vmatpush.bf16.msrb.mxu3 %v11784_v30 }
 0xa9f   : > { %vm7301_vm8 = vcmp.ge.f32.partialorder %v7269_v6, 0.0  ;;  %v7333_v38 = vmul.f32 0.01, %v7269_v6  ;;  %v7701_v36 = vpop.f32.mrf.mxu2  ;;  %v7823_v25 = vpop.f32.mrf.mxu3 }
 0xaa0   : > { %7964 = vmatmul.bf16.gmra.mxu0 %v16519_v1  ;;  %v8304_v19 = vsel %vm3845_vm6, %v8302_v51, %v8303_v12  ;;  %v12354_v51 = vld [vmem:[#allocation3 + $0x90] sm:$0xff]  ;;  %v8130_v30 = vrot.slane %v7823_v25, 1 }
 0xaa1   : > { %v7365_v16 = vsel %vm7301_vm8, %v7269_v6, %v7333_v38  ;;  %v7447_v22 = vld [vmem:[#allocation3 + $0x168] sm:$0xff]  ;;  %v16678_v60 = vadd.f32 %v8304_v19, %v16539_v3  ;;  %v6814_v6 = vadd.f32 %v6813_v23, %v16438_v57 }
 0xaa2   : > { %7398 = vst [vmem:[#allocation3 + $0x171] sm:$0xff] %v7365_v16  ;;  %v16674_v47 = vpack.c.bf16 %v7447_v22, %v16670_v0  ;;  %v16683_v38 = vld [vmem:[#allocation3 + $0x88] sm:$0xff]  ;;  %v12097_v22 = vld [vmem:[#allocation6 + $0x148] sm:$0xf0]  ;;  %8897 = vmatpush.bf16.msrb.mxu3 %v11772_v14  ;;  %v11747_v0 = vld [vmem:[#allocation6 + $0x128] sm:$0xf] }
 0xaa3   : > { %18241 = vst [vmem:[#allocation14_spill] sm:$0xff] %v16683_v38  ;;  %v16687_v34 = vpack.c.bf16 %v12354_v51, %v16683_v38  ;;  %v7168_v23 = vrot.slane %v6814_v6, 2  ;;  %v11760_v55 = vor.u32 %v12097_v22, %v11759_v27  ;;  %v12094_v38 = vld [vmem:[#allocation6 + $0x130] sm:$0xf0] }
 0xaa4   : > { %7738 = vmatmul.bf16.gmra.mxu2 %v16674_v47  ;;  %7865 = vmatmul.bf16.gmra.mxu3 %v16674_v47  ;;  %v11748_v14 = vor.u32 %v12094_v38, %v11747_v0  ;;  %v18244_v38 = vld [vmem:[#allocation62_spill] sm:$0xff] }
 0xaa5   : > { %v6816_v1 = vpop.f32.mrf.mxu1  ;;  %v7927_v16 = vpop.f32.mrf.mxu0 }
 0xaa6   : > { %v6817_v11 = vadd.f32 %v6816_v1, %v16447_v5  ;;  %v8305_v57 = vrot.slane %v7927_v16, 2  ;;  %v18242_v1 = vld [vmem:[#allocation60_spill] sm:$0xff]  ;;  %8898 = vmatpush.bf16.msrb.mxu3 %v11760_v55 }
 0xaa7   : > { %v7704_v3 = vpop.f32.mrf.mxu2  ;;  %v7826_v19 = vpop.f32.mrf.mxu3 }
 0xaa8   : > { %v7169_v37 = vrot.slane %v6817_v11, 2  ;;  %8693 = vmatmul.bf16.gmra.mxu1 %v16687_v34  ;;  %v8131_v32 = vrot.slane %v7826_v19, 1  ;;  %v8306_v63 = vsel %vm3845_vm6, %v8303_v12, %v8305_v57 }
 0xaa9   : > { %v16695_v6 = vadd.f32 %v8306_v63, %v16551_v35  ;;  %v16701_v22 = vld [vmem:[#allocation3 + $0x170] sm:$0xff]  ;;  %v16703_v19 = vld [vmem:[#allocation3 + $0x178] sm:$0xff] }
 0xaaa   : > { %v7170_v5 = vsel %vm3845_vm6, %v7168_v23, %v7169_v37  ;;  %v8132_v56 = vsel %vm3652_vm5, %v8130_v30, %v8131_v32  ;;  %18243 = vst [vmem:[#allocation11_spill] sm:$0xff] %v16703_v19  ;;  %v11735_v30 = vld [vmem:[#allocation6 + $0x110] sm:$0xf]  ;;  %8899 = vmatpush.bf16.msrb.mxu3 %v11748_v14  ;;  %v16709_v0 = vpack.c.bf16 %v16703_v19, %v16701_v22 }
 0xaab   : > { %v7235_v51 = vadd.f32 %v7170_v5, %v18242_v1  ;;  %v16697_v11 = vadd.f32 %v8132_v56, %v7701_v36  ;;  %v12091_v56 = vld [vmem:[#allocation6 + $0x118] sm:$0xf0] }
 0xaac   : > { %v11736_v1 = vor.u32 %v12091_v56, %v11735_v30  ;;  %v12355_v30 = vld [vmem:[#allocation3 + $0xa0] sm:$0xff] }
 0xaad   : > { %v7270_v25 = vadd.f32 %v16507_v62, %v7235_v51  ;;  %v6818_v16 = vpop.f32.mrf.mxu1  ;;  %v7930_v12 = vpop.f32.mrf.mxu0  ;;  %v16712_v51 = vld [vmem:[#allocation3 + $0x98] sm:$0xff] }
 0xaae   : > { %v6819_v27 = vadd.f32 %v6818_v16, %v16458_v8  ;;  %v11723_v16 = vld [vmem:[#allocation6 + $0xf8] sm:$0xf]  ;;  %8900 = vmatpush.bf16.msrb.mxu3 %v11736_v1 }
 0xaaf   : > { %vm7302_vm9 = vcmp.ge.f32.partialorder %v7270_v25, 0.0  ;;  %v7334_v57 = vmul.f32 0.01, %v7270_v25  ;;  %v7706_v23 = vpop.f32.mrf.mxu2  ;;  %v7828_v5 = vpop.f32.mrf.mxu3 }
 0xab0   : > { %v7171_v35 = vrot.slane %v6819_v27, 2  ;;  %v8133_v63 = vrot.slane %v7828_v5, 1  ;;  %7969 = vmatmul.bf16.gmra.mxu0 %v16545_v31  ;;  %v12088_v27 = vld [vmem:[#allocation6 + $0x100] sm:$0xf0] }
 0xab1   : > { %v7366_v36 = vsel %vm7302_vm9, %v7270_v25, %v7334_v57  ;;  %v11724_v57 = vor.u32 %v12088_v27, %v11723_v16  ;;  %v11693_v16 = vld [vmem:[#allocation6 + $0xcc] sm:$0xf0]  ;;  %v11699_v27 = vld [vmem:[#allocation6 + $0xc8] sm:$0xf] }
 0xab2   : > { %7399 = vst [vmem:[#allocation3 + $0x181] sm:$0xff] %v7366_v36  ;;  %v7172_v8 = vsel %vm3845_vm6, %v7169_v37, %v7171_v35  ;;  %v8134_v25 = vsel %vm3652_vm5, %v8131_v32, %v8133_v63  ;;  %v16724_v35 = vpack.c.bf16 %v12355_v30, %v16712_v51  ;;  %v11711_v36 = vld [vmem:[#allocation6 + $0xe0] sm:$0xf]  ;;  %v8307_v63 = vrot.slane %v7930_v12, 2  ;;  %v12082_v30 = vld [vmem:[#allocation6 + $0xd0] sm:$0xf0] }
 0xab3   : > { %v7236_v55 = vadd.f32 %v7172_v8, %v18244_v38  ;;  %v16717_v31 = vadd.f32 %v8134_v25, %v7704_v3  ;;  %8901 = vmatpush.bf16.msrb.mxu3 %v11724_v57 }
 0xab4   : > { %7742 = vmatmul.bf16.gmra.mxu2 %v16709_v0  ;;  %7870 = vmatmul.bf16.gmra.mxu3 %v16709_v0 }
 0xab5   : > { %v7271_v37 = vadd.f32 %v16507_v62, %v7236_v55  ;;  %v8663_v14 = vpop.f32.mrf.mxu1  ;;  %v7932_v5 = vpop.f32.mrf.mxu0  ;;  %v12085_v62 = vld [vmem:[#allocation6 + $0xe8] sm:$0xf0]  ;;  %v12080_v55 = vld [vmem:[#allocation6 + $0xc4] sm:$0xf] }
 0xab6   : > { %v16721_v23 = vadd.f32 %v8663_v14, %v16484_v50  ;;  %v8308_v3 = vrot.slane %v7932_v5, 2  ;;  %v11712_v38 = vor.u32 %v12085_v62, %v11711_v36  ;;  %v11696_v14 = vor.u32 %v12080_v55, %v11693_v16 }
 0xab7   : > { %vm7303_vm10 = vcmp.ge.f32.partialorder %v7271_v37, 0.0  ;;  %v7335_v32 = vmul.f32 0.01, %v7271_v37  ;;  %v7708_v56 = vpop.f32.mrf.mxu2  ;;  %v7831_v8 = vpop.f32.mrf.mxu3  ;;  %v11700_v5 = vor.u32 %v12082_v30, %v11699_v27  ;;  %v12356_v27 = vld [vmem:[#allocation3 + $0xa8] sm:$0xff] }
 0xab8   : > { %8697 = vmatmul.bf16.gmra.mxu1 %v16724_v35  ;;  %v8309_v50 = vsel %vm3845_vm6, %v8307_v63, %v8308_v3  ;;  %8902 = vmatpush.bf16.msrb.mxu3 %v11712_v38  ;;  %v8135_v63 = vrot.slane %v7831_v8, 1 }
 0xab9   : > { %v7367_v1 = vsel %vm7303_vm10, %v7271_v37, %v7335_v32  ;;  %v16729_v25 = vadd.f32 %v8309_v50, %v16576_v17  ;;  %8774 = vmatpush.bf16.msra.mxu2 %v11696_v14 }
 0xaba   : > { %7400 = vst [vmem:[#allocation3 + $0x189] sm:$0xff] %v7367_v1  ;;  %v16734_v1 = vld [vmem:[#allocation3 + $0x180] sm:$0xff] }
 0xabb   : > { %18245 = vst [vmem:[#allocation37_spill] sm:$0xff] %v16734_v1 }
 0xabc   : > { %8903 = vmatpush.bf16.msrb.mxu3 %v11700_v5 }
 0xabd   : > { %v8665_v12 = vpop.f32.mrf.mxu1  ;;  %v7935_v37 = vpop.f32.mrf.mxu0 }
 0xabe   : > { %v16732_v19 = vadd.f32 %v8665_v12, %v16497_v44  ;;  %v8310_v32 = vrot.slane %v7935_v37, 2 }
 0xabf   : > { %v7710_v57 = vpop.f32.mrf.mxu2  ;;  %v7833_v36 = vpop.f32.mrf.mxu3 }
 0xac0   : > { %v8136_v62 = vrot.slane %v7833_v36, 1  ;;  %7974 = vmatmul.bf16.gmra.mxu0 %v16566_v49  ;;  %v8311_v38 = vsel %vm3845_vm6, %v8308_v3, %v8310_v32  ;;  %v12357_v49 = vld [vmem:[#allocation3 + $0xb0] sm:$0xff] }
 0xac1   : > { %v16736_v17 = vld [vmem:[#allocation3 + $0x188] sm:$0xff]  ;;  %v16745_v50 = vadd.f32 %v8311_v38, %v16584_v61  ;;  %v16752_v14 = vpack.c.bf16 %v12357_v49, %v12356_v27  ;;  %v12359_v49 = vld [vmem:[#allocation3 + $0xc0] sm:$0xff] }
 0xac2   : > { %18246 = vst [vmem:[#allocation35_spill] sm:$0xff] %v16736_v17  ;;  %v16742_v44 = vpack.c.bf16 %v16736_v17, %v16734_v1  ;;  %v8137_v55 = vsel %vm3652_vm5, %v8135_v63, %v8136_v62 }
 0xac3   : > { %v16750_v8 = vadd.f32 %v8137_v55, %v7708_v56 }
 0xac4   : > { %18247 = vst [vmem:[#allocation23_spill] sm:$0xff] %v16742_v44  ;;  %8775 = vmatmul.bf16.vlgmr.msra.gmra.mxu2 %v16234_v15  ;;  %8904 = vmatmul.bf16.vlgmr.msrb.gmra.mxu3 %v16234_v15 }
 0xac5   : > { %v8668_v16 = vpop.f32.mrf.mxu1  ;;  %v7937_v3 = vpop.f32.mrf.mxu0 }
 0xac6   : > { %v8312_v63 = vrot.slane %v7937_v3, 2 }
 0xac7   : > { %v7713_v30 = vpop.f32.mrf.mxu2  ;;  %v7836_v12 = vpop.f32.mrf.mxu3 }
 0xac8   : > { %8701 = vmatmul.bf16.gmra.mxu1 %v16752_v14  ;;  %v8138_v61 = vrot.slane %v7836_v12, 1 }
 0xaca   : > { %v8139_v5 = vsel %vm3652_vm5, %v8136_v62, %v8138_v61  ;;  %v12358_v62 = vld [vmem:[#allocation3 + $0xb8] sm:$0xff] }
 0xacb   : > { %v16756_v37 = vadd.f32 %v8139_v5, %v7710_v57  ;;  %v16771_v3 = vpack.c.bf16 %v12359_v49, %v12358_v62  ;;  %v11871_v49 = vld [vmem:[#allocation6 + $0x228] sm:$0xf] }
 0xacd   : > { %v8669_v32 = vpop.f32.mrf.mxu1  ;;  %v7940_v56 = vpop.f32.mrf.mxu0 }
 0xace   : > { %v16759_v15 = vadd.f32 %v8669_v32, %v16525_v21  ;;  %v8313_v38 = vrot.slane %v7940_v56, 2 }
 0xacf   : > { %v7714_v36 = vpop.f32.mrf.mxu2  ;;  %v7838_v55 = vpop.f32.mrf.mxu3 }
 0xad0   : > { %7979 = vmatmul.bf16.gmra.mxu0 %v16591_v9  ;;  %v8314_v16 = vsel %vm3845_vm6, %v8312_v63, %v8313_v38 }
 0xad1   : > { %v16764_v27 = vadd.f32 %v8314_v16, %v16609_v58  ;;  %v8140_v58 = vrot.slane %v7838_v55, 1 }
 0xad4   : > { %8780 = vmatmul.bf16.gmra.mxu2 %v16252_v29  ;;  %8909 = vmatmul.bf16.gmra.mxu3 %v16252_v29 }
 0xad5   : > { %v8672_v57 = vpop.f32.mrf.mxu1  ;;  %v7942_v30 = vpop.f32.mrf.mxu0 }
 0xad6   : > { %v16769_v21 = vadd.f32 %v8672_v57, %v16537_v53  ;;  %v8315_v9 = vrot.slane %v7942_v30, 2  ;;  %v12126_v30 = vld [vmem:[#allocation6 + $0x230] sm:$0xf0] }
 0xad7   : > { %v7717_v12 = vpop.f32.mrf.mxu2  ;;  %v7841_v61 = vpop.f32.mrf.mxu3  ;;  %v11872_v17 = vor.u32 %v12126_v30, %v11871_v49  ;;  %v11835_v30 = vld [vmem:[#allocation6 + $0x1e0] sm:$0xf] }
 0xad8   : > { %8706 = vmatmul.bf16.gmra.mxu1 %v16771_v3  ;;  %v8141_v5 = vrot.slane %v7841_v61, 1  ;;  %v8316_v32 = vsel %vm3845_vm6, %v8313_v38, %v8315_v9 }
 0xad9   : > { %v16777_v56 = vadd.f32 %v8316_v32, %v16626_v13  ;;  %9675 = vmatpush.bf16.msra.mxu0 %v11872_v17  ;;  %v11859_v13 = vld [vmem:[#allocation6 + $0x210] sm:$0xf]  ;;  %v12360_v32 = vld [vmem:[#allocation3 + $0xc8] sm:$0xff] }
 0xada   : > { %v8142_v29 = vsel %vm3652_vm5, %v8140_v58, %v8141_v5 }
 0xadb   : > { %v16779_v53 = vadd.f32 %v8142_v29, %v7714_v36  ;;  %v12123_v36 = vld [vmem:[#allocation6 + $0x218] sm:$0xf0]  ;;  %v12361_v29 = vld [vmem:[#allocation3 + $0xd0] sm:$0xff] }
 0xadc   : > { %v11860_v61 = vor.u32 %v12123_v36, %v11859_v13 }
 0xadd   : > { %v8674_v63 = vpop.f32.mrf.mxu1  ;;  %v7945_v16 = vpop.f32.mrf.mxu0 }
 0xade   : > { %v16790_v63 = vpack.c.bf16 %v12361_v29, %v12360_v32  ;;  %9676 = vmatpush.bf16.msra.mxu0 %v11860_v61 }
 0xadf   : > { %v7719_v57 = vpop.f32.mrf.mxu2  ;;  %v7843_v62 = vpop.f32.mrf.mxu3 }
 0xae0   : > { %v8143_v44 = vrot.slane %v7843_v62, 1  ;;  %7984 = vmatmul.bf16.gmra.mxu0 %v16618_v4 }
 0xae2   : > { %v8144_v38 = vsel %vm3652_vm5, %v8141_v5, %v8143_v44  ;;  %v8317_v44 = vrot.slane %v7945_v16, 2 }
 0xae3   : > { %v16785_v55 = vadd.f32 %v8144_v38, %v7717_v12  ;;  %v12120_v12 = vld [vmem:[#allocation6 + $0x200] sm:$0xf0]  ;;  %v12117_v38 = vld [vmem:[#allocation6 + $0x1e8] sm:$0xf0] }
 0xae4   : > { %8785 = vmatmul.bf16.gmra.mxu2 %v18231_v42  ;;  %8914 = vmatmul.bf16.gmra.mxu3 %v18231_v42  ;;  %v11847_v42 = vld [vmem:[#allocation6 + $0x1f8] sm:$0xf]  ;;  %v11836_v36 = vor.u32 %v12117_v38, %v11835_v30  ;;  %v11811_v30 = vld [vmem:[#allocation6 + $0x1b0] sm:$0xf]  ;;  %v12111_v38 = vld [vmem:[#allocation6 + $0x1b8] sm:$0xf0] }
 0xae5   : > { %v8676_v9 = vpop.f32.mrf.mxu1  ;;  %v7947_v4 = vpop.f32.mrf.mxu0  ;;  %v11848_v62 = vor.u32 %v12120_v12, %v11847_v42  ;;  %v12114_v42 = vld [vmem:[#allocation6 + $0x1d0] sm:$0xf0] }
 0xae6   : > { %v16788_v58 = vadd.f32 %v8676_v9, %v16557_v26  ;;  %v8318_v5 = vrot.slane %v7947_v4, 2  ;;  %v11823_v4 = vld [vmem:[#allocation6 + $0x1c8] sm:$0xf] }
 0xae7   : > { %v7721_v17 = vpop.f32.mrf.mxu2  ;;  %v7846_v57 = vpop.f32.mrf.mxu3  ;;  %9677 = vmatpush.bf16.msra.mxu0 %v11848_v62  ;;  %v11824_v62 = vor.u32 %v12114_v42, %v11823_v4  ;;  %v11799_v4 = vld [vmem:[#allocation6 + $0x198] sm:$0xf]  ;;  %v12108_v42 = vld [vmem:[#allocation6 + $0x1a0] sm:$0xf0] }
 0xae8   : > { %8710 = vmatmul.bf16.gmra.mxu1 %v16790_v63  ;;  %v8319_v49 = vsel %vm3845_vm6, %v8317_v44, %v8318_v5  ;;  %v8145_v12 = vrot.slane %v7846_v57, 1 }
 0xae9   : > { %v16795_v26 = vadd.f32 %v8319_v49, %v16654_v39 }
 0xaeb   : > { %9678 = vmatpush.bf16.msra.mxu0 %v11836_v36  ;;  %v11812_v36 = vor.u32 %v12111_v38, %v11811_v30 }
 0xaed   : > { %v8678_v13 = vpop.f32.mrf.mxu1  ;;  %v7950_v16 = vpop.f32.mrf.mxu0 }
 0xaee   : > { %v16798_v9 = vadd.f32 %v8678_v13, %v16571_v33  ;;  %v8320_v32 = vrot.slane %v7950_v16, 2  ;;  %v12362_v16 = vld [vmem:[#allocation3 + $0xd8] sm:$0xff] }
 0xaef   : > { %v7723_v61 = vpop.f32.mrf.mxu2  ;;  %v7848_v29 = vpop.f32.mrf.mxu3  ;;  %9679 = vmatpush.bf16.msra.mxu0 %v11824_v62 }
 0xaf0   : > { %v8146_v44 = vrot.slane %v7848_v29, 1  ;;  %7989 = vmatmul.bf16.gmra.mxu0 %v16644_v52  ;;  %v8321_v39 = vsel %vm3845_vm6, %v8318_v5, %v8320_v32  ;;  %v12363_v52 = vld [vmem:[#allocation3 + $0xe0] sm:$0xff] }
 0xaf1   : > { %v16803_v49 = vadd.f32 %v8321_v39, %v16667_v41  ;;  %v16810_v29 = vpack.c.bf16 %v12363_v52, %v12362_v16  ;;  %v12105_v39 = vld [vmem:[#allocation6 + $0x188] sm:$0xf0] }
 0xaf2   : > { %v8147_v33 = vsel %vm3652_vm5, %v8145_v12, %v8146_v44 }
 0xaf3   : > { %v16808_v13 = vadd.f32 %v8147_v33, %v7721_v17  ;;  %9680 = vmatpush.bf16.msra.mxu0 %v11812_v36  ;;  %v11787_v17 = vld [vmem:[#allocation6 + $0x180] sm:$0xf] }
 0xaf4   : > { %8790 = vmatmul.bf16.gmra.mxu2 %v16288_v45  ;;  %8919 = vmatmul.bf16.gmra.mxu3 %v16288_v45  ;;  %v11800_v45 = vor.u32 %v12108_v42, %v11799_v4  ;;  %v11788_v38 = vor.u32 %v12105_v39, %v11787_v17  ;;  %v12127_v4 = vld [vmem:[#allocation6 + $0x238] sm:$0xf0] }
 0xaf5   : > { %v8681_v57 = vpop.f32.mrf.mxu1  ;;  %v7952_v5 = vpop.f32.mrf.mxu0  ;;  %v12364_v17 = vld [vmem:[#allocation3 + $0xe8] sm:$0xff] }
 0xaf6   : > { %v8322_v52 = vrot.slane %v7952_v5, 2 }
 0xaf7   : > { %v7726_v32 = vpop.f32.mrf.mxu2  ;;  %v7851_v41 = vpop.f32.mrf.mxu3  ;;  %9681 = vmatpush.bf16.msra.mxu0 %v11800_v45 }
 0xaf8   : > { %8714 = vmatmul.bf16.gmra.mxu1 %v16810_v29  ;;  %v8148_v12 = vrot.slane %v7851_v41, 1  ;;  %v11879_v41 = vld [vmem:[#allocation6 + $0x230] sm:$0xf] }
 0xaf9   : > { %v11880_v42 = vor.u32 %v12127_v4, %v11879_v41 }
 0xafa   : > { %v8149_v62 = vsel %vm3652_vm5, %v8146_v44, %v8148_v12  ;;  %v12125_v44 = vld [vmem:[#allocation6 + $0x22c] sm:$0xf]  ;;  %v11873_v12 = vld [vmem:[#allocation6 + $0x234] sm:$0xf0] }
 0xafb   : > { %v16814_v33 = vadd.f32 %v8149_v62, %v7723_v61  ;;  %9682 = vmatpush.bf16.msra.mxu0 %v11788_v38  ;;  %9917 = vmatpush.bf16.msrb.mxu2 %v11880_v42  ;;  %v11876_v45 = vor.u32 %v12125_v44, %v11873_v12 }
 0xafd   : > { %v8682_v30 = vpop.f32.mrf.mxu1  ;;  %v7955_v36 = vpop.f32.mrf.mxu0  ;;  %9788 = vmatpush.bf16.msra.mxu1 %v11876_v45 }
 0xafe   : > { %v16817_v57 = vadd.f32 %v8682_v30, %v16595_v10  ;;  %v8323_v32 = vrot.slane %v7955_v36, 2 }
 0xaff   : > { %v7727_v16 = vpop.f32.mrf.mxu2  ;;  %v7853_v1 = vpop.f32.mrf.mxu3 }
 0xb00   : > { %7994 = vmatmul.bf16.gmra.mxu0 %v16674_v47  ;;  %v8324_v61 = vsel %vm3845_vm6, %v8322_v52, %v8323_v32  ;;  %v12365_v47 = vld [vmem:[#allocation3 + $0xf0] sm:$0xff] }
 0xb01   : > { %v16822_v10 = vadd.f32 %v8324_v61, %v16697_v11  ;;  %v16829_v39 = vpack.c.bf16 %v12365_v47, %v12364_v17  ;;  %v8150_v11 = vrot.slane %v7853_v1, 1  ;;  %v12367_v47 = vld [vmem:[#allocation3 + $0x100] sm:$0xff] }
 0xb04   : > { %8795 = vmatmul.bf16.gmra.mxu2 %v16306_v46  ;;  %8924 = vmatmul.bf16.gmra.mxu3 %v16306_v46 }
 0xb05   : > { %v8685_v5 = vpop.f32.mrf.mxu1  ;;  %v7957_v30 = vpop.f32.mrf.mxu0 }
 0xb06   : > { %v16827_v62 = vadd.f32 %v8685_v5, %v16607_v54  ;;  %v8325_v36 = vrot.slane %v7957_v30, 2 }
 0xb07   : > { %v7730_v38 = vpop.f32.mrf.mxu2  ;;  %v7856_v52 = vpop.f32.mrf.mxu3 }
 0xb08   : > { %8719 = vmatmul.bf16.gmra.mxu1 %v16829_v39  ;;  %v8151_v41 = vrot.slane %v7856_v52, 1  ;;  %v8326_v4 = vsel %vm3845_vm6, %v8323_v32, %v8325_v36 }
 0xb09   : > { %v16835_v42 = vadd.f32 %v8326_v4, %v16717_v31 }
 0xb0a   : > { %v8152_v46 = vsel %vm3652_vm5, %v8150_v11, %v8151_v41 }
 0xb0b   : > { %v16837_v54 = vadd.f32 %v8152_v46, %v7727_v16  ;;  %v12366_v16 = vld [vmem:[#allocation3 + $0xf8] sm:$0xff] }
 0xb0c   : > { %v16848_v30 = vpack.c.bf16 %v12367_v47, %v12366_v16 }
 0xb0d   : > { %v8687_v44 = vpop.f32.mrf.mxu1  ;;  %v7960_v12 = vpop.f32.mrf.mxu0 }
 0xb0e   : > { %v8327_v11 = vrot.slane %v7960_v12, 2 }
 0xb0f   : > { %v7732_v61 = vpop.f32.mrf.mxu2  ;;  %v7858_v45 = vpop.f32.mrf.mxu3 }
 0xb10   : > { %v8153_v5 = vrot.slane %v7858_v45, 1  ;;  %7999 = vmatmul.bf16.gmra.mxu0 %v16709_v0  ;;  %v9442_v61 = vld [vmem:[#allocation3 + $0x30] sm:$0xff] }
 0xb12   : > { %v8154_v17 = vsel %vm3652_vm5, %v8151_v41, %v8153_v5 }
 0xb13   : > { %v16843_v1 = vadd.f32 %v8154_v17, %v7730_v38  ;;  %v9443_v38 = vld [vmem:[#allocation3 + $0x38] sm:$0xff] }
 0xb14   : > { %8800 = vmatmul.bf16.gmra.mxu2 %v16630_v18  ;;  %8929 = vmatmul.bf16.gmra.mxu3 %v16630_v18  ;;  %v16858_v17 = vpack.c.bf16 %v9443_v38, %v9442_v61  ;;  %v12369_v38 = vld [vmem:[#allocation3 + $0x110] sm:$0xff] }
 0xb15   : > { %v8689_v32 = vpop.f32.mrf.mxu1  ;;  %v7962_v36 = vpop.f32.mrf.mxu0 }
 0xb16   : > { %v16846_v31 = vadd.f32 %v8689_v32, %v16635_v48  ;;  %v8328_v0 = vrot.slane %v7962_v36, 2  ;;  %18249 = vst [vmem:[#allocation33_spill] sm:$0xff] %v16858_v17 }
 0xb17   : > { %v7734_v52 = vpop.f32.mrf.mxu2  ;;  %v7861_v4 = vpop.f32.mrf.mxu3 }
 0xb18   : > { %8723 = vmatmul.bf16.gmra.mxu1 %v16848_v30  ;;  %v8329_v41 = vsel %vm3845_vm6, %v8327_v11, %v8328_v0  ;;  %v8155_v32 = vrot.slane %v7861_v4, 1 }
 0xb19   : > { %v16853_v18 = vadd.f32 %v8329_v41, %v16750_v8  ;;  %v12368_v41 = vld [vmem:[#allocation3 + $0x108] sm:$0xff] }
 0xb1a   : > { %v16870_v4 = vpack.c.bf16 %v12369_v38, %v12368_v41 }
 0xb1d   : > { %v8691_v46 = vpop.f32.mrf.mxu1  ;;  %v7965_v44 = vpop.f32.mrf.mxu0 }
 0xb1e   : > { %v16856_v48 = vadd.f32 %v8691_v46, %v16649_v7  ;;  %v8330_v5 = vrot.slane %v7965_v44, 2 }
 0xb1f   : > { %v7736_v45 = vpop.f32.mrf.mxu2  ;;  %v7863_v12 = vpop.f32.mrf.mxu3 }
 0xb20   : > { %18248 = vst [vmem:[#allocation36_spill] sm:$0xff] %v16856_v48  ;;  %v8156_v16 = vrot.slane %v7863_v12, 1  ;;  %9683 = vmatmul.bf16.vlgmr.msra.gmra.mxu0 %v16858_v17  ;;  %v8331_v47 = vsel %vm3845_vm6, %v8328_v0, %v8330_v5  ;;  %v9445_v12 = vld [vmem:[#allocation3 + $0x48] sm:$0xff]  ;;  %v12124_v17 = vld [vmem:[#allocation6 + $0x220] sm:$0xf0] }
 0xb21   : > { %v16863_v8 = vadd.f32 %v8331_v47, %v16756_v37  ;;  %v9444_v47 = vld [vmem:[#allocation3 + $0x40] sm:$0xff]  ;;  %v11867_v48 = vld [vmem:[#allocation6 + $0x218] sm:$0xf] }
 0xb22   : > { %v8157_v36 = vsel %vm3652_vm5, %v8155_v32, %v8156_v16  ;;  %v16879_v38 = vpack.c.bf16 %v9445_v12, %v9444_v47  ;;  %v16888_v12 = vld [vmem:[#allocation3 + $0x118] sm:$0xff] }
 0xb23   : > { %v16868_v7 = vadd.f32 %v8157_v36, %v7734_v52  ;;  %18251 = vst [vmem:[#allocation51_spill] sm:$0xff] %v16888_v12 }
 0xb24   : > { %8805 = vmatmul.bf16.gmra.mxu2 %v16661_v24  ;;  %8934 = vmatmul.bf16.gmra.mxu3 %v16661_v24 }
 0xb25   : > { %v8694_v11 = vpop.f32.mrf.mxu1  ;;  %v7967_v46 = vpop.f32.mrf.mxu0 }
 0xb26   : > { %v8332_v11 = vrot.slane %v7967_v46, 2 }
 0xb27   : > { %v7739_v44 = vpop.f32.mrf.mxu2  ;;  %v7866_v61 = vpop.f32.mrf.mxu3 }
 0xb28   : > { %8727 = vmatmul.bf16.gmra.mxu1 %v16870_v4  ;;  %v8158_v37 = vrot.slane %v7866_v61, 1  ;;  %v11868_v61 = vor.u32 %v12124_v17, %v11867_v48  ;;  %v16895_v17 = vpack.c.bf16 %v16561_v43, %v16888_v12  ;;  %v9447_v43 = vld [vmem:[#allocation3 + $0x58] sm:$0xff] }
 0xb2a   : > { %v8159_v0 = vsel %vm3652_vm5, %v8156_v16, %v8158_v37  ;;  %v11861_v16 = vld [vmem:[#allocation6 + $0x21c] sm:$0xf0]  ;;  %9918 = vmatpush.bf16.msrb.mxu2 %v11868_v61 }
 0xb2b   : > { %v16874_v5 = vadd.f32 %v8159_v0, %v7736_v45  ;;  %v12122_v45 = vld [vmem:[#allocation6 + $0x214] sm:$0xf] }
 0xb2d   : > { %v8695_v32 = vpop.f32.mrf.mxu1  ;;  %v7970_v52 = vpop.f32.mrf.mxu0 }
 0xb2e   : > { %v16877_v24 = vadd.f32 %v8695_v32, %v16678_v60  ;;  %v8333_v41 = vrot.slane %v7970_v52, 2  ;;  %v11864_v60 = vor.u32 %v12122_v45, %v11861_v16 }
 0xb2f   : > { %v7740_v36 = vpop.f32.mrf.mxu2  ;;  %v7868_v44 = vpop.f32.mrf.mxu3 }
 0xb30   : > { %18250 = vst [vmem:[#allocation15_spill] sm:$0xff] %v16877_v24  ;;  %9688 = vmatmul.bf16.gmra.mxu0 %v16879_v38  ;;  %v8334_v37 = vsel %vm3845_vm6, %v8332_v11, %v8333_v41  ;;  %9789 = vmatpush.bf16.msra.mxu1 %v11864_v60  ;;  %v8160_v11 = vrot.slane %v7868_v44, 1  ;;  %v16908_v44 = vld [vmem:[#allocation3 + $0x128] sm:$0xff] }
 0xb31   : > { %v16884_v0 = vadd.f32 %v8334_v37, %v16779_v53  ;;  %v9446_v37 = vld [vmem:[#allocation3 + $0x50] sm:$0xff]  ;;  %18253 = vst [vmem:[#allocation39_spill] sm:$0xff] %v16908_v44 }
 0xb34   : > { %8810 = vmatmul.bf16.gmra.mxu2 %v16687_v34  ;;  %8939 = vmatmul.bf16.gmra.mxu3 %v16687_v34 }
 0xb35   : > { %v8698_v46 = vpop.f32.mrf.mxu1  ;;  %v7972_v32 = vpop.f32.mrf.mxu0 }
 0xb36   : > { %v16891_v48 = vadd.f32 %v8698_v46, %v16695_v6  ;;  %v8335_v47 = vrot.slane %v7972_v32, 2  ;;  %v16905_v32 = vpack.c.bf16 %v9447_v43, %v9446_v37  ;;  %v9448_v37 = vld [vmem:[#allocation3 + $0x60] sm:$0xff] }
 0xb37   : > { %v7743_v52 = vpop.f32.mrf.mxu2  ;;  %v7871_v53 = vpop.f32.mrf.mxu3 }
 0xb38   : > { %18252 = vst [vmem:[#allocation38_spill] sm:$0xff] %v16891_v48  ;;  %8732 = vmatmul.bf16.gmra.mxu1 %v16895_v17  ;;  %v8161_v61 = vrot.slane %v7871_v53, 1  ;;  %v8336_v34 = vsel %vm3845_vm6, %v8333_v41, %v8335_v47 }
 0xb39   : > { %v16901_v16 = vadd.f32 %v8336_v34, %v16785_v55 }
 0xb3a   : > { %v8162_v45 = vsel %vm3652_vm5, %v8160_v11, %v8161_v61 }
 0xb3b   : > { %v16903_v6 = vadd.f32 %v8162_v45, %v7740_v36 }
 0xb3d   : > { %v8700_v60 = vpop.f32.mrf.mxu1  ;;  %v7975_v46 = vpop.f32.mrf.mxu0 }
 0xb3e   : > { %v8337_v11 = vrot.slane %v7975_v46, 2  ;;  %v16931_v60 = vpack.c.bf16 %v16621_v40, %v9448_v37 }
 0xb3f   : > { %v7745_v12 = vpop.f32.mrf.mxu2  ;;  %v7873_v48 = vpop.f32.mrf.mxu3 }
 0xb40   : > { %v8163_v24 = vrot.slane %v7873_v48, 1  ;;  %9692 = vmatmul.bf16.gmra.mxu0 %v16905_v32  ;;  %v16920_v12 = vpack.c.bf16 %v16587_v20, %v16908_v44 }
 0xb42   : > { %v8164_v41 = vsel %vm3652_vm5, %v8161_v61, %v8163_v24 }
 0xb43   : > { %v16913_v55 = vadd.f32 %v8164_v41, %v7743_v52 }
 0xb44   : > { %8815 = vmatmul.bf16.gmra.mxu2 %v16724_v35  ;;  %8944 = vmatmul.bf16.gmra.mxu3 %v16724_v35 }
 0xb45   : > { %v8702_v36 = vpop.f32.mrf.mxu1  ;;  %v7977_v48 = vpop.f32.mrf.mxu0 }
 0xb46   : > { %v16916_v47 = vadd.f32 %v8702_v36, %v16729_v25  ;;  %v8338_v34 = vrot.slane %v7977_v48, 2 }
 0xb47   : > { %v8776_v53 = vpop.f32.mrf.mxu2  ;;  %v8905_v45 = vpop.f32.mrf.mxu3 }
 0xb48   : > { %8736 = vmatmul.bf16.gmra.mxu1 %v16920_v12  ;;  %v8339_v24 = vsel %vm3845_vm6, %v8337_v11, %v8338_v34  ;;  %v9105_v46 = vrot.slane %v8776_v53, 1  ;;  %v9297_v48 = vrot.slane %v8905_v45, 2  ;;  %v16943_v53 = vld [vmem:[#allocation3 + $0x138] sm:$0xff] }
 0xb49   : > { %v16925_v35 = vadd.f32 %v8339_v24, %v16808_v13  ;;  %18254 = vst [vmem:[#allocation25_spill] sm:$0xff] %v16943_v53 }
 0xb4d   : > { %v8704_v52 = vpop.f32.mrf.mxu1  ;;  %v7980_v61 = vpop.f32.mrf.mxu0 }
 0xb4e   : > { %v16928_v25 = vadd.f32 %v8704_v52, %v16745_v50  ;;  %v8340_v43 = vrot.slane %v7980_v61, 2  ;;  %v16949_v61 = vpack.c.bf16 %v16613_v28, %v16943_v53 }
 0xb4f   : > { %v8778_v20 = vpop.f32.mrf.mxu2  ;;  %v8907_v36 = vpop.f32.mrf.mxu3 }
 0xb50   : > { %v9106_v41 = vrot.slane %v8778_v20, 1  ;;  %v9298_v44 = vrot.slane %v8907_v36, 2  ;;  %9696 = vmatmul.bf16.gmra.mxu0 %v16931_v60  ;;  %v8341_v11 = vsel %vm3845_vm6, %v8338_v34, %v8340_v43 }
 0xb51   : > { %v16939_v52 = vadd.f32 %v8341_v11, %v16814_v33  ;;  %v9450_v11 = vld [vmem:[#allocation3 + $0x70] sm:$0xff] }
 0xb52   : > { %v9107_v13 = vsel %vm3652_vm5, %v9105_v46, %v9106_v41  ;;  %v9299_v24 = vsel %vm3845_vm6, %v9297_v48, %v9298_v44 }
 0xb53   : > { %v9217_v50 = vadd.f32 %v9107_v13, %v16721_v23 }
 0xb54   : > { %8820 = vmatmul.bf16.gmra.mxu2 %v16752_v14  ;;  %8949 = vmatmul.bf16.gmra.mxu3 %v16752_v14 }
 0xb55   : > { %v8707_v40 = vpop.f32.mrf.mxu1  ;;  %v16945_v45 = vadd.f32 %v9299_v24, %v9217_v50  ;;  %v7982_v34 = vpop.f32.mrf.mxu0 }
 0xb56   : > { %v8342_v24 = vrot.slane %v7982_v34, 2  ;;  %v16970_v34 = vld [vmem:[#allocation3 + $0x148] sm:$0xff] }
 0xb57   : > { %v8781_v23 = vpop.f32.mrf.mxu2  ;;  %v8910_v20 = vpop.f32.mrf.mxu3  ;;  %18255 = vst [vmem:[#allocation40_spill] sm:$0xff] %v16970_v34 }
 0xb58   : > { %v9108_v37 = vrot.slane %v8781_v23, 1  ;;  %8740 = vmatmul.bf16.gmra.mxu1 %v16949_v61  ;;  %v9300_v33 = vrot.slane %v8910_v20, 2  ;;  %v16961_v23 = vpack.c.bf16 %v16657_v59, %v9450_v11 }
 0xb5a   : > { %v9109_v43 = vsel %vm3652_vm5, %v9106_v41, %v9108_v37  ;;  %v9301_v46 = vsel %vm3845_vm6, %v9298_v44, %v9300_v33  ;;  %v11855_v41 = vld [vmem:[#allocation6 + $0x200] sm:$0xf]  ;;  %v12121_v37 = vld [vmem:[#allocation6 + $0x208] sm:$0xf0]  ;;  %v12119_v44 = vld [vmem:[#allocation6 + $0x1fc] sm:$0xf] }
 0xb5b   : > { %v9218_v14 = vadd.f32 %v9109_v43, %v16732_v19  ;;  %v11856_v19 = vor.u32 %v12121_v37, %v11855_v41  ;;  %v11849_v33 = vld [vmem:[#allocation6 + $0x204] sm:$0xf0] }
 0xb5d   : > { %v8708_v36 = vpop.f32.mrf.mxu1  ;;  %v16955_v48 = vadd.f32 %v9301_v46, %v9218_v14  ;;  %v7985_v28 = vpop.f32.mrf.mxu0  ;;  %9919 = vmatpush.bf16.msrb.mxu2 %v11856_v19 }
 0xb5e   : > { %v16958_v13 = vadd.f32 %v8708_v36, %v16764_v27  ;;  %v8343_v40 = vrot.slane %v7985_v28, 2  ;;  %v11852_v27 = vor.u32 %v12119_v44, %v11849_v33  ;;  %v16977_v36 = vpack.c.bf16 %v16639_v2, %v16970_v34  ;;  %v18256_v34 = vld [vmem:[#allocation14_spill] sm:$0xff] }
 0xb5f   : > { %v8783_v50 = vpop.f32.mrf.mxu2  ;;  %v8912_v20 = vpop.f32.mrf.mxu3 }
 0xb60   : > { %9701 = vmatmul.bf16.gmra.mxu0 %v16961_v23  ;;  %v8344_v43 = vsel %vm3845_vm6, %v8342_v24, %v8343_v40  ;;  %9790 = vmatpush.bf16.msra.mxu1 %v11852_v27  ;;  %v9452_v27 = vld [vmem:[#allocation3 + $0x80] sm:$0xff] }
 0xb61   : > { %v16966_v14 = vadd.f32 %v8344_v43, %v16837_v54  ;;  %v9110_v54 = vrot.slane %v8783_v50, 1 }
 0xb64   : > { %8825 = vmatmul.bf16.gmra.mxu2 %v16771_v3  ;;  %8954 = vmatmul.bf16.gmra.mxu3 %v16771_v3  ;;  %v9302_v3 = vrot.slane %v8912_v20, 2  ;;  %v16990_v20 = vpack.c.bf16 %v18256_v34, %v9452_v27 }
 0xb65   : > { %v8711_v59 = vpop.f32.mrf.mxu1  ;;  %v7987_v28 = vpop.f32.mrf.mxu0 }
 0xb66   : > { %v16973_v46 = vadd.f32 %v8711_v59, %v16777_v56  ;;  %v8345_v24 = vrot.slane %v7987_v28, 2 }
 0xb67   : > { %v8786_v11 = vpop.f32.mrf.mxu2  ;;  %v8915_v37 = vpop.f32.mrf.mxu3 }
 0xb68   : > { %v9111_v41 = vrot.slane %v8786_v11, 1  ;;  %8745 = vmatmul.bf16.gmra.mxu1 %v16977_v36  ;;  %v9303_v19 = vrot.slane %v8915_v37, 2  ;;  %v8346_v33 = vsel %vm3845_vm6, %v8343_v40, %v8345_v24  ;;  %v16994_v40 = vld [vmem:[#allocation3 + $0x158] sm:$0xff] }
 0xb69   : > { %v16985_v2 = vadd.f32 %v8346_v33, %v16843_v1  ;;  %18257 = vst [vmem:[#allocation42_spill] sm:$0xff] %v16994_v40  ;;  %v18258_v33 = vld [vmem:[#allocation13_spill] sm:$0xff] }
 0xb6a   : > { %v9112_v44 = vsel %vm3652_vm5, %v9110_v54, %v9111_v41  ;;  %v9304_v43 = vsel %vm3845_vm6, %v9302_v3, %v9303_v19 }
 0xb6b   : > { %v9219_v56 = vadd.f32 %v9112_v44, %v16759_v15 }
 0xb6d   : > { %v8713_v59 = vpop.f32.mrf.mxu1  ;;  %v16987_v50 = vadd.f32 %v9304_v43, %v9219_v56  ;;  %v7990_v28 = vpop.f32.mrf.mxu0  ;;  %v17007_v56 = vpack.c.bf16 %v18258_v33, %v16994_v40  ;;  %v18260_v40 = vld [vmem:[#allocation29_spill] sm:$0xff] }
 0xb6e   : > { %v8347_v27 = vrot.slane %v7990_v28, 2 }
 0xb6f   : > { %v8788_v11 = vpop.f32.mrf.mxu2  ;;  %v8917_v54 = vpop.f32.mrf.mxu3 }
 0xb70   : > { %v9113_v37 = vrot.slane %v8788_v11, 1  ;;  %v9305_v53 = vrot.slane %v8917_v54, 2  ;;  %9705 = vmatmul.bf16.gmra.mxu0 %v16990_v20 }
 0xb72   : > { %v9114_v15 = vsel %vm3652_vm5, %v9111_v41, %v9113_v37  ;;  %v9306_v24 = vsel %vm3845_vm6, %v9303_v19, %v9305_v53  ;;  %v9454_v37 = vld [vmem:[#allocation3 + $0x90] sm:$0xff] }
 0xb73   : > { %v9220_v1 = vadd.f32 %v9114_v15, %v16769_v21 }
 0xb74   : > { %8830 = vmatmul.bf16.gmra.mxu2 %v16790_v63  ;;  %8959 = vmatmul.bf16.gmra.mxu3 %v16790_v63 }
 0xb75   : > { %v8715_v3 = vpop.f32.mrf.mxu1  ;;  %v17000_v34 = vadd.f32 %v9306_v24, %v9220_v1  ;;  %v7992_v41 = vpop.f32.mrf.mxu0  ;;  %v17018_v1 = vpack.c.bf16 %v16712_v51, %v9454_v37 }
 0xb76   : > { %v17003_v44 = vadd.f32 %v8715_v3, %v16795_v26  ;;  %v8348_v21 = vrot.slane %v7992_v41, 2 }
 0xb77   : > { %v8791_v43 = vpop.f32.mrf.mxu2  ;;  %v8920_v59 = vpop.f32.mrf.mxu3 }
 0xb78   : > { %8749 = vmatmul.bf16.gmra.mxu1 %v17007_v56  ;;  %v8349_v53 = vsel %vm3845_vm6, %v8347_v27, %v8348_v21  ;;  %v9115_v28 = vrot.slane %v8791_v43, 1  ;;  %v9307_v33 = vrot.slane %v8920_v59, 2  ;;  %v17030_v43 = vld [vmem:[#allocation3 + $0x168] sm:$0xff] }
 0xb79   : > { %v17012_v63 = vadd.f32 %v8349_v53, %v16868_v7  ;;  %18259 = vst [vmem:[#allocation18_spill] sm:$0xff] %v17030_v43 }
 0xb7d   : > { %v8717_v19 = vpop.f32.mrf.mxu1  ;;  %v7995_v11 = vpop.f32.mrf.mxu0 }
 0xb7e   : > { %v17015_v26 = vadd.f32 %v8717_v19, %v16803_v49  ;;  %v8350_v15 = vrot.slane %v7995_v11, 2  ;;  %v17036_v11 = vpack.c.bf16 %v16701_v22, %v17030_v43 }
 0xb7f   : > { %v8793_v54 = vpop.f32.mrf.mxu2  ;;  %v8922_v3 = vpop.f32.mrf.mxu3 }
 0xb80   : > { %v9116_v24 = vrot.slane %v8793_v54, 1  ;;  %v9308_v41 = vrot.slane %v8922_v3, 2  ;;  %9709 = vmatmul.bf16.gmra.mxu0 %v17018_v1  ;;  %v8351_v27 = vsel %vm3845_vm6, %v8348_v21, %v8350_v15 }
 0xb81   : > { %v17026_v19 = vadd.f32 %v8351_v27, %v16874_v5 }
 0xb82   : > { %v9117_v7 = vsel %vm3652_vm5, %v9115_v28, %v9116_v24  ;;  %v9309_v53 = vsel %vm3845_vm6, %v9307_v33, %v9308_v41 }
 0xb83   : > { %v9221_v49 = vadd.f32 %v9117_v7, %v16788_v58 }
 0xb84   : > { %8835 = vmatmul.bf16.gmra.mxu2 %v16810_v29  ;;  %8964 = vmatmul.bf16.gmra.mxu3 %v16810_v29 }
 0xb85   : > { %v8720_v51 = vpop.f32.mrf.mxu1  ;;  %v17032_v59 = vadd.f32 %v9309_v53, %v9221_v49  ;;  %v7997_v21 = vpop.f32.mrf.mxu0  ;;  %v11843_v49 = vld [vmem:[#allocation6 + $0x1e8] sm:$0xf]  ;;  %v12118_v53 = vld [vmem:[#allocation6 + $0x1f0] sm:$0xf0] }
 0xb86   : > { %v8352_v51 = vrot.slane %v7997_v21, 2 }
 0xb87   : > { %v8796_v58 = vpop.f32.mrf.mxu2  ;;  %v8925_v54 = vpop.f32.mrf.mxu3 }
 0xb88   : > { %v9118_v37 = vrot.slane %v8796_v58, 1  ;;  %8753 = vmatmul.bf16.gmra.mxu1 %v17036_v11  ;;  %v9310_v5 = vrot.slane %v8925_v54, 2  ;;  %v11844_v54 = vor.u32 %v12118_v53, %v11843_v49 }
 0xb8a   : > { %v9119_v15 = vsel %vm3652_vm5, %v9116_v24, %v9118_v37  ;;  %v9311_v28 = vsel %vm3845_vm6, %v9308_v41, %v9310_v5  ;;  %9920 = vmatpush.bf16.msrb.mxu2 %v11844_v54  ;;  %v11837_v24 = vld [vmem:[#allocation6 + $0x1ec] sm:$0xf0] }
 0xb8b   : > { %v9222_v29 = vadd.f32 %v9119_v15, %v16798_v9  ;;  %v12116_v9 = vld [vmem:[#allocation6 + $0x1e4] sm:$0xf]  ;;  %v18261_v15 = vld [vmem:[#allocation11_spill] sm:$0xff] }
 0xb8c   : > { %v11840_v37 = vor.u32 %v12116_v9, %v11837_v24 }
 0xb8d   : > { %v8721_v3 = vpop.f32.mrf.mxu1  ;;  %v17042_v33 = vadd.f32 %v9311_v28, %v9222_v29  ;;  %v8000_v22 = vpop.f32.mrf.mxu0  ;;  %v18262_v29 = vld [vmem:[#allocation37_spill] sm:$0xff] }
 0xb8e   : > { %v17045_v7 = vadd.f32 %v8721_v3, %v16822_v10  ;;  %v8353_v58 = vrot.slane %v8000_v22, 2  ;;  %9791 = vmatpush.bf16.msra.mxu1 %v11840_v37  ;;  %v17059_v28 = vpack.c.bf16 %v18262_v29, %v18261_v15 }
 0xb8f   : > { %v8798_v27 = vpop.f32.mrf.mxu2  ;;  %v8927_v43 = vpop.f32.mrf.mxu3 }
 0xb90   : > { %9714 = vmatmul.bf16.gmra.mxu0 %v18260_v40  ;;  %v8354_v41 = vsel %vm3845_vm6, %v8352_v51, %v8353_v58  ;;  %v9120_v53 = vrot.slane %v8798_v27, 1  ;;  %v9312_v54 = vrot.slane %v8927_v43, 2 }
 0xb91   : > { %v17050_v5 = vadd.f32 %v8354_v41, %v16903_v6 }
 0xb94   : > { %8840 = vmatmul.bf16.gmra.mxu2 %v16829_v39  ;;  %8969 = vmatmul.bf16.gmra.mxu3 %v16829_v39 }
 0xb95   : > { %v8724_v10 = vpop.f32.mrf.mxu1  ;;  %v8002_v3 = vpop.f32.mrf.mxu0 }
 0xb96   : > { %v17055_v21 = vadd.f32 %v8724_v10, %v16835_v42  ;;  %v8355_v49 = vrot.slane %v8002_v3, 2 }
 0xb97   : > { %v8801_v22 = vpop.f32.mrf.mxu2  ;;  %v8930_v6 = vpop.f32.mrf.mxu3 }
 0xb98   : > { %v9121_v51 = vrot.slane %v8801_v22, 1  ;;  %8758 = vmatmul.bf16.gmra.mxu1 %v17059_v28  ;;  %v9313_v9 = vrot.slane %v8930_v6, 2  ;;  %v8356_v24 = vsel %vm3845_vm6, %v8353_v58, %v8355_v49  ;;  %v18263_v6 = vld [vmem:[#allocation63_spill] sm:$0xff]  ;;  %v17076_v58 = vld [vmem:[#allocation3 + $0x190] sm:$0xff] }
 0xb99   : > { %v17067_v37 = vadd.f32 %v8356_v24, %v16913_v55  ;;  %18264 = vst [vmem:[#allocation41_spill] sm:$0xff] %v17076_v58  ;;  %v12113_v49 = vld [vmem:[#allocation6 + $0x1cc] sm:$0xf]  ;;  %v11825_v55 = vld [vmem:[#allocation6 + $0x1d4] sm:$0xf0] }
 0xb9a   : > { %v9122_v39 = vsel %vm3652_vm5, %v9120_v53, %v9121_v51  ;;  %v9314_v41 = vsel %vm3845_vm6, %v9312_v54, %v9313_v9 }
 0xb9b   : > { %v9223_v42 = vadd.f32 %v9122_v39, %v16817_v57 }
 0xb9d   : > { %v8726_v10 = vpop.f32.mrf.mxu1  ;;  %v17069_v15 = vadd.f32 %v9314_v41, %v9223_v42  ;;  %v9684_v27 = vpop.f32.mrf.mxu0 }
 0xb9e   : > { %v17072_v3 = vadd.f32 %v9684_v27, %v16945_v45  ;;  %v11828_v45 = vor.u32 %v12113_v49, %v11825_v55 }
 0xb9f   : > { %v8803_v29 = vpop.f32.mrf.mxu2  ;;  %v8932_v22 = vpop.f32.mrf.mxu3 }
 0xba0   : > { %v9123_v43 = vrot.slane %v8803_v29, 1  ;;  %v9315_v53 = vrot.slane %v8932_v22, 2  ;;  %9718 = vmatmul.bf16.gmra.mxu0 %v18263_v6  ;;  %9792 = vmatpush.bf16.msra.mxu1 %v11828_v45  ;;  %v12110_v29 = vld [vmem:[#allocation6 + $0x1b4] sm:$0xf]  ;;  %v12104_v45 = vld [vmem:[#allocation6 + $0x184] sm:$0xf] }
 0xba2   : > { %v9124_v57 = vsel %vm3652_vm5, %v9121_v51, %v9123_v43  ;;  %v9316_v39 = vsel %vm3845_vm6, %v9313_v9, %v9315_v53  ;;  %v18266_v51 = vld [vmem:[#allocation35_spill] sm:$0xff]  ;;  %v11813_v9 = vld [vmem:[#allocation6 + $0x1bc] sm:$0xf0]  ;;  %v12107_v53 = vld [vmem:[#allocation6 + $0x19c] sm:$0xf] }
 0xba3   : > { %v9224_v54 = vadd.f32 %v9124_v57, %v16827_v62  ;;  %v17089_v10 = vpack.c.bf16 %v17076_v58, %v18266_v51  ;;  %v11816_v22 = vor.u32 %v12110_v29, %v11813_v9  ;;  %v18268_v29 = vld [vmem:[#allocation32_spill] sm:$0xff] }
 0xba4   : > { %8845 = vmatmul.bf16.gmra.mxu2 %v16848_v30  ;;  %8974 = vmatmul.bf16.gmra.mxu3 %v16848_v30 }
 0xba5   : > { %v8728_v24 = vpop.f32.mrf.mxu1  ;;  %v17082_v42 = vadd.f32 %v9316_v39, %v9224_v54  ;;  %v9686_v27 = vpop.f32.mrf.mxu0  ;;  %9793 = vmatpush.bf16.msra.mxu1 %v11816_v22 }
 0xba6   : > { %v17085_v41 = vadd.f32 %v8728_v24, %v16853_v18  ;;  %v17092_v43 = vadd.f32 %v9686_v27, %v16955_v48  ;;  %v11801_v18 = vld [vmem:[#allocation6 + $0x1a4] sm:$0xf0]  ;;  %v11789_v24 = vld [vmem:[#allocation6 + $0x18c] sm:$0xf0] }
 0xba7   : > { %v8806_v62 = vpop.f32.mrf.mxu2  ;;  %v8935_v30 = vpop.f32.mrf.mxu3  ;;  %v11804_v57 = vor.u32 %v12107_v53, %v11801_v18  ;;  %v11792_v58 = vor.u32 %v12104_v45, %v11789_v24 }
 0xba8   : > { %18265 = vst [vmem:[#allocation43_spill] sm:$0xff] %v17085_v41  ;;  %8762 = vmatmul.bf16.gmra.mxu1 %v17089_v10  ;;  %v9125_v51 = vrot.slane %v8806_v62, 1 }
 0xba9   : > { %18267 = vst [vmem:[#allocation20_spill] sm:$0xff] %v17092_v43  ;;  %9794 = vmatpush.bf16.msra.mxu1 %v11804_v57  ;;  %v9317_v43 = vrot.slane %v8935_v30, 2 }
 0xbad   : > { %v8730_v49 = vpop.f32.mrf.mxu1  ;;  %v9689_v54 = vpop.f32.mrf.mxu0  ;;  %9795 = vmatpush.bf16.msra.mxu1 %v11792_v58 }
 0xbae   : > { %v17096_v55 = vadd.f32 %v8730_v49, %v16863_v8  ;;  %v18269_v54 = vld [vmem:[#allocation33_spill] sm:$0xff] }
 0xbaf   : > { %v8808_v39 = vpop.f32.mrf.mxu2  ;;  %v8937_v27 = vpop.f32.mrf.mxu3 }
 0xbb0   : > { %v9126_v48 = vrot.slane %v8808_v39, 1  ;;  %v9318_v41 = vrot.slane %v8937_v27, 2  ;;  %9722 = vmatmul.bf16.gmra.mxu0 %v18268_v29 }
 0xbb2   : > { %v9127_v9 = vsel %vm3652_vm5, %v9125_v51, %v9126_v48  ;;  %v9319_v8 = vsel %vm3845_vm6, %v9317_v43, %v9318_v41  ;;  %v18270_v43 = vld [vmem:[#allocation36_spill] sm:$0xff] }
 0xbb3   : > { %v9225_v22 = vadd.f32 %v9127_v9, %v16846_v31 }
 0xbb4   : > { %8850 = vmatmul.bf16.gmra.mxu2 %v16870_v4  ;;  %8979 = vmatmul.bf16.gmra.mxu3 %v16870_v4 }
 0xbb5   : > { %v8733_v53 = vpop.f32.mrf.mxu1  ;;  %v17104_v62 = vadd.f32 %v9319_v8, %v9225_v22  ;;  %v9690_v18 = vpop.f32.mrf.mxu0  ;;  %v11831_v22 = vld [vmem:[#allocation6 + $0x1d0] sm:$0xf]  ;;  %v12115_v8 = vld [vmem:[#allocation6 + $0x1d8] sm:$0xf0] }
 0xbb6   : > { %v17107_v30 = vadd.f32 %v9690_v18, %v16987_v50 }
 0xbb7   : > { %v8811_v57 = vpop.f32.mrf.mxu2  ;;  %v8940_v58 = vpop.f32.mrf.mxu3 }
 0xbb8   : > { %v9128_v49 = vrot.slane %v8811_v57, 1  ;;  %9796 = vmatmul.bf16.vlgmr.msra.gmra.mxu1 %v18269_v54  ;;  %v9320_v39 = vrot.slane %v8940_v58, 2  ;;  %v11832_v57 = vor.u32 %v12115_v8, %v11831_v22 }
 0xbba   : > { %v9129_v31 = vsel %vm3652_vm5, %v9126_v48, %v9128_v49  ;;  %v9321_v24 = vsel %vm3845_vm6, %v9318_v41, %v9320_v39  ;;  %v18271_v48 = vld [vmem:[#allocation30_spill] sm:$0xff]  ;;  %9921 = vmatpush.bf16.msrb.mxu2 %v11832_v57 }
 0xbbb   : > { %v9226_v45 = vadd.f32 %v9129_v31, %v18270_v43 }
 0xbbd   : > { %v8734_v4 = vpop.f32.mrf.mxu1  ;;  %v17113_v51 = vadd.f32 %v9321_v24, %v9226_v45  ;;  %v9693_v9 = vpop.f32.mrf.mxu0 }
 0xbbe   : > { %v17116_v27 = vadd.f32 %v8734_v4, %v16884_v0  ;;  %v17119_v53 = vadd.f32 %v9693_v9, %v17000_v34  ;;  %v18273_v4 = vld [vmem:[#allocation15_spill] sm:$0xff] }
 0xbbf   : > { %v8813_v50 = vpop.f32.mrf.mxu2  ;;  %v8942_v18 = vpop.f32.mrf.mxu3 }
 0xbc0   : > { %9727 = vmatmul.bf16.gmra.mxu0 %v18271_v48  ;;  %v9130_v39 = vrot.slane %v8813_v50, 1  ;;  %v9322_v34 = vrot.slane %v8942_v18, 2 }
 0xbc4   : > { %8855 = vmatmul.bf16.gmra.mxu2 %v16895_v17  ;;  %8984 = vmatmul.bf16.gmra.mxu3 %v16895_v17 }
 0xbc5   : > { %v8737_v41 = vpop.f32.mrf.mxu1  ;;  %v9695_v49 = vpop.f32.mrf.mxu0 }
 0xbc6   : > { %v17125_v0 = vadd.f32 %v8737_v41, %v16901_v16 }
 0xbc7   : > { %v8816_v58 = vpop.f32.mrf.mxu2  ;;  %v8945_v43 = vpop.f32.mrf.mxu3 }
 0xbc8   : > { %18272 = vst [vmem:[#allocation45_spill] sm:$0xff] %v17125_v0  ;;  %v9131_v31 = vrot.slane %v8816_v58, 1  ;;  %9801 = vmatmul.bf16.gmra.mxu1 %v16879_v38  ;;  %v9323_v45 = vrot.slane %v8945_v43, 2  ;;  %v18274_v0 = vld [vmem:[#allocation28_spill] sm:$0xff] }
 0xbca   : > { %v9132_v24 = vsel %vm3652_vm5, %v9130_v39, %v9131_v31  ;;  %v9324_v22 = vsel %vm3845_vm6, %v9322_v34, %v9323_v45  ;;  %v18275_v39 = vld [vmem:[#allocation38_spill] sm:$0xff] }
 0xbcb   : > { %v9227_v9 = vadd.f32 %v9132_v24, %v18273_v4 }
 0xbcd   : > { %v8739_v17 = vpop.f32.mrf.mxu1  ;;  %v17131_v8 = vadd.f32 %v9324_v22, %v9227_v9  ;;  %v9697_v16 = vpop.f32.mrf.mxu0 }
 0xbce   : > { %v17134_v41 = vadd.f32 %v9697_v16, %v17032_v59 }
 0xbcf   : > { %v8818_v57 = vpop.f32.mrf.mxu2  ;;  %v8947_v49 = vpop.f32.mrf.mxu3 }
 0xbd0   : > { %v9133_v50 = vrot.slane %v8818_v57, 1  ;;  %v9325_v58 = vrot.slane %v8947_v49, 2  ;;  %9731 = vmatmul.bf16.gmra.mxu0 %v18274_v0 }
 0xbd2   : > { %v9134_v18 = vsel %vm3652_vm5, %v9131_v31, %v9133_v50  ;;  %v9326_v24 = vsel %vm3845_vm6, %v9323_v45, %v9325_v58 }
 0xbd3   : > { %v9228_v43 = vadd.f32 %v9134_v18, %v18275_v39  ;;  %v18276_v39 = vld [vmem:[#allocation46_spill] sm:$0xff] }
 0xbd4   : > { %8860 = vmatmul.bf16.gmra.mxu2 %v16920_v12  ;;  %8989 = vmatmul.bf16.gmra.mxu3 %v16920_v12 }
 0xbd5   : > { %v8741_v34 = vpop.f32.mrf.mxu1  ;;  %v17142_v4 = vadd.f32 %v9326_v24, %v9228_v43  ;;  %v9699_v9 = vpop.f32.mrf.mxu0 }
 0xbd6   : > { %v17145_v59 = vadd.f32 %v8741_v34, %v16925_v35  ;;  %v17148_v17 = vadd.f32 %v9699_v9, %v17042_v33 }
 0xbd7   : > { %v8821_v22 = vpop.f32.mrf.mxu2  ;;  %v8950_v31 = vpop.f32.mrf.mxu3 }
 0xbd8   : > { %9806 = vmatmul.bf16.gmra.mxu1 %v16905_v32  ;;  %v9135_v50 = vrot.slane %v8821_v22, 1  ;;  %v9327_v18 = vrot.slane %v8950_v31, 2 }
 0xbdd   : > { %v8743_v16 = vpop.f32.mrf.mxu1  ;;  %v9702_v57 = vpop.f32.mrf.mxu0 }
 0xbde   : > { %v17152_v45 = vadd.f32 %v8743_v16, %v16939_v52 }
 0xbdf   : > { %v8823_v12 = vpop.f32.mrf.mxu2  ;;  %v8952_v58 = vpop.f32.mrf.mxu3 }
 0xbe0   : > { %v9136_v49 = vrot.slane %v8823_v12, 1  ;;  %v9328_v35 = vrot.slane %v8952_v58, 2  ;;  %9735 = vmatmul.bf16.gmra.mxu0 %v18276_v39 }
 0xbe2   : > { %v9137_v43 = vsel %vm3652_vm5, %v9135_v50, %v9136_v49  ;;  %v9329_v24 = vsel %vm3845_vm6, %v9327_v18, %v9328_v35 }
 0xbe3   : > { %v9229_v33 = vadd.f32 %v9137_v43, %v16916_v47 }
 0xbe4   : > { %8865 = vmatmul.bf16.gmra.mxu2 %v16949_v61  ;;  %8994 = vmatmul.bf16.gmra.mxu3 %v16949_v61 }
 0xbe5   : > { %v8746_v52 = vpop.f32.mrf.mxu1  ;;  %v17160_v34 = vadd.f32 %v9329_v24, %v9229_v33  ;;  %v9703_v9 = vpop.f32.mrf.mxu0  ;;  %v11819_v24 = vld [vmem:[#allocation6 + $0x1b8] sm:$0xf] }
 0xbe6   : > { %v17163_v31 = vadd.f32 %v9703_v9, %v17069_v15  ;;  %v12112_v52 = vld [vmem:[#allocation6 + $0x1c0] sm:$0xf0] }
 0xbe7   : > { %v8826_v22 = vpop.f32.mrf.mxu2  ;;  %v8955_v57 = vpop.f32.mrf.mxu3 }
 0xbe8   : > { %v9138_v16 = vrot.slane %v8826_v22, 1  ;;  %9811 = vmatmul.bf16.gmra.mxu1 %v16931_v60  ;;  %v9330_v12 = vrot.slane %v8955_v57, 2  ;;  %v11820_v57 = vor.u32 %v12112_v52, %v11819_v24 }
 0xbea   : > { %v9139_v47 = vsel %vm3652_vm5, %v9136_v49, %v9138_v16  ;;  %v9331_v58 = vsel %vm3845_vm6, %v9328_v35, %v9330_v12  ;;  %v18277_v49 = vld [vmem:[#allocation31_spill] sm:$0xff]  ;;  %9922 = vmatpush.bf16.msrb.mxu2 %v11820_v57 }
 0xbeb   : > { %v9230_v50 = vadd.f32 %v9139_v47, %v16928_v25 }
 0xbed   : > { %v8747_v61 = vpop.f32.mrf.mxu1  ;;  %v17169_v18 = vadd.f32 %v9331_v58, %v9230_v50  ;;  %v9706_v33 = vpop.f32.mrf.mxu0 }
 0xbee   : > { %v17172_v43 = vadd.f32 %v8747_v61, %v16966_v14  ;;  %v17175_v9 = vadd.f32 %v9706_v33, %v17082_v42 }
 0xbef   : > { %v8828_v15 = vpop.f32.mrf.mxu2  ;;  %v8957_v22 = vpop.f32.mrf.mxu3 }
 0xbf0   : > { %9740 = vmatmul.bf16.gmra.mxu0 %v18277_v49  ;;  %v9140_v12 = vrot.slane %v8828_v15, 1  ;;  %v9332_v42 = vrot.slane %v8957_v22, 2 }
 0xbf4   : > { %8870 = vmatmul.bf16.gmra.mxu2 %v16977_v36  ;;  %8999 = vmatmul.bf16.gmra.mxu3 %v16977_v36  ;;  %v9470_v36 = vld [vmem:[#allocation3 + $0x110] sm:$0xff] }
 0xbf5   : > { %v8750_v25 = vpop.f32.mrf.mxu1  ;;  %v9708_v35 = vpop.f32.mrf.mxu0 }
 0xbf6   : > { %v17181_v14 = vadd.f32 %v8750_v25, %v16985_v2  ;;  %v18279_v35 = vld [vmem:[#allocation51_spill] sm:$0xff] }
 0xbf7   : > { %v8831_v16 = vpop.f32.mrf.mxu2  ;;  %v8960_v50 = vpop.f32.mrf.mxu3 }
 0xbf8   : > { %18278 = vst [vmem:[#allocation44_spill] sm:$0xff] %v17181_v14  ;;  %v9141_v47 = vrot.slane %v8831_v16, 1  ;;  %9816 = vmatmul.bf16.gmra.mxu1 %v16961_v23  ;;  %v9333_v58 = vrot.slane %v8960_v50, 2  ;;  %v17193_v16 = vpack.c.bf16 %v18279_v35, %v9470_v36 }
 0xbfa   : > { %v9142_v61 = vsel %vm3652_vm5, %v9140_v12, %v9141_v47  ;;  %v9334_v24 = vsel %vm3845_vm6, %v9332_v42, %v9333_v58 }
 0xbfb   : > { %v9231_v33 = vadd.f32 %v9142_v61, %v16958_v13 }
 0xbfd   : > { %v8752_v52 = vpop.f32.mrf.mxu1  ;;  %v17187_v57 = vadd.f32 %v9334_v24, %v9231_v33  ;;  %v9710_v2 = vpop.f32.mrf.mxu0 }
 0xbfe   : > { %v17190_v15 = vadd.f32 %v9710_v2, %v17104_v62  ;;  %v18280_v2 = vld [vmem:[#allocation39_spill] sm:$0xff] }
 0xbff   : > { %v8833_v25 = vpop.f32.mrf.mxu2  ;;  %v8962_v50 = vpop.f32.mrf.mxu3 }
 0xc00   : > { %v9143_v22 = vrot.slane %v8833_v25, 1  ;;  %v9335_v14 = vrot.slane %v8962_v50, 2  ;;  %9744 = vmatmul.bf16.gmra.mxu0 %v17193_v16 }
 0xc02   : > { %v9144_v13 = vsel %vm3652_vm5, %v9141_v47, %v9143_v22  ;;  %v9336_v42 = vsel %vm3845_vm6, %v9333_v58, %v9335_v14  ;;  %v9472_v58 = vld [vmem:[#allocation3 + $0x120] sm:$0xff] }
 0xc03   : > { %v9232_v12 = vadd.f32 %v9144_v13, %v16973_v46  ;;  %v17214_v25 = vpack.c.bf16 %v18280_v2, %v9472_v58  ;;  %v11807_v58 = vld [vmem:[#allocation6 + $0x1a0] sm:$0xf]  ;;  %v18281_v2 = vld [vmem:[#allocation25_spill] sm:$0xff] }
 0xc04   : > { %8875 = vmatmul.bf16.gmra.mxu2 %v17007_v56  ;;  %9004 = vmatmul.bf16.gmra.mxu3 %v17007_v56 }
 0xc05   : > { %v8754_v62 = vpop.f32.mrf.mxu1  ;;  %v17201_v61 = vadd.f32 %v9336_v42, %v9232_v12  ;;  %v9712_v24 = vpop.f32.mrf.mxu0 }
 0xc06   : > { %v17204_v33 = vadd.f32 %v8754_v62, %v17012_v63  ;;  %v17207_v52 = vadd.f32 %v9712_v24, %v17113_v51 }
 0xc07   : > { %v8836_v36 = vpop.f32.mrf.mxu2 }
 0xc08   : > { %9821 = vmatmul.bf16.gmra.mxu1 %v16990_v20  ;;  %v9145_v35 = vrot.slane %v8836_v36, 1 }
 0xc0d   : > { %v8756_v46 = vpop.f32.mrf.mxu1  ;;  %v9715_v47 = vpop.f32.mrf.mxu0 }
 0xc0e   : > { %v17211_v14 = vadd.f32 %v8756_v46, %v17026_v19 }
 0xc0f   : > { %v8838_v56 = vpop.f32.mrf.mxu2 }
 0xc10   : > { %v9146_v63 = vrot.slane %v8838_v56, 1  ;;  %9748 = vmatmul.bf16.gmra.mxu0 %v17214_v25  ;;  %v12109_v56 = vld [vmem:[#allocation6 + $0x1a8] sm:$0xf0] }
 0xc12   : > { %v9147_v22 = vsel %vm3652_vm5, %v9145_v35, %v9146_v63 }
 0xc13   : > { %v17219_v51 = vadd.f32 %v9147_v22, %v17003_v44  ;;  %v17240_v22 = vpop.f32.mrf.mxu3 }
 0xc14   : > { %8880 = vmatmul.bf16.gmra.mxu2 %v17036_v11  ;;  %9009 = vmatmul.bf16.gmra.mxu3 %v17036_v11  ;;  %v9474_v11 = vld [vmem:[#allocation3 + $0x130] sm:$0xff] }
 0xc15   : > { %v8759_v19 = vpop.f32.mrf.mxu1  ;;  %v9716_v50 = vpop.f32.mrf.mxu0  ;;  %v17238_v35 = vpack.c.bf16 %v18281_v2, %v9474_v11 }
 0xc16   : > { %v17224_v12 = vadd.f32 %v9716_v50, %v17131_v8 }
 0xc17   : > { %v8841_v13 = vpop.f32.mrf.mxu2 }
 0xc18   : > { %v9148_v42 = vrot.slane %v8841_v13, 1  ;;  %9826 = vmatmul.bf16.gmra.mxu1 %v17018_v1 }
 0xc1a   : > { %v9149_v62 = vsel %vm3652_vm5, %v9146_v63, %v9148_v42  ;;  %v11808_v63 = vor.u32 %v12109_v56, %v11807_v58  ;;  %v18283_v56 = vld [vmem:[#allocation40_spill] sm:$0xff] }
 0xc1b   : > { %v17229_v24 = vadd.f32 %v9149_v62, %v17015_v26  ;;  %v17249_v42 = vpop.f32.mrf.mxu3 }
 0xc1c   : > { %9923 = vmatpush.bf16.msrb.mxu2 %v11808_v63 }
 0xc1d   : > { %v8760_v44 = vpop.f32.mrf.mxu1  ;;  %v9719_v46 = vpop.f32.mrf.mxu0 }
 0xc1e   : > { %v17232_v36 = vadd.f32 %v8760_v44, %v17050_v5  ;;  %v17235_v8 = vadd.f32 %v9719_v46, %v17142_v4  ;;  %v9476_v46 = vld [vmem:[#allocation3 + $0x140] sm:$0xff] }
 0xc1f   : > { %v8843_v47 = vpop.f32.mrf.mxu2  ;;  %v17259_v2 = vpack.c.bf16 %v18283_v56, %v9476_v46  ;;  %v12106_v46 = vld [vmem:[#allocation6 + $0x190] sm:$0xf0] }
 0xc20   : > { %9753 = vmatmul.bf16.gmra.mxu0 %v17238_v35  ;;  %v9150_v50 = vrot.slane %v8843_v47, 1 }
 0xc21   : > { %18284 = vst [vmem:[#allocation22_spill] sm:$0xff] %v17259_v2 }
 0xc24   : > { %8885 = vmatmul.bf16.gmra.mxu2 %v17059_v28  ;;  %9014 = vmatmul.bf16.gmra.mxu3 %v17059_v28 }
 0xc25   : > { %v8763_v26 = vpop.f32.mrf.mxu1  ;;  %v9721_v19 = vpop.f32.mrf.mxu0 }
 0xc26   : > { %v17246_v5 = vadd.f32 %v8763_v26, %v17067_v37 }
 0xc27   : > { %v8846_v4 = vpop.f32.mrf.mxu2 }
 0xc28   : > { %v9151_v13 = vrot.slane %v8846_v4, 1  ;;  %9831 = vmatmul.bf16.gmra.mxu1 %v18260_v40 }
 0xc2a   : > { %v9152_v62 = vsel %vm3652_vm5, %v9150_v50, %v9151_v13 }
 0xc2b   : > { %v17253_v44 = vadd.f32 %v9152_v62, %v17045_v7  ;;  %v17266_v7 = vpop.f32.mrf.mxu3  ;;  %v11795_v62 = vld [vmem:[#allocation6 + $0x188] sm:$0xf] }
 0xc2d   : > { %v8765_v11 = vpop.f32.mrf.mxu1  ;;  %v9723_v28 = vpop.f32.mrf.mxu0 }
 0xc2e   : > { %v17256_v37 = vadd.f32 %v9723_v28, %v17160_v34 }
 0xc2f   : > { %v8848_v58 = vpop.f32.mrf.mxu2 }
 0xc30   : > { %18282 = vst [vmem:[#allocation47_spill] sm:$0xff] %v17256_v37  ;;  %v9153_v47 = vrot.slane %v8848_v58, 1  ;;  %9757 = vmatmul.bf16.gmra.mxu0 %v17259_v2 }
 0xc32   : > { %v9154_v63 = vsel %vm3652_vm5, %v9151_v13, %v9153_v47  ;;  %v11796_v13 = vor.u32 %v12106_v46, %v11795_v62  ;;  %v9478_v47 = vld [vmem:[#allocation3 + $0x150] sm:$0xff] }
 0xc33   : > { %v17264_v26 = vadd.f32 %v9154_v63, %v17055_v21  ;;  %v17274_v21 = vpop.f32.mrf.mxu3  ;;  %v18286_v63 = vld [vmem:[#allocation42_spill] sm:$0xff] }
 0xc34   : > { %8890 = vmatmul.bf16.gmra.mxu2 %v17089_v10  ;;  %9019 = vmatmul.bf16.gmra.mxu3 %v17089_v10  ;;  %v17277_v37 = vpack.c.bf16 %v18286_v63, %v9478_v47 }
 0xc35   : > { %v9797_v19 = vpop.f32.mrf.mxu1  ;;  %v9725_v34 = vpop.f32.mrf.mxu0  ;;  %9924 = vmatpush.bf16.msrb.mxu2 %v11796_v13 }
 0xc36   : > { %v17271_v50 = vadd.f32 %v9725_v34, %v17169_v18  ;;  %v10126_v28 = vrot.slane %v9797_v19, 1  ;;  %18287 = vst [vmem:[#allocation48_spill] sm:$0xff] %v17277_v37  ;;  %v18288_v19 = vld [vmem:[#allocation43_spill] sm:$0xff] }
 0xc37   : > { %v8851_v4 = vpop.f32.mrf.mxu2 }
 0xc38   : > { %18285 = vst [vmem:[#allocation10_spill] sm:$0xff] %v17271_v50  ;;  %9836 = vmatmul.bf16.gmra.mxu1 %v18263_v6  ;;  %v9155_v2 = vrot.slane %v8851_v4, 1 }
 0xc3b   : > { %v17289_v4 = vpop.f32.mrf.mxu3 }
 0xc3d   : > { %v9799_v11 = vpop.f32.mrf.mxu1  ;;  %v9728_v56 = vpop.f32.mrf.mxu0 }
 0xc3e   : > { %v10127_v58 = vrot.slane %v9799_v11, 1 }
 0xc3f   : > { %v8853_v10 = vpop.f32.mrf.mxu2 }
 0xc40   : > { %v10128_v18 = vsel %vm3652_vm5, %v10126_v28, %v10127_v58  ;;  %v9156_v34 = vrot.slane %v8853_v10, 1  ;;  %9761 = vmatmul.bf16.gmra.mxu0 %v17277_v37 }
 0xc41   : > { %v17281_v50 = vadd.f32 %v10128_v18, %v17072_v3 }
 0xc42   : > { %v9157_v62 = vsel %vm3652_vm5, %v9155_v2, %v9156_v34  ;;  %v18290_v2 = vld [vmem:[#allocation20_spill] sm:$0xff] }
 0xc43   : > { %v17286_v46 = vadd.f32 %v9157_v62, %v18288_v19 }
 0xc44   : > { %9925 = vmatmul.bf16.vlgmr.msrb.gmra.mxu2 %v18269_v54 }
 0xc45   : > { %v9802_v13 = vpop.f32.mrf.mxu1  ;;  %v9729_v56 = vpop.f32.mrf.mxu0 }
 0xc46   : > { %v10129_v11 = vrot.slane %v9802_v13, 1  ;;  %v17292_v28 = vadd.f32 %v9729_v56, %v17187_v57  ;;  %v9480_v13 = vld [vmem:[#allocation3 + $0x160] sm:$0xff]  ;;  %v18292_v56 = vld [vmem:[#allocation18_spill] sm:$0xff] }
 0xc47   : > { %v8856_v47 = vpop.f32.mrf.mxu2 }
 0xc48   : > { %18289 = vst [vmem:[#allocation12_spill] sm:$0xff] %v17292_v28  ;;  %v10130_v3 = vsel %vm3652_vm5, %v10127_v58, %v10129_v11  ;;  %v9158_v10 = vrot.slane %v8856_v47, 1  ;;  %9841 = vmatmul.bf16.gmra.mxu1 %v18268_v29  ;;  %v17307_v58 = vpack.c.bf16 %v18292_v56, %v9480_v13  ;;  %v17309_v11 = vpop.f32.mrf.mxu3 }
 0xc49   : > { %v17297_v63 = vadd.f32 %v10130_v3, %v18290_v2 }
 0xc4a   : > { %v9159_v18 = vsel %vm3652_vm5, %v9156_v34, %v9158_v10 }
 0xc4b   : > { %v17301_v54 = vadd.f32 %v9159_v18, %v17096_v55 }
 0xc4d   : > { %v9804_v62 = vpop.f32.mrf.mxu1  ;;  %v9732_v19 = vpop.f32.mrf.mxu0 }
 0xc4e   : > { %v17304_v57 = vadd.f32 %v9732_v19, %v17201_v61  ;;  %v10131_v47 = vrot.slane %v9804_v62, 1  ;;  %v9338_v61 = vrot.slane %v17249_v42, 2 }
 0xc4f   : > { %v8858_v37 = vpop.f32.mrf.mxu2 }
 0xc50   : > { %18291 = vst [vmem:[#allocation50_spill] sm:$0xff] %v17304_v57  ;;  %9766 = vmatmul.bf16.gmra.mxu0 %v17307_v58  ;;  %v9160_v2 = vrot.slane %v8858_v37, 1  ;;  %v17324_v56 = vpop.f32.mrf.mxu3 }
 0xc54   : > { %9930 = vmatmul.bf16.gmra.mxu2 %v16879_v38  ;;  %v9337_v38 = vrot.slane %v17240_v22, 2 }
 0xc55   : > { %v9807_v34 = vpop.f32.mrf.mxu1  ;;  %v9734_v3 = vpop.f32.mrf.mxu0 }
 0xc56   : > { %v10132_v55 = vrot.slane %v9807_v34, 1  ;;  %v9339_v37 = vsel %vm3845_vm6, %v9337_v38, %v9338_v61  ;;  %v9482_v34 = vld [vmem:[#allocation3 + $0x170] sm:$0xff] }
 0xc57   : > { %v8861_v10 = vpop.f32.mrf.mxu2 }
 0xc58   : > { %v10133_v18 = vsel %vm3652_vm5, %v10131_v47, %v10132_v55  ;;  %v9161_v28 = vrot.slane %v8861_v10, 1  ;;  %9846 = vmatmul.bf16.gmra.mxu1 %v18271_v48  ;;  %v9483_v47 = vld [vmem:[#allocation3 + $0x178] sm:$0xff]  ;;  %v9425_v10 = vadd.f32 %v9339_v37, %v17219_v51  ;;  %v18294_v51 = vld [vmem:[#allocation45_spill] sm:$0xff] }
 0xc59   : > { %v17317_v19 = vadd.f32 %v10133_v18, %v17107_v30 }
 0xc5a   : > { %v9162_v13 = vsel %vm3652_vm5, %v9160_v2, %v9161_v28  ;;  %v17330_v2 = vpack.c.bf16 %v9483_v47, %v9482_v34  ;;  %v17344_v47 = vpop.f32.mrf.mxu3 }
 0xc5b   : > { %18293 = vst [vmem:[#allocation49_spill] sm:$0xff] %v17317_v19  ;;  %v17322_v62 = vadd.f32 %v9162_v13, %v17116_v27  ;;  %v9340_v13 = vrot.slane %v17266_v7, 2 }
 0xc5d   : > { %v9809_v3 = vpop.f32.mrf.mxu1  ;;  %v9736_v57 = vpop.f32.mrf.mxu0 }
 0xc5e   : > { %v10134_v42 = vrot.slane %v9809_v3, 1  ;;  %v17328_v18 = vadd.f32 %v9736_v57, %v9425_v10  ;;  %v9341_v57 = vsel %vm3845_vm6, %v9338_v61, %v9340_v13 }
 0xc5f   : > { %v8863_v30 = vpop.f32.mrf.mxu2 }
 0xc60   : > { %v10135_v22 = vsel %vm3652_vm5, %v10132_v55, %v10134_v42  ;;  %v9163_v27 = vrot.slane %v8863_v30, 1  ;;  %9770 = vmatmul.bf16.gmra.mxu0 %v17330_v2  ;;  %v9426_v55 = vadd.f32 %v9341_v57, %v17229_v24 }
 0xc61   : > { %v17335_v19 = vadd.f32 %v10135_v22, %v17119_v53 }
 0xc62   : > { %v9164_v38 = vsel %vm3652_vm5, %v9161_v28, %v9163_v27  ;;  %v17350_v27 = vpop.f32.mrf.mxu3 }
 0xc63   : > { %v17340_v37 = vadd.f32 %v9164_v38, %v18294_v51  ;;  %v9343_v38 = vrot.slane %v17289_v4, 2  ;;  %v18295_v51 = vld [vmem:[#allocation23_spill] sm:$0xff] }
 0xc64   : > { %9935 = vmatmul.bf16.gmra.mxu2 %v16905_v32 }
 0xc65   : > { %v9812_v34 = vpop.f32.mrf.mxu1  ;;  %v9738_v7 = vpop.f32.mrf.mxu0 }
 0xc66   : > { %v17347_v53 = vadd.f32 %v9738_v7, %v9426_v55  ;;  %v10136_v28 = vrot.slane %v9812_v34, 1  ;;  %v9342_v34 = vrot.slane %v17274_v21, 2 }
 0xc67   : > { %v8866_v3 = vpop.f32.mrf.mxu2 }
 0xc68   : > { %9851 = vmatmul.bf16.gmra.mxu1 %v18274_v0  ;;  %v9165_v32 = vrot.slane %v8866_v3, 1  ;;  %v9344_v7 = vsel %vm3845_vm6, %v9342_v34, %v9343_v38  ;;  %v9487_v34 = vld [vmem:[#allocation3 + $0x198] sm:$0xff] }
 0xc6d   : > { %v9814_v10 = vpop.f32.mrf.mxu1  ;;  %v9741_v30 = vpop.f32.mrf.mxu0 }
 0xc6e   : > { %v10137_v42 = vrot.slane %v9814_v10, 1  ;;  %v9427_v10 = vadd.f32 %v9344_v7, %v17253_v44 }
 0xc6f   : > { %v8868_v22 = vpop.f32.mrf.mxu2 }
 0xc70   : > { %v10138_v61 = vsel %vm3652_vm5, %v10136_v28, %v10137_v42  ;;  %v9166_v13 = vrot.slane %v8868_v22, 1  ;;  %9774 = vmatmul.bf16.gmra.mxu0 %v18295_v51 }
 0xc71   : > { %v17355_v24 = vadd.f32 %v10138_v61, %v17134_v41 }
 0xc72   : > { %v9167_v57 = vsel %vm3652_vm5, %v9165_v32, %v9166_v13 }
 0xc73   : > { %v17361_v55 = vadd.f32 %v9167_v57, %v17145_v59  ;;  %v9345_v59 = vrot.slane %v17309_v11, 2  ;;  %v18296_v11 = vld [vmem:[#allocation41_spill] sm:$0xff] }
 0xc74   : > { %9940 = vmatmul.bf16.gmra.mxu2 %v16931_v60  ;;  %v17374_v60 = vpop.f32.mrf.mxu3 }
 0xc75   : > { %v9817_v3 = vpop.f32.mrf.mxu1  ;;  %v9742_v28 = vpop.f32.mrf.mxu0  ;;  %v9346_v57 = vsel %vm3845_vm6, %v9343_v38, %v9345_v59 }
 0xc76   : > { %v10139_v4 = vrot.slane %v9817_v3, 1  ;;  %v17366_v30 = vadd.f32 %v9742_v28, %v9427_v10 }
 0xc77   : > { %v8871_v41 = vpop.f32.mrf.mxu2 }
 0xc78   : > { %v10140_v22 = vsel %vm3652_vm5, %v10137_v42, %v10139_v4  ;;  %v9168_v32 = vrot.slane %v8871_v41, 1  ;;  %9856 = vmatmul.bf16.gmra.mxu1 %v18276_v39  ;;  %v9428_v42 = vadd.f32 %v9346_v57, %v17264_v26 }
 0xc79   : > { %v17372_v21 = vadd.f32 %v10140_v22, %v17148_v17  ;;  %v17385_v17 = vpack.c.bf16 %v9487_v34, %v18296_v11 }
 0xc7a   : > { %v9169_v61 = vsel %vm3652_vm5, %v9166_v13, %v9168_v32 }
 0xc7b   : > { %v17378_v44 = vadd.f32 %v9169_v61, %v17152_v45  ;;  %v9348_v61 = vrot.slane %v17344_v47, 2 }
 0xc7c   : > { %v17388_v28 = vpop.f32.mrf.mxu3 }
 0xc7d   : > { %v9819_v7 = vpop.f32.mrf.mxu1  ;;  %v9745_v3 = vpop.f32.mrf.mxu0 }
 0xc7e   : > { %v17382_v4 = vadd.f32 %v9745_v3, %v9428_v42  ;;  %v10141_v13 = vrot.slane %v9819_v7, 1  ;;  %v9489_v42 = vld [vmem:[#allocation3 + $0x1a8] sm:$0xff] }
 0xc7f   : > { %v8873_v10 = vpop.f32.mrf.mxu2 }
 0xc80   : > { %9779 = vmatmul.bf16.gmra.mxu0 %v17385_v17  ;;  %v9170_v32 = vrot.slane %v8873_v10, 1 }
 0xc84   : > { %9945 = vmatmul.bf16.gmra.mxu2 %v16961_v23  ;;  %v9347_v23 = vrot.slane %v17324_v56, 2  ;;  %v8992_v11 = vpop.f32.mrf.mxu3 }
 0xc85   : > { %v9822_v45 = vpop.f32.mrf.mxu1  ;;  %v9747_v41 = vpop.f32.mrf.mxu0 }
 0xc86   : > { %v10142_v38 = vrot.slane %v9822_v45, 1  ;;  %v9349_v3 = vsel %vm3845_vm6, %v9347_v23, %v9348_v61  ;;  %v18297_v23 = vld [vmem:[#allocation44_spill] sm:$0xff] }
 0xc87   : > { %v8876_v22 = vpop.f32.mrf.mxu2  ;;  %v9429_v45 = vadd.f32 %v9349_v3, %v17286_v46 }
 0xc88   : > { %v10143_v26 = vsel %vm3652_vm5, %v10141_v13, %v10142_v38  ;;  %v9171_v59 = vrot.slane %v8876_v22, 1  ;;  %9861 = vmatmul.bf16.gmra.mxu1 %v18277_v49  ;;  %v12370_v13 = vld [vmem:[#allocation2 + $0x10] sm:$0xff] }
 0xc89   : > { %v17395_v57 = vadd.f32 %v10143_v26, %v17163_v31  ;;  %v17404_v41 = vpack.c.bf16 %v9489_v42, %v12370_v13 }
 0xc8a   : > { %v9172_v34 = vsel %vm3652_vm5, %v9170_v32, %v9171_v59 }
 0xc8b   : > { %v17400_v7 = vadd.f32 %v9172_v34, %v17172_v43  ;;  %v9350_v43 = vrot.slane %v17350_v27, 2 }
 0xc8c   : > { %v8995_v27 = vpop.f32.mrf.mxu3 }
 0xc8d   : > { %v9824_v10 = vpop.f32.mrf.mxu1  ;;  %v9749_v31 = vpop.f32.mrf.mxu0  ;;  %v9351_v3 = vsel %vm3845_vm6, %v9348_v61, %v9350_v43  ;;  %v9353_v61 = vrot.slane %v17388_v28, 2 }
 0xc8e   : > { %v10144_v47 = vrot.slane %v9824_v10, 1  ;;  %v17406_v26 = vadd.f32 %v9749_v31, %v9429_v45 }
 0xc8f   : > { %v8878_v22 = vpop.f32.mrf.mxu2 }
 0xc90   : > { %v10145_v56 = vsel %vm3652_vm5, %v10142_v38, %v10144_v47  ;;  %v9173_v32 = vrot.slane %v8878_v22, 1  ;;  %9783 = vmatmul.bf16.gmra.mxu0 %v17404_v41  ;;  %v9430_v38 = vadd.f32 %v9351_v3, %v17301_v54  ;;  %v9352_v3 = vrot.slane %v17374_v60, 2 }
 0xc91   : > { %v17411_v34 = vadd.f32 %v10145_v56, %v17175_v9  ;;  %v9355_v60 = vrot.slane %v8992_v11, 2 }
 0xc92   : > { %v9174_v46 = vsel %vm3652_vm5, %v9171_v59, %v9173_v32 }
 0xc93   : > { %v17416_v42 = vadd.f32 %v9174_v46, %v18297_v23 }
 0xc94   : > { %9950 = vmatmul.bf16.gmra.mxu2 %v16990_v20  ;;  %v8997_v43 = vpop.f32.mrf.mxu3 }
 0xc95   : > { %v9827_v10 = vpop.f32.mrf.mxu1  ;;  %v9751_v45 = vpop.f32.mrf.mxu0 }
 0xc96   : > { %v17421_v47 = vadd.f32 %v9751_v45, %v9430_v38  ;;  %v10146_v31 = vrot.slane %v9827_v10, 1  ;;  %v9354_v10 = vsel %vm3845_vm6, %v9352_v3, %v9353_v61 }
 0xc97   : > { %v8881_v13 = vpop.f32.mrf.mxu2 }
 0xc98   : > { %9866 = vmatmul.bf16.gmra.mxu1 %v17193_v16  ;;  %v9175_v32 = vrot.slane %v8881_v13, 1  ;;  %v9431_v13 = vadd.f32 %v9354_v10, %v17322_v62 }
 0xc9c   : > { %v9000_v62 = vpop.f32.mrf.mxu3 }
 0xc9d   : > { %v9829_v9 = vpop.f32.mrf.mxu1  ;;  %v9754_v22 = vpop.f32.mrf.mxu0 }
 0xc9e   : > { %v10147_v59 = vrot.slane %v9829_v9, 1 }
 0xc9f   : > { %v8883_v56 = vpop.f32.mrf.mxu2 }
 0xca0   : > { %v10148_v20 = vsel %vm3652_vm5, %v10146_v31, %v10147_v59  ;;  %v9176_v46 = vrot.slane %v8883_v56, 1 }
 0xca1   : > { %v17427_v54 = vadd.f32 %v10148_v20, %v17190_v15  ;;  %v9356_v20 = vsel %vm3845_vm6, %v9353_v61, %v9355_v60  ;;  %v9358_v61 = vrot.slane %v8997_v43, 2  ;;  %v9357_v60 = vrot.slane %v8995_v27, 2 }
 0xca2   : > { %v9177_v23 = vsel %vm3652_vm5, %v9175_v32, %v9176_v46  ;;  %v9432_v3 = vadd.f32 %v9356_v20, %v17340_v37 }
 0xca3   : > { %v17432_v38 = vadd.f32 %v9177_v23, %v17204_v33 }
 0xca4   : > { %9955 = vmatmul.bf16.gmra.mxu2 %v17018_v1 }
 0xca5   : > { %v9832_v45 = vpop.f32.mrf.mxu1  ;;  %v9755_v28 = vpop.f32.mrf.mxu0 }
 0xca6   : > { %v10149_v9 = vrot.slane %v9832_v45, 1  ;;  %v17437_v15 = vadd.f32 %v9755_v28, %v9431_v13 }
 0xca7   : > { %v8886_v31 = vpop.f32.mrf.mxu2 }
 0xca8   : > { %v10150_v22 = vsel %vm3652_vm5, %v10147_v59, %v10149_v9  ;;  %v9178_v56 = vrot.slane %v8886_v31, 1  ;;  %9871 = vmatmul.bf16.gmra.mxu1 %v17214_v25 }
 0xca9   : > { %v17442_v33 = vadd.f32 %v10150_v22, %v17207_v52  ;;  %v9002_v52 = vpop.f32.mrf.mxu3 }
 0xcaa   : > { %v9179_v1 = vsel %vm3652_vm5, %v9176_v46, %v9178_v56 }
 0xcab   : > { %v17446_v32 = vadd.f32 %v9179_v1, %v17211_v14  ;;  %v9359_v1 = vsel %vm3845_vm6, %v9357_v60, %v9358_v61 }
 0xcad   : > { %v9834_v23 = vpop.f32.mrf.mxu1  ;;  %v9758_v10 = vpop.f32.mrf.mxu0 }
 0xcae   : > { %v17450_v45 = vadd.f32 %v9758_v10, %v9432_v3  ;;  %v10151_v13 = vrot.slane %v9834_v23, 1  ;;  %v9433_v23 = vadd.f32 %v9359_v1, %v17361_v55 }
 0xcaf   : > { %v8888_v59 = vpop.f32.mrf.mxu2 }
 0xcb0   : > { %v9180_v14 = vrot.slane %v8888_v59, 1 }
 0xcb4   : > { %9960 = vmatmul.bf16.gmra.mxu2 %v18260_v40 }
 0xcb5   : > { %v9837_v11 = vpop.f32.mrf.mxu1  ;;  %v9760_v46 = vpop.f32.mrf.mxu0 }
 0xcb6   : > { %v10152_v9 = vrot.slane %v9837_v11, 1  ;;  %v9005_v11 = vpop.f32.mrf.mxu3  ;;  %v9360_v46 = vrot.slane %v9000_v62, 2  ;;  %v18298_v62 = vld [vmem:[#allocation22_spill] sm:$0xff] }
 0xcb7   : > { %v8891_v28 = vpop.f32.mrf.mxu2 }
 0xcb8   : > { %v10153_v31 = vsel %vm3652_vm5, %v10151_v13, %v10152_v9  ;;  %v9181_v22 = vrot.slane %v8891_v28, 1  ;;  %9876 = vmatmul.bf16.gmra.mxu1 %v17238_v35  ;;  %v9361_v55 = vsel %vm3845_vm6, %v9358_v61, %v9360_v46  ;;  %v9363_v61 = vrot.slane %v9005_v11, 2 }
 0xcb9   : > { %v17456_v37 = vadd.f32 %v10153_v31, %v17224_v12  ;;  %v9434_v31 = vadd.f32 %v9361_v55, %v17378_v44 }
 0xcba   : > { %v9182_v56 = vsel %vm3652_vm5, %v9180_v14, %v9181_v22 }
 0xcbb   : > { %v17460_v40 = vadd.f32 %v9182_v56, %v17232_v36 }
 0xcbd   : > { %v9839_v20 = vpop.f32.mrf.mxu1  ;;  %v9762_v10 = vpop.f32.mrf.mxu0 }
 0xcbe   : > { %v10154_v3 = vrot.slane %v9839_v20, 1  ;;  %v17464_v13 = vadd.f32 %v9762_v10, %v9433_v23 }
 0xcbf   : > { %v8893_v59 = vpop.f32.mrf.mxu2 }
 0xcc0   : > { %v10155_v12 = vsel %vm3652_vm5, %v10152_v9, %v10154_v3  ;;  %v9183_v43 = vrot.slane %v8893_v59, 1  ;;  %v18299_v59 = vld [vmem:[#allocation47_spill] sm:$0xff] }
 0xcc1   : > { %v17468_v27 = vadd.f32 %v10155_v12, %v17235_v8  ;;  %v9007_v8 = vpop.f32.mrf.mxu3 }
 0xcc2   : > { %v9184_v36 = vsel %vm3652_vm5, %v9181_v22, %v9183_v43  ;;  %v9362_v43 = vrot.slane %v9002_v52, 2 }
 0xcc3   : > { %v17472_v28 = vadd.f32 %v9184_v36, %v17246_v5 }
 0xcc4   : > { %9965 = vmatmul.bf16.gmra.mxu2 %v18263_v6  ;;  %v9364_v36 = vsel %vm3845_vm6, %v9362_v43, %v9363_v61 }
 0xcc5   : > { %v9842_v14 = vpop.f32.mrf.mxu1  ;;  %v9764_v56 = vpop.f32.mrf.mxu0  ;;  %v9435_v11 = vadd.f32 %v9364_v36, %v17400_v7 }
 0xcc6   : > { %v17477_v9 = vadd.f32 %v9764_v56, %v9434_v31  ;;  %v10156_v20 = vrot.slane %v9842_v14, 1  ;;  %v17491_v14 = vld [vmem:[%s17708_s9] ss:$0 sm:$0xff] }
 0xcc7   : > { %v9926_v60 = vpop.f32.mrf.mxu2 }
 0xcc8   : > { %9881 = vmatmul.bf16.gmra.mxu1 %v18298_v62  ;;  %v10318_v3 = vrot.slane %v9926_v60, 2 }
 0xcc9   : > { %v9010_v46 = vpop.f32.mrf.mxu3 }
 0xccd   : > { %v9844_v1 = vpop.f32.mrf.mxu1  ;;  %v9767_v23 = vpop.f32.mrf.mxu0 }
 0xcce   : > { %v10157_v22 = vrot.slane %v9844_v1, 1  ;;  %v18300_v23 = vld [vmem:[#allocation48_spill] sm:$0xff] }
 0xccf   : > { %v9928_v5 = vpop.f32.mrf.mxu2 }
 0xcd0   : > { %v10158_v6 = vsel %vm3652_vm5, %v10156_v20, %v10157_v22  ;;  %v10319_v10 = vrot.slane %v9928_v5, 2  ;;  %v9365_v5 = vrot.slane %v9007_v8, 2 }
 0xcd1   : > { %v17482_v12 = vadd.f32 %v10158_v6, %v18299_v59 }
 0xcd2   : > { %v10320_v44 = vsel %vm3845_vm6, %v10318_v3, %v10319_v10  ;;  %v18301_v3 = vld [vmem:[#allocation10_spill] sm:$0xff] }
 0xcd3   : > { %v10430_v55 = vadd.f32 %v10320_v44, %v17281_v50  ;;  %v9366_v44 = vsel %vm3845_vm6, %v9363_v61, %v9365_v5 }
 0xcd4   : > { %9970 = vmatmul.bf16.gmra.mxu2 %v18268_v29 }
 0xcd5   : > { %v9847_v31 = vpop.f32.mrf.mxu1  ;;  %v9768_v60 = vpop.f32.mrf.mxu0  ;;  %v10465_v50 = vadd.f32 %v17491_v14, %v10430_v55 }
 0xcd6   : > { %v10159_v56 = vrot.slane %v9847_v31, 1  ;;  %v17494_v20 = vadd.f32 %v9768_v60, %v9435_v11  ;;  %v9012_v31 = vpop.f32.mrf.mxu3  ;;  %v9436_v11 = vadd.f32 %v9366_v44, %v17416_v42 }
 0xcd7   : > { %v9931_v1 = vpop.f32.mrf.mxu2  ;;  %v10529_v43 = vmul.f32 0.01, %v10465_v50  ;;  %vm10497_vm11 = vcmp.ge.f32.partialorder %v10465_v50, 0.0 }
 0xcd8   : > { %v10160_v52 = vsel %vm3652_vm5, %v10157_v22, %v10159_v56  ;;  %v10321_v29 = vrot.slane %v9931_v1, 2  ;;  %9886 = vmatmul.bf16.gmra.mxu1 %v18300_v23 }
 0xcd9   : > { %v17500_v6 = vadd.f32 %v10160_v52, %v18301_v3 }
 0xcda   : > { %v10322_v59 = vsel %vm3845_vm6, %v10319_v10, %v10321_v29 }
 0xcdb   : > { %v10431_v7 = vadd.f32 %v10322_v59, %v17297_v63  ;;  %v10561_v63 = vsel %vm10497_vm11, %v10465_v50, %v10529_v43 }
 0xcdd   : > { %v10466_v36 = vadd.f32 %v17491_v14, %v10431_v7  ;;  %v9849_v22 = vpop.f32.mrf.mxu1  ;;  %v9771_v8 = vpop.f32.mrf.mxu0 }
 0xcde   : > { %v17507_v60 = vadd.f32 %v9771_v8, %v9436_v11  ;;  %v10161_v1 = vrot.slane %v9849_v22, 1  ;;  %v9015_v3 = vpop.f32.mrf.mxu3  ;;  %v9368_v11 = vrot.slane %v9012_v31, 2  ;;  %v18302_v8 = vld [vmem:[#allocation12_spill] sm:$0xff]  ;;  %v18303_v22 = vld [vmem:[#allocation49_spill] sm:$0xff] }
 0xcdf   : > { %vm10498_vm12 = vcmp.ge.f32.partialorder %v10466_v36, 0.0  ;;  %v10530_v55 = vmul.f32 0.01, %v10466_v36  ;;  %v9933_v56 = vpop.f32.mrf.mxu2 }
 0xce0   : > { %v10323_v59 = vrot.slane %v9933_v56, 2 }
 0xce1   : > { %v10562_v10 = vsel %vm10498_vm12, %v10466_v36, %v10530_v55  ;;  %v9367_v36 = vrot.slane %v9010_v46, 2 }
 0xce2   : > { %v12195_v61 = vpack.c.bf16 %v10562_v10, %v10561_v63 }
 0xce4   : > { %12196 = vst [vmem:[%s17514_s30] sm:$0xff] %v12195_v61   ;;  %9975 = vmatmul.bf16.gmra.mxu2 %v18271_v48  ;;  %v9369_v48 = vsel %vm3845_vm6, %v9367_v36, %v9368_v11 }
 0xce5   : > { %v9852_v42 = vpop.f32.mrf.mxu1  ;;  %v9773_v29 = vpop.f32.mrf.mxu0  ;;  %v9437_v10 = vadd.f32 %v9369_v48, %v17432_v38 }
 0xce6   : > { %v10162_v52 = vrot.slane %v9852_v42, 1 }
 0xce7   : > { %v9936_v5 = vpop.f32.mrf.mxu2 }
 0xce8   : > { %v10163_v7 = vsel %vm3652_vm5, %v10161_v1, %v10162_v52  ;;  %v10324_v44 = vrot.slane %v9936_v5, 2  ;;  %9891 = vmatmul.bf16.gmra.mxu1 %v17307_v58  ;;  %v9370_v5 = vrot.slane %v9015_v3, 2 }
 0xce9   : > { %v17521_v50 = vadd.f32 %v10163_v7, %v18302_v8  ;;  %v9017_v8 = vpop.f32.mrf.mxu3 }
 0xcea   : > { %v10325_v43 = vsel %vm3845_vm6, %v10323_v59, %v10324_v44  ;;  %v18304_v59 = vld [vmem:[#allocation50_spill] sm:$0xff]  ;;  %v9371_v38 = vsel %vm3845_vm6, %v9368_v11, %v9370_v5  ;;  %v9372_v5 = vrot.slane %v9017_v8, 2 }
 0xceb   : > { %v10432_v55 = vadd.f32 %v10325_v43, %v18303_v22  ;;  %v9438_v3 = vadd.f32 %v9371_v38, %v17446_v32 }
 0xced   : > { %v9854_v63 = vpop.f32.mrf.mxu1  ;;  %v9775_v61 = vpop.f32.mrf.mxu0  ;;  %v10467_v7 = vadd.f32 %v17491_v14, %v10432_v55 }
 0xcee   : > { %v10164_v56 = vrot.slane %v9854_v63, 1  ;;  %v17527_v1 = vadd.f32 %v9775_v61, %v9437_v10 }
 0xcef   : > { %v9938_v42 = vpop.f32.mrf.mxu2  ;;  %v10531_v48 = vmul.f32 0.01, %v10467_v7  ;;  %vm10499_vm13 = vcmp.ge.f32.partialorder %v10467_v7, 0.0 }
 0xcf0   : > { %v10165_v31 = vsel %vm3652_vm5, %v10162_v52, %v10164_v56  ;;  %v10326_v29 = vrot.slane %v9938_v42, 2 }
 0xcf1   : > { %v17532_v46 = vadd.f32 %v10165_v31, %v18304_v59  ;;  %v9020_v56 = vpop.f32.mrf.mxu3 }
 0xcf2   : > { %v10327_v43 = vsel %vm3845_vm6, %v10324_v44, %v10326_v29  ;;  %v9373_v29 = vrot.slane %v9020_v56, 2 }
 0xcf3   : > { %v10433_v36 = vadd.f32 %v10327_v43, %v17335_v19  ;;  %v10563_v19 = vsel %vm10499_vm13, %v10467_v7, %v10531_v48 }
 0xcf4   : > { %9980 = vmatmul.bf16.gmra.mxu2 %v18274_v0  ;;  %v9374_v59 = vsel %vm3845_vm6, %v9372_v5, %v9373_v29 }
 0xcf5   : > { %v10468_v52 = vadd.f32 %v17491_v14, %v10433_v36  ;;  %v9777_v22 = vpop.f32.mrf.mxu0  ;;  %v9439_v7 = vadd.f32 %v9374_v59, %v17460_v40 }
 0xcf6   : > { %v17540_v10 = vadd.f32 %v9777_v22, %v9438_v3 }
 0xcf7   : > { %vm10500_vm14 = vcmp.ge.f32.partialorder %v10468_v52, 0.0  ;;  %v10532_v55 = vmul.f32 0.01, %v10468_v52  ;;  %v9941_v63 = vpop.f32.mrf.mxu2 }
 0xcf8   : > { %9896 = vmatmul.bf16.gmra.mxu1 %v17330_v2  ;;  %v10328_v42 = vrot.slane %v9941_v63, 2 }
 0xcf9   : > { %v10564_v44 = vsel %vm10500_vm14, %v10468_v52, %v10532_v55  ;;  %v9022_v36 = vpop.f32.mrf.mxu3 }
 0xcfa   : > { %v12200_v0 = vpack.c.bf16 %v10564_v44, %v10563_v19  ;;  %v9375_v22 = vrot.slane %v9022_v36, 2 }
 0xcfc   : > { %12287 = vst [vmem:[%s17514_s30 + $0x8] sm:$0xff] %v12200_v0  }
 0xcfd   : > { %v9780_v11 = vpop.f32.mrf.mxu0 }
 0xcff   : > { %v9943_v61 = vpop.f32.mrf.mxu2 }
 0xd00   : > { %v10329_v31 = vrot.slane %v9943_v61, 2 }
 0xd02   : > { %v10330_v32 = vsel %vm3845_vm6, %v10328_v42, %v10329_v31 }
 0xd03   : > { %v10434_v43 = vadd.f32 %v10330_v32, %v17355_v24  ;;  %v9376_v24 = vsel %vm3845_vm6, %v9373_v29, %v9375_v22 }
 0xd04   : > { %9985 = vmatmul.bf16.gmra.mxu2 %v18276_v39  ;;  %v9440_v19 = vadd.f32 %v9376_v24, %v17472_v28 }
 0xd05   : > { %v9781_v38 = vpop.f32.mrf.mxu0  ;;  %v10469_v55 = vadd.f32 %v17491_v14, %v10434_v43 }
 0xd06   : > { %v17549_v52 = vadd.f32 %v9781_v38, %v9439_v7 }
 0xd07   : > { %v9946_v48 = vpop.f32.mrf.mxu2  ;;  %v10533_v63 = vmul.f32 0.01, %v10469_v55  ;;  %vm10501_vm15 = vcmp.ge.f32.partialorder %v10469_v55, 0.0 }
 0xd08   : > { %v10331_v3 = vrot.slane %v9946_v48, 2  ;;  %9901 = vmatmul.bf16.gmra.mxu1 %v18295_v51 }
 0xd09   : > { %v10565_v61 = vsel %vm10501_vm15, %v10469_v55, %v10533_v63 }
 0xd0a   : > { %v10332_v39 = vsel %vm3845_vm6, %v10329_v31, %v10331_v3 }
 0xd0b   : > { %v10435_v8 = vadd.f32 %v10332_v39, %v17372_v21 }
 0xd0d   : > { %v10470_v40 = vadd.f32 %v17491_v14, %v10435_v8  ;;  %v9784_v44 = vpop.f32.mrf.mxu0 }
 0xd0e   : > { %v17558_v11 = vadd.f32 %v9784_v44, %v9440_v19 }
 0xd0f   : > { %vm10502_vm0 = vcmp.ge.f32.partialorder %v10470_v40, 0.0  ;;  %v10534_v0 = vmul.f32 0.01, %v10470_v40  ;;  %v9948_v56 = vpop.f32.mrf.mxu2 }
 0xd10   : > { %v10333_v29 = vrot.slane %v9948_v56, 2 }
 0xd11   : > { %v10566_v42 = vsel %vm10502_vm0, %v10470_v40, %v10534_v0 }
 0xd12   : > { %v12205_v32 = vpack.c.bf16 %v10566_v42, %v10565_v61 }
 0xd14   : > { %12288 = vst [vmem:[%s17514_s30 + $0x10] sm:$0xff] %v12205_v32   ;;  %9990 = vmatmul.bf16.gmra.mxu2 %v18277_v49 }
 0xd15   : > { %v9786_v31 = vpop.f32.mrf.mxu0 }
 0xd17   : > { %v9951_v21 = vpop.f32.mrf.mxu2 }
 0xd18   : > { %v10334_v5 = vrot.slane %v9951_v21, 2  ;;  %9906 = vmatmul.bf16.gmra.mxu1 %v17385_v17 }
 0xd1a   : > { %v10335_v28 = vsel %vm3845_vm6, %v10333_v29, %v10334_v5 }
 0xd1b   : > { %v10436_v59 = vadd.f32 %v10335_v28, %v17395_v57 }
 0xd1d   : > { %v10471_v7 = vadd.f32 %v17491_v14, %v10436_v59 }
 0xd1f   : > { %v9953_v43 = vpop.f32.mrf.mxu2  ;;  %v10535_v49 = vmul.f32 0.01, %v10471_v7  ;;  %vm10503_vm1 = vcmp.ge.f32.partialorder %v10471_v7, 0.0 }
 0xd20   : > { %v10336_v36 = vrot.slane %v9953_v43, 2 }
 0xd21   : > { %v10567_v57 = vsel %vm10503_vm1, %v10471_v7, %v10535_v49 }
 0xd22   : > { %v10337_v38 = vsel %vm3845_vm6, %v10334_v5, %v10336_v36 }
 0xd23   : > { %v10437_v48 = vadd.f32 %v10337_v38, %v17411_v34  ;;  %v17583_v38 = vpop.f32.mrf.mxu1 }
 0xd24   : > { %9995 = vmatmul.bf16.gmra.mxu2 %v17193_v16 }
 0xd25   : > { %v10472_v3 = vadd.f32 %v17491_v14, %v10437_v48 }
 0xd27   : > { %vm10504_vm2 = vcmp.ge.f32.partialorder %v10472_v3, 0.0  ;;  %v10536_v22 = vmul.f32 0.01, %v10472_v3  ;;  %v9956_v55 = vpop.f32.mrf.mxu2 }
 0xd28   : > { %9911 = vmatmul.bf16.gmra.mxu1 %v17404_v41  ;;  %v10338_v63 = vrot.slane %v9956_v55, 2 }
 0xd29   : > { %v10568_v39 = vsel %vm10504_vm2, %v10472_v3, %v10536_v22 }
 0xd2a   : > { %v12210_v8 = vpack.c.bf16 %v10568_v39, %v10567_v57 }
 0xd2c   : > { %12289 = vst [vmem:[%s17514_s30 + $0x18] sm:$0xff] %v12210_v8  }
 0xd2f   : > { %v9958_v24 = vpop.f32.mrf.mxu2 }
 0xd30   : > { %v10339_v40 = vrot.slane %v9958_v24, 2  ;;  %v17590_v24 = vpop.f32.mrf.mxu1 }
 0xd32   : > { %v10340_v34 = vsel %vm3845_vm6, %v10338_v63, %v10339_v40 }
 0xd33   : > { %v10438_v16 = vadd.f32 %v10340_v34, %v17427_v54 }
 0xd34   : > { %10000 = vmatmul.bf16.gmra.mxu2 %v17214_v25 }
 0xd35   : > { %v10473_v0 = vadd.f32 %v17491_v14, %v10438_v16 }
 0xd37   : > { %v9961_v19 = vpop.f32.mrf.mxu2  ;;  %v10537_v42 = vmul.f32 0.01, %v10473_v0  ;;  %vm10505_vm3 = vcmp.ge.f32.partialorder %v10473_v0, 0.0 }
 0xd38   : > { %v10341_v44 = vrot.slane %v9961_v19, 2 }
 0xd39   : > { %v10569_v29 = vsel %vm10505_vm3, %v10473_v0, %v10537_v42 }
 0xd3a   : > { %v10342_v56 = vsel %vm3845_vm6, %v10339_v40, %v10341_v44 }
 0xd3b   : > { %v10439_v61 = vadd.f32 %v10342_v56, %v17442_v33 }
 0xd3d   : > { %v10474_v32 = vadd.f32 %v17491_v14, %v10439_v61 }
 0xd3f   : > { %vm10506_vm4 = vcmp.ge.f32.partialorder %v10474_v32, 0.0  ;;  %v10538_v21 = vmul.f32 0.01, %v10474_v32  ;;  %v9963_v31 = vpop.f32.mrf.mxu2 }
 0xd40   : > { %v10343_v28 = vrot.slane %v9963_v31, 2 }
 0xd41   : > { %v10570_v25 = vsel %vm10506_vm4, %v10474_v32, %v10538_v21 }
 0xd42   : > { %v12215_v5 = vpack.c.bf16 %v10570_v25, %v10569_v29 }
 0xd44   : > { %12290 = vst [vmem:[%s17514_s30 + $0x20] sm:$0xff] %v12215_v5   ;;  %10005 = vmatmul.bf16.gmra.mxu2 %v17238_v35 }
 0xd47   : > { %v9966_v54 = vpop.f32.mrf.mxu2 }
 0xd48   : > { %v10344_v59 = vrot.slane %v9966_v54, 2 }
 0xd4a   : > { %v10345_v43 = vsel %vm3845_vm6, %v10343_v28, %v10344_v59 }
 0xd4b   : > { %v10440_v33 = vadd.f32 %v10345_v43, %v17456_v37 }
 0xd4d   : > { %v10475_v48 = vadd.f32 %v17491_v14, %v10440_v33 }
 0xd4f   : > { %v9968_v36 = vpop.f32.mrf.mxu2  ;;  %v10539_v35 = vmul.f32 0.01, %v10475_v48  ;;  %vm10507_vm7 = vcmp.ge.f32.partialorder %v10475_v48, 0.0 }
 0xd50   : > { %v10346_v7 = vrot.slane %v9968_v36, 2 }
 0xd51   : > { %v10571_v57 = vsel %vm10507_vm7, %v10475_v48, %v10539_v35 }
 0xd52   : > { %v10347_v49 = vsel %vm3845_vm6, %v10344_v59, %v10346_v7 }
 0xd53   : > { %v10441_v3 = vadd.f32 %v10347_v49, %v17468_v27 }
 0xd54   : > { %10010 = vmatmul.bf16.gmra.mxu2 %v18298_v62  ;;  %v9862_v62 = vpop.f32.mrf.mxu1 }
 0xd55   : > { %v10476_v22 = vadd.f32 %v17491_v14, %v10441_v3 }
 0xd57   : > { %vm10508_vm8 = vcmp.ge.f32.partialorder %v10476_v22, 0.0  ;;  %v10540_v55 = vmul.f32 0.01, %v10476_v22  ;;  %v9971_v37 = vpop.f32.mrf.mxu2 }
 0xd58   : > { %v10348_v40 = vrot.slane %v9971_v37, 2 }
 0xd59   : > { %v10572_v39 = vsel %vm10508_vm8, %v10476_v22, %v10540_v55 }
 0xd5a   : > { %v12220_v8 = vpack.c.bf16 %v10572_v39, %v10571_v57  ;;  %v10167_v39 = vrot.slane %v17590_v24, 1 }
 0xd5c   : > { %12291 = vst [vmem:[%s17514_s30 + $0x28] sm:$0xff] %v12220_v8   ;;  %v17600_v21 = vpop.f32.mrf.mxu1 }
 0xd5f   : > { %v9973_v63 = vpop.f32.mrf.mxu2 }
 0xd60   : > { %v10349_v34 = vrot.slane %v9973_v63, 2  ;;  %v10166_v63 = vrot.slane %v17583_v38, 1 }
 0xd62   : > { %v10350_v27 = vsel %vm3845_vm6, %v10348_v40, %v10349_v34 }
 0xd63   : > { %v10442_v16 = vadd.f32 %v10350_v27, %v17482_v12  ;;  %v10169_v27 = vrot.slane %v9862_v62, 1 }
 0xd64   : > { %10015 = vmatmul.bf16.gmra.mxu2 %v18300_v23  ;;  %v17604_v59 = vpop.f32.mrf.mxu1 }
 0xd65   : > { %v10477_v0 = vadd.f32 %v17491_v14, %v10442_v16  ;;  %v10170_v24 = vsel %vm3652_vm5, %v10167_v39, %v10169_v27 }
 0xd66   : > { %v10255_v38 = vadd.f32 %v10170_v24, %v17347_v53  ;;  %v10171_v53 = vrot.slane %v17600_v21, 1 }
 0xd67   : > { %v9976_v19 = vpop.f32.mrf.mxu2  ;;  %v10541_v42 = vmul.f32 0.01, %v10477_v0  ;;  %vm10509_vm9 = vcmp.ge.f32.partialorder %v10477_v0, 0.0 }
 0xd68   : > { %v10351_v44 = vrot.slane %v9976_v19, 2 }
 0xd69   : > { %v10573_v29 = vsel %vm10509_vm9, %v10477_v0, %v10541_v42 }
 0xd6a   : > { %v10352_v56 = vsel %vm3845_vm6, %v10349_v34, %v10351_v44 }
 0xd6b   : > { %v10443_v61 = vadd.f32 %v10352_v56, %v17500_v6 }
 0xd6c   : > { %v9869_v49 = vpop.f32.mrf.mxu1 }
 0xd6d   : > { %v10478_v32 = vadd.f32 %v17491_v14, %v10443_v61 }
 0xd6f   : > { %vm10510_vm10 = vcmp.ge.f32.partialorder %v10478_v32, 0.0  ;;  %v10542_v23 = vmul.f32 0.01, %v10478_v32  ;;  %v9978_v31 = vpop.f32.mrf.mxu2 }
 0xd70   : > { %v10353_v54 = vrot.slane %v9978_v31, 2 }
 0xd71   : > { %v10574_v12 = vsel %vm10510_vm10, %v10478_v32, %v10542_v23 }
 0xd72   : > { %v12225_v25 = vpack.c.bf16 %v10574_v12, %v10573_v29 }
 0xd74   : > { %12292 = vst [vmem:[%s17514_s30 + $0x30] sm:$0xff] %v12225_v25   ;;  %10020 = vmatmul.bf16.gmra.mxu2 %v17307_v58  ;;  %v17615_v8 = vpop.f32.mrf.mxu1 }
 0xd77   : > { %v9981_v5 = vpop.f32.mrf.mxu2 }
 0xd78   : > { %v10354_v28 = vrot.slane %v9981_v5, 2 }
 0xd7a   : > { %v10355_v6 = vsel %vm3845_vm6, %v10353_v54, %v10354_v28  ;;  %v10172_v54 = vrot.slane %v17604_v59, 1 }
 0xd7b   : > { %v10444_v43 = vadd.f32 %v10355_v6, %v17521_v50 }
 0xd7c   : > { %v9874_v0 = vpop.f32.mrf.mxu1  ;;  %v10173_v6 = vsel %vm3652_vm5, %v10171_v53, %v10172_v54 }
 0xd7d   : > { %v10479_v7 = vadd.f32 %v17491_v14, %v10444_v43 }
 0xd7f   : > { %v9983_v33 = vpop.f32.mrf.mxu2  ;;  %v10543_v58 = vmul.f32 0.01, %v10479_v7  ;;  %vm10511_vm11 = vcmp.ge.f32.partialorder %v10479_v7, 0.0 }
 0xd80   : > { %v10356_v36 = vrot.slane %v9983_v33, 2 }
 0xd81   : > { %v10575_v50 = vsel %vm10511_vm11, %v10479_v7, %v10543_v58 }
 0xd82   : > { %v10357_v48 = vsel %vm3845_vm6, %v10354_v28, %v10356_v36  ;;  %v10174_v36 = vrot.slane %v9869_v49, 1 }
 0xd83   : > { %v10445_v3 = vadd.f32 %v10357_v48, %v17532_v46  ;;  %v10256_v48 = vadd.f32 %v10173_v6, %v17366_v30 }
 0xd84   : > { %10025 = vmatmul.bf16.gmra.mxu2 %v17330_v2  ;;  %v10168_v2 = vsel %vm3652_vm5, %v10166_v63, %v10167_v39  ;;  %v9877_v29 = vpop.f32.mrf.mxu1 }
 0xd85   : > { %v10480_v35 = vadd.f32 %v17491_v14, %v10445_v3  ;;  %v10254_v19 = vadd.f32 %v10168_v2, %v17328_v18 }
 0xd87   : > { %vm10512_vm12 = vcmp.ge.f32.partialorder %v10480_v35, 0.0  ;;  %v10544_v22 = vmul.f32 0.01, %v10480_v35  ;;  %v9986_v55 = vpop.f32.mrf.mxu2 }
 0xd88   : > { %v10358_v40 = vrot.slane %v9986_v55, 2 }
 0xd89   : > { %v10576_v37 = vsel %vm10512_vm12, %v10480_v35, %v10544_v22  ;;  %v10175_v35 = vsel %vm3652_vm5, %v10172_v54, %v10174_v36 }
 0xd8a   : > { %v12230_v57 = vpack.c.bf16 %v10576_v37, %v10575_v50 }
 0xd8c   : > { %12293 = vst [vmem:[%s17514_s30 + $0x38] sm:$0xff] %v12230_v57   ;;  %v9879_v3 = vpop.f32.mrf.mxu1 }
 0xd8f   : > { %v9988_v46 = vpop.f32.mrf.mxu2 }
 0xd90   : > { %v10359_v34 = vrot.slane %v9988_v46, 2 }
 0xd92   : > { %v10360_v16 = vsel %vm3845_vm6, %v10358_v40, %v10359_v34  ;;  %v10176_v40 = vrot.slane %v17615_v8, 1 }
 0xd93   : > { %v10446_v44 = vadd.f32 %v10360_v16, %v10254_v19 }
 0xd94   : > { %10030 = vmatmul.bf16.gmra.mxu2 %v18295_v51  ;;  %v9882_v49 = vpop.f32.mrf.mxu1 }
 0xd95   : > { %v10481_v42 = vadd.f32 %v17491_v14, %v10446_v44  ;;  %v10179_v44 = vrot.slane %v9877_v29, 1  ;;  %v10182_v53 = vrot.slane %v9882_v49, 1 }
 0xd97   : > { %v9991_v56 = vpop.f32.mrf.mxu2  ;;  %v10545_v23 = vmul.f32 0.01, %v10481_v42  ;;  %vm10513_vm13 = vcmp.ge.f32.partialorder %v10481_v42, 0.0 }
 0xd98   : > { %v10361_v61 = vrot.slane %v9991_v56, 2 }
 0xd99   : > { %v10577_v12 = vsel %vm10513_vm13, %v10481_v42, %v10545_v23 }
 0xd9a   : > { %v10362_v32 = vsel %vm3845_vm6, %v10359_v34, %v10361_v61 }
 0xd9b   : > { %v10447_v62 = vadd.f32 %v10362_v32, %v10255_v38 }
 0xd9c   : > { %v9884_v34 = vpop.f32.mrf.mxu1 }
 0xd9d   : > { %v10482_v31 = vadd.f32 %v17491_v14, %v10447_v62  ;;  %v10184_v36 = vrot.slane %v9884_v34, 1 }
 0xd9f   : > { %vm10514_vm14 = vcmp.ge.f32.partialorder %v10482_v31, 0.0  ;;  %v10546_v18 = vmul.f32 0.01, %v10482_v31  ;;  %v9993_v51 = vpop.f32.mrf.mxu2 }
 0xda0   : > { %v10363_v43 = vrot.slane %v9993_v51, 2 }
 0xda1   : > { %v10578_v25 = vsel %vm10514_vm14, %v10482_v31, %v10546_v18 }
 0xda2   : > { %v12235_v5 = vpack.c.bf16 %v10578_v25, %v10577_v12 }
 0xda4   : > { %12294 = vst [vmem:[%s17514_s30 + $0x40] sm:$0xff] %v12235_v5   ;;  %10035 = vmatmul.bf16.gmra.mxu2 %v17385_v17  ;;  %v10257_v17 = vadd.f32 %v10175_v35, %v17382_v4  ;;  %v10177_v4 = vrot.slane %v9874_v0, 1  ;;  %v9887_v8 = vpop.f32.mrf.mxu1 }
 0xda6   : > { %v10178_v16 = vsel %vm3652_vm5, %v10176_v40, %v10177_v4  ;;  %v10180_v38 = vsel %vm3652_vm5, %v10177_v4, %v10179_v44  ;;  %v10186_v4 = vrot.slane %v9887_v8, 1 }
 0xda7   : > { %v9996_v28 = vpop.f32.mrf.mxu2  ;;  %v10258_v56 = vadd.f32 %v10178_v16, %v17406_v26  ;;  %v10259_v0 = vadd.f32 %v10180_v38, %v17421_v47  ;;  %v10181_v47 = vrot.slane %v9879_v3, 1 }
 0xda8   : > { %v10364_v33 = vrot.slane %v9996_v28, 2 }
 0xda9   : > { %v10183_v6 = vsel %vm3652_vm5, %v10181_v47, %v10182_v53 }
 0xdaa   : > { %v10365_v7 = vsel %vm3845_vm6, %v10363_v43, %v10364_v33 }
 0xdab   : > { %v10448_v58 = vadd.f32 %v10365_v7, %v10256_v48  ;;  %v10260_v48 = vadd.f32 %v10183_v6, %v17437_v15 }
 0xdac   : > { %v9889_v54 = vpop.f32.mrf.mxu1 }
 0xdad   : > { %v10483_v21 = vadd.f32 %v17491_v14, %v10448_v58 }
 0xdaf   : > { %v9998_v59 = vpop.f32.mrf.mxu2  ;;  %v10547_v37 = vmul.f32 0.01, %v10483_v21  ;;  %vm10515_vm15 = vcmp.ge.f32.partialorder %v10483_v21, 0.0 }
 0xdb0   : > { %v10366_v22 = vrot.slane %v9998_v59, 2  ;;  %v10185_v59 = vsel %vm3652_vm5, %v10182_v53, %v10184_v36 }
 0xdb1   : > { %v10579_v63 = vsel %vm10515_vm15, %v10483_v21, %v10547_v37  ;;  %v10261_v21 = vadd.f32 %v10185_v59, %v17450_v45 }
 0xdb2   : > { %v10367_v55 = vsel %vm3845_vm6, %v10364_v33, %v10366_v22 }
 0xdb3   : > { %v10449_v50 = vadd.f32 %v10367_v55, %v10257_v17 }
 0xdb4   : > { %10040 = vmatmul.bf16.gmra.mxu2 %v17404_v41  ;;  %v9892_v58 = vpop.f32.mrf.mxu1 }
 0xdb5   : > { %v10484_v30 = vadd.f32 %v17491_v14, %v10449_v50 }
 0xdb7   : > { %vm10516_vm0 = vcmp.ge.f32.partialorder %v10484_v30, 0.0  ;;  %v10548_v57 = vmul.f32 0.01, %v10484_v30  ;;  %v10001_v39 = vpop.f32.mrf.mxu2 }
 0xdb8   : > { %v10368_v41 = vrot.slane %v10001_v39, 2 }
 0xdb9   : > { %v10580_v46 = vsel %vm10516_vm0, %v10484_v30, %v10548_v57 }
 0xdba   : > { %v12240_v2 = vpack.c.bf16 %v10580_v46, %v10579_v63 }
 0xdbc   : > { %12295 = vst [vmem:[%s17514_s30 + $0x48] sm:$0xff] %v12240_v2   ;;  %v9894_v30 = vpop.f32.mrf.mxu1  ;;  %v10187_v2 = vrot.slane %v9889_v54, 1 }
 0xdbe   : > { %v10188_v40 = vsel %vm3652_vm5, %v10186_v4, %v10187_v2 }
 0xdbf   : > { %v10003_v27 = vpop.f32.mrf.mxu2  ;;  %v10262_v44 = vadd.f32 %v10188_v40, %v17464_v13 }
 0xdc0   : > { %v10369_v19 = vrot.slane %v10003_v27, 2 }
 0xdc2   : > { %v10370_v24 = vsel %vm3845_vm6, %v10368_v41, %v10369_v19  ;;  %v10189_v41 = vrot.slane %v9892_v58, 1 }
 0xdc3   : > { %v10450_v61 = vadd.f32 %v10370_v24, %v10258_v56 }
 0xdc4   : > { %v9897_v16 = vpop.f32.mrf.mxu1  ;;  %v10190_v56 = vsel %vm3652_vm5, %v10187_v2, %v10189_v41 }
 0xdc5   : > { %v10485_v62 = vadd.f32 %v17491_v14, %v10450_v61 }
 0xdc7   : > { %v10006_v42 = vpop.f32.mrf.mxu2  ;;  %v10549_v18 = vmul.f32 0.01, %v10485_v62  ;;  %vm10517_vm1 = vcmp.ge.f32.partialorder %v10485_v62, 0.0 }
 0xdc8   : > { %v10371_v32 = vrot.slane %v10006_v42, 2  ;;  %v10263_v42 = vadd.f32 %v10190_v56, %v17477_v9  ;;  %v10191_v9 = vrot.slane %v9894_v30, 1 }
 0xdc9   : > { %v10581_v12 = vsel %vm10517_vm1, %v10485_v62, %v10549_v18 }
 0xdca   : > { %v10372_v23 = vsel %vm3845_vm6, %v10369_v19, %v10371_v32 }
 0xdcb   : > { %v10451_v31 = vadd.f32 %v10372_v23, %v10259_v0 }
 0xdcc   : > { %v9899_v8 = vpop.f32.mrf.mxu1 }
 0xdcd   : > { %v10486_v51 = vadd.f32 %v17491_v14, %v10451_v31 }
 0xdcf   : > { %vm10518_vm2 = vcmp.ge.f32.partialorder %v10486_v51, 0.0  ;;  %v10550_v26 = vmul.f32 0.01, %v10486_v51  ;;  %v10008_v29 = vpop.f32.mrf.mxu2 }
 0xdd0   : > { %v10373_v43 = vrot.slane %v10008_v29, 2 }
 0xdd1   : > { %v10582_v25 = vsel %vm10518_vm2, %v10486_v51, %v10550_v26 }
 0xdd2   : > { %v12245_v5 = vpack.c.bf16 %v10582_v25, %v10581_v12  ;;  %v10192_v12 = vrot.slane %v9897_v16, 1 }
 0xdd4   : > { %12296 = vst [vmem:[%s17514_s30 + $0x50] sm:$0xff] %v12245_v5   ;;  %v9902_v25 = vpop.f32.mrf.mxu1  ;;  %v10193_v54 = vsel %vm3652_vm5, %v10191_v9, %v10192_v12 }
 0xdd7   : > { %v10011_v28 = vpop.f32.mrf.mxu2 }
 0xdd8   : > { %v10374_v33 = vrot.slane %v10011_v28, 2  ;;  %v10194_v28 = vrot.slane %v9899_v8, 1 }
 0xdda   : > { %v10375_v7 = vsel %vm3845_vm6, %v10373_v43, %v10374_v33  ;;  %v10264_v43 = vadd.f32 %v10193_v54, %v17494_v20  ;;  %v10195_v36 = vsel %vm3652_vm5, %v10192_v12, %v10194_v28 }
 0xddb   : > { %v10452_v35 = vadd.f32 %v10375_v7, %v10260_v48 }
 0xddc   : > { %v9904_v7 = vpop.f32.mrf.mxu1 }
 0xddd   : > { %v10487_v3 = vadd.f32 %v17491_v14, %v10452_v35  ;;  %v10265_v35 = vadd.f32 %v10195_v36, %v17507_v60 }
 0xddf   : > { %v10013_v22 = vpop.f32.mrf.mxu2  ;;  %v10551_v49 = vmul.f32 0.01, %v10487_v3  ;;  %vm10519_vm3 = vcmp.ge.f32.partialorder %v10487_v3, 0.0 }
 0xde0   : > { %v10376_v17 = vrot.slane %v10013_v22, 2 }
 0xde1   : > { %v10583_v39 = vsel %vm10519_vm3, %v10487_v3, %v10551_v49 }
 0xde2   : > { %v10377_v55 = vsel %vm3845_vm6, %v10374_v33, %v10376_v17 }
 0xde3   : > { %v10453_v50 = vadd.f32 %v10377_v55, %v10261_v21 }
 0xde5   : > { %v10488_v37 = vadd.f32 %v17491_v14, %v10453_v50  ;;  %v9907_v50 = vpop.f32.mrf.mxu1 }
 0xde6   : > { %v10199_v2 = vrot.slane %v9907_v50, 1 }
 0xde7   : > { %vm10520_vm4 = vcmp.ge.f32.partialorder %v10488_v37, 0.0  ;;  %v10552_v15 = vmul.f32 0.01, %v10488_v37  ;;  %v10016_v57 = vpop.f32.mrf.mxu2 }
 0xde8   : > { %v10378_v34 = vrot.slane %v10016_v57, 2  ;;  %v10196_v57 = vrot.slane %v9902_v25, 1 }
 0xde9   : > { %v10584_v63 = vsel %vm10520_vm4, %v10488_v37, %v10552_v15  ;;  %v10197_v15 = vrot.slane %v9904_v7, 1 }
 0xdea   : > { %v12250_v46 = vpack.c.bf16 %v10584_v63, %v10583_v39 }
 0xdeb   : > { %v10198_v39 = vsel %vm3652_vm5, %v10196_v57, %v10197_v15 }
 0xdec   : > { %12297 = vst [vmem:[%s17514_s30 + $0x58] sm:$0xff] %v12250_v46  }
 0xded   : > { %v9909_v40 = vpop.f32.mrf.mxu1 }
 0xdef   : > { %v10018_v45 = vpop.f32.mrf.mxu2 }
 0xdf0   : > { %v10379_v27 = vrot.slane %v10018_v45, 2  ;;  %v10266_v45 = vadd.f32 %v10198_v39, %v17527_v1 }
 0xdf2   : > { %v10380_v19 = vsel %vm3845_vm6, %v10378_v34, %v10379_v27 }
 0xdf3   : > { %v10454_v24 = vadd.f32 %v10380_v19, %v10262_v44 }
 0xdf5   : > { %v10489_v32 = vadd.f32 %v17491_v14, %v10454_v24 }
 0xdf7   : > { %v10021_v61 = vpop.f32.mrf.mxu2  ;;  %v10553_v23 = vmul.f32 0.01, %v10489_v32  ;;  %vm10521_vm7 = vcmp.ge.f32.partialorder %v10489_v32, 0.0 }
 0xdf8   : > { %v10381_v38 = vrot.slane %v10021_v61, 2  ;;  %v9912_v61 = vpop.f32.mrf.mxu1 }
 0xdf9   : > { %v10585_v51 = vsel %vm10521_vm7, %v10489_v32, %v10553_v23  ;;  %v10202_v23 = vrot.slane %v9912_v61, 1 }
 0xdfa   : > { %v10382_v0 = vsel %vm3845_vm6, %v10379_v27, %v10381_v38  ;;  %v10200_v27 = vsel %vm3652_vm5, %v10197_v15, %v10199_v2 }
 0xdfb   : > { %v10455_v62 = vadd.f32 %v10382_v0, %v10263_v42  ;;  %v10267_v19 = vadd.f32 %v10200_v27, %v17540_v10 }
 0xdfd   : > { %v10490_v31 = vadd.f32 %v17491_v14, %v10455_v62 }
 0xdff   : > { %vm10522_vm8 = vcmp.ge.f32.partialorder %v10490_v31, 0.0  ;;  %v10554_v13 = vmul.f32 0.01, %v10490_v31  ;;  %v10023_v18 = vpop.f32.mrf.mxu2 }
 0xe00   : > { %v10383_v53 = vrot.slane %v10023_v18, 2  ;;  %v9914_v10 = vpop.f32.mrf.mxu1 }
 0xe01   : > { %v10586_v26 = vsel %vm10522_vm8, %v10490_v31, %v10554_v13  ;;  %v10201_v31 = vrot.slane %v9909_v40, 1 }
 0xe02   : > { %v12255_v29 = vpack.c.bf16 %v10586_v26, %v10585_v51 }
 0xe03   : > { %v10203_v18 = vsel %vm3652_vm5, %v10201_v31, %v10202_v23 }
 0xe04   : > { %12298 = vst [vmem:[%s17514_s30 + $0x60] sm:$0xff] %v12255_v29   ;;  %v10204_v29 = vrot.slane %v9914_v10, 1  ;;  %v10268_v25 = vadd.f32 %v10203_v18, %v17549_v52 }
 0xe07   : > { %v10026_v5 = vpop.f32.mrf.mxu2 }
 0xe08   : > { %v10384_v47 = vrot.slane %v10026_v5, 2  ;;  %v10205_v5 = vsel %vm3652_vm5, %v10202_v23, %v10204_v29 }
 0xe0a   : > { %v10385_v6 = vsel %vm3845_vm6, %v10383_v53, %v10384_v47 }
 0xe0b   : > { %v10456_v33 = vadd.f32 %v10385_v6, %v10264_v43 }
 0xe0d   : > { %v10491_v59 = vadd.f32 %v17491_v14, %v10456_v33 }
 0xe0f   : > { %v10028_v48 = vpop.f32.mrf.mxu2  ;;  %v10555_v21 = vmul.f32 0.01, %v10491_v59  ;;  %vm10523_vm9 = vcmp.ge.f32.partialorder %v10491_v59, 0.0 }
 0xe10   : > { %v10386_v58 = vrot.slane %v10028_v48, 2 }
 0xe11   : > { %v10587_v49 = vsel %vm10523_vm9, %v10491_v59, %v10555_v21 }
 0xe12   : > { %v10387_v22 = vsel %vm3845_vm6, %v10384_v47, %v10386_v58  ;;  %v10269_v47 = vadd.f32 %v10205_v5, %v17558_v11 }
 0xe13   : > { %v10457_v17 = vadd.f32 %v10387_v22, %v10265_v35 }
 0xe15   : > { %v10492_v3 = vadd.f32 %v17491_v14, %v10457_v17 }
 0xe17   : > { %vm10524_vm10 = vcmp.ge.f32.partialorder %v10492_v3, 0.0  ;;  %v10556_v20 = vmul.f32 0.01, %v10492_v3  ;;  %v10031_v55 = vpop.f32.mrf.mxu2 }
 0xe18   : > { %v10388_v63 = vrot.slane %v10031_v55, 2 }
 0xe19   : > { %v10588_v37 = vsel %vm10524_vm10, %v10492_v3, %v10556_v20 }
 0xe1a   : > { %v12260_v30 = vpack.c.bf16 %v10588_v37, %v10587_v49 }
 0xe1c   : > { %12299 = vst [vmem:[%s17514_s30 + $0x68] sm:$0xff] %v12260_v30  }
 0xe1f   : > { %v10033_v60 = vpop.f32.mrf.mxu2 }
 0xe20   : > { %v10389_v46 = vrot.slane %v10033_v60, 2 }
 0xe22   : > { %v10390_v4 = vsel %vm3845_vm6, %v10388_v63, %v10389_v46 }
 0xe23   : > { %v10458_v34 = vadd.f32 %v10390_v4, %v10266_v45 }
 0xe25   : > { %v10493_v44 = vadd.f32 %v17491_v14, %v10458_v34 }
 0xe27   : > { %v10036_v16 = vpop.f32.mrf.mxu2  ;;  %v10557_v38 = vmul.f32 0.01, %v10493_v44  ;;  %vm10525_vm11 = vcmp.ge.f32.partialorder %v10493_v44, 0.0 }
 0xe28   : > { %v10391_v41 = vrot.slane %v10036_v16, 2 }
 0xe29   : > { %v10589_v0 = vsel %vm10525_vm11, %v10493_v44, %v10557_v38 }
 0xe2a   : > { %v10392_v24 = vsel %vm3845_vm6, %v10389_v46, %v10391_v41 }
 0xe2b   : > { %v10459_v56 = vadd.f32 %v10392_v24, %v10267_v19 }
 0xe2d   : > { %v10494_v42 = vadd.f32 %v17491_v14, %v10459_v56 }
 0xe2f   : > { %vm10526_vm12 = vcmp.ge.f32.partialorder %v10494_v42, 0.0  ;;  %v10558_v1 = vmul.f32 0.01, %v10494_v42  ;;  %v10038_v32 = vpop.f32.mrf.mxu2 }
 0xe30   : > { %v10393_v51 = vrot.slane %v10038_v32, 2 }
 0xe31   : > { %v10590_v8 = vsel %vm10526_vm12, %v10494_v42, %v10558_v1 }
 0xe32   : > { %v12265_v62 = vpack.c.bf16 %v10590_v8, %v10589_v0 }
 0xe34   : > { %12300 = vst [vmem:[%s17514_s30 + $0x70] sm:$0xff] %v12265_v62  }
 0xe37   : > { %v10041_v13 = vpop.f32.mrf.mxu2 }
 0xe38   : > { %v10394_v26 = vrot.slane %v10041_v13, 2 }
 0xe3a   : > { %v10395_v12 = vsel %vm3845_vm6, %v10393_v51, %v10394_v26 }
 0xe3b   : > { %v10460_v9 = vadd.f32 %v10395_v12, %v10268_v25 }
 0xe3d   : > { %v10495_v28 = vadd.f32 %v17491_v14, %v10460_v9 }
 0xe3f   : > { %v10043_v54 = vpop.f32.mrf.mxu2  ;;  %v10559_v33 = vmul.f32 0.01, %v10495_v28  ;;  %vm10527_vm13 = vcmp.ge.f32.partialorder %v10495_v28, 0.0 }
 0xe40   : > { %v10396_v53 = vrot.slane %v10043_v54, 2 }
 0xe41   : > { %v10591_v52 = vsel %vm10527_vm13, %v10495_v28, %v10559_v33 }
 0xe42   : > { %v10397_v6 = vsel %vm3845_vm6, %v10394_v26, %v10396_v53 }
 0xe43   : > { %v10461_v43 = vadd.f32 %v10397_v6, %v10269_v47 }
 0xe45   : > { %v10496_v36 = vadd.f32 %v17491_v14, %v10461_v43 }
 0xe47   : > { %vm10528_vm14 = vcmp.ge.f32.partialorder %v10496_v36, 0.0  ;;  %v10560_v7 = vmul.f32 0.01, %v10496_v36 }
 0xe49   : > { %v10592_v48 = vsel %vm10528_vm14, %v10496_v36, %v10560_v7 }
 0xe4a   : > { %v12270_v58 = vpack.c.bf16 %v10592_v48, %v10591_v52 }
 0xe4c   : > { %12301 = vst [vmem:[%s17514_s30 + $0x78] sm:$0xff] %v12270_v58  }
 0xe4d PF: > { %s22_s13 = sadd.s32 1, %s12445_s13  }
 0xe4e   : > { %p19_p7 = scmp.ge.s32.totalorder %s22_s13, 4  }
 0xe50   :  { %21 = sbr.rel (!%p19_p7) target bundleno = 2 (0x2), region = 147 }
 0xe55   :  { %10678 = vsyncpa [#allocation5], 1 }
 0xe56   :  { %10680 = vsyncpa [#allocation5 + $0x1], 1 }
 0xe57   :  { %10681 = vsyncpa [#allocation7], 1 }

</bundles_post_ra>
